<compile_context>
chip_gen: v6e
topology: v6e:2x2x1
jax: 0.10.0
libtpu: 0.0.40
codegen_flags: <defaults>
</compile_context>

<pallas_src>
import functools
import math

import jax
import jax.numpy as jnp
from jax.experimental import pallas as pl
from jax.experimental.pallas import tpu as pltpu


def _round_up(x, m):
    return (x + m - 1) // m * m


def _pick_divisor(n, candidates=(16, 8, 4, 2, 1)):
    for c in candidates:
        if n % c == 0:
            return c
    return 1


# --------------------------------------------------------------------------
# Fused matmul + bias (+ ReLU) kernel, tiled over rows (M)
# --------------------------------------------------------------------------

def _linear_kernel(x_ref, w_ref, b_ref, o_ref, *, relu):
    y = jnp.dot(x_ref[...], w_ref[...], preferred_element_type=jnp.float32)
    y = y + b_ref[...]
    if relu:
        y = jnp.maximum(y, 0.0)
    o_ref[...] = y.astype(o_ref.dtype)


def pallas_linear(x, w, b, *, relu=False, tile_m=512, out_dtype=jnp.float32):
    """y = x @ w + b (optional ReLU).  x: [M, K], w: [K, N] (bf16), b: [N] f32."""
    M, K = x.shape
    Kw, N = w.shape
    assert K == Kw
    x = x.astype(w.dtype)

    tm = min(tile_m, _round_up(M, 8))
    Mp = _round_up(M, tm)
    if Mp != M:
        x = jnp.pad(x, ((0, Mp - M), (0, 0)))

    y = pl.pallas_call(
        functools.partial(_linear_kernel, relu=relu),
        out_shape=jax.ShapeDtypeStruct((Mp, N), out_dtype),
        grid=(Mp // tm,),
        in_specs=[
            pl.BlockSpec((tm, K), lambda i: (i, 0)),
            pl.BlockSpec((K, N), lambda i: (0, 0)),
            pl.BlockSpec((1, N), lambda i: (0, 0)),
        ],
        out_specs=pl.BlockSpec((tm, N), lambda i: (i, 0)),
        compiler_params=pltpu.CompilerParams(
            dimension_semantics=("parallel",)),
    )(x, w, b.reshape(1, N).astype(jnp.float32))
    return y[:M] if Mp != M else y


# --------------------------------------------------------------------------
# Fused strided conv (k = 2*s) + bias + ReLU, no im2col in HBM
# --------------------------------------------------------------------------
# XLA-side prep (one relayout pass, same order of magnitude as the raw image):
#   space-to-depth by s, pair adjacent block-columns along channels (resolving
#   the conv's column offset), flatten (row, col) so the conv's two ROW
#   offsets become contiguous row windows of the flattened per-image slab.
# Kernel: out = relu(win0 @ W[0] + win1 @ W[1] + b), per image.

def _space_to_depth_pairs(x_nhwc, s):
    """[N, H, W, C] -> [N, Hb*(Wb-1), 2*s*s*C]  (Hb = H//s, Wb = W//s)."""
    N, H, W, C = x_nhwc.shape
    Hb, Wb = H // s, W // s
    x = x_nhwc.reshape(N, Hb, s, Wb, s, C)
    x = x.transpose(0, 1, 3, 2, 4, 5)                 # [N, Hb, Wb, s, s, C]
    x = x.reshape(N, Hb, Wb, s * s * C)
    x = jnp.concatenate([x[:, :, :Wb - 1, :], x[:, :, 1:, :]], axis=-1)
    return x.reshape(N, Hb * (Wb - 1), 2 * s * s * C)


def _conv_win_kernel(x_ref, w_ref, b_ref, o_ref, *, n_imgs, npos, row_off):
    # x_ref: [nI, npos + row_off, K]  bf16 (per-image s2d + column-pair slab)
    # w_ref: [2, K, Cout] bf16 (row-offset 0 / 1 weight slabs)
    # b_ref: [1, Cout] f32;  o_ref: [nI, npos, Cout]
    w0 = w_ref[0]
    w1 = w_ref[1]
    b = b_ref[...]
    for i in range(n_imgs):
        xi = x_ref[i]                                   # [R, K]
        y = jnp.dot(xi[0:npos], w0, preferred_element_type=jnp.float32)
        y = y + jnp.dot(xi[row_off:row_off + npos], w1,
                        preferred_element_type=jnp.float32)
        y = jnp.maximum(y + b, 0.0)
        o_ref[i] = y.astype(o_ref.dtype)


def conv2d_s2d_relu(x_flat, w, b, *, npos, row_off, out_dtype=jnp.bfloat16):
    """Fused conv (k = 2*stride) on the space-to-depth/pair layout.

    x_flat: [N, npos + row_off, K] bf16, w: [2, K, Cout] bf16, b: [Cout] f32.
    Returns [N, npos, Cout] (row = oh*OW + ow).
    """
    N, R, K = x_flat.shape
    assert R == npos + row_off
    Cout = w.shape[2]
    nI = _pick_divisor(N)
    return pl.pallas_call(
        functools.partial(_conv_win_kernel, n_imgs=nI, npos=npos,
                          row_off=row_off),
        out_shape=jax.ShapeDtypeStruct((N, npos, Cout), out_dtype),
        grid=(N // nI,),
        in_specs=[
            pl.BlockSpec((nI, R, K), lambda i: (i, 0, 0)),
            pl.BlockSpec((2, K, Cout), lambda i: (0, 0, 0)),
            pl.BlockSpec((1, Cout), lambda i: (0, 0)),
        ],
        out_specs=pl.BlockSpec((nI, npos, Cout), lambda i: (i, 0, 0)),
        compiler_params=pltpu.CompilerParams(
            dimension_semantics=("parallel",)),
    )(x_flat, w, b.reshape(1, Cout).astype(jnp.float32))


# --------------------------------------------------------------------------
# Masked LSTM recurrence with fused policy/critic head
# (input projection x @ W_ih + b is hoisted out of the T loop)
# --------------------------------------------------------------------------

def _lstm_head_kernel(gx_ref, m_ref, h0_ref, c0_ref, whh_ref, hw_ref, hb_ref,
                      head_ref, hT_ref, cT_ref, h_sc, c_sc, *, hidden):
    t = pl.program_id(1)

    @pl.when(t == 0)
    def _():
        h_sc[...] = h0_ref[...]
        c_sc[...] = c0_ref[...]

    m = m_ref[0]                        # (tb, 1) float mask
    # forward_masked_rnn semantics: reset state where mask == 0
    h = h_sc[...] * m
    c = c_sc[...] * m

    # gates = (x@W_ih + b)  [precomputed, bf16 stream]  +  h@W_hh   (i,f,g,o)
    gates = gx_ref[0].astype(jnp.float32) + jnp.dot(
        h.astype(whh_ref.dtype), whh_ref[...],
        preferred_element_type=jnp.float32)

    H = hidden
    i_g = jax.nn.sigmoid(gates[:, 0 * H:1 * H])
    f_g = jax.nn.sigmoid(gates[:, 1 * H:2 * H])
    g_g = jnp.tanh(gates[:, 2 * H:3 * H])
    o_g = jax.nn.sigmoid(gates[:, 3 * H:4 * H])

    c_new = f_g * c + i_g * g_g
    h_new = o_g * jnp.tanh(c_new)

    h_sc[...] = h_new
    c_sc[...] = c_new

    # Fused policy + critic head on this step's hidden state.
    heads = jnp.dot(h_new.astype(hw_ref.dtype), hw_ref[...],
                    preferred_element_type=jnp.float32) + hb_ref[...]
    head_ref[0] = heads.astype(head_ref.dtype)
    hT_ref[...] = h_new
    cT_ref[...] = c_new


def pallas_masked_lstm_head(gates_x, mask3, h0, c0, w_hh, head_w, head_b, tb):
    """gates_x [T,Bp,4H] bf16, mask3 [T,Bp,1] f32, h0/c0 [Bp,H] f32,
    w_hh [H,4H] bf16, head_w [H,A+1] bf16, head_b [1,A+1] f32.
    Returns (heads [T,Bp,A+1] f32, hT [Bp,H] f32, cT [Bp,H] f32)."""
    T, Bp, G = gates_x.shape
    H = h0.shape[1]
    A1 = head_w.shape[1]
    assert G == 4 * H and Bp % tb == 0
    nb = Bp // tb

    return pl.pallas_call(
        functools.partial(_lstm_head_kernel, hidden=H),
        out_shape=(
            jax.ShapeDtypeStruct((T, Bp, A1), jnp.float32),
            jax.ShapeDtypeStruct((Bp, H), jnp.float32),
            jax.ShapeDtypeStruct((Bp, H), jnp.float32),
        ),
        grid=(nb, T),
        in_specs=[
            pl.BlockSpec((1, tb, 4 * H), lambda b, t: (t, b, 0)),
            pl.BlockSpec((1, tb, 1), lambda b, t: (t, b, 0)),
            pl.BlockSpec((tb, H), lambda b, t: (b, 0)),
            pl.BlockSpec((tb, H), lambda b, t: (b, 0)),
            pl.BlockSpec((H, 4 * H), lambda b, t: (0, 0)),
            pl.BlockSpec((H, A1), lambda b, t: (0, 0)),
            pl.BlockSpec((1, A1), lambda b, t: (0, 0)),
        ],
        out_specs=[
            pl.BlockSpec((1, tb, A1), lambda b, t: (t, b, 0)),
            pl.BlockSpec((tb, H), lambda b, t: (b, 0)),
            pl.BlockSpec((tb, H), lambda b, t: (b, 0)),
        ],
        scratch_shapes=[pltpu.VMEM((tb, H), jnp.float32),
                        pltpu.VMEM((tb, H), jnp.float32)],
        compiler_params=pltpu.CompilerParams(
            dimension_semantics=("parallel", "arbitrary")),
    )(gates_x, mask3, h0, c0, w_hh, head_w, head_b)


# --------------------------------------------------------------------------
# Parameter init (mimics the module's init scheme) + one-time fast relayout
# --------------------------------------------------------------------------

def init_params(key, num_inputs, num_outputs):
    H = 256
    Din = 256 + num_outputs + 1

    def uni(k, shape, fan_in):
        d = 1.0 / math.sqrt(fan_in)
        return jax.random.uniform(k, shape, jnp.float32, -d, d)

    def xavier(k, shape):
        fan_out, fan_in = shape
        lim = math.sqrt(6.0 / (fan_in + fan_out))
        return jax.random.uniform(k, shape, jnp.float32, -lim, lim)

    ks = jax.random.split(key, 8)
    orth = jax.nn.initializers.orthogonal()
    return dict(
        conv1_w=uni(ks[0], (16, num_inputs, 8, 8), num_inputs * 8 * 8),
        conv1_b=jnp.zeros((16,), jnp.float32),
        conv2_w=uni(ks[1], (32, 16, 4, 4), 16 * 4 * 4),
        conv2_b=jnp.zeros((32,), jnp.float32),
        fc_w=uni(ks[2], (256, 9 * 9 * 32), 9 * 9 * 32),
        fc_b=jnp.zeros((256,), jnp.float32),
        policy_w=uni(ks[3], (num_outputs, 256), 256),
        policy_b=jnp.zeros((num_outputs,), jnp.float32),
        critic_w=uni(ks[4], (1, 256), 256),
        critic_b=jnp.zeros((1,), jnp.float32),
        lstm_w_ih=xavier(ks[5], (4 * H, Din)),
        lstm_w_hh=orth(ks[6], (4 * H, H)).astype(jnp.float32),
        lstm_b=jnp.zeros((4 * H,), jnp.float32),   # bias_ih + bias_hh (both 0)
    )


def prepare_params(p):
    """One-time weight relayout into kernel-friendly (bf16) shapes."""

    def conv_w_s2d(w, s):
        # [Cout, Cin, k, k] (k = 2s) -> [2, 2*s*s*Cin, Cout] matching the
        # space-to-depth + column-pair input layout (row offsets bi = 0, 1).
        cout, cin, _, _ = w.shape
        w = w.reshape(cout, cin, 2, s, 2, s)          # co, c, bi, di, bj, dj
        w = w.transpose(2, 4, 3, 5, 1, 0)             # bi, bj, di, dj, c, co
        return w.reshape(2, 2 * s * s * cin, cout)

    conv1_w = conv_w_s2d(p["conv1_w"], 4)             # [2, 32*Cin, 16]
    conv2_w = conv_w_s2d(p["conv2_w"], 2)             # [2, 128, 32]
    # fc: torch flatten is (c, h, w); our conv output flatten is (h, w, c).
    fc_w = (p["fc_w"].reshape(256, 32, 9, 9).transpose(0, 2, 3, 1)
            .reshape(256, 9 * 9 * 32).T)              # [2592, 256]
    head_w = jnp.concatenate([p["policy_w"], p["critic_w"]], axis=0).T
    head_b = jnp.concatenate([p["policy_b"], p["critic_b"]], axis=0)
    A1 = head_b.shape[0]
    return dict(
        conv1_w=conv1_w.astype(jnp.bfloat16), conv1_b=p["conv1_b"],
        conv2_w=conv2_w.astype(jnp.bfloat16), conv2_b=p["conv2_b"],
        fc_w=fc_w.astype(jnp.bfloat16), fc_b=p["fc_b"],
        head_w=head_w.astype(jnp.bfloat16),
        head_b=head_b.reshape(1, A1).astype(jnp.float32),
        lstm_w_ih=p["lstm_w_ih"].T.astype(jnp.bfloat16),   # [Din, 4H]
        lstm_w_hh=p["lstm_w_hh"].T.astype(jnp.bfloat16),   # [H, 4H]
        # NOTE: single fused bias is exact only because bias_ih == bias_hh == 0
        # at init; for loaded torch weights use bias_ih + bias_hh here.
        lstm_b=p["lstm_b"],
    )


# --------------------------------------------------------------------------
# UnrealModel.forward
# --------------------------------------------------------------------------

def unreal_forward(fp, observations, last_reward_action, masks, states):
    """observations [B,T,C,84,84] f32, last_reward_action [B,T,A+1],
    masks [B,T], states (h,c) each [B,1,256].
    Returns (policy_logits [B,T,A], critic [B,T,1], (h,c) [B,1,256])."""
    B, T, C, H, W = observations.shape
    HID = 256
    A1 = fp["head_w"].shape[1]
    A = A1 - 1
    BT = B * T

    # ---- conv_base: Conv(8,s4)+ReLU, Conv(4,s2)+ReLU (fused, no im2col) ----
    x = observations.reshape(BT, C, H, W).astype(jnp.bfloat16)
    x = x.transpose(0, 2, 3, 1)                                    # NHWC
    x1 = _space_to_depth_pairs(x, 4)                               # [BT,420,32C]
    h1 = conv2d_s2d_relu(x1, fp["conv1_w"], fp["conv1_b"],
                         npos=400, row_off=20)                     # [BT,400,16]
    x2 = _space_to_depth_pairs(h1.reshape(BT, 20, 20, 16), 2)      # [BT,90,128]
    h2 = conv2d_s2d_relu(x2, fp["conv2_w"], fp["conv2_b"],
                         npos=81, row_off=9)                       # [BT,81,32]

    # ---- conv_merge: Flatten + Linear(2592, 256) + ReLU --------------------
    feats = pallas_linear(h2.reshape(BT, 9 * 9 * 32), fp["fc_w"], fp["fc_b"],
                          relu=True, out_dtype=jnp.bfloat16)       # [BT,256]
    feats = feats.reshape(B, T, HID)

    # ---- concat last_reward_action, reorder to [T, B, Din], pad batch -----
    feats = jnp.concatenate(
        [feats, last_reward_action.astype(jnp.bfloat16)], axis=2)  # [B,T,Din]
    feats_tb = feats.transpose(1, 0, 2)                            # [T,B,Din]
    Din = feats_tb.shape[2]

    Bp = _round_up(B, 8)
    tb = Bp if Bp <= 128 else 128
    Bp = _round_up(Bp, tb)
    mask_tb = masks.T
    h0 = states[0][:, 0, :]
    c0 = states[1][:, 0, :]
    if Bp != B:
        feats_tb = jnp.pad(feats_tb, ((0, 0), (0, Bp - B), (0, 0)))
        mask_tb = jnp.pad(mask_tb, ((0, 0), (0, Bp - B)))
        h0 = jnp.pad(h0, ((0, Bp - B), (0, 0)))
        c0 = jnp.pad(c0, ((0, Bp - B), (0, 0)))
    mask3 = mask_tb.reshape(T, Bp, 1).astype(jnp.float32)

    # Hoisted LSTM input projection: one matmul over all T*Bp rows (bf16 out).
    gates_x = pallas_linear(feats_tb.reshape(T * Bp, Din), fp["lstm_w_ih"],
                            fp["lstm_b"], out_dtype=jnp.bfloat16)  # [T*Bp,4H]
    gates_x = gates_x.reshape(T, Bp, 4 * HID)

    # Masked LSTM recurrence with fused policy/critic head.
    heads, hT, cT = pallas_masked_lstm_head(
        gates_x, mask3, h0, c0, fp["lstm_w_hh"], fp["head_w"], fp["head_b"], tb)

    heads = heads[:, :B].transpose(1, 0, 2)                        # [B,T,A+1]
    policy_logits = heads[..., :A]
    critic = heads[..., A:A1]
    new_states = (hT[:B, None, :], cT[:B, None, :])
    return policy_logits, critic, new_states


# --------------------------------------------------------------------------
# Main
# --------------------------------------------------------------------------

if __name__ == "__main__":
    key = jax.random.PRNGKey(0)
    B, T = 2, 3
    num_inputs, num_outputs = 4, 6
    HID = 256

    k_par, k_obs, k_ra = jax.random.split(key, 3)
    params = prepare_params(init_params(k_par, num_inputs, num_outputs))

    # 84x84 spatial is required by the hard-coded Linear(9*9*32, 256)
    observations = jax.random.normal(k_obs, (B, T, num_inputs, 84, 84),
                                     jnp.float32)
    last_reward_action = jax.random.normal(k_ra, (B, T, num_outputs + 1),
                                           jnp.float32)
    masks = jnp.ones((B, T), jnp.float32).at[0, 1].set(0.0)  # exercise reset
    states = (jnp.zeros((B, 1, HID), jnp.float32),
              jnp.zeros((B, 1, HID), jnp.float32))

    fwd = jax.jit(unreal_forward)
    policy_logits, critic, new_states = fwd(
        params, observations, last_reward_action, masks, states)
    jax.block_until_ready((policy_logits, critic, new_states))

    assert policy_logits.shape == (B, T, num_outputs)
    assert critic.shape == (B, T, 1)
    assert new_states[0].shape == (B, 1, HID) and new_states[1].shape == (B, 1, HID)
    assert bool(jnp.all(jnp.isfinite(policy_logits)))
    assert bool(jnp.all(jnp.isfinite(critic)))
    print("KERNEL_OK")
</pallas_src>

<mosaic_0001>
module attributes {stable_mosaic.version = 11 : i64} {
  func.func @_conv_win_kernel(%arg0: i32, %arg1: memref<2x420x128xbf16, #tpu.memory_space<vmem>>, %arg2: memref<2x128x16xbf16, #tpu.memory_space<vmem>>, %arg3: memref<1x16xf32, #tpu.memory_space<vmem>>, %arg4: memref<2x400x16xbf16, #tpu.memory_space<vmem>>) attributes {dimension_semantics = [#tpu.dimension_semantics<parallel>], iteration_bounds = array<i64: 3>, scalar_prefetch = 0 : i64, scratch_operands = 0 : i64, tpu.core_type = #tpu.core_type<tc>, window_params = [{transform_indices = @transform_0, window_bounds = array<i64: 2, 420, 128>}, {pipeline_mode = #tpu.pipeline_mode<synchronous>, transform_indices = @transform_1, window_bounds = array<i64: 2, 128, 16>}, {pipeline_mode = #tpu.pipeline_mode<synchronous>, transform_indices = @transform_2, window_bounds = array<i64: 1, 16>}, {transform_indices = @transform_3, window_bounds = array<i64: 2, 400, 16>}]} {
    %c0 = arith.constant 0 : index
    %c0_0 = arith.constant 0 : index
    %c0_1 = arith.constant 0 : index
    %0 = vector.load %arg2[%c0, %c0_0, %c0_1] : memref<2x128x16xbf16, #tpu.memory_space<vmem>>, vector<1x128x16xbf16>
    %1 = vector.shape_cast %0 : vector<1x128x16xbf16> to vector<128x16xbf16>
    %c1 = arith.constant 1 : index
    %c0_2 = arith.constant 0 : index
    %c0_3 = arith.constant 0 : index
    %2 = vector.load %arg2[%c1, %c0_2, %c0_3] : memref<2x128x16xbf16, #tpu.memory_space<vmem>>, vector<1x128x16xbf16>
    %3 = vector.shape_cast %2 : vector<1x128x16xbf16> to vector<128x16xbf16>
    %c0_4 = arith.constant 0 : index
    %c0_5 = arith.constant 0 : index
    %4 = vector.load %arg3[%c0_4, %c0_5] : memref<1x16xf32, #tpu.memory_space<vmem>>, vector<1x16xf32>
    %c0_6 = arith.constant 0 : index
    %c0_7 = arith.constant 0 : index
    %c0_8 = arith.constant 0 : index
    %5 = vector.load %arg1[%c0_6, %c0_7, %c0_8] : memref<2x420x128xbf16, #tpu.memory_space<vmem>>, vector<1x420x128xbf16>
    %6 = vector.shape_cast %5 : vector<1x420x128xbf16> to vector<420x128xbf16>
    %7 = vector.extract_strided_slice %6 {offsets = [0, 0], sizes = [400, 128], strides = [1, 1]} : vector<420x128xbf16> to vector<400x128xbf16>
    %cst = arith.constant dense<0.000000e+00> : vector<400x16xf32>
    %8 = tpu.matmul %7, %1, %cst {dimension_numbers = #tpu.dot_dimension_numbers<[1], [0], [0], [1], [0, 0, 1, 1], [], []>} : vector<400x128xbf16>, vector<128x16xbf16>, vector<400x16xf32> -> vector<400x16xf32>
    %9 = vector.extract_strided_slice %6 {offsets = [20, 0], sizes = [400, 128], strides = [1, 1]} : vector<420x128xbf16> to vector<400x128xbf16>
    %cst_9 = arith.constant dense<0.000000e+00> : vector<400x16xf32>
    %10 = tpu.matmul %9, %3, %cst_9 {dimension_numbers = #tpu.dot_dimension_numbers<[1], [0], [0], [1], [0, 0, 1, 1], [], []>} : vector<400x128xbf16>, vector<128x16xbf16>, vector<400x16xf32> -> vector<400x16xf32>
    %11 = arith.addf %8, %10 : vector<400x16xf32>
    %12 = vector.broadcast %4 : vector<1x16xf32> to vector<400x16xf32>
    %13 = arith.addf %11, %12 : vector<400x16xf32>
    %cst_10 = arith.constant 0.000000e+00 : f32
    %14 = vector.broadcast %cst_10 : f32 to vector<400x16xf32>
    %15 = arith.maximumf %13, %14 : vector<400x16xf32>
    %16 = arith.truncf %15 : vector<400x16xf32> to vector<400x16xbf16>
    %c0_11 = arith.constant 0 : index
    %c0_12 = arith.constant 0 : index
    %c0_13 = arith.constant 0 : index
    %17 = vector.load %arg4[%c0_11, %c0_12, %c0_13] : memref<2x400x16xbf16, #tpu.memory_space<vmem>>, vector<1x400x16xbf16>
    %18 = vector.shape_cast %17 : vector<1x400x16xbf16> to vector<400x16xbf16>
    %19 = vector.shape_cast %16 : vector<400x16xbf16> to vector<1x400x16xbf16>
    tpu.vector_store %arg4[%c0_11, %c0_12, %c0_13], %19 {strides = array<i32>} : memref<2x400x16xbf16, #tpu.memory_space<vmem>>, vector<1x400x16xbf16>,
    %c1_14 = arith.constant 1 : index
    %c0_15 = arith.constant 0 : index
    %c0_16 = arith.constant 0 : index
    %20 = vector.load %arg1[%c1_14, %c0_15, %c0_16] : memref<2x420x128xbf16, #tpu.memory_space<vmem>>, vector<1x420x128xbf16>
    %21 = vector.shape_cast %20 : vector<1x420x128xbf16> to vector<420x128xbf16>
    %22 = vector.extract_strided_slice %21 {offsets = [0, 0], sizes = [400, 128], strides = [1, 1]} : vector<420x128xbf16> to vector<400x128xbf16>
    %cst_17 = arith.constant dense<0.000000e+00> : vector<400x16xf32>
    %23 = tpu.matmul %22, %1, %cst_17 {dimension_numbers = #tpu.dot_dimension_numbers<[1], [0], [0], [1], [0, 0, 1, 1], [], []>} : vector<400x128xbf16>, vector<128x16xbf16>, vector<400x16xf32> -> vector<400x16xf32>
    %24 = vector.extract_strided_slice %21 {offsets = [20, 0], sizes = [400, 128], strides = [1, 1]} : vector<420x128xbf16> to vector<400x128xbf16>
    %cst_18 = arith.constant dense<0.000000e+00> : vector<400x16xf32>
    %25 = tpu.matmul %24, %3, %cst_18 {dimension_numbers = #tpu.dot_dimension_numbers<[1], [0], [0], [1], [0, 0, 1, 1], [], []>} : vector<400x128xbf16>, vector<128x16xbf16>, vector<400x16xf32> -> vector<400x16xf32>
    %26 = arith.addf %23, %25 : vector<400x16xf32>
    %27 = vector.broadcast %4 : vector<1x16xf32> to vector<400x16xf32>
    %28 = arith.addf %26, %27 : vector<400x16xf32>
    %cst_19 = arith.constant 0.000000e+00 : f32
    %29 = vector.broadcast %cst_19 : f32 to vector<400x16xf32>
    %30 = arith.maximumf %28, %29 : vector<400x16xf32>
    %31 = arith.truncf %30 : vector<400x16xf32> to vector<400x16xbf16>
    %c1_20 = arith.constant 1 : index
    %c0_21 = arith.constant 0 : index
    %c0_22 = arith.constant 0 : index
    %32 = vector.load %arg4[%c1_20, %c0_21, %c0_22] : memref<2x400x16xbf16, #tpu.memory_space<vmem>>, vector<1x400x16xbf16>
    %33 = vector.shape_cast %32 : vector<1x400x16xbf16> to vector<400x16xbf16>
    %34 = vector.shape_cast %31 : vector<400x16xbf16> to vector<1x400x16xbf16>
    tpu.vector_store %arg4[%c1_20, %c0_21, %c0_22], %34 {strides = array<i32>} : memref<2x400x16xbf16, #tpu.memory_space<vmem>>, vector<1x400x16xbf16>,
    return
  }
  func.func @transform_0(%arg0: i32) -> (i32, i32, i32) {
    %c0_i32 = arith.constant 0 : i32
    %c0_i32_0 = arith.constant 0 : i32
    %c0_i32_1 = arith.constant 0 : i32
    return %arg0, %c0_i32, %c0_i32_0 : i32, i32, i32
  }
  func.func @transform_1(%arg0: i32) -> (i32, i32, i32) {
    %c0_i32 = arith.constant 0 : i32
    %c0_i32_0 = arith.constant 0 : i32
    %c0_i32_1 = arith.constant 0 : i32
    %c0_i32_2 = arith.constant 0 : i32
    return %c0_i32, %c0_i32_0, %c0_i32_1 : i32, i32, i32
  }
  func.func @transform_2(%arg0: i32) -> (i32, i32) {
    %c0_i32 = arith.constant 0 : i32
    %c0_i32_0 = arith.constant 0 : i32
    %c0_i32_1 = arith.constant 0 : i32
    return %c0_i32, %c0_i32_0 : i32, i32
  }
  func.func @transform_3(%arg0: i32) -> (i32, i32, i32) {
    %c0_i32 = arith.constant 0 : i32
    %c0_i32_0 = arith.constant 0 : i32
    %c0_i32_1 = arith.constant 0 : i32
    return %arg0, %c0_i32, %c0_i32_0 : i32, i32, i32
  }
}

module attributes {stable_mosaic.version = 11 : i64} {
  func.func @_conv_win_kernel(%arg0: i32, %arg1: memref<2x90x128xbf16, #tpu.memory_space<vmem>>, %arg2: memref<2x128x32xbf16, #tpu.memory_space<vmem>>, %arg3: memref<1x32xf32, #tpu.memory_space<vmem>>, %arg4: memref<2x81x32xbf16, #tpu.memory_space<vmem>>) attributes {dimension_semantics = [#tpu.dimension_semantics<parallel>], iteration_bounds = array<i64: 3>, scalar_prefetch = 0 : i64, scratch_operands = 0 : i64, tpu.core_type = #tpu.core_type<tc>, window_params = [{transform_indices = @transform_0, window_bounds = array<i64: 2, 90, 128>}, {pipeline_mode = #tpu.pipeline_mode<synchronous>, transform_indices = @transform_1, window_bounds = array<i64: 2, 128, 32>}, {pipeline_mode = #tpu.pipeline_mode<synchronous>, transform_indices = @transform_2, window_bounds = array<i64: 1, 32>}, {transform_indices = @transform_3, window_bounds = array<i64: 2, 81, 32>}]} {
    %c0 = arith.constant 0 : index
    %c0_0 = arith.constant 0 : index
    %c0_1 = arith.constant 0 : index
    %0 = vector.load %arg2[%c0, %c0_0, %c0_1] : memref<2x128x32xbf16, #tpu.memory_space<vmem>>, vector<1x128x32xbf16>
    %1 = vector.shape_cast %0 : vector<1x128x32xbf16> to vector<128x32xbf16>
    %c1 = arith.constant 1 : index
    %c0_2 = arith.constant 0 : index
    %c0_3 = arith.constant 0 : index
    %2 = vector.load %arg2[%c1, %c0_2, %c0_3] : memref<2x128x32xbf16, #tpu.memory_space<vmem>>, vector<1x128x32xbf16>
    %3 = vector.shape_cast %2 : vector<1x128x32xbf16> to vector<128x32xbf16>
    %c0_4 = arith.constant 0 : index
    %c0_5 = arith.constant 0 : index
    %4 = vector.load %arg3[%c0_4, %c0_5] : memref<1x32xf32, #tpu.memory_space<vmem>>, vector<1x32xf32>
    %c0_6 = arith.constant 0 : index
    %c0_7 = arith.constant 0 : index
    %c0_8 = arith.constant 0 : index
    %5 = vector.load %arg1[%c0_6, %c0_7, %c0_8] : memref<2x90x128xbf16, #tpu.memory_space<vmem>>, vector<1x90x128xbf16>
    %6 = vector.shape_cast %5 : vector<1x90x128xbf16> to vector<90x128xbf16>
    %7 = vector.extract_strided_slice %6 {offsets = [0, 0], sizes = [81, 128], strides = [1, 1]} : vector<90x128xbf16> to vector<81x128xbf16>
    %cst = arith.constant dense<0.000000e+00> : vector<81x32xf32>
    %8 = tpu.matmul %7, %1, %cst {dimension_numbers = #tpu.dot_dimension_numbers<[1], [0], [0], [1], [0, 0, 1, 1], [], []>} : vector<81x128xbf16>, vector<128x32xbf16>, vector<81x32xf32> -> vector<81x32xf32>
    %9 = vector.extract_strided_slice %6 {offsets = [9, 0], sizes = [81, 128], strides = [1, 1]} : vector<90x128xbf16> to vector<81x128xbf16>
    %cst_9 = arith.constant dense<0.000000e+00> : vector<81x32xf32>
    %10 = tpu.matmul %9, %3, %cst_9 {dimension_numbers = #tpu.dot_dimension_numbers<[1], [0], [0], [1], [0, 0, 1, 1], [], []>} : vector<81x128xbf16>, vector<128x32xbf16>, vector<81x32xf32> -> vector<81x32xf32>
    %11 = arith.addf %8, %10 : vector<81x32xf32>
    %12 = vector.broadcast %4 : vector<1x32xf32> to vector<81x32xf32>
    %13 = arith.addf %11, %12 : vector<81x32xf32>
    %cst_10 = arith.constant 0.000000e+00 : f32
    %14 = vector.broadcast %cst_10 : f32 to vector<81x32xf32>
    %15 = arith.maximumf %13, %14 : vector<81x32xf32>
    %16 = arith.truncf %15 : vector<81x32xf32> to vector<81x32xbf16>
    %c0_11 = arith.constant 0 : index
    %c0_12 = arith.constant 0 : index
    %c0_13 = arith.constant 0 : index
    %17 = vector.load %arg4[%c0_11, %c0_12, %c0_13] : memref<2x81x32xbf16, #tpu.memory_space<vmem>>, vector<1x81x32xbf16>
    %18 = vector.shape_cast %17 : vector<1x81x32xbf16> to vector<81x32xbf16>
    %19 = vector.shape_cast %16 : vector<81x32xbf16> to vector<1x81x32xbf16>
    tpu.vector_store %arg4[%c0_11, %c0_12, %c0_13], %19 {strides = array<i32>} : memref<2x81x32xbf16, #tpu.memory_space<vmem>>, vector<1x81x32xbf16>,
    %c1_14 = arith.constant 1 : index
    %c0_15 = arith.constant 0 : index
    %c0_16 = arith.constant 0 : index
    %20 = vector.load %arg1[%c1_14, %c0_15, %c0_16] : memref<2x90x128xbf16, #tpu.memory_space<vmem>>, vector<1x90x128xbf16>
    %21 = vector.shape_cast %20 : vector<1x90x128xbf16> to vector<90x128xbf16>
    %22 = vector.extract_strided_slice %21 {offsets = [0, 0], sizes = [81, 128], strides = [1, 1]} : vector<90x128xbf16> to vector<81x128xbf16>
    %cst_17 = arith.constant dense<0.000000e+00> : vector<81x32xf32>
    %23 = tpu.matmul %22, %1, %cst_17 {dimension_numbers = #tpu.dot_dimension_numbers<[1], [0], [0], [1], [0, 0, 1, 1], [], []>} : vector<81x128xbf16>, vector<128x32xbf16>, vector<81x32xf32> -> vector<81x32xf32>
    %24 = vector.extract_strided_slice %21 {offsets = [9, 0], sizes = [81, 128], strides = [1, 1]} : vector<90x128xbf16> to vector<81x128xbf16>
    %cst_18 = arith.constant dense<0.000000e+00> : vector<81x32xf32>
    %25 = tpu.matmul %24, %3, %cst_18 {dimension_numbers = #tpu.dot_dimension_numbers<[1], [0], [0], [1], [0, 0, 1, 1], [], []>} : vector<81x128xbf16>, vector<128x32xbf16>, vector<81x32xf32> -> vector<81x32xf32>
    %26 = arith.addf %23, %25 : vector<81x32xf32>
    %27 = vector.broadcast %4 : vector<1x32xf32> to vector<81x32xf32>
    %28 = arith.addf %26, %27 : vector<81x32xf32>
    %cst_19 = arith.constant 0.000000e+00 : f32
    %29 = vector.broadcast %cst_19 : f32 to vector<81x32xf32>
    %30 = arith.maximumf %28, %29 : vector<81x32xf32>
    %31 = arith.truncf %30 : vector<81x32xf32> to vector<81x32xbf16>
    %c1_20 = arith.constant 1 : index
    %c0_21 = arith.constant 0 : index
    %c0_22 = arith.constant 0 : index
    %32 = vector.load %arg4[%c1_20, %c0_21, %c0_22] : memref<2x81x32xbf16, #tpu.memory_space<vmem>>, vector<1x81x32xbf16>
    %33 = vector.shape_cast %32 : vector<1x81x32xbf16> to vector<81x32xbf16>
    %34 = vector.shape_cast %31 : vector<81x32xbf16> to vector<1x81x32xbf16>
    tpu.vector_store %arg4[%c1_20, %c0_21, %c0_22], %34 {strides = array<i32>} : memref<2x81x32xbf16, #tpu.memory_space<vmem>>, vector<1x81x32xbf16>,
    return
  }
  func.func @transform_0(%arg0: i32) -> (i32, i32, i32) {
    %c0_i32 = arith.constant 0 : i32
    %c0_i32_0 = arith.constant 0 : i32
    %c0_i32_1 = arith.constant 0 : i32
    return %arg0, %c0_i32, %c0_i32_0 : i32, i32, i32
  }
  func.func @transform_1(%arg0: i32) -> (i32, i32, i32) {
    %c0_i32 = arith.constant 0 : i32
    %c0_i32_0 = arith.constant 0 : i32
    %c0_i32_1 = arith.constant 0 : i32
    %c0_i32_2 = arith.constant 0 : i32
    return %c0_i32, %c0_i32_0, %c0_i32_1 : i32, i32, i32
  }
  func.func @transform_2(%arg0: i32) -> (i32, i32) {
    %c0_i32 = arith.constant 0 : i32
    %c0_i32_0 = arith.constant 0 : i32
    %c0_i32_1 = arith.constant 0 : i32
    return %c0_i32, %c0_i32_0 : i32, i32
  }
  func.func @transform_3(%arg0: i32) -> (i32, i32, i32) {
    %c0_i32 = arith.constant 0 : i32
    %c0_i32_0 = arith.constant 0 : i32
    %c0_i32_1 = arith.constant 0 : i32
    return %arg0, %c0_i32, %c0_i32_0 : i32, i32, i32
  }
}

module attributes {stable_mosaic.version = 11 : i64} {
  func.func @_linear_kernel(%arg0: i32, %arg1: memref<8x2592xbf16, #tpu.memory_space<vmem>>, %arg2: memref<2592x256xbf16, #tpu.memory_space<vmem>>, %arg3: memref<1x256xf32, #tpu.memory_space<vmem>>, %arg4: memref<8x256xbf16, #tpu.memory_space<vmem>>) attributes {dimension_semantics = [#tpu.dimension_semantics<parallel>], iteration_bounds = array<i64: 1>, scalar_prefetch = 0 : i64, scratch_operands = 0 : i64, tpu.core_type = #tpu.core_type<tc>, window_params = [{transform_indices = @transform_0, window_bounds = array<i64: 8, 2592>}, {pipeline_mode = #tpu.pipeline_mode<synchronous>, transform_indices = @transform_1, window_bounds = array<i64: 2592, 256>}, {pipeline_mode = #tpu.pipeline_mode<synchronous>, transform_indices = @transform_2, window_bounds = array<i64: 1, 256>}, {transform_indices = @transform_3, window_bounds = array<i64: 8, 256>}]} {
    %c0 = arith.constant 0 : index
    %c0_0 = arith.constant 0 : index
    %0 = vector.load %arg1[%c0, %c0_0] : memref<8x2592xbf16, #tpu.memory_space<vmem>>, vector<8x2592xbf16>
    %c0_1 = arith.constant 0 : index
    %c0_2 = arith.constant 0 : index
    %1 = vector.load %arg2[%c0_1, %c0_2] : memref<2592x256xbf16, #tpu.memory_space<vmem>>, vector<2592x256xbf16>
    %cst = arith.constant dense<0.000000e+00> : vector<8x256xf32>
    %2 = tpu.matmul %0, %1, %cst {dimension_numbers = #tpu.dot_dimension_numbers<[1], [0], [0], [1], [0, 0, 1, 1], [], []>} : vector<8x2592xbf16>, vector<2592x256xbf16>, vector<8x256xf32> -> vector<8x256xf32>
    %c0_3 = arith.constant 0 : index
    %c0_4 = arith.constant 0 : index
    %3 = vector.load %arg3[%c0_3, %c0_4] : memref<1x256xf32, #tpu.memory_space<vmem>>, vector<1x256xf32>
    %4 = vector.broadcast %3 : vector<1x256xf32> to vector<8x256xf32>
    %5 = arith.addf %2, %4 : vector<8x256xf32>
    %cst_5 = arith.constant 0.000000e+00 : f32
    %6 = vector.broadcast %cst_5 : f32 to vector<8x256xf32>
    %7 = arith.maximumf %5, %6 : vector<8x256xf32>
    %8 = arith.truncf %7 : vector<8x256xf32> to vector<8x256xbf16>
    %c0_6 = arith.constant 0 : index
    %c0_7 = arith.constant 0 : index
    %9 = vector.load %arg4[%c0_6, %c0_7] : memref<8x256xbf16, #tpu.memory_space<vmem>>, vector<8x256xbf16>
    tpu.vector_store %arg4[%c0_6, %c0_7], %8 {strides = array<i32>} : memref<8x256xbf16, #tpu.memory_space<vmem>>, vector<8x256xbf16>,
    return
  }
  func.func @transform_0(%arg0: i32) -> (i32, i32) {
    %c0_i32 = arith.constant 0 : i32
    %c0_i32_0 = arith.constant 0 : i32
    return %arg0, %c0_i32 : i32, i32
  }
  func.func @transform_1(%arg0: i32) -> (i32, i32) {
    %c0_i32 = arith.constant 0 : i32
    %c0_i32_0 = arith.constant 0 : i32
    %c0_i32_1 = arith.constant 0 : i32
    return %c0_i32, %c0_i32_0 : i32, i32
  }
  func.func @transform_2(%arg0: i32) -> (i32, i32) {
    %c0_i32 = arith.constant 0 : i32
    %c0_i32_0 = arith.constant 0 : i32
    %c0_i32_1 = arith.constant 0 : i32
    return %c0_i32, %c0_i32_0 : i32, i32
  }
  func.func @transform_3(%arg0: i32) -> (i32, i32) {
    %c0_i32 = arith.constant 0 : i32
    %c0_i32_0 = arith.constant 0 : i32
    return %arg0, %c0_i32 : i32, i32
  }
}

module attributes {stable_mosaic.version = 11 : i64} {
  func.func @_linear_kernel(%arg0: i32, %arg1: memref<24x263xbf16, #tpu.memory_space<vmem>>, %arg2: memref<263x1024xbf16, #tpu.memory_space<vmem>>, %arg3: memref<1x1024xf32, #tpu.memory_space<vmem>>, %arg4: memref<24x1024xbf16, #tpu.memory_space<vmem>>) attributes {dimension_semantics = [#tpu.dimension_semantics<parallel>], iteration_bounds = array<i64: 1>, scalar_prefetch = 0 : i64, scratch_operands = 0 : i64, tpu.core_type = #tpu.core_type<tc>, window_params = [{transform_indices = @transform_0, window_bounds = array<i64: 24, 263>}, {pipeline_mode = #tpu.pipeline_mode<synchronous>, transform_indices = @transform_1, window_bounds = array<i64: 263, 1024>}, {pipeline_mode = #tpu.pipeline_mode<synchronous>, transform_indices = @transform_2, window_bounds = array<i64: 1, 1024>}, {transform_indices = @transform_3, window_bounds = array<i64: 24, 1024>}]} {
    %c0 = arith.constant 0 : index
    %c0_0 = arith.constant 0 : index
    %0 = vector.load %arg1[%c0, %c0_0] : memref<24x263xbf16, #tpu.memory_space<vmem>>, vector<24x263xbf16>
    %c0_1 = arith.constant 0 : index
    %c0_2 = arith.constant 0 : index
    %1 = vector.load %arg2[%c0_1, %c0_2] : memref<263x1024xbf16, #tpu.memory_space<vmem>>, vector<263x1024xbf16>
    %cst = arith.constant dense<0.000000e+00> : vector<24x1024xf32>
    %2 = tpu.matmul %0, %1, %cst {dimension_numbers = #tpu.dot_dimension_numbers<[1], [0], [0], [1], [0, 0, 1, 1], [], []>} : vector<24x263xbf16>, vector<263x1024xbf16>, vector<24x1024xf32> -> vector<24x1024xf32>
    %c0_3 = arith.constant 0 : index
    %c0_4 = arith.constant 0 : index
    %3 = vector.load %arg3[%c0_3, %c0_4] : memref<1x1024xf32, #tpu.memory_space<vmem>>, vector<1x1024xf32>
    %4 = vector.broadcast %3 : vector<1x1024xf32> to vector<24x1024xf32>
    %5 = arith.addf %2, %4 : vector<24x1024xf32>
    %6 = arith.truncf %5 : vector<24x1024xf32> to vector<24x1024xbf16>
    %c0_5 = arith.constant 0 : index
    %c0_6 = arith.constant 0 : index
    %7 = vector.load %arg4[%c0_5, %c0_6] : memref<24x1024xbf16, #tpu.memory_space<vmem>>, vector<24x1024xbf16>
    tpu.vector_store %arg4[%c0_5, %c0_6], %6 {strides = array<i32>} : memref<24x1024xbf16, #tpu.memory_space<vmem>>, vector<24x1024xbf16>,
    return
  }
  func.func @transform_0(%arg0: i32) -> (i32, i32) {
    %c0_i32 = arith.constant 0 : i32
    %c0_i32_0 = arith.constant 0 : i32
    return %arg0, %c0_i32 : i32, i32
  }
  func.func @transform_1(%arg0: i32) -> (i32, i32) {
    %c0_i32 = arith.constant 0 : i32
    %c0_i32_0 = arith.constant 0 : i32
    %c0_i32_1 = arith.constant 0 : i32
    return %c0_i32, %c0_i32_0 : i32, i32
  }
  func.func @transform_2(%arg0: i32) -> (i32, i32) {
    %c0_i32 = arith.constant 0 : i32
    %c0_i32_0 = arith.constant 0 : i32
    %c0_i32_1 = arith.constant 0 : i32
    return %c0_i32, %c0_i32_0 : i32, i32
  }
  func.func @transform_3(%arg0: i32) -> (i32, i32) {
    %c0_i32 = arith.constant 0 : i32
    %c0_i32_0 = arith.constant 0 : i32
    return %arg0, %c0_i32 : i32, i32
  }
}

module attributes {stable_mosaic.version = 11 : i64} {
  func.func @_lstm_head_kernel(%arg0: i32, %arg1: i32, %arg2: memref<1x8x1024xbf16, #tpu.memory_space<vmem>>, %arg3: memref<1x8x1xf32, #tpu.memory_space<vmem>>, %arg4: memref<8x256xf32, #tpu.memory_space<vmem>>, %arg5: memref<8x256xf32, #tpu.memory_space<vmem>>, %arg6: memref<256x1024xbf16, #tpu.memory_space<vmem>>, %arg7: memref<256x7xbf16, #tpu.memory_space<vmem>>, %arg8: memref<1x7xf32, #tpu.memory_space<vmem>>, %arg9: memref<1x8x7xf32, #tpu.memory_space<vmem>>, %arg10: memref<8x256xf32, #tpu.memory_space<vmem>>, %arg11: memref<8x256xf32, #tpu.memory_space<vmem>>, %arg12: memref<8x256xf32, #tpu.memory_space<vmem>>, %arg13: memref<8x256xf32, #tpu.memory_space<vmem>>) attributes {dimension_semantics = [#tpu.dimension_semantics<parallel>, #tpu.dimension_semantics<arbitrary>], iteration_bounds = array<i64: 1, 3>, scalar_prefetch = 0 : i64, scratch_operands = 2 : i64, tpu.core_type = #tpu.core_type<tc>, window_params = [{transform_indices = @transform_0, window_bounds = array<i64: 1, 8, 1024>}, {transform_indices = @transform_1, window_bounds = array<i64: 1, 8, 1>}, {transform_indices = @transform_2, window_bounds = array<i64: 8, 256>}, {transform_indices = @transform_3, window_bounds = array<i64: 8, 256>}, {pipeline_mode = #tpu.pipeline_mode<synchronous>, transform_indices = @transform_4, window_bounds = array<i64: 256, 1024>}, {pipeline_mode = #tpu.pipeline_mode<synchronous>, transform_indices = @transform_5, window_bounds = array<i64: 256, 7>}, {pipeline_mode = #tpu.pipeline_mode<synchronous>, transform_indices = @transform_6, window_bounds = array<i64: 1, 7>}, {transform_indices = @transform_7, window_bounds = array<i64: 1, 8, 7>}, {transform_indices = @transform_8, window_bounds = array<i64: 8, 256>}, {transform_indices = @transform_9, window_bounds = array<i64: 8, 256>}]} {
    %c0_i32 = arith.constant 0 : i32
    %0 = arith.cmpi eq, %arg1, %c0_i32 : i32
    %1 = arith.extui %0 : i1 to i32
    %c0_i32_0 = arith.constant 0 : i32
    %2 = arith.cmpi ne, %1, %c0_i32_0 : i32
    scf.if %2 {
      %c0_31 = arith.constant 0 : index
      %c0_32 = arith.constant 0 : index
      %56 = vector.load %arg4[%c0_31, %c0_32] : memref<8x256xf32, #tpu.memory_space<vmem>>, vector<8x256xf32>
      %c0_33 = arith.constant 0 : index
      %c0_34 = arith.constant 0 : index
      %57 = vector.load %arg12[%c0_33, %c0_34] : memref<8x256xf32, #tpu.memory_space<vmem>>, vector<8x256xf32>
      tpu.vector_store %arg12[%c0_33, %c0_34], %56 {strides = array<i32>} : memref<8x256xf32, #tpu.memory_space<vmem>>, vector<8x256xf32>,
      %c0_35 = arith.constant 0 : index
      %c0_36 = arith.constant 0 : index
      %58 = vector.load %arg5[%c0_35, %c0_36] : memref<8x256xf32, #tpu.memory_space<vmem>>, vector<8x256xf32>
      %c0_37 = arith.constant 0 : index
      %c0_38 = arith.constant 0 : index
      %59 = vector.load %arg13[%c0_37, %c0_38] : memref<8x256xf32, #tpu.memory_space<vmem>>, vector<8x256xf32>
      tpu.vector_store %arg13[%c0_37, %c0_38], %58 {strides = array<i32>} : memref<8x256xf32, #tpu.memory_space<vmem>>, vector<8x256xf32>,
    } else {
    }
    %c0 = arith.constant 0 : index
    %c0_1 = arith.constant 0 : index
    %c0_2 = arith.constant 0 : index
    %3 = vector.load %arg3[%c0, %c0_1, %c0_2] : memref<1x8x1xf32, #tpu.memory_space<vmem>>, vector<1x8x1xf32>
    %4 = vector.shape_cast %3 : vector<1x8x1xf32> to vector<8x1xf32>
    %c0_3 = arith.constant 0 : index
    %c0_4 = arith.constant 0 : index
    %5 = vector.load %arg12[%c0_3, %c0_4] : memref<8x256xf32, #tpu.memory_space<vmem>>, vector<8x256xf32>
    %6 = vector.broadcast %4 : vector<8x1xf32> to vector<8x256xf32>
    %7 = arith.mulf %5, %6 : vector<8x256xf32>
    %c0_5 = arith.constant 0 : index
    %c0_6 = arith.constant 0 : index
    %8 = vector.load %arg13[%c0_5, %c0_6] : memref<8x256xf32, #tpu.memory_space<vmem>>, vector<8x256xf32>
    %9 = vector.broadcast %4 : vector<8x1xf32> to vector<8x256xf32>
    %10 = arith.mulf %8, %9 : vector<8x256xf32>
    %c0_7 = arith.constant 0 : index
    %c0_8 = arith.constant 0 : index
    %c0_9 = arith.constant 0 : index
    %11 = vector.load %arg2[%c0_7, %c0_8, %c0_9] : memref<1x8x1024xbf16, #tpu.memory_space<vmem>>, vector<1x8x1024xbf16>
    %12 = vector.shape_cast %11 : vector<1x8x1024xbf16> to vector<8x1024xbf16>
    %13 = arith.extf %12 : vector<8x1024xbf16> to vector<8x1024xf32>
    %14 = arith.truncf %7 : vector<8x256xf32> to vector<8x256xbf16>
    %c0_10 = arith.constant 0 : index
    %c0_11 = arith.constant 0 : index
    %15 = vector.load %arg6[%c0_10, %c0_11] : memref<256x1024xbf16, #tpu.memory_space<vmem>>, vector<256x1024xbf16>
    %cst = arith.constant dense<0.000000e+00> : vector<8x1024xf32>
    %16 = tpu.matmul %14, %15, %cst {dimension_numbers = #tpu.dot_dimension_numbers<[1], [0], [0], [1], [0, 0, 1, 1], [], []>} : vector<8x256xbf16>, vector<256x1024xbf16>, vector<8x1024xf32> -> vector<8x1024xf32>
    %17 = arith.addf %13, %16 : vector<8x1024xf32>
    %18 = vector.extract_strided_slice %17 {offsets = [0, 0], sizes = [8, 256], strides = [1, 1]} : vector<8x1024xf32> to vector<8x256xf32>
    %19 = arith.negf %18 : vector<8x256xf32>
    %20 = math.exp %19 : vector<8x256xf32>
    %cst_12 = arith.constant 1.000000e+00 : f32
    %21 = vector.broadcast %cst_12 : f32 to vector<8x256xf32>
    %22 = arith.addf %21, %20 : vector<8x256xf32>
    %23 = arith.divf %21, %22 : vector<8x256xf32>
    %24 = vector.extract_strided_slice %17 {offsets = [0, 256], sizes = [8, 256], strides = [1, 1]} : vector<8x1024xf32> to vector<8x256xf32>
    %25 = arith.negf %24 : vector<8x256xf32>
    %26 = math.exp %25 : vector<8x256xf32>
    %cst_13 = arith.constant 1.000000e+00 : f32
    %27 = vector.broadcast %cst_13 : f32 to vector<8x256xf32>
    %28 = arith.addf %27, %26 : vector<8x256xf32>
    %29 = arith.divf %27, %28 : vector<8x256xf32>
    %30 = vector.extract_strided_slice %17 {offsets = [0, 512], sizes = [8, 256], strides = [1, 1]} : vector<8x1024xf32> to vector<8x256xf32>
    %31 = math.tanh %30 : vector<8x256xf32>
    %32 = vector.extract_strided_slice %17 {offsets = [0, 768], sizes = [8, 256], strides = [1, 1]} : vector<8x1024xf32> to vector<8x256xf32>
    %33 = arith.negf %32 : vector<8x256xf32>
    %34 = math.exp %33 : vector<8x256xf32>
    %cst_14 = arith.constant 1.000000e+00 : f32
    %35 = vector.broadcast %cst_14 : f32 to vector<8x256xf32>
    %36 = arith.addf %35, %34 : vector<8x256xf32>
    %37 = arith.divf %35, %36 : vector<8x256xf32>
    %38 = arith.mulf %29, %10 : vector<8x256xf32>
    %39 = arith.mulf %23, %31 : vector<8x256xf32>
    %40 = arith.addf %38, %39 : vector<8x256xf32>
    %41 = math.tanh %40 : vector<8x256xf32>
    %42 = arith.mulf %37, %41 : vector<8x256xf32>
    %c0_15 = arith.constant 0 : index
    %c0_16 = arith.constant 0 : index
    %43 = vector.load %arg12[%c0_15, %c0_16] : memref<8x256xf32, #tpu.memory_space<vmem>>, vector<8x256xf32>
    tpu.vector_store %arg12[%c0_15, %c0_16], %42 {strides = array<i32>} : memref<8x256xf32, #tpu.memory_space<vmem>>, vector<8x256xf32>,
    %c0_17 = arith.constant 0 : index
    %c0_18 = arith.constant 0 : index
    %44 = vector.load %arg13[%c0_17, %c0_18] : memref<8x256xf32, #tpu.memory_space<vmem>>, vector<8x256xf32>
    tpu.vector_store %arg13[%c0_17, %c0_18], %40 {strides = array<i32>} : memref<8x256xf32, #tpu.memory_space<vmem>>, vector<8x256xf32>,
    %45 = arith.truncf %42 : vector<8x256xf32> to vector<8x256xbf16>
    %c0_19 = arith.constant 0 : index
    %c0_20 = arith.constant 0 : index
    %46 = vector.load %arg7[%c0_19, %c0_20] : memref<256x7xbf16, #tpu.memory_space<vmem>>, vector<256x7xbf16>
    %cst_21 = arith.constant dense<0.000000e+00> : vector<8x7xf32>
    %47 = tpu.matmul %45, %46, %cst_21 {dimension_numbers = #tpu.dot_dimension_numbers<[1], [0], [0], [1], [0, 0, 1, 1], [], []>} : vector<8x256xbf16>, vector<256x7xbf16>, vector<8x7xf32> -> vector<8x7xf32>
    %c0_22 = arith.constant 0 : index
    %c0_23 = arith.constant 0 : index
    %48 = vector.load %arg8[%c0_22, %c0_23] : memref<1x7xf32, #tpu.memory_space<vmem>>, vector<1x7xf32>
    %49 = vector.broadcast %48 : vector<1x7xf32> to vector<8x7xf32>
    %50 = arith.addf %47, %49 : vector<8x7xf32>
    %c0_24 = arith.constant 0 : index
    %c0_25 = arith.constant 0 : index
    %c0_26 = arith.constant 0 : index
    %51 = vector.load %arg9[%c0_24, %c0_25, %c0_26] : memref<1x8x7xf32, #tpu.memory_space<vmem>>, vector<1x8x7xf32>
    %52 = vector.shape_cast %51 : vector<1x8x7xf32> to vector<8x7xf32>
    %53 = vector.shape_cast %50 : vector<8x7xf32> to vector<1x8x7xf32>
    tpu.vector_store %arg9[%c0_24, %c0_25, %c0_26], %53 {strides = array<i32>} : memref<1x8x7xf32, #tpu.memory_space<vmem>>, vector<1x8x7xf32>,
    %c0_27 = arith.constant 0 : index
    %c0_28 = arith.constant 0 : index
    %54 = vector.load %arg10[%c0_27, %c0_28] : memref<8x256xf32, #tpu.memory_space<vmem>>, vector<8x256xf32>
    tpu.vector_store %arg10[%c0_27, %c0_28], %42 {strides = array<i32>} : memref<8x256xf32, #tpu.memory_space<vmem>>, vector<8x256xf32>,
    %c0_29 = arith.constant 0 : index
    %c0_30 = arith.constant 0 : index
    %55 = vector.load %arg11[%c0_29, %c0_30] : memref<8x256xf32, #tpu.memory_space<vmem>>, vector<8x256xf32>
    tpu.vector_store %arg11[%c0_29, %c0_30], %40 {strides = array<i32>} : memref<8x256xf32, #tpu.memory_space<vmem>>, vector<8x256xf32>,
    return
  }
  func.func @transform_0(%arg0: i32, %arg1: i32) -> (i32, i32, i32) {
    %c0_i32 = arith.constant 0 : i32
    %c0_i32_0 = arith.constant 0 : i32
    return %arg1, %arg0, %c0_i32 : i32, i32, i32
  }
  func.func @transform_1(%arg0: i32, %arg1: i32) -> (i32, i32, i32) {
    %c0_i32 = arith.constant 0 : i32
    %c0_i32_0 = arith.constant 0 : i32
    return %arg1, %arg0, %c0_i32 : i32, i32, i32
  }
  func.func @transform_2(%arg0: i32, %arg1: i32) -> (i32, i32) {
    %c0_i32 = arith.constant 0 : i32
    %c0_i32_0 = arith.constant 0 : i32
    return %arg0, %c0_i32 : i32, i32
  }
  func.func @transform_3(%arg0: i32, %arg1: i32) -> (i32, i32) {
    %c0_i32 = arith.constant 0 : i32
    %c0_i32_0 = arith.constant 0 : i32
    return %arg0, %c0_i32 : i32, i32
  }
  func.func @transform_4(%arg0: i32, %arg1: i32) -> (i32, i32) {
    %c0_i32 = arith.constant 0 : i32
    %c0_i32_0 = arith.constant 0 : i32
    %c0_i32_1 = arith.constant 0 : i32
    return %c0_i32, %c0_i32_0 : i32, i32
  }
  func.func @transform_5(%arg0: i32, %arg1: i32) -> (i32, i32) {
    %c0_i32 = arith.constant 0 : i32
    %c0_i32_0 = arith.constant 0 : i32
    %c0_i32_1 = arith.constant 0 : i32
    return %c0_i32, %c0_i32_0 : i32, i32
  }
  func.func @transform_6(%arg0: i32, %arg1: i32) -> (i32, i32) {
    %c0_i32 = arith.constant 0 : i32
    %c0_i32_0 = arith.constant 0 : i32
    %c0_i32_1 = arith.constant 0 : i32
    return %c0_i32, %c0_i32_0 : i32, i32
  }
  func.func @transform_7(%arg0: i32, %arg1: i32) -> (i32, i32, i32) {
    %c0_i32 = arith.constant 0 : i32
    %c0_i32_0 = arith.constant 0 : i32
    return %arg1, %arg0, %c0_i32 : i32, i32, i32
  }
  func.func @transform_8(%arg0: i32, %arg1: i32) -> (i32, i32) {
    %c0_i32 = arith.constant 0 : i32
    %c0_i32_0 = arith.constant 0 : i32
    return %arg0, %c0_i32 : i32, i32
  }
  func.func @transform_9(%arg0: i32, %arg1: i32) -> (i32, i32) {
    %c0_i32 = arith.constant 0 : i32
    %c0_i32_0 = arith.constant 0 : i32
    return %arg0, %c0_i32 : i32, i32
  }
}

</mosaic_0001>

<bundles_post_ra>
// kernel: unreal_forward.5
= control target key start
LH: loop header
LB: loop body
LE: loop exit
PB: predicated region body
PF: predicated region fallthrough
CT: control target
= control target key end

     0   :  { %s3695_s12 = smov 0   ;;  %s4567_s0 = inlined_call_operand.vmem [shape: bf16[6,420,128], index: 0, kind: input, shape index: {}]   ;;  %s4568_s1 = inlined_call_operand.vmem [shape: bf16[2,128,16], index: 1, kind: input, shape index: {}]   ;;  %s4569_s2 = inlined_call_operand.vmem [shape: f32[1,16], index: 2, kind: input, shape index: {}]   ;;  %s4570_s3 = inlined_call_operand.vmem [shape: bf16[6,400,16], index: 3, kind: output, shape index: {}]  }
   0x1 LB: > { %s2584_s13 = sadd.s32 4294967295, %s3671_s12   ;;  %p2588_p0 = scmp.ge.s32.totalorder %s3671_s12, 1  ;;  %s3671_s12 = sphi %s3695_s12, %s13_s12  }
   0x2   : > { %p139_p1 = scmp.lt.s32.totalorder %s3671_s12, 4 }
   0x4   : > { %p140_p2 = pnand %p2588_p0, %p139_p1 }
   0x5   : > { %s2589_s20 = sshll.u32 (!%p140_p2), %s2584_s13, 1 }
   0x6   : > { %143 = sbr.rel (%p140_p2) target bundleno = 643 (0x283), region = 32  ;;  %p166_p3 = scmp.lt.s32.totalorder (!%p140_p2), %s2589_s20, 5 }
   0xb   : > { %v3706_v0 = vld [vmem:[%s4568_s1 + $0x78] sm:$0xff]   ;;  %v3673_v1 = vmov 0.0   ;;  %v3719_v3 = vld [vmem:[%s4568_s1 + $0x70] sm:$0xff]   ;;  %vm3674_vm0 = vmmov 0   ;;  %v3737_v5 = vld [vmem:[%s4568_s1 + $0x68] sm:$0xff]   ;;  %s4572_s20 = smov (!%p166_p3, %s2589_s20), 5 }
   0xc   : > { %3117 = vmatprep.subr.bf16.mxu0 %v3673_v1  ;;  %3233 = vmatprep.subr.bf16.mxu1 %v3673_v1  ;;  %v3713_v2 = vld [vmem:[%s4568_s1 + $0x38] sm:$0xff]   ;;  %v3728_v4 = vld [vmem:[%s4568_s1 + $0x30] sm:$0xff]   ;;  %v3744_v6 = vld [vmem:[%s4568_s1 + $0x28] sm:$0xff]   ;;  %s3581_s4 = smul.u32 212, %s4572_s20  ;;  %vm395_vm1 = vcmask 1045504   ;;  %vm1370_vm2 = vcmask 125952  }
   0xd   : > { %3118 = vmatpush3.bf16.msra.mxu0 %v3706_v0  ;;  %3133 = vmatprep.mubr.msk.bf16.mxu0 %vm3674_vm0, %v3673_v1  ;;  %v3753_v7 = vld [vmem:[%s4568_s1 + $0x60] sm:$0xff]   ;;  %v3768_v9 = vld [vmem:[%s4568_s1 + $0x58] sm:$0xff]   ;;  %v3787_v11 = vld [vmem:[%s4568_s1 + $0x50] sm:$0xff]   ;;  %s3582_s28 = smul.u32 200, %s4572_s20 }
   0xe   : > { %3234 = vmatpush3.bf16.msra.mxu1 %v3713_v2  ;;  %3119 = vmatprep.subr.bf16.mxu0 %v3673_v1  ;;  %v3760_v8 = vld [vmem:[%s4568_s1 + $0x20] sm:$0xff]   ;;  %v3775_v10 = vld [vmem:[%s4568_s1 + $0x18] sm:$0xff]   ;;  %s3780_s11 = scalar_lea.vmem %s4567_s0, %s3581_s4  ;;  %v3794_v12 = vld [vmem:[%s4568_s1 + $0x10] sm:$0xff]  }
   0xf   : > { %3235 = vmatprep.subr.bf16.mxu1 %v3673_v1  ;;  %3249 = vmatprep.mubr.msk.bf16.mxu1 %vm3674_vm0, %v3673_v1  ;;  %v3800_v13 = vld [vmem:[%s4568_s1 + $0x48] sm:$0xff]   ;;  %v3610_v15 = vld [vmem:[%s3780_s11 + $0x10] sm:$0xff]   ;;  %v3816_v17 = vld [vmem:[%s4568_s1 + $0x40] sm:$0xff]   ;;  %s4031_s4 = scalar_lea.vmem %s4570_s3, %s3582_s28 }
  0x10   : > { %v3609_v14 = vld [vmem:[%s3780_s11 + $0x8] sm:$0xff]   ;;  %v397_v19 = vrot.slane %v3610_v15, 2  ;;  %v3824_v20 = vld [vmem:[%s4568_s1] sm:$0xff]   ;;  %v3612_v23 = vld [vmem:[%s3780_s11 + $0x18] sm:$0xff]  }
  0x11   : > { %3120 = vmatpush3.bf16.msra.mxu0 %v3719_v3  ;;  %v3810_v16 = vld [vmem:[%s4568_s1 + $0x8] sm:$0xff]   ;;  %v396_v18 = vrot.slane %v3609_v14, 2  ;;  %v3611_v21 = vld [vmem:[%s3780_s11] sm:$0xff]   ;;  %v399_v24 = vrot.slane %v3612_v23, 2  ;;  %v3615_v31 = vld [vmem:[%s3780_s11 + $0x30] sm:$0xff]  }
  0x12   : > { %3236 = vmatpush3.bf16.msra.mxu1 %v3728_v4  ;;  %3121 = vmatprep.subr.bf16.mxu0 %v3673_v1  ;;  %v3613_v25 = vld [vmem:[%s3780_s11 + $0x20] sm:$0xff]   ;;  %v3614_v28 = vld [vmem:[%s3780_s11 + $0x28] sm:$0xff]   ;;  %v405_v32 = vrot.slane %v3615_v31, 2  ;;  %v3616_v35 = vld [vmem:[%s3780_s11 + $0x38] sm:$0xff]  }
  0x13   : > { %3237 = vmatprep.subr.bf16.mxu1 %v3673_v1  ;;  %v398_v22 = vsel %vm395_vm1, %v396_v18, %v397_v19  ;;  %v400_v26 = vsel %vm395_vm1, %v397_v19, %v399_v24  ;;  %v401_v27 = vrot.slane %v3613_v25, 2  ;;  %v403_v29 = vrot.slane %v3614_v28, 2  ;;  %v3617_v38 = vld [vmem:[%s3780_s11 + $0x40] sm:$0xff]   ;;  %v3618_v41 = vld [vmem:[%s3780_s11 + $0x48] sm:$0xff]   ;;  %v3619_v44 = vld [vmem:[%s3780_s11 + $0x50] sm:$0xff]  }
  0x14   : > { %v407_v36 = vrot.slane %v3616_v35, 2  ;;  %v409_v39 = vrot.slane %v3617_v38, 2  ;;  %v411_v42 = vrot.slane %v3618_v41, 2  ;;  %v413_v45 = vrot.slane %v3619_v44, 2  ;;  %v3620_v47 = vld [vmem:[%s3780_s11 + $0x58] sm:$0xff]   ;;  %v3621_v50 = vld [vmem:[%s3780_s11 + $0x60] sm:$0xff]  }
  0x15   : > { %3122 = vmatpush3.bf16.msra.mxu0 %v3737_v5  ;;  %v402_v30 = vsel %vm395_vm1, %v399_v24, %v401_v27  ;;  %v404_v33 = vsel %vm395_vm1, %v401_v27, %v403_v29  ;;  %v406_v34 = vsel %vm395_vm1, %v403_v29, %v405_v32  ;;  %v415_v48 = vrot.slane %v3620_v47, 2  ;;  %v3622_v53 = vld [vmem:[%s3780_s11 + $0x68] sm:$0xff]   ;;  %v3623_v56 = vld [vmem:[%s3780_s11 + $0x70] sm:$0xff]   ;;  %v3624_v59 = vld [vmem:[%s3780_s11 + $0x78] sm:$0xff]  }
  0x16   : > { %3238 = vmatpush3.bf16.msra.mxu1 %v3744_v6  ;;  %3123 = vmatprep.subr.bf16.mxu0 %v3673_v1  ;;  %v408_v37 = vsel %vm395_vm1, %v405_v32, %v407_v36  ;;  %v410_v40 = vsel %vm395_vm1, %v407_v36, %v409_v39  ;;  %v412_v43 = vsel %vm395_vm1, %v409_v39, %v411_v42  ;;  %v417_v51 = vrot.slane %v3621_v50, 2  ;;  %v3625_v62 = vld [vmem:[%s3780_s11 + $0x80] sm:$0xff]   ;;  %v3635_v29 = vld [vmem:[%s3780_s11 + $0xd0] ss:$0 sps:$4 sm:$0x33]  }
  0x17   : > { %3239 = vmatprep.subr.bf16.mxu1 %v3673_v1  ;;  %v414_v46 = vsel %vm395_vm1, %v411_v42, %v413_v45  ;;  %v416_v49 = vsel %vm395_vm1, %v413_v45, %v415_v48  ;;  %v419_v54 = vrot.slane %v3622_v53, 2  ;;  %v421_v57 = vrot.slane %v3623_v56, 2  ;;  %v3636_v32 = vld [vmem:[%s3780_s11 + $0xdc] sm:$0xff]  }
  0x18   : > { %v418_v52 = vsel %vm395_vm1, %v415_v48, %v417_v51  ;;  %v423_v60 = vrot.slane %v3624_v59, 2  ;;  %v425_v63 = vrot.slane %v3625_v62, 2 }
  0x19   : > { %3124 = vmatpush3.bf16.msra.mxu0 %v3753_v7  ;;  %v420_v55 = vsel %vm395_vm1, %v417_v51, %v419_v54  ;;  %v422_v58 = vsel %vm395_vm1, %v419_v54, %v421_v57 }
  0x1a   : > { %3240 = vmatpush3.bf16.msra.mxu1 %v3760_v8  ;;  %3125 = vmatprep.subr.bf16.mxu0 %v3673_v1  ;;  %v424_v61 = vsel %vm395_vm1, %v421_v57, %v423_v60 }
  0x1b   : > { %3241 = vmatprep.subr.bf16.mxu1 %v3673_v1 }
  0x1d   : > { %3126 = vmatpush3.bf16.msra.mxu0 %v3768_v9 }
  0x1e   : > { %3242 = vmatpush3.bf16.msra.mxu1 %v3775_v10  ;;  %3127 = vmatprep.subr.bf16.mxu0 %v3673_v1 }
  0x1f   : > { %3243 = vmatprep.subr.bf16.mxu1 %v3673_v1 }
  0x21   : > { %3128 = vmatpush3.bf16.msra.mxu0 %v3787_v11 }
  0x22   : > { %3244 = vmatpush3.bf16.msra.mxu1 %v3794_v12  ;;  %3129 = vmatprep.subr.bf16.mxu0 %v3673_v1 }
  0x23   : > { %3245 = vmatprep.subr.bf16.mxu1 %v3673_v1 }
  0x25   : > { %3130 = vmatpush3.bf16.msra.mxu0 %v3800_v13 }
  0x26   : > { %3246 = vmatpush3.bf16.msra.mxu1 %v3810_v16  ;;  %3131 = vmatprep.subr.bf16.mxu0 %v3673_v1 }
  0x27   : > { %3247 = vmatprep.subr.bf16.mxu1 %v3673_v1 }
  0x29   : > { %3132 = vmatpush3.bf16.msra.mxu0 %v3816_v17 }
  0x2a   : > { %3248 = vmatpush3.bf16.msra.mxu1 %v3824_v20  ;;  %3349 = vmatprep.subr.bf16.mxu0 %v3673_v1 }
  0x2b   : > { %3465 = vmatprep.subr.bf16.mxu1 %v3673_v1 }
  0x2c   : > { %3134 = vmatmul.mubr.bf16.vlgmr.msra.gmra.mxu0 %v398_v22 }
  0x2d   : > { %3250 = vmatmul.mubr.bf16.vlgmr.msra.gmra.mxu1 %v3611_v21  ;;  %3350 = vmatpush3.bf16.msra.mxu0 %v3706_v0  ;;  %v426_v0 = vsel %vm395_vm1, %v423_v60, %v425_v63 }
  0x2e   : > { %3466 = vmatpush3.bf16.msra.mxu1 %v3713_v2  ;;  %3137 = vmatprep.mubr.msk.bf16.mxu0 %vm3674_vm0, %v3673_v1  ;;  %v3626_v2 = vld [vmem:[%s3780_s11 + $0x88] sm:$0xff]  }
  0x2f   : > { %3253 = vmatprep.mubr.msk.bf16.mxu1 %vm3674_vm0, %v3673_v1  ;;  %3351 = vmatprep.subr.bf16.mxu0 %v3673_v1 }
  0x30   : > { %3467 = vmatprep.subr.bf16.mxu1 %v3673_v1 }
  0x31   : > { %3352 = vmatpush3.bf16.msra.mxu0 %v3719_v3  ;;  %v427_v3 = vrot.slane %v3626_v2, 2 }
  0x32   : > { %3468 = vmatpush3.bf16.msra.mxu1 %v3728_v4  ;;  %3353 = vmatprep.subr.bf16.mxu0 %v3673_v1 }
  0x33   : > { %3469 = vmatprep.subr.bf16.mxu1 %v3673_v1  ;;  %v428_v4 = vsel %vm395_vm1, %v425_v63, %v427_v3 }
  0x34   : > { %3138 = vmatmul.mubr.bf16.gmra.mxu0 %v400_v26  ;;  %v3634_v26 = vld [vmem:[%s3780_s11 + $0xc8] sm:$0xff]  }
  0x35   : > { %3254 = vmatmul.mubr.bf16.gmra.mxu1 %v3609_v14  ;;  %3141 = vmatprep.mubr.msk.bf16.mxu0 %vm3674_vm0, %v3673_v1  ;;  %v3630_v14 = vld [vmem:[%s3780_s11 + $0xa8] sm:$0xff]   ;;  %v443_v27 = vrot.slane %v3634_v26, 2 }
  0x36   : > { %3257 = vmatprep.mubr.msk.bf16.mxu1 %vm3674_vm0, %v3673_v1  ;;  %3354 = vmatpush3.bf16.msra.mxu0 %v3737_v5  ;;  %v3627_v5 = vld [vmem:[%s3780_s11 + $0x90] sm:$0xff]  }
  0x37   : > { %3470 = vmatpush3.bf16.msra.mxu1 %v3744_v6  ;;  %3355 = vmatprep.subr.bf16.mxu0 %v3673_v1  ;;  %v429_v6 = vrot.slane %v3627_v5, 2 }
  0x38   : > { %3471 = vmatprep.subr.bf16.mxu1 %v3673_v1 }
  0x3a   : > { %3356 = vmatpush3.bf16.msra.mxu0 %v3753_v7  ;;  %v430_v7 = vsel %vm395_vm1, %v427_v3, %v429_v6  ;;  %v4044_v3 = vld [vmem:[%s3780_s11 + $0xf4] sm:$0xff]  }
  0x3b   : > { %3472 = vmatpush3.bf16.msra.mxu1 %v3760_v8  ;;  %3357 = vmatprep.subr.bf16.mxu0 %v3673_v1  ;;  %v3628_v8 = vld [vmem:[%s3780_s11 + $0x98] sm:$0xff]  }
  0x3c   : > { %3142 = vmatmul.mubr.bf16.gmra.mxu0 %v402_v30  ;;  %3473 = vmatprep.subr.bf16.mxu1 %v3673_v1  ;;  %v445_v30 = vrot.slane %v3635_v29, 2 }
  0x3d   : > { %3258 = vmatmul.mubr.bf16.gmra.mxu1 %v3610_v15  ;;  %3145 = vmatprep.mubr.msk.bf16.mxu0 %vm3674_vm0, %v3673_v1  ;;  %v435_v15 = vrot.slane %v3630_v14, 2 }
  0x3e   : > { %3261 = vmatprep.mubr.msk.bf16.mxu1 %vm3674_vm0, %v3673_v1  ;;  %3358 = vmatpush3.bf16.msra.mxu0 %v3768_v9  ;;  %v431_v9 = vrot.slane %v3628_v8, 2 }
  0x3f   : > { %3474 = vmatpush3.bf16.msra.mxu1 %v3775_v10  ;;  %3359 = vmatprep.subr.bf16.mxu0 %v3673_v1 }
  0x40   : > { %3475 = vmatprep.subr.bf16.mxu1 %v3673_v1  ;;  %v432_v10 = vsel %vm395_vm1, %v429_v6, %v431_v9 }
  0x42   : > { %3360 = vmatpush3.bf16.msra.mxu0 %v3787_v11  ;;  %v3629_v11 = vld [vmem:[%s3780_s11 + $0xa0] sm:$0xff]  }
  0x43   : > { %3476 = vmatpush3.bf16.msra.mxu1 %v3794_v12  ;;  %3361 = vmatprep.subr.bf16.mxu0 %v3673_v1  ;;  %v433_v12 = vrot.slane %v3629_v11, 2 }
  0x44   : > { %3146 = vmatmul.mubr.bf16.gmra.mxu0 %v404_v33  ;;  %3477 = vmatprep.subr.bf16.mxu1 %v3673_v1  ;;  %v4009_v33 = vld [vmem:[%s3780_s11 + $0xe4] sm:$0xff]  }
  0x45   : > { %3262 = vmatmul.mubr.bf16.gmra.mxu1 %v3612_v23  ;;  %3149 = vmatprep.mubr.msk.bf16.mxu0 %vm3674_vm0, %v3673_v1  ;;  %v3633_v23 = vld [vmem:[%s3780_s11 + $0xc0] sm:$0xff]  }
  0x46   : > { %3265 = vmatprep.mubr.msk.bf16.mxu1 %vm3674_vm0, %v3673_v1  ;;  %3362 = vmatpush3.bf16.msra.mxu0 %v3800_v13  ;;  %v434_v13 = vsel %vm395_vm1, %v431_v9, %v433_v12  ;;  %v441_v24 = vrot.slane %v3633_v23, 2 }
  0x47   : > { %3478 = vmatpush3.bf16.msra.mxu1 %v3810_v16  ;;  %3363 = vmatprep.subr.bf16.mxu0 %v3673_v1  ;;  %v436_v16 = vsel %vm395_vm1, %v433_v12, %v435_v15  ;;  %v1608_v12 = vrot.slane %v4044_v3, 2 }
  0x48   : > { %3479 = vmatprep.subr.bf16.mxu1 %v3673_v1 }
  0x4a   : > { %3364 = vmatpush3.bf16.msra.mxu0 %v3816_v17  ;;  %v3631_v17 = vld [vmem:[%s3780_s11 + $0xb0] sm:$0xff]  }
  0x4b   : > { %3480 = vmatpush3.bf16.msra.mxu1 %v3824_v20  ;;  %v437_v18 = vrot.slane %v3631_v17, 2  ;;  %v3632_v20 = vld [vmem:[%s3780_s11 + $0xb8] sm:$0xff]  }
  0x4c   : > { %3150 = vmatmul.mubr.bf16.gmra.mxu0 %v406_v34  ;;  %v439_v21 = vrot.slane %v3632_v20, 2 }
  0x4d   : > { %3266 = vmatmul.mubr.bf16.gmra.mxu1 %v3613_v25  ;;  %3153 = vmatprep.mubr.msk.bf16.mxu0 %vm3674_vm0, %v3673_v1  ;;  %v438_v19 = vsel %vm395_vm1, %v435_v15, %v437_v18 }
  0x4e   : > { %3269 = vmatprep.mubr.msk.bf16.mxu1 %vm3674_vm0, %v3673_v1  ;;  %v440_v22 = vsel %vm395_vm1, %v437_v18, %v439_v21  ;;  %v442_v25 = vsel %vm395_vm1, %v439_v21, %v441_v24 }
  0x54   : > { %3154 = vmatmul.mubr.bf16.gmra.mxu0 %v408_v37  ;;  %v1603_v37 = vrot.slane %v3636_v32, 2 }
  0x55   : > { %3270 = vmatmul.mubr.bf16.gmra.mxu1 %v3614_v28  ;;  %3157 = vmatprep.mubr.msk.bf16.mxu0 %vm3674_vm0, %v3673_v1  ;;  %v444_v28 = vsel %vm395_vm1, %v441_v24, %v443_v27 }
  0x56   : > { %3273 = vmatprep.mubr.msk.bf16.mxu1 %vm3674_vm0, %v3673_v1 }
  0x5c   : > { %3158 = vmatmul.mubr.bf16.gmra.mxu0 %v410_v40 }
  0x5d   : > { %3274 = vmatmul.mubr.bf16.gmra.mxu1 %v3615_v31  ;;  %3161 = vmatprep.mubr.msk.bf16.mxu0 %vm3674_vm0, %v3673_v1  ;;  %v446_v31 = vsel %vm395_vm1, %v443_v27, %v445_v30 }
  0x5e   : > { %3277 = vmatprep.mubr.msk.bf16.mxu1 %vm3674_vm0, %v3673_v1 }
  0x64   : > { %3162 = vmatmul.mubr.bf16.gmra.mxu0 %v412_v43 }
  0x65   : > { %3278 = vmatmul.mubr.bf16.gmra.mxu1 %v3616_v35  ;;  %3165 = vmatprep.mubr.msk.bf16.mxu0 %vm3674_vm0, %v3673_v1  ;;  %v4014_v35 = vld [vmem:[%s4569_s2] ss:$0 sm:$0xff] }
  0x66   : > { %3281 = vmatprep.mubr.msk.bf16.mxu1 %vm3674_vm0, %v3673_v1 }
  0x6c   : > { %3166 = vmatmul.mubr.bf16.gmra.mxu0 %v414_v46  ;;  %v3638_v46 = vld [vmem:[%s3780_s11 + $0xd4] sm:$0xff]  }
  0x6d   : > { %3282 = vmatmul.mubr.bf16.gmra.mxu1 %v3617_v38  ;;  %3169 = vmatprep.mubr.msk.bf16.mxu0 %vm3674_vm0, %v3673_v1  ;;  %v1604_v38 = vrot.slane %v4009_v33, 2 }
  0x6e   : > { %3285 = vmatprep.mubr.msk.bf16.mxu1 %vm3674_vm0, %v3673_v1 }
  0x6f   : > { %v1605_v45 = vsel %vm395_vm1, %v1603_v37, %v1604_v38 }
  0x74   : > { %3170 = vmatmul.mubr.bf16.gmra.mxu0 %v416_v49 }
  0x75   : > { %3286 = vmatmul.mubr.bf16.gmra.mxu1 %v3618_v41  ;;  %3173 = vmatprep.mubr.msk.bf16.mxu0 %vm3674_vm0, %v3673_v1 }
  0x76   : > { %3289 = vmatprep.mubr.msk.bf16.mxu1 %vm3674_vm0, %v3673_v1 }
  0x7c   : > { %3174 = vmatmul.mubr.bf16.gmra.mxu0 %v418_v52 }
  0x7d   : > { %3290 = vmatmul.mubr.bf16.gmra.mxu1 %v3619_v44  ;;  %3177 = vmatprep.mubr.msk.bf16.mxu0 %vm3674_vm0, %v3673_v1 }
  0x7e   : > { %3293 = vmatprep.mubr.msk.bf16.mxu1 %vm3674_vm0, %v3673_v1 }
  0x84   : > { %3178 = vmatmul.mubr.bf16.gmra.mxu0 %v420_v55 }
  0x85   : > { %3294 = vmatmul.mubr.bf16.gmra.mxu1 %v3620_v47  ;;  %3181 = vmatprep.mubr.msk.bf16.mxu0 %vm3674_vm0, %v3673_v1  ;;  %v4026_v47 = vld [vmem:[%s3780_s11 + $0xec] sm:$0xff]  }
  0x86   : > { %3297 = vmatprep.mubr.msk.bf16.mxu1 %vm3674_vm0, %v3673_v1 }
  0x8c   : > { %3182 = vmatmul.mubr.bf16.gmra.mxu0 %v422_v58 }
  0x8d   : > { %3298 = vmatmul.mubr.bf16.gmra.mxu1 %v3621_v50  ;;  %3185 = vmatprep.mubr.msk.bf16.mxu0 %vm3674_vm0, %v3673_v1 }
  0x8e   : > { %3301 = vmatprep.mubr.msk.bf16.mxu1 %vm3674_vm0, %v3673_v1 }
  0x94   : > { %3186 = vmatmul.mubr.bf16.gmra.mxu0 %v424_v61 }
  0x95   : > { %3302 = vmatmul.mubr.bf16.gmra.mxu1 %v3622_v53  ;;  %3189 = vmatprep.mubr.msk.bf16.mxu0 %vm3674_vm0, %v3673_v1 }
  0x96   : > { %3305 = vmatprep.mubr.msk.bf16.mxu1 %vm3674_vm0, %v3673_v1 }
  0x9c   : > { %3190 = vmatmul.mubr.bf16.gmra.mxu0 %v426_v0 }
  0x9d   : > { %3306 = vmatmul.mubr.bf16.gmra.mxu1 %v3623_v56  ;;  %3193 = vmatprep.mubr.msk.bf16.mxu0 %vm3674_vm0, %v3673_v1  ;;  %v1606_v56 = vrot.slane %v4026_v47, 2 }
  0x9e   : > { %3309 = vmatprep.mubr.msk.bf16.mxu1 %vm3674_vm0, %v3673_v1 }
  0x9f   : > { %v1609_v21 = vsel %vm395_vm1, %v1606_v56, %v1608_v12 }
  0xa4   : > { %3194 = vmatmul.mubr.bf16.gmra.mxu0 %v428_v4 }
  0xa5   : > { %3310 = vmatmul.mubr.bf16.gmra.mxu1 %v3624_v59  ;;  %3197 = vmatprep.mubr.msk.bf16.mxu0 %vm3674_vm0, %v3673_v1 }
  0xa6   : > { %3313 = vmatprep.mubr.msk.bf16.mxu1 %vm3674_vm0, %v3673_v1 }
  0xac   : > { %3198 = vmatmul.mubr.bf16.gmra.mxu0 %v430_v7 }
  0xad   : > { %3314 = vmatmul.mubr.bf16.gmra.mxu1 %v3625_v62  ;;  %3201 = vmatprep.mubr.msk.bf16.mxu0 %vm3674_vm0, %v3673_v1 }
  0xae   : > { %3317 = vmatprep.mubr.msk.bf16.mxu1 %vm3674_vm0, %v3673_v1 }
  0xb4   : > { %3202 = vmatmul.mubr.bf16.gmra.mxu0 %v432_v10 }
  0xb5   : > { %3318 = vmatmul.mubr.bf16.gmra.mxu1 %v3626_v2  ;;  %3205 = vmatprep.mubr.msk.bf16.mxu0 %vm3674_vm0, %v3673_v1  ;;  %v1607_v2 = vsel %vm395_vm1, %v1604_v38, %v1606_v56 }
  0xb6   : > { %3321 = vmatprep.mubr.msk.bf16.mxu1 %vm3674_vm0, %v3673_v1 }
  0xbc   : > { %3206 = vmatmul.mubr.bf16.gmra.mxu0 %v434_v13 }
  0xbd   : > { %3322 = vmatmul.mubr.bf16.gmra.mxu1 %v3627_v5  ;;  %3209 = vmatprep.mubr.msk.bf16.mxu0 %vm3674_vm0, %v3673_v1 }
  0xbe   : > { %3325 = vmatprep.mubr.msk.bf16.mxu1 %vm3674_vm0, %v3673_v1 }
  0xc4   : > { %3210 = vmatmul.mubr.bf16.gmra.mxu0 %v436_v16 }
  0xc5   : > { %3326 = vmatmul.mubr.bf16.gmra.mxu1 %v3628_v8  ;;  %3213 = vmatprep.mubr.msk.bf16.mxu0 %vm3674_vm0, %v3673_v1 }
  0xc6   : > { %3329 = vmatprep.mubr.msk.bf16.mxu1 %vm3674_vm0, %v3673_v1 }
  0xcc   : > { %3214 = vmatmul.mubr.bf16.gmra.mxu0 %v438_v19 }
  0xcd   : > { %3330 = vmatmul.mubr.bf16.gmra.mxu1 %v3629_v11  ;;  %3217 = vmatprep.mubr.msk.bf16.mxu0 %vm3674_vm0, %v3673_v1 }
  0xce   : > { %3333 = vmatprep.mubr.msk.bf16.mxu1 %vm3674_vm0, %v3673_v1 }
  0xd4   : > { %3218 = vmatmul.mubr.bf16.gmra.mxu0 %v440_v22  ;;  %v4059_v22 = vld [vmem:[%s3780_s11 + $0xfc] sm:$0xff]  }
  0xd5   : > { %3334 = vmatmul.mubr.bf16.gmra.mxu1 %v3630_v14  ;;  %3221 = vmatprep.mubr.msk.bf16.mxu0 %vm3674_vm0, %v3673_v1 }
  0xd6   : > { %3337 = vmatprep.mubr.msk.bf16.mxu1 %vm3674_vm0, %v3673_v1 }
  0xdc   : > { %3222 = vmatmul.mubr.bf16.gmra.mxu0 %v442_v25 }
  0xdd   : > { %3338 = vmatmul.mubr.bf16.gmra.mxu1 %v3631_v17  ;;  %3225 = vmatprep.mubr.msk.bf16.mxu0 %vm3674_vm0, %v3673_v1 }
  0xde   : > { %3341 = vmatprep.mubr.msk.bf16.mxu1 %vm3674_vm0, %v3673_v1 }
  0xe4   : > { %3226 = vmatmul.mubr.bf16.gmra.mxu0 %v444_v28 }
  0xe5   : > { %3342 = vmatmul.mubr.bf16.gmra.mxu1 %v3632_v20  ;;  %3229 = vmatprep.mubr.msk.bf16.mxu0 %vm3674_vm0, %v3673_v1 }
  0xe6   : > { %3345 = vmatprep.mubr.msk.bf16.mxu1 %vm3674_vm0, %v3673_v1 }
  0xec   : > { %v554_v34 = vpop.f32.mrf.mxu0  ;;  %3230 = vmatmul.mubr.bf16.gmra.mxu0 %v446_v31  ;;  %v1610_v31 = vrot.slane %v4059_v22, 2 }
  0xed   : > { %v865_v36 = vpop.f32.mrf.mxu1  ;;  %3346 = vmatmul.mubr.bf16.gmra.mxu1 %v3633_v23  ;;  %3365 = vmatprep.mubr.msk.bf16.mxu0 %vm3674_vm0, %v3673_v1 }
  0xee   : > { %v866_v39 = vadd.f32 %v865_v36, %v554_v34  ;;  %v3135_v40 = vpop.f32.mrf.mxu0  ;;  %3481 = vmatprep.mubr.msk.bf16.mxu1 %vm3674_vm0, %v3673_v1 }
  0xef   : > { %v3251_v41 = vpop.f32.mrf.mxu1 }
  0xf0   : > { %v1070_v42 = vadd.f32 %v4014_v35, %v866_v39  ;;  %v557_v43 = vpop.f32.mrf.mxu0 }
  0xf1   : > { %v868_v44 = vpop.f32.mrf.mxu1 }
  0xf2   : > { %v1120_v48 = vmax.f32 %v1070_v42, 0.0  ;;  %v869_v49 = vadd.f32 %v868_v44, %v557_v43  ;;  %v3136_v50 = vpop.f32.mrf.mxu0  ;;  %v4075_v42 = vld [vmem:[%s3780_s11 + $0x104] sm:$0xff]  }
  0xf3   : > { %v3252_v51 = vpop.f32.mrf.mxu1 }
  0xf4   : > { %v2885_v52 = vpack.c.bf16 %v1120_v48, %v1120_v48  ;;  %v1071_v53 = vadd.f32 %v4014_v35, %v869_v49  ;;  %v562_v54 = vpop.f32.mrf.mxu0  ;;  %3366 = vmatmul.mubr.bf16.vlgmr.msra.gmra.mxu0 %v1605_v45 }
  0xf5   : > { %v873_v55 = vpop.f32.mrf.mxu1  ;;  %3482 = vmatmul.mubr.bf16.vlgmr.msra.gmra.mxu1 %v3638_v46  ;;  %3369 = vmatprep.mubr.msk.bf16.mxu0 %vm3674_vm0, %v3673_v1 }
  0xf6   : > { %1371 = vst.msk [vmem:[%s4031_s4] sm:$0xf] %vm1370_vm2, %v2885_v52  ;;  %v1121_v57 = vmax.f32 %v1071_v53, 0.0  ;;  %v874_v58 = vadd.f32 %v873_v55, %v562_v54  ;;  %v3139_v59 = vpop.f32.mrf.mxu0  ;;  %3485 = vmatprep.mubr.msk.bf16.mxu1 %vm3674_vm0, %v3673_v1  ;;  %v1612_v52 = vrot.slane %v4075_v42, 2 }
  0xf7   : > { %v3255_v60 = vpop.f32.mrf.mxu1 }
  0xf8   : > { %v2886_v61 = vpack.c.bf16 %v1121_v57, %v1121_v57  ;;  %v1072_v62 = vadd.f32 %v4014_v35, %v874_v58  ;;  %v565_v63 = vpop.f32.mrf.mxu0 }
  0xf9   : > { %v876_v0 = vpop.f32.mrf.mxu1 }
  0xfa   : > { %1372 = vst.msk [vmem:[%s4031_s4 + $0x4] sm:$0xf] %vm1370_vm2, %v2886_v61  ;;  %v1122_v4 = vmax.f32 %v1072_v62, 0.0  ;;  %v877_v5 = vadd.f32 %v876_v0, %v565_v63  ;;  %v3140_v6 = vpop.f32.mrf.mxu0  ;;  %v4091_v61 = vld [vmem:[%s3780_s11 + $0x10c] sm:$0xff]  }
  0xfb   : > { %v3256_v7 = vpop.f32.mrf.mxu1 }
  0xfc   : > { %v2887_v8 = vpack.c.bf16 %v1122_v4, %v1122_v4  ;;  %v1073_v9 = vadd.f32 %v4014_v35, %v877_v5  ;;  %v570_v10 = vpop.f32.mrf.mxu0  ;;  %3370 = vmatmul.mubr.bf16.gmra.mxu0 %v1607_v2 }
  0xfd   : > { %v881_v11 = vpop.f32.mrf.mxu1  ;;  %3486 = vmatmul.mubr.bf16.gmra.mxu1 %v3636_v32  ;;  %3373 = vmatprep.mubr.msk.bf16.mxu0 %vm3674_vm0, %v3673_v1 }
  0xfe   : > { %1373 = vst.msk [vmem:[%s4031_s4 + $0x8] sm:$0xf] %vm1370_vm2, %v2887_v8  ;;  %v1123_v13 = vmax.f32 %v1073_v9, 0.0  ;;  %v882_v14 = vadd.f32 %v881_v11, %v570_v10  ;;  %v3143_v15 = vpop.f32.mrf.mxu0  ;;  %3489 = vmatprep.mubr.msk.bf16.mxu1 %vm3674_vm0, %v3673_v1  ;;  %v1614_v8 = vrot.slane %v4091_v61, 2 }
  0xff   : > { %v3259_v16 = vpop.f32.mrf.mxu1 }
 0x100   : > { %v2888_v17 = vpack.c.bf16 %v1123_v13, %v1123_v13  ;;  %v1074_v18 = vadd.f32 %v4014_v35, %v882_v14  ;;  %v573_v19 = vpop.f32.mrf.mxu0 }
 0x101   : > { %v884_v20 = vpop.f32.mrf.mxu1 }
 0x102   : > { %1374 = vst.msk [vmem:[%s4031_s4 + $0xc] sm:$0xf] %vm1370_vm2, %v2888_v17  ;;  %v1124_v23 = vmax.f32 %v1074_v18, 0.0  ;;  %v885_v24 = vadd.f32 %v884_v20, %v573_v19  ;;  %v3144_v25 = vpop.f32.mrf.mxu0  ;;  %v4107_v17 = vld [vmem:[%s3780_s11 + $0x114] sm:$0xff]  }
 0x103   : > { %v3260_v26 = vpop.f32.mrf.mxu1 }
 0x104   : > { %v2889_v27 = vpack.c.bf16 %v1124_v23, %v1124_v23  ;;  %v1075_v28 = vadd.f32 %v4014_v35, %v885_v24  ;;  %v578_v29 = vpop.f32.mrf.mxu0  ;;  %3374 = vmatmul.mubr.bf16.gmra.mxu0 %v1609_v21 }
 0x105   : > { %v889_v30 = vpop.f32.mrf.mxu1  ;;  %3490 = vmatmul.mubr.bf16.gmra.mxu1 %v4009_v33  ;;  %3377 = vmatprep.mubr.msk.bf16.mxu0 %vm3674_vm0, %v3673_v1  ;;  %v1611_v33 = vsel %vm395_vm1, %v1608_v12, %v1610_v31 }
 0x106   : > { %1375 = vst.msk [vmem:[%s4031_s4 + $0x10] sm:$0xf] %vm1370_vm2, %v2889_v27  ;;  %v1125_v32 = vmax.f32 %v1075_v28, 0.0  ;;  %v890_v34 = vadd.f32 %v889_v30, %v578_v29  ;;  %v3147_v36 = vpop.f32.mrf.mxu0  ;;  %3493 = vmatprep.mubr.msk.bf16.mxu1 %vm3674_vm0, %v3673_v1  ;;  %v1616_v27 = vrot.slane %v4107_v17, 2 }
 0x107   : > { %v3263_v37 = vpop.f32.mrf.mxu1 }
 0x108   : > { %v2890_v38 = vpack.c.bf16 %v1125_v32, %v1125_v32  ;;  %v1076_v39 = vadd.f32 %v4014_v35, %v890_v34  ;;  %v581_v40 = vpop.f32.mrf.mxu0 }
 0x109   : > { %v892_v41 = vpop.f32.mrf.mxu1 }
 0x10a   : > { %1376 = vst.msk [vmem:[%s4031_s4 + $0x14] sm:$0xf] %vm1370_vm2, %v2890_v38  ;;  %v1126_v43 = vmax.f32 %v1076_v39, 0.0  ;;  %v893_v44 = vadd.f32 %v892_v41, %v581_v40  ;;  %v3148_v45 = vpop.f32.mrf.mxu0  ;;  %v4123_v38 = vld [vmem:[%s3780_s11 + $0x11c] sm:$0xff]  }
 0x10b   : > { %v3264_v46 = vpop.f32.mrf.mxu1 }
 0x10c   : > { %v2891_v48 = vpack.c.bf16 %v1126_v43, %v1126_v43  ;;  %v1077_v49 = vadd.f32 %v4014_v35, %v893_v44  ;;  %v586_v50 = vpop.f32.mrf.mxu0  ;;  %3378 = vmatmul.mubr.bf16.gmra.mxu0 %v1611_v33 }
 0x10d   : > { %v897_v51 = vpop.f32.mrf.mxu1  ;;  %3494 = vmatmul.mubr.bf16.gmra.mxu1 %v4026_v47  ;;  %3381 = vmatprep.mubr.msk.bf16.mxu0 %vm3674_vm0, %v3673_v1  ;;  %v1613_v47 = vsel %vm395_vm1, %v1610_v31, %v1612_v52 }
 0x10e   : > { %1377 = vst.msk [vmem:[%s4031_s4 + $0x18] sm:$0xf] %vm1370_vm2, %v2891_v48  ;;  %v1127_v53 = vmax.f32 %v1077_v49, 0.0  ;;  %v898_v54 = vadd.f32 %v897_v51, %v586_v50  ;;  %v3151_v55 = vpop.f32.mrf.mxu0  ;;  %3497 = vmatprep.mubr.msk.bf16.mxu1 %vm3674_vm0, %v3673_v1  ;;  %v1618_v48 = vrot.slane %v4123_v38, 2 }
 0x10f   : > { %v3267_v56 = vpop.f32.mrf.mxu1 }
 0x110   : > { %v2892_v57 = vpack.c.bf16 %v1127_v53, %v1127_v53  ;;  %v1078_v58 = vadd.f32 %v4014_v35, %v898_v54  ;;  %v589_v59 = vpop.f32.mrf.mxu0 }
 0x111   : > { %v900_v60 = vpop.f32.mrf.mxu1 }
 0x112   : > { %1378 = vst.msk [vmem:[%s4031_s4 + $0x1c] sm:$0xf] %vm1370_vm2, %v2892_v57  ;;  %v1128_v62 = vmax.f32 %v1078_v58, 0.0  ;;  %v901_v63 = vadd.f32 %v900_v60, %v589_v59  ;;  %v3152_v0 = vpop.f32.mrf.mxu0  ;;  %v4139_v57 = vld [vmem:[%s3780_s11 + $0x124] sm:$0xff]  }
 0x113   : > { %v3268_v2 = vpop.f32.mrf.mxu1 }
 0x114   : > { %v2893_v4 = vpack.c.bf16 %v1128_v62, %v1128_v62  ;;  %v1079_v5 = vadd.f32 %v4014_v35, %v901_v63  ;;  %v594_v6 = vpop.f32.mrf.mxu0  ;;  %3382 = vmatmul.mubr.bf16.gmra.mxu0 %v1613_v47 }
 0x115   : > { %v905_v7 = vpop.f32.mrf.mxu1  ;;  %3498 = vmatmul.mubr.bf16.gmra.mxu1 %v4044_v3  ;;  %3385 = vmatprep.mubr.msk.bf16.mxu0 %vm3674_vm0, %v3673_v1  ;;  %v1615_v3 = vsel %vm395_vm1, %v1612_v52, %v1614_v8 }
 0x116   : > { %1379 = vst.msk [vmem:[%s4031_s4 + $0x20] sm:$0xf] %vm1370_vm2, %v2893_v4  ;;  %v1129_v9 = vmax.f32 %v1079_v5, 0.0  ;;  %v906_v10 = vadd.f32 %v905_v7, %v594_v6  ;;  %v3155_v11 = vpop.f32.mrf.mxu0  ;;  %3501 = vmatprep.mubr.msk.bf16.mxu1 %vm3674_vm0, %v3673_v1  ;;  %v1620_v4 = vrot.slane %v4139_v57, 2 }
 0x117   : > { %v3271_v12 = vpop.f32.mrf.mxu1 }
 0x118   : > { %v2894_v13 = vpack.c.bf16 %v1129_v9, %v1129_v9  ;;  %v1080_v14 = vadd.f32 %v4014_v35, %v906_v10  ;;  %v597_v15 = vpop.f32.mrf.mxu0 }
 0x119   : > { %v908_v16 = vpop.f32.mrf.mxu1 }
 0x11a   : > { %1380 = vst.msk [vmem:[%s4031_s4 + $0x24] sm:$0xf] %vm1370_vm2, %v2894_v13  ;;  %v1130_v18 = vmax.f32 %v1080_v14, 0.0  ;;  %v909_v19 = vadd.f32 %v908_v16, %v597_v15  ;;  %v3156_v20 = vpop.f32.mrf.mxu0  ;;  %v4155_v13 = vld [vmem:[%s3780_s11 + $0x12c] sm:$0xff]  }
 0x11b   : > { %v3272_v21 = vpop.f32.mrf.mxu1 }
 0x11c   : > { %v2895_v23 = vpack.c.bf16 %v1130_v18, %v1130_v18  ;;  %v1081_v24 = vadd.f32 %v4014_v35, %v909_v19  ;;  %v602_v25 = vpop.f32.mrf.mxu0  ;;  %3386 = vmatmul.mubr.bf16.gmra.mxu0 %v1615_v3 }
 0x11d   : > { %v913_v26 = vpop.f32.mrf.mxu1  ;;  %3502 = vmatmul.mubr.bf16.gmra.mxu1 %v4059_v22  ;;  %3389 = vmatprep.mubr.msk.bf16.mxu0 %vm3674_vm0, %v3673_v1  ;;  %v1617_v22 = vsel %vm395_vm1, %v1614_v8, %v1616_v27 }
 0x11e   : > { %1381 = vst.msk [vmem:[%s4031_s4 + $0x28] sm:$0xf] %vm1370_vm2, %v2895_v23  ;;  %v1131_v28 = vmax.f32 %v1081_v24, 0.0  ;;  %v914_v29 = vadd.f32 %v913_v26, %v602_v25  ;;  %v3159_v30 = vpop.f32.mrf.mxu0  ;;  %3505 = vmatprep.mubr.msk.bf16.mxu1 %vm3674_vm0, %v3673_v1  ;;  %v1622_v23 = vrot.slane %v4155_v13, 2 }
 0x11f   : > { %v3275_v31 = vpop.f32.mrf.mxu1 }
 0x120   : > { %v2896_v32 = vpack.c.bf16 %v1131_v28, %v1131_v28  ;;  %v1082_v34 = vadd.f32 %v4014_v35, %v914_v29  ;;  %v605_v36 = vpop.f32.mrf.mxu0 }
 0x121   : > { %v916_v37 = vpop.f32.mrf.mxu1 }
 0x122   : > { %1382 = vst.msk [vmem:[%s4031_s4 + $0x2c] sm:$0xf] %vm1370_vm2, %v2896_v32  ;;  %v1132_v39 = vmax.f32 %v1082_v34, 0.0  ;;  %v917_v40 = vadd.f32 %v916_v37, %v605_v36  ;;  %v3160_v41 = vpop.f32.mrf.mxu0  ;;  %v4171_v32 = vld [vmem:[%s3780_s11 + $0x134] sm:$0xff]  }
 0x123   : > { %v3276_v33 = vpop.f32.mrf.mxu1 }
 0x124   : > { %v2897_v43 = vpack.c.bf16 %v1132_v39, %v1132_v39  ;;  %v1083_v44 = vadd.f32 %v4014_v35, %v917_v40  ;;  %v610_v45 = vpop.f32.mrf.mxu0  ;;  %3390 = vmatmul.mubr.bf16.gmra.mxu0 %v1617_v22 }
 0x125   : > { %v921_v46 = vpop.f32.mrf.mxu1  ;;  %3506 = vmatmul.mubr.bf16.gmra.mxu1 %v4075_v42  ;;  %3393 = vmatprep.mubr.msk.bf16.mxu0 %vm3674_vm0, %v3673_v1  ;;  %v1619_v42 = vsel %vm395_vm1, %v1616_v27, %v1618_v48 }
 0x126   : > { %1383 = vst.msk [vmem:[%s4031_s4 + $0x30] sm:$0xf] %vm1370_vm2, %v2897_v43  ;;  %v1133_v49 = vmax.f32 %v1083_v44, 0.0  ;;  %v922_v50 = vadd.f32 %v921_v46, %v610_v45  ;;  %v3163_v51 = vpop.f32.mrf.mxu0  ;;  %3509 = vmatprep.mubr.msk.bf16.mxu1 %vm3674_vm0, %v3673_v1  ;;  %v1624_v43 = vrot.slane %v4171_v32, 2 }
 0x127   : > { %v3279_v52 = vpop.f32.mrf.mxu1 }
 0x128   : > { %v2898_v53 = vpack.c.bf16 %v1133_v49, %v1133_v49  ;;  %v1084_v54 = vadd.f32 %v4014_v35, %v922_v50  ;;  %v613_v55 = vpop.f32.mrf.mxu0 }
 0x129   : > { %v924_v56 = vpop.f32.mrf.mxu1 }
 0x12a   : > { %1384 = vst.msk [vmem:[%s4031_s4 + $0x34] sm:$0xf] %vm1370_vm2, %v2898_v53  ;;  %v1134_v58 = vmax.f32 %v1084_v54, 0.0  ;;  %v925_v59 = vadd.f32 %v924_v56, %v613_v55  ;;  %v3164_v60 = vpop.f32.mrf.mxu0  ;;  %v4187_v53 = vld [vmem:[%s3780_s11 + $0x13c] sm:$0xff]  }
 0x12b   : > { %v3280_v47 = vpop.f32.mrf.mxu1 }
 0x12c   : > { %v2899_v62 = vpack.c.bf16 %v1134_v58, %v1134_v58  ;;  %v1085_v63 = vadd.f32 %v4014_v35, %v925_v59  ;;  %v618_v0 = vpop.f32.mrf.mxu0  ;;  %3394 = vmatmul.mubr.bf16.gmra.mxu0 %v1619_v42 }
 0x12d   : > { %v929_v2 = vpop.f32.mrf.mxu1  ;;  %3510 = vmatmul.mubr.bf16.gmra.mxu1 %v4091_v61  ;;  %3397 = vmatprep.mubr.msk.bf16.mxu0 %vm3674_vm0, %v3673_v1  ;;  %v1621_v61 = vsel %vm395_vm1, %v1618_v48, %v1620_v4 }
 0x12e   : > { %1385 = vst.msk [vmem:[%s4031_s4 + $0x38] sm:$0xf] %vm1370_vm2, %v2899_v62  ;;  %v1135_v5 = vmax.f32 %v1085_v63, 0.0  ;;  %v930_v6 = vadd.f32 %v929_v2, %v618_v0  ;;  %v3167_v7 = vpop.f32.mrf.mxu0  ;;  %3513 = vmatprep.mubr.msk.bf16.mxu1 %vm3674_vm0, %v3673_v1  ;;  %v1626_v62 = vrot.slane %v4187_v53, 2 }
 0x12f   : > { %v3283_v8 = vpop.f32.mrf.mxu1 }
 0x130   : > { %v2900_v9 = vpack.c.bf16 %v1135_v5, %v1135_v5  ;;  %v1086_v10 = vadd.f32 %v4014_v35, %v930_v6  ;;  %v621_v11 = vpop.f32.mrf.mxu0 }
 0x131   : > { %v932_v12 = vpop.f32.mrf.mxu1 }
 0x132   : > { %1386 = vst.msk [vmem:[%s4031_s4 + $0x3c] sm:$0xf] %vm1370_vm2, %v2900_v9  ;;  %v1136_v14 = vmax.f32 %v1086_v10, 0.0  ;;  %v933_v15 = vadd.f32 %v932_v12, %v621_v11  ;;  %v3168_v16 = vpop.f32.mrf.mxu0  ;;  %v4203_v9 = vld [vmem:[%s3780_s11 + $0x144] sm:$0xff]  }
 0x133   : > { %v3284_v3 = vpop.f32.mrf.mxu1 }
 0x134   : > { %v2901_v18 = vpack.c.bf16 %v1136_v14, %v1136_v14  ;;  %v1087_v19 = vadd.f32 %v4014_v35, %v933_v15  ;;  %v626_v20 = vpop.f32.mrf.mxu0  ;;  %3398 = vmatmul.mubr.bf16.gmra.mxu0 %v1621_v61 }
 0x135   : > { %v937_v21 = vpop.f32.mrf.mxu1  ;;  %3514 = vmatmul.mubr.bf16.gmra.mxu1 %v4107_v17  ;;  %3401 = vmatprep.mubr.msk.bf16.mxu0 %vm3674_vm0, %v3673_v1  ;;  %v1623_v17 = vsel %vm395_vm1, %v1620_v4, %v1622_v23 }
 0x136   : > { %1387 = vst.msk [vmem:[%s4031_s4 + $0x40] sm:$0xf] %vm1370_vm2, %v2901_v18  ;;  %v1137_v24 = vmax.f32 %v1087_v19, 0.0  ;;  %v938_v25 = vadd.f32 %v937_v21, %v626_v20  ;;  %v3171_v26 = vpop.f32.mrf.mxu0  ;;  %3517 = vmatprep.mubr.msk.bf16.mxu1 %vm3674_vm0, %v3673_v1  ;;  %v1628_v18 = vrot.slane %v4203_v9, 2 }
 0x137   : > { %v3287_v27 = vpop.f32.mrf.mxu1 }
 0x138   : > { %v2902_v28 = vpack.c.bf16 %v1137_v24, %v1137_v24  ;;  %v1088_v29 = vadd.f32 %v4014_v35, %v938_v25  ;;  %v629_v30 = vpop.f32.mrf.mxu0 }
 0x139   : > { %v940_v31 = vpop.f32.mrf.mxu1 }
 0x13a   : > { %1388 = vst.msk [vmem:[%s4031_s4 + $0x44] sm:$0xf] %vm1370_vm2, %v2902_v28  ;;  %v1138_v34 = vmax.f32 %v1088_v29, 0.0  ;;  %v941_v36 = vadd.f32 %v940_v31, %v629_v30  ;;  %v3172_v37 = vpop.f32.mrf.mxu0  ;;  %v4219_v28 = vld [vmem:[%s3780_s11 + $0x14c] sm:$0xff]  }
 0x13b   : > { %v3288_v22 = vpop.f32.mrf.mxu1 }
 0x13c   : > { %v2903_v39 = vpack.c.bf16 %v1138_v34, %v1138_v34  ;;  %v1089_v40 = vadd.f32 %v4014_v35, %v941_v36  ;;  %v634_v41 = vpop.f32.mrf.mxu0  ;;  %3402 = vmatmul.mubr.bf16.gmra.mxu0 %v1623_v17 }
 0x13d   : > { %v945_v33 = vpop.f32.mrf.mxu1  ;;  %3518 = vmatmul.mubr.bf16.gmra.mxu1 %v4123_v38  ;;  %3405 = vmatprep.mubr.msk.bf16.mxu0 %vm3674_vm0, %v3673_v1  ;;  %v1625_v38 = vsel %vm395_vm1, %v1622_v23, %v1624_v43 }
 0x13e   : > { %1389 = vst.msk [vmem:[%s4031_s4 + $0x48] sm:$0xf] %vm1370_vm2, %v2903_v39  ;;  %v1139_v44 = vmax.f32 %v1089_v40, 0.0  ;;  %v946_v45 = vadd.f32 %v945_v33, %v634_v41  ;;  %v3175_v46 = vpop.f32.mrf.mxu0  ;;  %3521 = vmatprep.mubr.msk.bf16.mxu1 %vm3674_vm0, %v3673_v1  ;;  %v1630_v39 = vrot.slane %v4219_v28, 2 }
 0x13f   : > { %v3291_v48 = vpop.f32.mrf.mxu1 }
 0x140   : > { %v2904_v49 = vpack.c.bf16 %v1139_v44, %v1139_v44  ;;  %v1090_v50 = vadd.f32 %v4014_v35, %v946_v45  ;;  %v637_v51 = vpop.f32.mrf.mxu0 }
 0x141   : > { %v948_v52 = vpop.f32.mrf.mxu1 }
 0x142   : > { %1390 = vst.msk [vmem:[%s4031_s4 + $0x4c] sm:$0xf] %vm1370_vm2, %v2904_v49  ;;  %v1140_v54 = vmax.f32 %v1090_v50, 0.0  ;;  %v949_v55 = vadd.f32 %v948_v52, %v637_v51  ;;  %v3176_v56 = vpop.f32.mrf.mxu0  ;;  %v4235_v49 = vld [vmem:[%s3780_s11 + $0x154] sm:$0xff]  }
 0x143   : > { %v3292_v42 = vpop.f32.mrf.mxu1 }
 0x144   : > { %v2905_v58 = vpack.c.bf16 %v1140_v54, %v1140_v54  ;;  %v1091_v59 = vadd.f32 %v4014_v35, %v949_v55  ;;  %v642_v60 = vpop.f32.mrf.mxu0  ;;  %3406 = vmatmul.mubr.bf16.gmra.mxu0 %v1625_v38 }
 0x145   : > { %v953_v47 = vpop.f32.mrf.mxu1  ;;  %3522 = vmatmul.mubr.bf16.gmra.mxu1 %v4139_v57  ;;  %3409 = vmatprep.mubr.msk.bf16.mxu0 %vm3674_vm0, %v3673_v1  ;;  %v1627_v57 = vsel %vm395_vm1, %v1624_v43, %v1626_v62 }
 0x146   : > { %1391 = vst.msk [vmem:[%s4031_s4 + $0x50] sm:$0xf] %vm1370_vm2, %v2905_v58  ;;  %v1141_v63 = vmax.f32 %v1091_v59, 0.0  ;;  %v954_v0 = vadd.f32 %v953_v47, %v642_v60  ;;  %v3179_v2 = vpop.f32.mrf.mxu0  ;;  %3525 = vmatprep.mubr.msk.bf16.mxu1 %vm3674_vm0, %v3673_v1  ;;  %v1632_v58 = vrot.slane %v4235_v49, 2 }
 0x147   : > { %v3295_v4 = vpop.f32.mrf.mxu1 }
 0x148   : > { %v2906_v5 = vpack.c.bf16 %v1141_v63, %v1141_v63  ;;  %v1092_v6 = vadd.f32 %v4014_v35, %v954_v0  ;;  %v645_v7 = vpop.f32.mrf.mxu0 }
 0x149   : > { %v956_v8 = vpop.f32.mrf.mxu1 }
 0x14a   : > { %1392 = vst.msk [vmem:[%s4031_s4 + $0x54] sm:$0xf] %vm1370_vm2, %v2906_v5  ;;  %v1142_v10 = vmax.f32 %v1092_v6, 0.0  ;;  %v957_v11 = vadd.f32 %v956_v8, %v645_v7  ;;  %v3180_v12 = vpop.f32.mrf.mxu0  ;;  %v4251_v5 = vld [vmem:[%s3780_s11 + $0x15c] sm:$0xff]  }
 0x14b   : > { %v3296_v61 = vpop.f32.mrf.mxu1 }
 0x14c   : > { %v2907_v14 = vpack.c.bf16 %v1142_v10, %v1142_v10  ;;  %v1093_v15 = vadd.f32 %v4014_v35, %v957_v11  ;;  %v650_v16 = vpop.f32.mrf.mxu0  ;;  %3410 = vmatmul.mubr.bf16.gmra.mxu0 %v1627_v57 }
 0x14d   : > { %v961_v3 = vpop.f32.mrf.mxu1  ;;  %3526 = vmatmul.mubr.bf16.gmra.mxu1 %v4155_v13  ;;  %3413 = vmatprep.mubr.msk.bf16.mxu0 %vm3674_vm0, %v3673_v1  ;;  %v1629_v13 = vsel %vm395_vm1, %v1626_v62, %v1628_v18 }
 0x14e   : > { %1393 = vst.msk [vmem:[%s4031_s4 + $0x58] sm:$0xf] %vm1370_vm2, %v2907_v14  ;;  %v1143_v19 = vmax.f32 %v1093_v15, 0.0  ;;  %v962_v20 = vadd.f32 %v961_v3, %v650_v16  ;;  %v3183_v21 = vpop.f32.mrf.mxu0  ;;  %3529 = vmatprep.mubr.msk.bf16.mxu1 %vm3674_vm0, %v3673_v1  ;;  %v1634_v14 = vrot.slane %v4251_v5, 2 }
 0x14f   : > { %v3299_v23 = vpop.f32.mrf.mxu1 }
 0x150   : > { %v2908_v24 = vpack.c.bf16 %v1143_v19, %v1143_v19  ;;  %v1094_v25 = vadd.f32 %v4014_v35, %v962_v20  ;;  %v653_v26 = vpop.f32.mrf.mxu0 }
 0x151   : > { %v964_v27 = vpop.f32.mrf.mxu1 }
 0x152   : > { %1394 = vst.msk [vmem:[%s4031_s4 + $0x5c] sm:$0xf] %vm1370_vm2, %v2908_v24  ;;  %v1144_v29 = vmax.f32 %v1094_v25, 0.0  ;;  %v965_v30 = vadd.f32 %v964_v27, %v653_v26  ;;  %v3184_v31 = vpop.f32.mrf.mxu0  ;;  %v4267_v24 = vld [vmem:[%s3780_s11 + $0x164] sm:$0xff]  }
 0x153   : > { %v3300_v17 = vpop.f32.mrf.mxu1 }
 0x154   : > { %v2909_v34 = vpack.c.bf16 %v1144_v29, %v1144_v29  ;;  %v1095_v36 = vadd.f32 %v4014_v35, %v965_v30  ;;  %v658_v37 = vpop.f32.mrf.mxu0  ;;  %3414 = vmatmul.mubr.bf16.gmra.mxu0 %v1629_v13 }
 0x155   : > { %v969_v22 = vpop.f32.mrf.mxu1  ;;  %3530 = vmatmul.mubr.bf16.gmra.mxu1 %v4171_v32  ;;  %3417 = vmatprep.mubr.msk.bf16.mxu0 %vm3674_vm0, %v3673_v1  ;;  %v1631_v32 = vsel %vm395_vm1, %v1628_v18, %v1630_v39 }
 0x156   : > { %1395 = vst.msk [vmem:[%s4031_s4 + $0x60] sm:$0xf] %vm1370_vm2, %v2909_v34  ;;  %v1145_v40 = vmax.f32 %v1095_v36, 0.0  ;;  %v970_v41 = vadd.f32 %v969_v22, %v658_v37  ;;  %v3187_v33 = vpop.f32.mrf.mxu0  ;;  %3533 = vmatprep.mubr.msk.bf16.mxu1 %vm3674_vm0, %v3673_v1  ;;  %v1636_v34 = vrot.slane %v4267_v24, 2 }
 0x157   : > { %v3303_v43 = vpop.f32.mrf.mxu1 }
 0x158   : > { %v2910_v44 = vpack.c.bf16 %v1145_v40, %v1145_v40  ;;  %v1096_v45 = vadd.f32 %v4014_v35, %v970_v41  ;;  %v661_v46 = vpop.f32.mrf.mxu0 }
 0x159   : > { %v972_v48 = vpop.f32.mrf.mxu1 }
 0x15a   : > { %1396 = vst.msk [vmem:[%s4031_s4 + $0x64] sm:$0xf] %vm1370_vm2, %v2910_v44  ;;  %v1146_v50 = vmax.f32 %v1096_v45, 0.0  ;;  %v973_v51 = vadd.f32 %v972_v48, %v661_v46  ;;  %v3188_v52 = vpop.f32.mrf.mxu0  ;;  %v4283_v44 = vld [vmem:[%s3780_s11 + $0x16c] sm:$0xff]  }
 0x15b   : > { %v3304_v38 = vpop.f32.mrf.mxu1 }
 0x15c   : > { %v2911_v54 = vpack.c.bf16 %v1146_v50, %v1146_v50  ;;  %v1097_v55 = vadd.f32 %v4014_v35, %v973_v51  ;;  %v666_v56 = vpop.f32.mrf.mxu0  ;;  %3418 = vmatmul.mubr.bf16.gmra.mxu0 %v1631_v32 }
 0x15d   : > { %v977_v42 = vpop.f32.mrf.mxu1  ;;  %3534 = vmatmul.mubr.bf16.gmra.mxu1 %v4187_v53  ;;  %3421 = vmatprep.mubr.msk.bf16.mxu0 %vm3674_vm0, %v3673_v1  ;;  %v1633_v53 = vsel %vm395_vm1, %v1630_v39, %v1632_v58 }
 0x15e   : > { %1397 = vst.msk [vmem:[%s4031_s4 + $0x68] sm:$0xf] %vm1370_vm2, %v2911_v54  ;;  %v1147_v59 = vmax.f32 %v1097_v55, 0.0  ;;  %v978_v60 = vadd.f32 %v977_v42, %v666_v56  ;;  %v3191_v47 = vpop.f32.mrf.mxu0  ;;  %3537 = vmatprep.mubr.msk.bf16.mxu1 %vm3674_vm0, %v3673_v1  ;;  %v1638_v54 = vrot.slane %v4283_v44, 2 }
 0x15f   : > { %v3307_v62 = vpop.f32.mrf.mxu1 }
 0x160   : > { %v2912_v63 = vpack.c.bf16 %v1147_v59, %v1147_v59  ;;  %v1098_v0 = vadd.f32 %v4014_v35, %v978_v60  ;;  %v669_v2 = vpop.f32.mrf.mxu0 }
 0x161   : > { %v980_v4 = vpop.f32.mrf.mxu1 }
 0x162   : > { %1398 = vst.msk [vmem:[%s4031_s4 + $0x6c] sm:$0xf] %vm1370_vm2, %v2912_v63  ;;  %v1148_v6 = vmax.f32 %v1098_v0, 0.0  ;;  %v981_v7 = vadd.f32 %v980_v4, %v669_v2  ;;  %v3192_v8 = vpop.f32.mrf.mxu0  ;;  %v4299_v63 = vld [vmem:[%s3780_s11 + $0x174] sm:$0xff]  }
 0x163   : > { %v3308_v57 = vpop.f32.mrf.mxu1 }
 0x164   : > { %v2913_v10 = vpack.c.bf16 %v1148_v6, %v1148_v6  ;;  %v1099_v11 = vadd.f32 %v4014_v35, %v981_v7  ;;  %v674_v12 = vpop.f32.mrf.mxu0  ;;  %3422 = vmatmul.mubr.bf16.gmra.mxu0 %v1633_v53 }
 0x165   : > { %v985_v61 = vpop.f32.mrf.mxu1  ;;  %3538 = vmatmul.mubr.bf16.gmra.mxu1 %v4203_v9  ;;  %3425 = vmatprep.mubr.msk.bf16.mxu0 %vm3674_vm0, %v3673_v1  ;;  %v1635_v9 = vsel %vm395_vm1, %v1632_v58, %v1634_v14 }
 0x166   : > { %1399 = vst.msk [vmem:[%s4031_s4 + $0x70] sm:$0xf] %vm1370_vm2, %v2913_v10  ;;  %v1149_v15 = vmax.f32 %v1099_v11, 0.0  ;;  %v986_v16 = vadd.f32 %v985_v61, %v674_v12  ;;  %v3195_v3 = vpop.f32.mrf.mxu0  ;;  %3541 = vmatprep.mubr.msk.bf16.mxu1 %vm3674_vm0, %v3673_v1  ;;  %v1640_v10 = vrot.slane %v4299_v63, 2 }
 0x167   : > { %v3311_v18 = vpop.f32.mrf.mxu1 }
 0x168   : > { %v2914_v19 = vpack.c.bf16 %v1149_v15, %v1149_v15  ;;  %v1100_v20 = vadd.f32 %v4014_v35, %v986_v16  ;;  %v677_v21 = vpop.f32.mrf.mxu0 }
 0x169   : > { %v988_v23 = vpop.f32.mrf.mxu1 }
 0x16a   : > { %1400 = vst.msk [vmem:[%s4031_s4 + $0x74] sm:$0xf] %vm1370_vm2, %v2914_v19  ;;  %v1150_v25 = vmax.f32 %v1100_v20, 0.0  ;;  %v989_v26 = vadd.f32 %v988_v23, %v677_v21  ;;  %v3196_v27 = vpop.f32.mrf.mxu0  ;;  %v4315_v19 = vld [vmem:[%s3780_s11 + $0x17c] sm:$0xff]  }
 0x16b   : > { %v3312_v13 = vpop.f32.mrf.mxu1 }
 0x16c   : > { %v2915_v29 = vpack.c.bf16 %v1150_v25, %v1150_v25  ;;  %v1101_v30 = vadd.f32 %v4014_v35, %v989_v26  ;;  %v682_v31 = vpop.f32.mrf.mxu0  ;;  %3426 = vmatmul.mubr.bf16.gmra.mxu0 %v1635_v9 }
 0x16d   : > { %v993_v17 = vpop.f32.mrf.mxu1  ;;  %3542 = vmatmul.mubr.bf16.gmra.mxu1 %v4219_v28  ;;  %3429 = vmatprep.mubr.msk.bf16.mxu0 %vm3674_vm0, %v3673_v1  ;;  %v1637_v28 = vsel %vm395_vm1, %v1634_v14, %v1636_v34 }
 0x16e   : > { %1401 = vst.msk [vmem:[%s4031_s4 + $0x78] sm:$0xf] %vm1370_vm2, %v2915_v29  ;;  %v1151_v36 = vmax.f32 %v1101_v30, 0.0  ;;  %v994_v37 = vadd.f32 %v993_v17, %v682_v31  ;;  %v3199_v22 = vpop.f32.mrf.mxu0  ;;  %3545 = vmatprep.mubr.msk.bf16.mxu1 %vm3674_vm0, %v3673_v1  ;;  %v1642_v29 = vrot.slane %v4315_v19, 2 }
 0x16f   : > { %v3315_v39 = vpop.f32.mrf.mxu1 }
 0x170   : > { %v2916_v40 = vpack.c.bf16 %v1151_v36, %v1151_v36  ;;  %v1102_v41 = vadd.f32 %v4014_v35, %v994_v37  ;;  %v685_v33 = vpop.f32.mrf.mxu0 }
 0x171   : > { %v996_v43 = vpop.f32.mrf.mxu1 }
 0x172   : > { %1402 = vst.msk [vmem:[%s4031_s4 + $0x7c] sm:$0xf] %vm1370_vm2, %v2916_v40  ;;  %v1152_v45 = vmax.f32 %v1102_v41, 0.0  ;;  %v997_v46 = vadd.f32 %v996_v43, %v685_v33  ;;  %v3200_v48 = vpop.f32.mrf.mxu0  ;;  %v4331_v40 = vld [vmem:[%s3780_s11 + $0x184] sm:$0xff]  }
 0x173   : > { %v3316_v32 = vpop.f32.mrf.mxu1 }
 0x174   : > { %v2917_v50 = vpack.c.bf16 %v1152_v45, %v1152_v45  ;;  %v1103_v51 = vadd.f32 %v4014_v35, %v997_v46  ;;  %v690_v52 = vpop.f32.mrf.mxu0  ;;  %3430 = vmatmul.mubr.bf16.gmra.mxu0 %v1637_v28 }
 0x175   : > { %v1001_v38 = vpop.f32.mrf.mxu1  ;;  %3546 = vmatmul.mubr.bf16.gmra.mxu1 %v4235_v49  ;;  %3433 = vmatprep.mubr.msk.bf16.mxu0 %vm3674_vm0, %v3673_v1  ;;  %v1639_v49 = vsel %vm395_vm1, %v1636_v34, %v1638_v54 }
 0x176   : > { %1403 = vst.msk [vmem:[%s4031_s4 + $0x80] sm:$0xf] %vm1370_vm2, %v2917_v50  ;;  %v1153_v55 = vmax.f32 %v1103_v51, 0.0  ;;  %v1002_v56 = vadd.f32 %v1001_v38, %v690_v52  ;;  %v3203_v42 = vpop.f32.mrf.mxu0  ;;  %3549 = vmatprep.mubr.msk.bf16.mxu1 %vm3674_vm0, %v3673_v1  ;;  %v1644_v50 = vrot.slane %v4331_v40, 2 }
 0x177   : > { %v3319_v58 = vpop.f32.mrf.mxu1 }
 0x178   : > { %v2918_v59 = vpack.c.bf16 %v1153_v55, %v1153_v55  ;;  %v1104_v60 = vadd.f32 %v4014_v35, %v1002_v56  ;;  %v693_v47 = vpop.f32.mrf.mxu0  ;;  %v1645_v58 = vsel %vm395_vm1, %v1642_v29, %v1644_v50 }
 0x179   : > { %v1004_v62 = vpop.f32.mrf.mxu1 }
 0x17a   : > { %1404 = vst.msk [vmem:[%s4031_s4 + $0x84] sm:$0xf] %vm1370_vm2, %v2918_v59  ;;  %v1154_v0 = vmax.f32 %v1104_v60, 0.0  ;;  %v1005_v2 = vadd.f32 %v1004_v62, %v693_v47  ;;  %v3204_v4 = vpop.f32.mrf.mxu0  ;;  %v4352_v59 = vld [vmem:[%s3780_s11 + $0x18c] sm:$0xff]  }
 0x17b   : > { %v3320_v53 = vpop.f32.mrf.mxu1 }
 0x17c   : > { %v2919_v6 = vpack.c.bf16 %v1154_v0, %v1154_v0  ;;  %v1105_v7 = vadd.f32 %v4014_v35, %v1005_v2  ;;  %v698_v8 = vpop.f32.mrf.mxu0  ;;  %3434 = vmatmul.mubr.bf16.gmra.mxu0 %v1639_v49 }
 0x17d   : > { %v1009_v57 = vpop.f32.mrf.mxu1  ;;  %3550 = vmatmul.mubr.bf16.gmra.mxu1 %v4251_v5  ;;  %3437 = vmatprep.mubr.msk.bf16.mxu0 %vm3674_vm0, %v3673_v1  ;;  %v1641_v5 = vsel %vm395_vm1, %v1638_v54, %v1640_v10 }
 0x17e   : > { %1405 = vst.msk [vmem:[%s4031_s4 + $0x88] sm:$0xf] %vm1370_vm2, %v2919_v6  ;;  %v1155_v11 = vmax.f32 %v1105_v7, 0.0  ;;  %v1010_v12 = vadd.f32 %v1009_v57, %v698_v8  ;;  %v3207_v61 = vpop.f32.mrf.mxu0  ;;  %3553 = vmatprep.mubr.msk.bf16.mxu1 %vm3674_vm0, %v3673_v1  ;;  %v1646_v6 = vrot.slane %v4352_v59, 2 }
 0x17f   : > { %v3323_v14 = vpop.f32.mrf.mxu1 }
 0x180   : > { %v2920_v15 = vpack.c.bf16 %v1155_v11, %v1155_v11  ;;  %v1106_v16 = vadd.f32 %v4014_v35, %v1010_v12  ;;  %v701_v3 = vpop.f32.mrf.mxu0 }
 0x181   : > { %v1012_v18 = vpop.f32.mrf.mxu1 }
 0x182   : > { %1406 = vst.msk [vmem:[%s4031_s4 + $0x8c] sm:$0xf] %vm1370_vm2, %v2920_v15  ;;  %v1156_v20 = vmax.f32 %v1106_v16, 0.0  ;;  %v1013_v21 = vadd.f32 %v1012_v18, %v701_v3  ;;  %v3208_v23 = vpop.f32.mrf.mxu0  ;;  %v4368_v15 = vld [vmem:[%s3780_s11 + $0x194] sm:$0xff]  }
 0x183   : > { %v3324_v9 = vpop.f32.mrf.mxu1 }
 0x184   : > { %v2921_v25 = vpack.c.bf16 %v1156_v20, %v1156_v20  ;;  %v1107_v26 = vadd.f32 %v4014_v35, %v1013_v21  ;;  %v706_v27 = vpop.f32.mrf.mxu0  ;;  %3438 = vmatmul.mubr.bf16.gmra.mxu0 %v1641_v5 }
 0x185   : > { %v1017_v13 = vpop.f32.mrf.mxu1  ;;  %3554 = vmatmul.mubr.bf16.gmra.mxu1 %v4267_v24  ;;  %3441 = vmatprep.mubr.msk.bf16.mxu0 %vm3674_vm0, %v3673_v1  ;;  %v1643_v24 = vsel %vm395_vm1, %v1640_v10, %v1642_v29 }
 0x186   : > { %1407 = vst.msk [vmem:[%s4031_s4 + $0x90] sm:$0xf] %vm1370_vm2, %v2921_v25  ;;  %v1157_v30 = vmax.f32 %v1107_v26, 0.0  ;;  %v1018_v31 = vadd.f32 %v1017_v13, %v706_v27  ;;  %v3211_v17 = vpop.f32.mrf.mxu0  ;;  %3557 = vmatprep.mubr.msk.bf16.mxu1 %vm3674_vm0, %v3673_v1  ;;  %v1648_v25 = vrot.slane %v4368_v15, 2 }
 0x187   : > { %v3327_v34 = vpop.f32.mrf.mxu1 }
 0x188   : > { %v2922_v36 = vpack.c.bf16 %v1157_v30, %v1157_v30  ;;  %v1108_v37 = vadd.f32 %v4014_v35, %v1018_v31  ;;  %v709_v22 = vpop.f32.mrf.mxu0 }
 0x189   : > { %v1020_v39 = vpop.f32.mrf.mxu1 }
 0x18a   : > { %1408 = vst.msk [vmem:[%s4031_s4 + $0x94] sm:$0xf] %vm1370_vm2, %v2922_v36  ;;  %v1158_v41 = vmax.f32 %v1108_v37, 0.0  ;;  %v1021_v33 = vadd.f32 %v1020_v39, %v709_v22  ;;  %v3212_v43 = vpop.f32.mrf.mxu0  ;;  %v3661_v36 = vld [vmem:[%s3780_s11 + $0x19c] sm:$0xff]  }
 0x18b   : > { %v3328_v28 = vpop.f32.mrf.mxu1 }
 0x18c   : > { %v2923_v45 = vpack.c.bf16 %v1158_v41, %v1158_v41  ;;  %v1109_v46 = vadd.f32 %v4014_v35, %v1021_v33  ;;  %v714_v48 = vpop.f32.mrf.mxu0  ;;  %3442 = vmatmul.mubr.bf16.gmra.mxu0 %v1643_v24 }
 0x18d   : > { %v1025_v32 = vpop.f32.mrf.mxu1  ;;  %3558 = vmatmul.mubr.bf16.gmra.mxu1 %v4283_v44  ;;  %3445 = vmatprep.mubr.msk.bf16.mxu0 %vm3674_vm0, %v3673_v1  ;;  %v4347_v44 = vld [vmem:[%s4569_s2] ss:$0 sm:$0xff] }
 0x18e   : > { %1409 = vst.msk [vmem:[%s4031_s4 + $0x98] sm:$0xf] %vm1370_vm2, %v2923_v45  ;;  %v1159_v51 = vmax.f32 %v1109_v46, 0.0  ;;  %v1026_v52 = vadd.f32 %v1025_v32, %v714_v48  ;;  %v3215_v38 = vpop.f32.mrf.mxu0  ;;  %3561 = vmatprep.mubr.msk.bf16.mxu1 %vm3674_vm0, %v3673_v1  ;;  %v1650_v45 = vrot.slane %v3661_v36, 2 }
 0x18f   : > { %v3331_v35 = vpop.f32.mrf.mxu1 }
 0x190   : > { %v2924_v54 = vpack.c.bf16 %v1159_v51, %v1159_v51  ;;  %v1110_v55 = vadd.f32 %v4347_v44, %v1026_v52  ;;  %v717_v56 = vpop.f32.mrf.mxu0 }
 0x191   : > { %v1028_v42 = vpop.f32.mrf.mxu1 }
 0x192   : > { %1410 = vst.msk [vmem:[%s4031_s4 + $0x9c] sm:$0xf] %vm1370_vm2, %v2924_v54  ;;  %v1160_v60 = vmax.f32 %v1110_v55, 0.0  ;;  %v1029_v47 = vadd.f32 %v1028_v42, %v717_v56  ;;  %v3216_v62 = vpop.f32.mrf.mxu0  ;;  %v3662_v54 = vld [vmem:[%s3780_s11 + $0x1a4] ss:$0 sps:$4 sm:$0x33]  }
 0x193   : > { %v3332_v49 = vpop.f32.mrf.mxu1 }
 0x194   : > { %v2925_v0 = vpack.c.bf16 %v1160_v60, %v1160_v60  ;;  %v1111_v2 = vadd.f32 %v4347_v44, %v1029_v47  ;;  %v722_v4 = vpop.f32.mrf.mxu0  ;;  %3446 = vmatmul.mubr.bf16.gmra.mxu0 %v1645_v58 }
 0x195   : > { %v1033_v53 = vpop.f32.mrf.mxu1  ;;  %3562 = vmatmul.mubr.bf16.gmra.mxu1 %v4299_v63  ;;  %3449 = vmatprep.mubr.msk.bf16.mxu0 %vm3674_vm0, %v3673_v1  ;;  %v1647_v63 = vsel %vm395_vm1, %v1644_v50, %v1646_v6 }
 0x196   : > { %1411 = vst.msk [vmem:[%s4031_s4 + $0xa0] sm:$0xf] %vm1370_vm2, %v2925_v0  ;;  %v1161_v7 = vmax.f32 %v1111_v2, 0.0  ;;  %v1034_v8 = vadd.f32 %v1033_v53, %v722_v4  ;;  %v3219_v57 = vpop.f32.mrf.mxu0  ;;  %3565 = vmatprep.mubr.msk.bf16.mxu1 %vm3674_vm0, %v3673_v1  ;;  %v1652_v0 = vrot.slane %v3662_v54, 2 }
 0x197   : > { %v3335_v10 = vpop.f32.mrf.mxu1 }
 0x198   : > { %v2926_v11 = vpack.c.bf16 %v1161_v7, %v1161_v7  ;;  %v1112_v12 = vadd.f32 %v4347_v44, %v1034_v8  ;;  %v725_v61 = vpop.f32.mrf.mxu0 }
 0x199   : > { %v1036_v14 = vpop.f32.mrf.mxu1 }
 0x19a   : > { %1412 = vst.msk [vmem:[%s4031_s4 + $0xa4] sm:$0xf] %vm1370_vm2, %v2926_v11  ;;  %v1162_v16 = vmax.f32 %v1112_v12, 0.0  ;;  %v1037_v3 = vadd.f32 %v1036_v14, %v725_v61  ;;  %v3220_v18 = vpop.f32.mrf.mxu0 }
 0x19b   : > { %v3336_v5 = vpop.f32.mrf.mxu1 }
 0x19c   : > { %v2927_v20 = vpack.c.bf16 %v1162_v16, %v1162_v16  ;;  %v1113_v21 = vadd.f32 %v4347_v44, %v1037_v3  ;;  %v730_v23 = vpop.f32.mrf.mxu0  ;;  %3450 = vmatmul.mubr.bf16.gmra.mxu0 %v1647_v63 }
 0x19d   : > { %v1041_v9 = vpop.f32.mrf.mxu1  ;;  %3566 = vmatmul.mubr.bf16.gmra.mxu1 %v4315_v19  ;;  %3453 = vmatprep.mubr.msk.bf16.mxu0 %vm3674_vm0, %v3673_v1  ;;  %v1649_v19 = vsel %vm395_vm1, %v1646_v6, %v1648_v25 }
 0x19e   : > { %1413 = vst.msk [vmem:[%s4031_s4 + $0xa8] sm:$0xf] %vm1370_vm2, %v2927_v20  ;;  %v1163_v26 = vmax.f32 %v1113_v21, 0.0  ;;  %v1042_v27 = vadd.f32 %v1041_v9, %v730_v23  ;;  %v3223_v13 = vpop.f32.mrf.mxu0  ;;  %3569 = vmatprep.mubr.msk.bf16.mxu1 %vm3674_vm0, %v3673_v1 }
 0x19f   : > { %v3339_v29 = vpop.f32.mrf.mxu1 }
 0x1a0   : > { %v2928_v30 = vpack.c.bf16 %v1163_v26, %v1163_v26  ;;  %v1114_v31 = vadd.f32 %v4347_v44, %v1042_v27  ;;  %v733_v17 = vpop.f32.mrf.mxu0 }
 0x1a1   : > { %v1044_v34 = vpop.f32.mrf.mxu1 }
 0x1a2   : > { %1414 = vst.msk [vmem:[%s4031_s4 + $0xac] sm:$0xf] %vm1370_vm2, %v2928_v30  ;;  %v1164_v37 = vmax.f32 %v1114_v31, 0.0  ;;  %v1045_v22 = vadd.f32 %v1044_v34, %v733_v17  ;;  %v3224_v39 = vpop.f32.mrf.mxu0 }
 0x1a3   : > { %v3340_v24 = vpop.f32.mrf.mxu1 }
 0x1a4   : > { %v2929_v41 = vpack.c.bf16 %v1164_v37, %v1164_v37  ;;  %v1115_v33 = vadd.f32 %v4347_v44, %v1045_v22  ;;  %v738_v43 = vpop.f32.mrf.mxu0  ;;  %3454 = vmatmul.mubr.bf16.gmra.mxu0 %v1649_v19 }
 0x1a5   : > { %v1049_v28 = vpop.f32.mrf.mxu1  ;;  %3570 = vmatmul.mubr.bf16.gmra.mxu1 %v4331_v40  ;;  %3457 = vmatprep.mubr.msk.bf16.mxu0 %vm3674_vm0, %v3673_v1  ;;  %v1651_v40 = vsel %vm395_vm1, %v1648_v25, %v1650_v45 }
 0x1a6   : > { %1415 = vst.msk [vmem:[%s4031_s4 + $0xb0] sm:$0xf] %vm1370_vm2, %v2929_v41  ;;  %v1165_v46 = vmax.f32 %v1115_v33, 0.0  ;;  %v1050_v48 = vadd.f32 %v1049_v28, %v738_v43  ;;  %v3227_v32 = vpop.f32.mrf.mxu0  ;;  %3573 = vmatprep.mubr.msk.bf16.mxu1 %vm3674_vm0, %v3673_v1 }
 0x1a7   : > { %v3343_v50 = vpop.f32.mrf.mxu1 }
 0x1a8   : > { %v2930_v51 = vpack.c.bf16 %v1165_v46, %v1165_v46  ;;  %v1116_v52 = vadd.f32 %v4347_v44, %v1050_v48  ;;  %v741_v38 = vpop.f32.mrf.mxu0 }
 0x1a9   : > { %v1052_v35 = vpop.f32.mrf.mxu1 }
 0x1aa   : > { %1416 = vst.msk [vmem:[%s4031_s4 + $0xb4] sm:$0xf] %vm1370_vm2, %v2930_v51  ;;  %v1166_v55 = vmax.f32 %v1116_v52, 0.0  ;;  %v1053_v56 = vadd.f32 %v1052_v35, %v741_v38  ;;  %v3228_v42 = vpop.f32.mrf.mxu0 }
 0x1ab   : > { %v3344_v58 = vpop.f32.mrf.mxu1 }
 0x1ac   : > { %v2931_v60 = vpack.c.bf16 %v1166_v55, %v1166_v55  ;;  %v1117_v47 = vadd.f32 %v4347_v44, %v1053_v56  ;;  %v746_v62 = vpop.f32.mrf.mxu0  ;;  %3458 = vmatmul.mubr.bf16.gmra.mxu0 %v1651_v40 }
 0x1ad   : > { %v1057_v49 = vpop.f32.mrf.mxu1  ;;  %3574 = vmatmul.mubr.bf16.gmra.mxu1 %v4352_v59  ;;  %3461 = vmatprep.mubr.msk.bf16.mxu0 %vm3674_vm0, %v3673_v1  ;;  %v1653_v59 = vsel %vm395_vm1, %v1650_v45, %v1652_v0 }
 0x1ae   : > { %1417 = vst.msk [vmem:[%s4031_s4 + $0xb8] sm:$0xf] %vm1370_vm2, %v2931_v60  ;;  %v1167_v2 = vmax.f32 %v1117_v47, 0.0  ;;  %v1058_v4 = vadd.f32 %v1057_v49, %v746_v62  ;;  %v3231_v53 = vpop.f32.mrf.mxu0  ;;  %3577 = vmatprep.mubr.msk.bf16.mxu1 %vm3674_vm0, %v3673_v1 }
 0x1af   : > { %v3347_v6 = vpop.f32.mrf.mxu1 }
 0x1b0   : > { %v2932_v7 = vpack.c.bf16 %v1167_v2, %v1167_v2  ;;  %v1118_v8 = vadd.f32 %v4347_v44, %v1058_v4  ;;  %v749_v57 = vpop.f32.mrf.mxu0 }
 0x1b1   : > { %v1060_v10 = vpop.f32.mrf.mxu1 }
 0x1b2   : > { %1418 = vst.msk [vmem:[%s4031_s4 + $0xbc] sm:$0xf] %vm1370_vm2, %v2932_v7  ;;  %v1168_v11 = vmax.f32 %v1118_v8, 0.0  ;;  %v1061_v12 = vadd.f32 %v1060_v10, %v749_v57  ;;  %v3232_v61 = vpop.f32.mrf.mxu0 }
 0x1b3   : > { %v3348_v14 = vpop.f32.mrf.mxu1 }
 0x1b4   : > { %v2933_v63 = vpack.c.bf16 %v1168_v11, %v1168_v11  ;;  %v1119_v16 = vadd.f32 %v4347_v44, %v1061_v12  ;;  %v1713_v1 = vpop.f32.mrf.mxu0  ;;  %3462 = vmatmul.mubr.bf16.gmra.mxu0 %v1653_v59 }
 0x1b5   : > { %v1976_v3 = vpop.f32.mrf.mxu1  ;;  %3578 = vmatmul.mubr.bf16.gmra.mxu1 %v4368_v15 }
 0x1b6   : > { %1419 = vst.msk [vmem:[%s4031_s4 + $0xc0] sm:$0xf] %vm1370_vm2, %v2933_v63  ;;  %v1169_v18 = vmax.f32 %v1119_v16, 0.0  ;;  %v1977_v5 = vadd.f32 %v1976_v3, %v1713_v1  ;;  %v3367_v20 = vpop.f32.mrf.mxu0 }
 0x1b7   : > { %v3483_v21 = vpop.f32.mrf.mxu1 }
 0x1b8   : > { %v2934_v23 = vpack.c.bf16 %v1169_v18, %v1169_v18  ;;  %v2175_v9 = vadd.f32 %v4347_v44, %v1977_v5  ;;  %v1716_v25 = vpop.f32.mrf.mxu0 }
 0x1b9   : > { %v1979_v26 = vpop.f32.mrf.mxu1 }
 0x1ba   : > { %1420 = vst.msk [vmem:[%s4031_s4 + $0xc4] sm:$0xf] %vm1370_vm2, %v2934_v23  ;;  %v2225_v27 = vmax.f32 %v2175_v9, 0.0  ;;  %v1980_v13 = vadd.f32 %v1979_v26, %v1716_v25  ;;  %v3368_v29 = vpop.f32.mrf.mxu0 }
 0x1bb   : > { %v3484_v30 = vpop.f32.mrf.mxu1 }
 0x1bc   : > { %v2935_v15 = vpack.c.bf16 %v2225_v27, %v2225_v27  ;;  %v2176_v31 = vadd.f32 %v4347_v44, %v1980_v13  ;;  %v1721_v17 = vpop.f32.mrf.mxu0 }
 0x1bd   : > { %v1984_v34 = vpop.f32.mrf.mxu1 }
 0x1be   : > { %2833 = vst.msk [vmem:[%s4031_s4 + $0xc8] sm:$0xf] %vm1370_vm2, %v2935_v15  ;;  %v2226_v19 = vmax.f32 %v2176_v31, 0.0  ;;  %v1985_v36 = vadd.f32 %v1984_v34, %v1721_v17  ;;  %v3371_v37 = vpop.f32.mrf.mxu0 }
 0x1bf   : > { %v3487_v22 = vpop.f32.mrf.mxu1 }
 0x1c0   : > { %v2936_v39 = vpack.c.bf16 %v2226_v19, %v2226_v19  ;;  %v2177_v24 = vadd.f32 %v4347_v44, %v1985_v36  ;;  %v1724_v41 = vpop.f32.mrf.mxu0 }
 0x1c1   : > { %v1987_v33 = vpop.f32.mrf.mxu1 }
 0x1c2   : > { %2834 = vst.msk [vmem:[%s4031_s4 + $0xcc] sm:$0xf] %vm1370_vm2, %v2936_v39  ;;  %v2227_v43 = vmax.f32 %v2177_v24, 0.0  ;;  %v1988_v28 = vadd.f32 %v1987_v33, %v1724_v41  ;;  %v3372_v45 = vpop.f32.mrf.mxu0 }
 0x1c3   : > { %v3488_v46 = vpop.f32.mrf.mxu1 }
 0x1c4   : > { %v2937_v48 = vpack.c.bf16 %v2227_v43, %v2227_v43  ;;  %v2178_v32 = vadd.f32 %v4347_v44, %v1988_v28  ;;  %v1729_v50 = vpop.f32.mrf.mxu0 }
 0x1c5   : > { %v1992_v51 = vpop.f32.mrf.mxu1 }
 0x1c6   : > { %2835 = vst.msk [vmem:[%s4031_s4 + $0xd0] sm:$0xf] %vm1370_vm2, %v2937_v48  ;;  %v2228_v52 = vmax.f32 %v2178_v32, 0.0  ;;  %v1993_v38 = vadd.f32 %v1992_v51, %v1729_v50  ;;  %v3375_v35 = vpop.f32.mrf.mxu0 }
 0x1c7   : > { %v3491_v40 = vpop.f32.mrf.mxu1 }
 0x1c8   : > { %v2938_v54 = vpack.c.bf16 %v2228_v52, %v2228_v52  ;;  %v2179_v55 = vadd.f32 %v4347_v44, %v1993_v38  ;;  %v1732_v56 = vpop.f32.mrf.mxu0 }
 0x1c9   : > { %v1995_v42 = vpop.f32.mrf.mxu1 }
 0x1ca   : > { %2836 = vst.msk [vmem:[%s4031_s4 + $0xd4] sm:$0xf] %vm1370_vm2, %v2938_v54  ;;  %v2229_v58 = vmax.f32 %v2179_v55, 0.0  ;;  %v1996_v60 = vadd.f32 %v1995_v42, %v1732_v56  ;;  %v3376_v47 = vpop.f32.mrf.mxu0 }
 0x1cb   : > { %v3492_v62 = vpop.f32.mrf.mxu1 }
 0x1cc   : > { %v2939_v49 = vpack.c.bf16 %v2229_v58, %v2229_v58  ;;  %v2180_v0 = vadd.f32 %v4347_v44, %v1996_v60  ;;  %v1737_v2 = vpop.f32.mrf.mxu0 }
 0x1cd   : > { %v2000_v4 = vpop.f32.mrf.mxu1 }
 0x1ce   : > { %2837 = vst.msk [vmem:[%s4031_s4 + $0xd8] sm:$0xf] %vm1370_vm2, %v2939_v49  ;;  %v2230_v53 = vmax.f32 %v2180_v0, 0.0  ;;  %v2001_v6 = vadd.f32 %v2000_v4, %v1737_v2  ;;  %v3379_v7 = vpop.f32.mrf.mxu0 }
 0x1cf   : > { %v3495_v8 = vpop.f32.mrf.mxu1 }
 0x1d0   : > { %v2940_v57 = vpack.c.bf16 %v2230_v53, %v2230_v53  ;;  %v2181_v10 = vadd.f32 %v4347_v44, %v2001_v6  ;;  %v1740_v59 = vpop.f32.mrf.mxu0 }
 0x1d1   : > { %v2003_v11 = vpop.f32.mrf.mxu1 }
 0x1d2   : > { %2838 = vst.msk [vmem:[%s4031_s4 + $0xdc] sm:$0xf] %vm1370_vm2, %v2940_v57  ;;  %v2231_v12 = vmax.f32 %v2181_v10, 0.0  ;;  %v2004_v61 = vadd.f32 %v2003_v11, %v1740_v59  ;;  %v3380_v14 = vpop.f32.mrf.mxu0 }
 0x1d3   : > { %v3496_v63 = vpop.f32.mrf.mxu1 }
 0x1d4   : > { %v2941_v16 = vpack.c.bf16 %v2231_v12, %v2231_v12  ;;  %v2182_v1 = vadd.f32 %v4347_v44, %v2004_v61  ;;  %v1745_v3 = vpop.f32.mrf.mxu0 }
 0x1d5   : > { %v2008_v18 = vpop.f32.mrf.mxu1 }
 0x1d6   : > { %2839 = vst.msk [vmem:[%s4031_s4 + $0xe0] sm:$0xf] %vm1370_vm2, %v2941_v16  ;;  %v2232_v5 = vmax.f32 %v2182_v1, 0.0  ;;  %v2009_v20 = vadd.f32 %v2008_v18, %v1745_v3  ;;  %v3383_v21 = vpop.f32.mrf.mxu0 }
 0x1d7   : > { %v3499_v23 = vpop.f32.mrf.mxu1 }
 0x1d8   : > { %v2942_v9 = vpack.c.bf16 %v2232_v5, %v2232_v5  ;;  %v2183_v25 = vadd.f32 %v4347_v44, %v2009_v20  ;;  %v1748_v26 = vpop.f32.mrf.mxu0 }
 0x1d9   : > { %v2011_v27 = vpop.f32.mrf.mxu1 }
 0x1da   : > { %2840 = vst.msk [vmem:[%s4031_s4 + $0xe4] sm:$0xf] %vm1370_vm2, %v2942_v9  ;;  %v2233_v13 = vmax.f32 %v2183_v25, 0.0  ;;  %v2012_v29 = vadd.f32 %v2011_v27, %v1748_v26  ;;  %v3384_v30 = vpop.f32.mrf.mxu0 }
 0x1db   : > { %v3500_v15 = vpop.f32.mrf.mxu1 }
 0x1dc   : > { %v2943_v31 = vpack.c.bf16 %v2233_v13, %v2233_v13  ;;  %v2184_v17 = vadd.f32 %v4347_v44, %v2012_v29  ;;  %v1753_v34 = vpop.f32.mrf.mxu0 }
 0x1dd   : > { %v2016_v19 = vpop.f32.mrf.mxu1 }
 0x1de   : > { %2841 = vst.msk [vmem:[%s4031_s4 + $0xe8] sm:$0xf] %vm1370_vm2, %v2943_v31  ;;  %v2234_v36 = vmax.f32 %v2184_v17, 0.0  ;;  %v2017_v37 = vadd.f32 %v2016_v19, %v1753_v34  ;;  %v3387_v22 = vpop.f32.mrf.mxu0 }
 0x1df   : > { %v3503_v39 = vpop.f32.mrf.mxu1 }
 0x1e0   : > { %v2944_v24 = vpack.c.bf16 %v2234_v36, %v2234_v36  ;;  %v2185_v41 = vadd.f32 %v4347_v44, %v2017_v37  ;;  %v1756_v33 = vpop.f32.mrf.mxu0 }
 0x1e1   : > { %v2019_v43 = vpop.f32.mrf.mxu1 }
 0x1e2   : > { %2842 = vst.msk [vmem:[%s4031_s4 + $0xec] sm:$0xf] %vm1370_vm2, %v2944_v24  ;;  %v2235_v28 = vmax.f32 %v2185_v41, 0.0  ;;  %v2020_v45 = vadd.f32 %v2019_v43, %v1756_v33  ;;  %v3388_v46 = vpop.f32.mrf.mxu0 }
 0x1e3   : > { %v3504_v48 = vpop.f32.mrf.mxu1 }
 0x1e4   : > { %v2945_v32 = vpack.c.bf16 %v2235_v28, %v2235_v28  ;;  %v2186_v50 = vadd.f32 %v4347_v44, %v2020_v45  ;;  %v1761_v51 = vpop.f32.mrf.mxu0 }
 0x1e5   : > { %v2024_v52 = vpop.f32.mrf.mxu1 }
 0x1e6   : > { %2843 = vst.msk [vmem:[%s4031_s4 + $0xf0] sm:$0xf] %vm1370_vm2, %v2945_v32  ;;  %v2236_v38 = vmax.f32 %v2186_v50, 0.0  ;;  %v2025_v35 = vadd.f32 %v2024_v52, %v1761_v51  ;;  %v3391_v40 = vpop.f32.mrf.mxu0 }
 0x1e7   : > { %v3507_v54 = vpop.f32.mrf.mxu1 }
 0x1e8   : > { %v2946_v55 = vpack.c.bf16 %v2236_v38, %v2236_v38  ;;  %v2187_v56 = vadd.f32 %v4347_v44, %v2025_v35  ;;  %v1764_v42 = vpop.f32.mrf.mxu0 }
 0x1e9   : > { %v2027_v58 = vpop.f32.mrf.mxu1 }
 0x1ea   : > { %2844 = vst.msk [vmem:[%s4031_s4 + $0xf4] sm:$0xf] %vm1370_vm2, %v2946_v55  ;;  %v2237_v60 = vmax.f32 %v2187_v56, 0.0  ;;  %v2028_v47 = vadd.f32 %v2027_v58, %v1764_v42  ;;  %v3392_v62 = vpop.f32.mrf.mxu0 }
 0x1eb   : > { %v3508_v49 = vpop.f32.mrf.mxu1 }
 0x1ec   : > { %v2947_v0 = vpack.c.bf16 %v2237_v60, %v2237_v60  ;;  %v2188_v2 = vadd.f32 %v4347_v44, %v2028_v47  ;;  %v1769_v4 = vpop.f32.mrf.mxu0 }
 0x1ed   : > { %v2032_v53 = vpop.f32.mrf.mxu1 }
 0x1ee   : > { %2845 = vst.msk [vmem:[%s4031_s4 + $0xf8] sm:$0xf] %vm1370_vm2, %v2947_v0  ;;  %v2238_v6 = vmax.f32 %v2188_v2, 0.0  ;;  %v2033_v7 = vadd.f32 %v2032_v53, %v1769_v4  ;;  %v3395_v8 = vpop.f32.mrf.mxu0 }
 0x1ef   : > { %v3511_v57 = vpop.f32.mrf.mxu1 }
 0x1f0   : > { %v2948_v10 = vpack.c.bf16 %v2238_v6, %v2238_v6  ;;  %v2189_v59 = vadd.f32 %v4347_v44, %v2033_v7  ;;  %v1772_v11 = vpop.f32.mrf.mxu0 }
 0x1f1   : > { %v2035_v12 = vpop.f32.mrf.mxu1 }
 0x1f2   : > { %2846 = vst.msk [vmem:[%s4031_s4 + $0xfc] sm:$0xf] %vm1370_vm2, %v2948_v10  ;;  %v2239_v61 = vmax.f32 %v2189_v59, 0.0  ;;  %v2036_v14 = vadd.f32 %v2035_v12, %v1772_v11  ;;  %v3396_v63 = vpop.f32.mrf.mxu0 }
 0x1f3   : > { %v3512_v16 = vpop.f32.mrf.mxu1 }
 0x1f4   : > { %v2949_v1 = vpack.c.bf16 %v2239_v61, %v2239_v61  ;;  %v2190_v3 = vadd.f32 %v4347_v44, %v2036_v14  ;;  %v1777_v18 = vpop.f32.mrf.mxu0 }
 0x1f5   : > { %v2040_v5 = vpop.f32.mrf.mxu1 }
 0x1f6   : > { %2847 = vst.msk [vmem:[%s4031_s4 + $0x100] sm:$0xf] %vm1370_vm2, %v2949_v1  ;;  %v2240_v20 = vmax.f32 %v2190_v3, 0.0  ;;  %v2041_v21 = vadd.f32 %v2040_v5, %v1777_v18  ;;  %v3399_v23 = vpop.f32.mrf.mxu0 }
 0x1f7   : > { %v3515_v9 = vpop.f32.mrf.mxu1 }
 0x1f8   : > { %v2950_v25 = vpack.c.bf16 %v2240_v20, %v2240_v20  ;;  %v2191_v26 = vadd.f32 %v4347_v44, %v2041_v21  ;;  %v1780_v27 = vpop.f32.mrf.mxu0 }
 0x1f9   : > { %v2043_v13 = vpop.f32.mrf.mxu1 }
 0x1fa   : > { %2848 = vst.msk [vmem:[%s4031_s4 + $0x104] sm:$0xf] %vm1370_vm2, %v2950_v25  ;;  %v2241_v29 = vmax.f32 %v2191_v26, 0.0  ;;  %v2044_v30 = vadd.f32 %v2043_v13, %v1780_v27  ;;  %v3400_v15 = vpop.f32.mrf.mxu0 }
 0x1fb   : > { %v3516_v31 = vpop.f32.mrf.mxu1 }
 0x1fc   : > { %v2951_v17 = vpack.c.bf16 %v2241_v29, %v2241_v29  ;;  %v2192_v34 = vadd.f32 %v4347_v44, %v2044_v30  ;;  %v1785_v19 = vpop.f32.mrf.mxu0 }
 0x1fd   : > { %v2048_v36 = vpop.f32.mrf.mxu1 }
 0x1fe   : > { %2849 = vst.msk [vmem:[%s4031_s4 + $0x108] sm:$0xf] %vm1370_vm2, %v2951_v17  ;;  %v2242_v37 = vmax.f32 %v2192_v34, 0.0  ;;  %v2049_v22 = vadd.f32 %v2048_v36, %v1785_v19  ;;  %v3403_v39 = vpop.f32.mrf.mxu0 }
 0x1ff   : > { %v3519_v24 = vpop.f32.mrf.mxu1 }
 0x200   : > { %v2952_v41 = vpack.c.bf16 %v2242_v37, %v2242_v37  ;;  %v2193_v33 = vadd.f32 %v4347_v44, %v2049_v22  ;;  %v1788_v43 = vpop.f32.mrf.mxu0 }
 0x201   : > { %v2051_v28 = vpop.f32.mrf.mxu1 }
 0x202   : > { %2850 = vst.msk [vmem:[%s4031_s4 + $0x10c] sm:$0xf] %vm1370_vm2, %v2952_v41  ;;  %v2243_v45 = vmax.f32 %v2193_v33, 0.0  ;;  %v2052_v46 = vadd.f32 %v2051_v28, %v1788_v43  ;;  %v3404_v48 = vpop.f32.mrf.mxu0 }
 0x203   : > { %v3520_v32 = vpop.f32.mrf.mxu1 }
 0x204   : > { %v2953_v50 = vpack.c.bf16 %v2243_v45, %v2243_v45  ;;  %v2194_v51 = vadd.f32 %v4347_v44, %v2052_v46  ;;  %v1793_v52 = vpop.f32.mrf.mxu0 }
 0x205   : > { %v2056_v38 = vpop.f32.mrf.mxu1 }
 0x206   : > { %2851 = vst.msk [vmem:[%s4031_s4 + $0x110] sm:$0xf] %vm1370_vm2, %v2953_v50  ;;  %v2244_v35 = vmax.f32 %v2194_v51, 0.0  ;;  %v2057_v40 = vadd.f32 %v2056_v38, %v1793_v52  ;;  %v3407_v54 = vpop.f32.mrf.mxu0 }
 0x207   : > { %v3523_v55 = vpop.f32.mrf.mxu1 }
 0x208   : > { %v2954_v56 = vpack.c.bf16 %v2244_v35, %v2244_v35  ;;  %v2195_v42 = vadd.f32 %v4347_v44, %v2057_v40  ;;  %v1796_v58 = vpop.f32.mrf.mxu0 }
 0x209   : > { %v2059_v60 = vpop.f32.mrf.mxu1 }
 0x20a   : > { %2852 = vst.msk [vmem:[%s4031_s4 + $0x114] sm:$0xf] %vm1370_vm2, %v2954_v56  ;;  %v2245_v47 = vmax.f32 %v2195_v42, 0.0  ;;  %v2060_v62 = vadd.f32 %v2059_v60, %v1796_v58  ;;  %v3408_v49 = vpop.f32.mrf.mxu0 }
 0x20b   : > { %v3524_v0 = vpop.f32.mrf.mxu1 }
 0x20c   : > { %v2955_v2 = vpack.c.bf16 %v2245_v47, %v2245_v47  ;;  %v2196_v4 = vadd.f32 %v4347_v44, %v2060_v62  ;;  %v1801_v53 = vpop.f32.mrf.mxu0 }
 0x20d   : > { %v2064_v6 = vpop.f32.mrf.mxu1 }
 0x20e   : > { %2853 = vst.msk [vmem:[%s4031_s4 + $0x118] sm:$0xf] %vm1370_vm2, %v2955_v2  ;;  %v2246_v7 = vmax.f32 %v2196_v4, 0.0  ;;  %v2065_v8 = vadd.f32 %v2064_v6, %v1801_v53  ;;  %v3411_v57 = vpop.f32.mrf.mxu0 }
 0x20f   : > { %v3527_v10 = vpop.f32.mrf.mxu1 }
 0x210   : > { %v2956_v59 = vpack.c.bf16 %v2246_v7, %v2246_v7  ;;  %v2197_v11 = vadd.f32 %v4347_v44, %v2065_v8  ;;  %v1804_v12 = vpop.f32.mrf.mxu0 }
 0x211   : > { %v2067_v61 = vpop.f32.mrf.mxu1 }
 0x212   : > { %2854 = vst.msk [vmem:[%s4031_s4 + $0x11c] sm:$0xf] %vm1370_vm2, %v2956_v59  ;;  %v2247_v14 = vmax.f32 %v2197_v11, 0.0  ;;  %v2068_v63 = vadd.f32 %v2067_v61, %v1804_v12  ;;  %v3412_v16 = vpop.f32.mrf.mxu0 }
 0x213   : > { %v3528_v1 = vpop.f32.mrf.mxu1 }
 0x214   : > { %v2957_v3 = vpack.c.bf16 %v2247_v14, %v2247_v14  ;;  %v2198_v18 = vadd.f32 %v4347_v44, %v2068_v63  ;;  %v1809_v5 = vpop.f32.mrf.mxu0 }
 0x215   : > { %v2072_v20 = vpop.f32.mrf.mxu1 }
 0x216   : > { %2855 = vst.msk [vmem:[%s4031_s4 + $0x120] sm:$0xf] %vm1370_vm2, %v2957_v3  ;;  %v2248_v21 = vmax.f32 %v2198_v18, 0.0  ;;  %v2073_v23 = vadd.f32 %v2072_v20, %v1809_v5  ;;  %v3415_v9 = vpop.f32.mrf.mxu0 }
 0x217   : > { %v3531_v25 = vpop.f32.mrf.mxu1 }
 0x218   : > { %v2958_v26 = vpack.c.bf16 %v2248_v21, %v2248_v21  ;;  %v2199_v27 = vadd.f32 %v4347_v44, %v2073_v23  ;;  %v1812_v13 = vpop.f32.mrf.mxu0 }
 0x219   : > { %v2075_v29 = vpop.f32.mrf.mxu1 }
 0x21a   : > { %2856 = vst.msk [vmem:[%s4031_s4 + $0x124] sm:$0xf] %vm1370_vm2, %v2958_v26  ;;  %v2249_v30 = vmax.f32 %v2199_v27, 0.0  ;;  %v2076_v15 = vadd.f32 %v2075_v29, %v1812_v13  ;;  %v3416_v31 = vpop.f32.mrf.mxu0 }
 0x21b   : > { %v3532_v17 = vpop.f32.mrf.mxu1 }
 0x21c   : > { %v2959_v34 = vpack.c.bf16 %v2249_v30, %v2249_v30  ;;  %v2200_v19 = vadd.f32 %v4347_v44, %v2076_v15  ;;  %v1817_v36 = vpop.f32.mrf.mxu0 }
 0x21d   : > { %v2080_v37 = vpop.f32.mrf.mxu1 }
 0x21e   : > { %2857 = vst.msk [vmem:[%s4031_s4 + $0x128] sm:$0xf] %vm1370_vm2, %v2959_v34  ;;  %v2250_v22 = vmax.f32 %v2200_v19, 0.0  ;;  %v2081_v39 = vadd.f32 %v2080_v37, %v1817_v36  ;;  %v3419_v24 = vpop.f32.mrf.mxu0 }
 0x21f   : > { %v3535_v41 = vpop.f32.mrf.mxu1 }
 0x220   : > { %v2960_v33 = vpack.c.bf16 %v2250_v22, %v2250_v22  ;;  %v2201_v43 = vadd.f32 %v4347_v44, %v2081_v39  ;;  %v1820_v28 = vpop.f32.mrf.mxu0 }
 0x221   : > { %v2083_v45 = vpop.f32.mrf.mxu1 }
 0x222   : > { %2858 = vst.msk [vmem:[%s4031_s4 + $0x12c] sm:$0xf] %vm1370_vm2, %v2960_v33  ;;  %v2251_v46 = vmax.f32 %v2201_v43, 0.0  ;;  %v2084_v48 = vadd.f32 %v2083_v45, %v1820_v28  ;;  %v3420_v32 = vpop.f32.mrf.mxu0 }
 0x223   : > { %v3536_v50 = vpop.f32.mrf.mxu1 }
 0x224   : > { %v2961_v51 = vpack.c.bf16 %v2251_v46, %v2251_v46  ;;  %v2202_v52 = vadd.f32 %v4347_v44, %v2084_v48  ;;  %v1825_v38 = vpop.f32.mrf.mxu0 }
 0x225   : > { %v2088_v35 = vpop.f32.mrf.mxu1 }
 0x226   : > { %2859 = vst.msk [vmem:[%s4031_s4 + $0x130] sm:$0xf] %vm1370_vm2, %v2961_v51  ;;  %v2252_v40 = vmax.f32 %v2202_v52, 0.0  ;;  %v2089_v54 = vadd.f32 %v2088_v35, %v1825_v38  ;;  %v3423_v55 = vpop.f32.mrf.mxu0 }
 0x227   : > { %v3539_v56 = vpop.f32.mrf.mxu1 }
 0x228   : > { %v2962_v42 = vpack.c.bf16 %v2252_v40, %v2252_v40  ;;  %v2203_v58 = vadd.f32 %v4347_v44, %v2089_v54  ;;  %v1828_v60 = vpop.f32.mrf.mxu0 }
 0x229   : > { %v2091_v47 = vpop.f32.mrf.mxu1 }
 0x22a   : > { %2860 = vst.msk [vmem:[%s4031_s4 + $0x134] sm:$0xf] %vm1370_vm2, %v2962_v42  ;;  %v2253_v62 = vmax.f32 %v2203_v58, 0.0  ;;  %v2092_v49 = vadd.f32 %v2091_v47, %v1828_v60  ;;  %v3424_v0 = vpop.f32.mrf.mxu0 }
 0x22b   : > { %v3540_v2 = vpop.f32.mrf.mxu1 }
 0x22c   : > { %v2963_v4 = vpack.c.bf16 %v2253_v62, %v2253_v62  ;;  %v2204_v53 = vadd.f32 %v4347_v44, %v2092_v49  ;;  %v1833_v6 = vpop.f32.mrf.mxu0 }
 0x22d   : > { %v2096_v7 = vpop.f32.mrf.mxu1 }
 0x22e   : > { %2861 = vst.msk [vmem:[%s4031_s4 + $0x138] sm:$0xf] %vm1370_vm2, %v2963_v4  ;;  %v2254_v8 = vmax.f32 %v2204_v53, 0.0  ;;  %v2097_v57 = vadd.f32 %v2096_v7, %v1833_v6  ;;  %v3427_v10 = vpop.f32.mrf.mxu0 }
 0x22f   : > { %v3543_v59 = vpop.f32.mrf.mxu1 }
 0x230   : > { %v2964_v11 = vpack.c.bf16 %v2254_v8, %v2254_v8  ;;  %v2205_v12 = vadd.f32 %v4347_v44, %v2097_v57  ;;  %v1836_v61 = vpop.f32.mrf.mxu0 }
 0x231   : > { %v2099_v14 = vpop.f32.mrf.mxu1 }
 0x232   : > { %2862 = vst.msk [vmem:[%s4031_s4 + $0x13c] sm:$0xf] %vm1370_vm2, %v2964_v11  ;;  %v2255_v63 = vmax.f32 %v2205_v12, 0.0  ;;  %v2100_v16 = vadd.f32 %v2099_v14, %v1836_v61  ;;  %v3428_v1 = vpop.f32.mrf.mxu0 }
 0x233   : > { %v3544_v3 = vpop.f32.mrf.mxu1 }
 0x234   : > { %v2965_v18 = vpack.c.bf16 %v2255_v63, %v2255_v63  ;;  %v2206_v5 = vadd.f32 %v4347_v44, %v2100_v16  ;;  %v1841_v20 = vpop.f32.mrf.mxu0 }
 0x235   : > { %v2104_v21 = vpop.f32.mrf.mxu1 }
 0x236   : > { %2863 = vst.msk [vmem:[%s4031_s4 + $0x140] sm:$0xf] %vm1370_vm2, %v2965_v18  ;;  %v2256_v23 = vmax.f32 %v2206_v5, 0.0  ;;  %v2105_v9 = vadd.f32 %v2104_v21, %v1841_v20  ;;  %v3431_v25 = vpop.f32.mrf.mxu0 }
 0x237   : > { %v3547_v26 = vpop.f32.mrf.mxu1 }
 0x238   : > { %v2966_v27 = vpack.c.bf16 %v2256_v23, %v2256_v23  ;;  %v2207_v13 = vadd.f32 %v4347_v44, %v2105_v9  ;;  %v1844_v29 = vpop.f32.mrf.mxu0 }
 0x239   : > { %v2107_v30 = vpop.f32.mrf.mxu1 }
 0x23a   : > { %2864 = vst.msk [vmem:[%s4031_s4 + $0x144] sm:$0xf] %vm1370_vm2, %v2966_v27  ;;  %v2257_v15 = vmax.f32 %v2207_v13, 0.0  ;;  %v2108_v31 = vadd.f32 %v2107_v30, %v1844_v29  ;;  %v3432_v17 = vpop.f32.mrf.mxu0 }
 0x23b   : > { %v3548_v34 = vpop.f32.mrf.mxu1 }
 0x23c   : > { %v2967_v19 = vpack.c.bf16 %v2257_v15, %v2257_v15  ;;  %v2208_v36 = vadd.f32 %v4347_v44, %v2108_v31  ;;  %v1849_v37 = vpop.f32.mrf.mxu0 }
 0x23d   : > { %v2112_v22 = vpop.f32.mrf.mxu1 }
 0x23e   : > { %2865 = vst.msk [vmem:[%s4031_s4 + $0x148] sm:$0xf] %vm1370_vm2, %v2967_v19  ;;  %v2258_v39 = vmax.f32 %v2208_v36, 0.0  ;;  %v2113_v24 = vadd.f32 %v2112_v22, %v1849_v37  ;;  %v3435_v41 = vpop.f32.mrf.mxu0 }
 0x23f   : > { %v3551_v33 = vpop.f32.mrf.mxu1 }
 0x240   : > { %v2968_v43 = vpack.c.bf16 %v2258_v39, %v2258_v39  ;;  %v2209_v28 = vadd.f32 %v4347_v44, %v2113_v24  ;;  %v1852_v45 = vpop.f32.mrf.mxu0 }
 0x241   : > { %v2115_v46 = vpop.f32.mrf.mxu1 }
 0x242   : > { %2866 = vst.msk [vmem:[%s4031_s4 + $0x14c] sm:$0xf] %vm1370_vm2, %v2968_v43  ;;  %v2259_v48 = vmax.f32 %v2209_v28, 0.0  ;;  %v2116_v32 = vadd.f32 %v2115_v46, %v1852_v45  ;;  %v3436_v50 = vpop.f32.mrf.mxu0 }
 0x243   : > { %v3552_v51 = vpop.f32.mrf.mxu1 }
 0x244   : > { %v2969_v52 = vpack.c.bf16 %v2259_v48, %v2259_v48  ;;  %v2210_v38 = vadd.f32 %v4347_v44, %v2116_v32  ;;  %v1857_v35 = vpop.f32.mrf.mxu0 }
 0x245   : > { %v2120_v40 = vpop.f32.mrf.mxu1 }
 0x246   : > { %2867 = vst.msk [vmem:[%s4031_s4 + $0x150] sm:$0xf] %vm1370_vm2, %v2969_v52  ;;  %v2260_v54 = vmax.f32 %v2210_v38, 0.0  ;;  %v2121_v55 = vadd.f32 %v2120_v40, %v1857_v35  ;;  %v3439_v56 = vpop.f32.mrf.mxu0 }
 0x247   : > { %v3555_v42 = vpop.f32.mrf.mxu1 }
 0x248   : > { %v2970_v58 = vpack.c.bf16 %v2260_v54, %v2260_v54  ;;  %v2211_v60 = vadd.f32 %v4347_v44, %v2121_v55  ;;  %v1860_v47 = vpop.f32.mrf.mxu0 }
 0x249   : > { %v2123_v62 = vpop.f32.mrf.mxu1 }
 0x24a   : > { %2868 = vst.msk [vmem:[%s4031_s4 + $0x154] sm:$0xf] %vm1370_vm2, %v2970_v58  ;;  %v2261_v49 = vmax.f32 %v2211_v60, 0.0  ;;  %v2124_v0 = vadd.f32 %v2123_v62, %v1860_v47  ;;  %v3440_v2 = vpop.f32.mrf.mxu0  ;;  %v3664_v47 = vld [vmem:[%s4569_s2] ss:$0 sm:$0xff] }
 0x24b   : > { %v3556_v4 = vpop.f32.mrf.mxu1 }
 0x24c   : > { %v2971_v53 = vpack.c.bf16 %v2261_v49, %v2261_v49  ;;  %v2212_v6 = vadd.f32 %v4347_v44, %v2124_v0  ;;  %v1865_v7 = vpop.f32.mrf.mxu0 }
 0x24d   : > { %v2128_v8 = vpop.f32.mrf.mxu1 }
 0x24e   : > { %2869 = vst.msk [vmem:[%s4031_s4 + $0x158] sm:$0xf] %vm1370_vm2, %v2971_v53  ;;  %v2262_v57 = vmax.f32 %v2212_v6, 0.0  ;;  %v2129_v10 = vadd.f32 %v2128_v8, %v1865_v7  ;;  %v3443_v59 = vpop.f32.mrf.mxu0 }
 0x24f   : > { %v3559_v11 = vpop.f32.mrf.mxu1 }
 0x250   : > { %v2972_v12 = vpack.c.bf16 %v2262_v57, %v2262_v57  ;;  %v2213_v61 = vadd.f32 %v4347_v44, %v2129_v10  ;;  %v1868_v14 = vpop.f32.mrf.mxu0 }
 0x251   : > { %v2131_v63 = vpop.f32.mrf.mxu1 }
 0x252   : > { %2870 = vst.msk [vmem:[%s4031_s4 + $0x15c] sm:$0xf] %vm1370_vm2, %v2972_v12  ;;  %v2263_v16 = vmax.f32 %v2213_v61, 0.0  ;;  %v2132_v1 = vadd.f32 %v2131_v63, %v1868_v14  ;;  %v3444_v3 = vpop.f32.mrf.mxu0 }
 0x253   : > { %v3560_v18 = vpop.f32.mrf.mxu1 }
 0x254   : > { %v2973_v5 = vpack.c.bf16 %v2263_v16, %v2263_v16  ;;  %v2214_v20 = vadd.f32 %v4347_v44, %v2132_v1  ;;  %v1873_v21 = vpop.f32.mrf.mxu0 }
 0x255   : > { %v2136_v23 = vpop.f32.mrf.mxu1 }
 0x256   : > { %2871 = vst.msk [vmem:[%s4031_s4 + $0x160] sm:$0xf] %vm1370_vm2, %v2973_v5  ;;  %v2264_v9 = vmax.f32 %v2214_v20, 0.0  ;;  %v2137_v25 = vadd.f32 %v2136_v23, %v1873_v21  ;;  %v3447_v26 = vpop.f32.mrf.mxu0 }
 0x257   : > { %v3563_v27 = vpop.f32.mrf.mxu1 }
 0x258   : > { %v2974_v13 = vpack.c.bf16 %v2264_v9, %v2264_v9  ;;  %v2215_v29 = vadd.f32 %v4347_v44, %v2137_v25  ;;  %v1876_v30 = vpop.f32.mrf.mxu0 }
 0x259   : > { %v2139_v15 = vpop.f32.mrf.mxu1 }
 0x25a   : > { %2872 = vst.msk [vmem:[%s4031_s4 + $0x164] sm:$0xf] %vm1370_vm2, %v2974_v13  ;;  %v2265_v31 = vmax.f32 %v2215_v29, 0.0  ;;  %v2140_v17 = vadd.f32 %v2139_v15, %v1876_v30  ;;  %v3448_v34 = vpop.f32.mrf.mxu0 }
 0x25b   : > { %v3564_v19 = vpop.f32.mrf.mxu1 }
 0x25c   : > { %v2975_v36 = vpack.c.bf16 %v2265_v31, %v2265_v31  ;;  %v2216_v37 = vadd.f32 %v4347_v44, %v2140_v17  ;;  %v1881_v22 = vpop.f32.mrf.mxu0 }
 0x25d   : > { %v2144_v39 = vpop.f32.mrf.mxu1 }
 0x25e   : > { %2873 = vst.msk [vmem:[%s4031_s4 + $0x168] sm:$0xf] %vm1370_vm2, %v2975_v36  ;;  %v2266_v24 = vmax.f32 %v2216_v37, 0.0  ;;  %v2145_v41 = vadd.f32 %v2144_v39, %v1881_v22  ;;  %v3451_v33 = vpop.f32.mrf.mxu0 }
 0x25f   : > { %v3567_v43 = vpop.f32.mrf.mxu1 }
 0x260   : > { %v2976_v28 = vpack.c.bf16 %v2266_v24, %v2266_v24  ;;  %v2217_v45 = vadd.f32 %v4347_v44, %v2145_v41  ;;  %v1884_v46 = vpop.f32.mrf.mxu0 }
 0x261   : > { %v2147_v48 = vpop.f32.mrf.mxu1 }
 0x262   : > { %2874 = vst.msk [vmem:[%s4031_s4 + $0x16c] sm:$0xf] %vm1370_vm2, %v2976_v28  ;;  %v2267_v32 = vmax.f32 %v2217_v45, 0.0  ;;  %v2148_v50 = vadd.f32 %v2147_v48, %v1884_v46  ;;  %v3452_v51 = vpop.f32.mrf.mxu0 }
 0x263   : > { %v3568_v52 = vpop.f32.mrf.mxu1 }
 0x264   : > { %v2977_v38 = vpack.c.bf16 %v2267_v32, %v2267_v32  ;;  %v2218_v35 = vadd.f32 %v4347_v44, %v2148_v50  ;;  %v1889_v40 = vpop.f32.mrf.mxu0 }
 0x265   : > { %v2152_v54 = vpop.f32.mrf.mxu1 }
 0x266   : > { %2875 = vst.msk [vmem:[%s4031_s4 + $0x170] sm:$0xf] %vm1370_vm2, %v2977_v38  ;;  %v2268_v55 = vmax.f32 %v2218_v35, 0.0  ;;  %v2153_v56 = vadd.f32 %v2152_v54, %v1889_v40  ;;  %v3455_v42 = vpop.f32.mrf.mxu0 }
 0x267   : > { %v3571_v58 = vpop.f32.mrf.mxu1 }
 0x268   : > { %v2978_v60 = vpack.c.bf16 %v2268_v55, %v2268_v55  ;;  %v2219_v62 = vadd.f32 %v3664_v47, %v2153_v56  ;;  %v1892_v49 = vpop.f32.mrf.mxu0 }
 0x269   : > { %v2155_v0 = vpop.f32.mrf.mxu1 }
 0x26a   : > { %2876 = vst.msk [vmem:[%s4031_s4 + $0x174] sm:$0xf] %vm1370_vm2, %v2978_v60  ;;  %v2269_v44 = vmax.f32 %v2219_v62, 0.0  ;;  %v2156_v2 = vadd.f32 %v2155_v0, %v1892_v49  ;;  %v3456_v4 = vpop.f32.mrf.mxu0 }
 0x26b   : > { %v3572_v53 = vpop.f32.mrf.mxu1 }
 0x26c   : > { %v2979_v6 = vpack.c.bf16 %v2269_v44, %v2269_v44  ;;  %v2220_v7 = vadd.f32 %v3664_v47, %v2156_v2  ;;  %v1897_v8 = vpop.f32.mrf.mxu0 }
 0x26d   : > { %v2160_v57 = vpop.f32.mrf.mxu1 }
 0x26e   : > { %2877 = vst.msk [vmem:[%s4031_s4 + $0x178] sm:$0xf] %vm1370_vm2, %v2979_v6  ;;  %v2270_v10 = vmax.f32 %v2220_v7, 0.0  ;;  %v2161_v59 = vadd.f32 %v2160_v57, %v1897_v8  ;;  %v3459_v11 = vpop.f32.mrf.mxu0 }
 0x26f   : > { %v3575_v12 = vpop.f32.mrf.mxu1 }
 0x270   : > { %v2980_v61 = vpack.c.bf16 %v2270_v10, %v2270_v10  ;;  %v2221_v14 = vadd.f32 %v3664_v47, %v2161_v59  ;;  %v1900_v63 = vpop.f32.mrf.mxu0 }
 0x271   : > { %v2163_v16 = vpop.f32.mrf.mxu1 }
 0x272   : > { %2878 = vst.msk [vmem:[%s4031_s4 + $0x17c] sm:$0xf] %vm1370_vm2, %v2980_v61  ;;  %v2271_v1 = vmax.f32 %v2221_v14, 0.0  ;;  %v2164_v3 = vadd.f32 %v2163_v16, %v1900_v63  ;;  %v3460_v18 = vpop.f32.mrf.mxu0 }
 0x273   : > { %v3576_v5 = vpop.f32.mrf.mxu1 }
 0x274   : > { %v2981_v20 = vpack.c.bf16 %v2271_v1, %v2271_v1  ;;  %v2222_v21 = vadd.f32 %v3664_v47, %v2164_v3  ;;  %v1905_v23 = vpop.f32.mrf.mxu0 }
 0x275   : > { %v2168_v9 = vpop.f32.mrf.mxu1 }
 0x276   : > { %2879 = vst.msk [vmem:[%s4031_s4 + $0x180] sm:$0xf] %vm1370_vm2, %v2981_v20  ;;  %v2272_v25 = vmax.f32 %v2222_v21, 0.0  ;;  %v2169_v26 = vadd.f32 %v2168_v9, %v1905_v23  ;;  %v3463_v27 = vpop.f32.mrf.mxu0 }
 0x277   : > { %v3579_v13 = vpop.f32.mrf.mxu1 }
 0x278   : > { %v2982_v29 = vpack.c.bf16 %v2272_v25, %v2272_v25  ;;  %v2223_v30 = vadd.f32 %v3664_v47, %v2169_v26  ;;  %v1908_v15 = vpop.f32.mrf.mxu0 }
 0x279   : > { %v2171_v31 = vpop.f32.mrf.mxu1 }
 0x27a   : > { %2880 = vst.msk [vmem:[%s4031_s4 + $0x184] sm:$0xf] %vm1370_vm2, %v2982_v29  ;;  %v2273_v17 = vmax.f32 %v2223_v30, 0.0  ;;  %v2172_v34 = vadd.f32 %v2171_v31, %v1908_v15  ;;  %v3464_v19 = vpop.f32.mrf.mxu0 }
 0x27b   : > { %v3580_v36 = vpop.f32.mrf.mxu1 }
 0x27c   : > { %v2983_v37 = vpack.c.bf16 %v2273_v17, %v2273_v17  ;;  %v2224_v22 = vadd.f32 %v3664_v47, %v2172_v34 }
 0x27e   : > { %2881 = vst.msk [vmem:[%s4031_s4 + $0x188] sm:$0xf] %vm1370_vm2, %v2983_v37  ;;  %v2274_v39 = vmax.f32 %v2224_v22, 0.0 }
 0x280   : > { %v2984_v24 = vpack.c.bf16 %v2274_v39, %v2274_v39 }
 0x282   : > { %2882 = vst.msk [vmem:[%s4031_s4 + $0x18c] sm:$0xf] %vm1370_vm2, %v2984_v24 }
 0x283 PF: > { %s13_s12 = sadd.s32 1, %s3671_s12  }
 0x284   : > { %p10_p4 = scmp.ge.s32.totalorder %s13_s12, 5  }
 0x286   :  { %12 = sbr.rel (!%p10_p4) target bundleno = 1 (0x1), region = 65 }

// kernel: unreal_forward.6
= control target key start
LH: loop header
LB: loop body
LE: loop exit
PB: predicated region body
PF: predicated region fallthrough
CT: control target
= control target key end

     0   :  { %s1455_s12 = smov 0   ;;  %s1795_s0 = inlined_call_operand.vmem [shape: bf16[6,90,128], index: 0, kind: input, shape index: {}]   ;;  %s1796_s1 = inlined_call_operand.vmem [shape: bf16[2,128,32], index: 1, kind: input, shape index: {}]   ;;  %s1797_s2 = inlined_call_operand.vmem [shape: f32[1,32], index: 2, kind: input, shape index: {}]   ;;  %s1798_s3 = inlined_call_operand.vmem [shape: bf16[6,81,32], index: 3, kind: output, shape index: {}]  }
   0x1 LB: > { %s1073_s13 = sadd.s32 4294967295, %s1433_s12   ;;  %p1077_p0 = scmp.ge.s32.totalorder %s1433_s12, 1  ;;  %s1433_s12 = sphi %s1455_s12, %s13_s12  }
   0x2   : > { %p139_p1 = scmp.lt.s32.totalorder %s1433_s12, 4 }
   0x4   : > { %p140_p2 = pnand %p1077_p0, %p139_p1 }
   0x5   : > { %s1078_s16 = sshll.u32 (!%p140_p2), %s1073_s13, 1 }
   0x6   : > { %143 = sbr.rel (%p140_p2) target bundleno = 301 (0x12d), region = 32  ;;  %p166_p3 = scmp.lt.s32.totalorder (!%p140_p2), %s1078_s16, 5 }
   0xb   : > { %v1466_v0 = vld [vmem:[%s1796_s1 + $0x78] sm:$0xff]   ;;  %v1477_v2 = vld [vmem:[%s1796_s1 + $0x70] sm:$0xff]   ;;  %v1491_v4 = vld [vmem:[%s1796_s1 + $0x68] sm:$0xff]   ;;  %s1802_s16 = smov (!%p166_p3, %s1078_s16), 5  ;;  %vm254_vm0 = vsmask.f32 7424 }
   0xc   : > { %v1471_v1 = vld [vmem:[%s1796_s1 + $0x38] sm:$0xff]   ;;  %1265 = vmatprep.subr.bf16.mxu0 %v1466_v0  ;;  %v1484_v3 = vld [vmem:[%s1796_s1 + $0x30] sm:$0xff]   ;;  %v1497_v5 = vld [vmem:[%s1796_s1 + $0x28] sm:$0xff]   ;;  %s1377_s4 = smul.u32 48, %s1802_s16  ;;  %vm650_vm1 = vcmask 257024   ;;  %vm661_vm2 = vcmask 253952  }
   0xd   : > { %1293 = vmatprep.subr.bf16.mxu1 %v1471_v1  ;;  %1266 = vmatpush3.bf16.msra.mxu0 %v1466_v0  ;;  %v1507_v6 = vld [vmem:[%s1796_s1 + $0x60] sm:$0xff]   ;;  %v1522_v8 = vld [vmem:[%s1796_s1 + $0x58] sm:$0xff]   ;;  %v1539_v10 = vld [vmem:[%s1796_s1 + $0x50] sm:$0xff]   ;;  %s1378_s28 = smul.u32 44, %s1802_s16  ;;  %vm662_vm3 = vsmask.f32 256 }
   0xe   : > { %1294 = vmatpush3.bf16.msra.mxu1 %v1471_v1  ;;  %1267 = vmatprep.subr.bf16.mxu0 %v1477_v2  ;;  %v1513_v7 = vld [vmem:[%s1796_s1 + $0x20] sm:$0xff]   ;;  %v1528_v9 = vld [vmem:[%s1796_s1 + $0x18] sm:$0xff]   ;;  %s1533_s11 = scalar_lea.vmem %s1795_s0, %s1377_s4  ;;  %v1554_v14 = vld [vmem:[%s1796_s1 + $0x10] sm:$0xff]  }
   0xf   : > { %1295 = vmatprep.subr.bf16.mxu1 %v1484_v3  ;;  %v215_v11 = vld [vmem:[%s1533_s11 + $0x4] sm:$0xf]  ;;  %v1545_v12 = vld [vmem:[%s1533_s11 + $0x8] sm:$0xf]  ;;  %v1548_v13 = vld [vmem:[%s1533_s11 + $0xc] sm:$0xf]  ;;  %s1717_s4 = scalar_lea.vmem %s1798_s3, %s1378_s28 }
  0x10   : > { %v1557_v15 = vld [vmem:[%s1533_s11 + $0x10] sm:$0xf]  ;;  %v1098_v16 = vcombine.low %v215_v11, %v1545_v12  ;;  %v214_v17 = vld [vmem:[%s1533_s11] sm:$0xf]  ;;  %v1564_v20 = vld [vmem:[%s1533_s11 + $0x14] sm:$0xf]  ;;  %v1113_v50 = vcombine.low %v1545_v12, %v1548_v13 }
  0x11   : > { %1268 = vmatpush3.bf16.msra.mxu0 %v1477_v2  ;;  %v1099_v18 = vcombine.low %v1548_v13, %v1557_v15  ;;  %v1112_v19 = vcombine.low %v214_v17, %v215_v11  ;;  %v1567_v21 = vld [vmem:[%s1533_s11 + $0x18] sm:$0xf]  ;;  %v1573_v25 = vld [vmem:[%s1533_s11 + $0x1c] sm:$0xf]  ;;  %v1576_v26 = vld [vmem:[%s1533_s11 + $0x20] sm:$0xf]  ;;  %v1114_v55 = vcombine.low %v1557_v15, %v1564_v20 }
  0x12   : > { %1296 = vmatpush3.bf16.msra.mxu1 %v1484_v3  ;;  %1269 = vmatprep.subr.bf16.mxu0 %v1491_v4  ;;  %v256_v22 = vshrl.u32 %v1098_v16, 16  ;;  %v258_v23 = vshll.u32 %v1098_v16, 16  ;;  %v1100_v24 = vcombine.low %v1564_v20, %v1567_v21  ;;  %v1583_v27 = vld [vmem:[%s1796_s1 + $0x48] sm:$0xff]   ;;  %v1101_v32 = vcombine.low %v1573_v25, %v1576_v26  ;;  %v1599_v36 = vld [vmem:[%s1796_s1 + $0x40] sm:$0xff]   ;;  %v1628_v53 = vld [vmem:[%s1533_s11 + $0x34] sm:$0xf] }
  0x13   : > { %1297 = vmatprep.subr.bf16.mxu1 %v1497_v5  ;;  %v263_v28 = vshll.u32 %v1099_v18, 16  ;;  %v1589_v29 = vld [vmem:[%s1796_s1 + $0x8] sm:$0xff]   ;;  %1309 = vmatprep.mubr.bf16.mxu1 %v1112_v19  ;;  %v267_v34 = vshrl.u32 %v1099_v18, 16  ;;  %v1602_v37 = vld [vmem:[%s1533_s11 + $0x24] sm:$0xf]  ;;  %v1115_v16 = vcombine.low %v1567_v21, %v1573_v25  ;;  %vm1742_vm4 = vmand %vm661_vm2, %vm662_vm3 }
  0x14   : > { %v260_v30 = vrot.slane %v258_v23, 1  ;;  %v271_v35 = vshll.u32 %v1100_v24, 16  ;;  %v1605_v38 = vld [vmem:[%s1533_s11 + $0x28] sm:$0xf]  ;;  %v1611_v39 = vld [vmem:[%s1796_s1] sm:$0xff]   ;;  %v275_v41 = vshrl.u32 %v1100_v24, 16 }
  0x15   : > { %1270 = vmatpush3.bf16.msra.mxu0 %v1491_v4  ;;  %v265_v31 = vrot.slane %v263_v28, 1  ;;  %v279_v42 = vshll.u32 %v1101_v32, 16  ;;  %v1102_v45 = vcombine.low %v1602_v37, %v1605_v38  ;;  %v1621_v48 = vld [vmem:[%s1533_s11 + $0x2c] ss:$0 sps:$4 sm:$0x11]   ;;  %v283_v51 = vshrl.u32 %v1101_v32, 16 }
  0x16   : > { %1298 = vmatpush3.bf16.msra.mxu1 %v1497_v5  ;;  %1271 = vmatprep.subr.bf16.mxu0 %v1507_v6  ;;  %v261_v33 = vor.u32 %v260_v30, %v256_v22  ;;  %v273_v44 = vrot.slane %v271_v35, 1  ;;  %v1631_v54 = vld [vmem:[%s1533_s11 + $0x38] sm:$0xf]  ;;  %v295_v58 = vshll.u32 %v1621_v48, 16  ;;  %v1644_v62 = vld [vmem:[%s1533_s11 + $0x3c] sm:$0xf] }
  0x17   : > { %1299 = vmatprep.subr.bf16.mxu1 %v1513_v7  ;;  %v269_v43 = vor.u32 %v267_v34, %v265_v31  ;;  %v281_v47 = vrot.slane %v279_v42, 1  ;;  %v287_v52 = vshll.u32 %v1102_v45, 16  ;;  %v291_v57 = vshrl.u32 %v1102_v45, 16  ;;  %v1647_v63 = vld [vmem:[%s1533_s11 + $0x40] sm:$0xf] }
  0x18   : > { %v266_v40 = vsel %vm254_vm0, %v261_v33, %v265_v31  ;;  %v277_v46 = vor.u32 %v275_v41, %v273_v44  ;;  %v1150_v59 = vcombine.low %v1628_v53, %v1631_v54  ;;  %v297_v12 = vrot.slane %v295_v58, 1  ;;  %v1138_v22 = vld [vmem:[%s1533_s11 + $0x30] sm:$0xf]  ;;  %v1143_v23 = vld [vmem:[%s1533_s11 + $0x44] sm:$0xf] }
  0x19   : > { %1272 = vmatpush3.bf16.msra.mxu0 %v1507_v6  ;;  %1281 = vmatprep.mubr.bf16.mxu0 %v266_v40  ;;  %v274_v49 = vsel %vm254_vm0, %v269_v43, %v273_v44  ;;  %v285_v60 = vor.u32 %v283_v51, %v281_v47  ;;  %v289_v61 = vrot.slane %v287_v52, 1  ;;  %v1151_v13 = vcombine.low %v1644_v62, %v1647_v63  ;;  %v1145_v24 = vld [vmem:[%s1533_s11 + $0x4c] sm:$0xf]  ;;  %v1146_v25 = vld [vmem:[%s1533_s11 + $0x50] sm:$0xf] }
  0x1a   : > { %1300 = vmatpush3.bf16.msra.mxu1 %v1513_v7  ;;  %1273 = vmatprep.subr.bf16.mxu0 %v1522_v8  ;;  %v282_v56 = vsel %vm254_vm0, %v277_v46, %v281_v47  ;;  %v709_v18 = vshrl.u32 %v1150_v59, 16  ;;  %v1147_v32 = vld [vmem:[%s1533_s11 + $0x54] sm:$0xf]  ;;  %v1148_v33 = vld [vmem:[%s1533_s11 + $0x58] sm:$0xf]  ;;  %v1157_v41 = vcombine.low %v1631_v54, %v1644_v62 }
  0x1b   : > { %1301 = vmatprep.subr.bf16.mxu1 %v1528_v9  ;;  %v293_v11 = vor.u32 %v291_v57, %v289_v61  ;;  %v290_v15 = vsel %vm254_vm0, %v285_v60, %v289_v61  ;;  %v716_v19 = vshll.u32 %v1151_v13, 16  ;;  %v720_v31 = vshrl.u32 %v1151_v13, 16  ;;  %v1424_v40 = vld [vmem:[%s1533_s11 + $0x5c] ss:$0 sps:$4 sm:$0x11]  }
  0x1c   : > { %v1154_v35 = vcombine.low %v1147_v32, %v1148_v33  ;;  %v748_v45 = vshll.u32 %v1424_v40, 16  ;;  %v1160_v51 = vcombine.low %v1146_v25, %v1147_v32  ;;  %v752_v52 = vshrl.u32 %v1424_v40, 16 }
  0x1d   : > { %1274 = vmatpush3.bf16.msra.mxu0 %v1522_v8  ;;  %v298_v17 = vsel %vm254_vm0, %v293_v11, %v297_v12  ;;  %v718_v21 = vrot.slane %v716_v19, 1 }
  0x1e   : > { %1302 = vmatpush3.bf16.msra.mxu1 %v1528_v9  ;;  %1275 = vmatprep.subr.bf16.mxu0 %v1539_v10  ;;  %v744_v44 = vshrl.u32 %v1154_v35, 16 }
  0x1f   : > { %1303 = vmatprep.subr.bf16.mxu1 %v1554_v14 }
  0x21   : > { %1276 = vmatpush3.bf16.msra.mxu0 %v1539_v10 }
  0x22   : > { %1304 = vmatpush3.bf16.msra.mxu1 %v1554_v14  ;;  %1277 = vmatprep.subr.bf16.mxu0 %v1583_v27 }
  0x23   : > { %1305 = vmatprep.subr.bf16.mxu1 %v1589_v29 }
  0x25   : > { %1278 = vmatpush3.bf16.msra.mxu0 %v1583_v27 }
  0x26   : > { %1306 = vmatpush3.bf16.msra.mxu1 %v1589_v29  ;;  %1279 = vmatprep.subr.bf16.mxu0 %v1599_v36 }
  0x27   : > { %1307 = vmatprep.subr.bf16.mxu1 %v1611_v39 }
  0x29   : > { %1280 = vmatpush3.bf16.msra.mxu0 %v1599_v36 }
  0x2a   : > { %1308 = vmatpush3.bf16.msra.mxu1 %v1611_v39  ;;  %1321 = vmatprep.subr.bf16.mxu0 %v1466_v0 }
  0x2b   : > { %1349 = vmatprep.subr.bf16.mxu1 %v1471_v1 }
  0x2c   : > { %1282 = vmatmul.mubr.bf16.vlgmr.msra.gmra.mxu0 %v274_v49 }
  0x2d   : > { %1310 = vmatmul.mubr.bf16.vlgmr.msra.gmra.mxu1 %v1113_v50  ;;  %1322 = vmatpush3.bf16.msra.mxu0 %v1466_v0  ;;  %v711_v0 = vshll.u32 %v1150_v59, 16 }
  0x2e   : > { %1350 = vmatpush3.bf16.msra.mxu1 %v1471_v1  ;;  %1323 = vmatprep.subr.bf16.mxu0 %v1477_v2  ;;  %v1116_v1 = vcombine.low %v1576_v26, %v1602_v37  ;;  %v722_v37 = vor.u32 %v720_v31, %v718_v21 }
  0x2f   : > { %1351 = vmatprep.subr.bf16.mxu1 %v1484_v3  ;;  %1285 = vmatprep.mubr.bf16.mxu0 %v282_v56 }
  0x30   : > { %1313 = vmatprep.mubr.bf16.mxu1 %v1114_v55  ;;  %v1709_v55 = vld [vmem:[%s1797_s2] ss:$0 sm:$0xff] }
  0x31   : > { %1324 = vmatpush3.bf16.msra.mxu0 %v1477_v2  ;;  %v713_v2 = vrot.slane %v711_v0, 1 }
  0x32   : > { %1352 = vmatpush3.bf16.msra.mxu1 %v1484_v3  ;;  %1325 = vmatprep.subr.bf16.mxu0 %v1491_v4  ;;  %v299_v3 = vshrl.u32 %v1621_v48, 16  ;;  %v750_v48 = vrot.slane %v748_v45, 1 }
  0x33   : > { %1353 = vmatprep.subr.bf16.mxu1 %v1497_v5  ;;  %v714_v20 = vor.u32 %v713_v2, %v709_v18 }
  0x34   : > { %1286 = vmatmul.mubr.bf16.gmra.mxu0 %v290_v15 }
  0x35   : > { %1326 = vmatpush3.bf16.msra.mxu0 %v1491_v4  ;;  %1314 = vmatmul.mubr.bf16.gmra.mxu1 %v1115_v16  ;;  %v1117_v4 = vcombine.low %v1605_v38, %v1605_v38  ;;  %v719_v26 = vsel %vm254_vm0, %v714_v20, %v718_v21 }
  0x36   : > { %1354 = vmatpush3.bf16.msra.mxu1 %v1497_v5  ;;  %1327 = vmatprep.subr.bf16.mxu0 %v1507_v6  ;;  %v1144_v5 = vld [vmem:[%s1533_s11 + $0x48] sm:$0xf] }
  0x37   : > { %1355 = vmatprep.subr.bf16.mxu1 %v1513_v7  ;;  %1289 = vmatprep.mubr.bf16.mxu0 %v298_v17  ;;  %v1152_v28 = vcombine.low %v1143_v23, %v1144_v5  ;;  %v1159_v50 = vcombine.low %v1144_v5, %v1145_v24 }
  0x38   : > { %1317 = vmatprep.mubr.bf16.mxu1 %v1116_v1 }
  0x39   : > { %1328 = vmatpush3.bf16.msra.mxu0 %v1507_v6  ;;  %v1156_v6 = vcombine.low %v1138_v22, %v1628_v53  ;;  %v724_v30 = vshll.u32 %v1152_v28, 16  ;;  %v1161_v53 = vcombine.low %v1148_v33, %v1148_v33 }
  0x3a   : > { %1356 = vmatpush3.bf16.msra.mxu1 %v1513_v7  ;;  %1329 = vmatprep.subr.bf16.mxu0 %v1522_v8  ;;  %v1153_v7 = vcombine.low %v1145_v24, %v1146_v25 }
  0x3b   : > { %1357 = vmatprep.subr.bf16.mxu1 %v1528_v9  ;;  %v726_v34 = vrot.slane %v724_v30, 1 }
  0x3c   : > { %1290 = vmatmul.mubr.bf16.gmra.mxu0 %v299_v3  ;;  %v736_v43 = vshrl.u32 %v1153_v7, 16 }
  0x3d   : > { %1330 = vmatpush3.bf16.msra.mxu0 %v1522_v8  ;;  %1318 = vmatmul.mubr.bf16.gmra.mxu1 %v1117_v4  ;;  %v728_v8 = vshrl.u32 %v1152_v28, 16  ;;  %v727_v42 = vsel %vm254_vm0, %v722_v37, %v726_v34 }
  0x3e   : > { %1358 = vmatpush3.bf16.msra.mxu1 %v1528_v9  ;;  %1331 = vmatprep.subr.bf16.mxu0 %v1539_v10  ;;  %v732_v9 = vshll.u32 %v1153_v7, 16 }
  0x3f   : > { %1359 = vmatprep.subr.bf16.mxu1 %v1554_v14  ;;  %1337 = vmatprep.mubr.bf16.mxu0 %v719_v26 }
  0x40   : > { %1365 = vmatprep.mubr.bf16.mxu1 %v1156_v6  ;;  %v734_v38 = vrot.slane %v732_v9, 1 }
  0x41   : > { %1332 = vmatpush3.bf16.msra.mxu0 %v1539_v10  ;;  %v730_v10 = vor.u32 %v728_v8, %v726_v34 }
  0x42   : > { %1360 = vmatpush3.bf16.msra.mxu1 %v1554_v14  ;;  %1333 = vmatprep.subr.bf16.mxu0 %v1583_v27  ;;  %v740_v14 = vshll.u32 %v1154_v35, 16  ;;  %v738_v47 = vor.u32 %v736_v43, %v734_v38 }
  0x43   : > { %1361 = vmatprep.subr.bf16.mxu1 %v1589_v29 }
  0x44   : > { %v742_v46 = vrot.slane %v740_v14, 1 }
  0x45   : > { %1334 = vmatpush3.bf16.msra.mxu0 %v1583_v27  ;;  %v735_v27 = vsel %vm254_vm0, %v730_v10, %v734_v38 }
  0x46   : > { %1362 = vmatpush3.bf16.msra.mxu1 %v1589_v29  ;;  %1335 = vmatprep.subr.bf16.mxu0 %v1599_v36  ;;  %v1158_v29 = vcombine.low %v1647_v63, %v1143_v23  ;;  %v743_v49 = vsel %vm254_vm0, %v738_v47, %v742_v46 }
  0x47   : > { %1363 = vmatprep.subr.bf16.mxu1 %v1611_v39 }
  0x49   : > { %1336 = vmatpush3.bf16.msra.mxu0 %v1599_v36  ;;  %v746_v36 = vor.u32 %v744_v44, %v742_v46 }
  0x4a   : > { %1364 = vmatpush3.bf16.msra.mxu1 %v1611_v39 }
  0x4b   : > { %v751_v39 = vsel %vm254_vm0, %v746_v36, %v750_v48 }
  0x4c   : > { %1338 = vmatmul.mubr.bf16.vlgmr.msra.gmra.mxu0 %v727_v42 }
  0x4d   : > { %1366 = vmatmul.mubr.bf16.vlgmr.msra.gmra.mxu1 %v1157_v41  ;;  %1341 = vmatprep.mubr.bf16.mxu0 %v735_v27 }
  0x4e   : > { %1369 = vmatprep.mubr.bf16.mxu1 %v1158_v29 }
  0x54   : > { %1342 = vmatmul.mubr.bf16.gmra.mxu0 %v743_v49 }
  0x55   : > { %1370 = vmatmul.mubr.bf16.gmra.mxu1 %v1159_v50  ;;  %1345 = vmatprep.mubr.bf16.mxu0 %v751_v39 }
  0x56   : > { %1373 = vmatprep.mubr.bf16.mxu1 %v1160_v51 }
  0x5c   : > { %1346 = vmatmul.mubr.bf16.gmra.mxu0 %v752_v52  ;;  %v664_v52 = vld [vmem:[%s1717_s4 + $0x28] sm:$0x1] }
  0x5d   : > { %1374 = vmatmul.mubr.bf16.gmra.mxu1 %v1161_v53 }
  0xec   : > { %v1283_v54 = vpop.f32.mrf.mxu0 }
  0xed   : > { %v1311_v56 = vpop.f32.mrf.mxu1 }
  0xee   : > { %v540_v57 = vadd.f32 %v1311_v56, %v1283_v54  ;;  %v389_v58 = vpop.f32.mrf.mxu0 }
  0xef   : > { %v531_v59 = vpop.f32.mrf.mxu1 }
  0xf0   : > { %v585_v60 = vadd.f32 %v1709_v55, %v540_v57  ;;  %v532_v61 = vadd.f32 %v531_v59, %v389_v58  ;;  %v1284_v62 = vpop.f32.mrf.mxu0 }
  0xf1   : > { %v1312_v63 = vpop.f32.mrf.mxu1 }
  0xf2   : > { %v596_v11 = vmax.f32 %v585_v60, 0.0  ;;  %v583_v12 = vadd.f32 %v1709_v55, %v532_v61  ;;  %v543_v13 = vadd.f32 %v1312_v63, %v1284_v62  ;;  %v392_v0 = vpop.f32.mrf.mxu0 }
  0xf3   : > { %v534_v15 = vpop.f32.mrf.mxu1 }
  0xf4   : > { %v1189_v16 = vpack.c.bf16 %v596_v11, %v596_v11  ;;  %v594_v1 = vmax.f32 %v583_v12, 0.0  ;;  %v586_v17 = vadd.f32 %v1709_v55, %v543_v13  ;;  %v535_v18 = vadd.f32 %v534_v15, %v392_v0  ;;  %v1287_v2 = vpop.f32.mrf.mxu0 }
  0xf5   : > { %v1315_v19 = vpop.f32.mrf.mxu1 }
  0xf6   : > { %653 = vst.msk [vmem:[%s1717_s4 + $0x8] sm:$0xf] %vm650_vm1, %v1189_v16  ;;  %v1187_v3 = vpack.c.bf16 %v594_v1, %v594_v1  ;;  %v597_v20 = vmax.f32 %v586_v17, 0.0  ;;  %v584_v21 = vadd.f32 %v1709_v55, %v535_v18  ;;  %v556_v4 = vadd.f32 %v1315_v19, %v1287_v2  ;;  %v405_v22 = vpop.f32.mrf.mxu0 }
  0xf7   : > { %v547_v23 = vpop.f32.mrf.mxu1 }
  0xf8   : > { %651 = vst.msk [vmem:[%s1717_s4] sm:$0xf] %vm650_vm1, %v1187_v3  ;;  %v1190_v5 = vpack.c.bf16 %v597_v20, %v597_v20  ;;  %v595_v24 = vmax.f32 %v584_v21, 0.0  ;;  %v589_v25 = vadd.f32 %v1709_v55, %v556_v4  ;;  %v548_v26 = vadd.f32 %v547_v23, %v405_v22  ;;  %v1288_v6 = vpop.f32.mrf.mxu0 }
  0xf9   : > { %v1316_v28 = vpop.f32.mrf.mxu1 }
  0xfa   : > { %654 = vst.msk [vmem:[%s1717_s4 + $0xc] sm:$0xf] %vm650_vm1, %v1190_v5  ;;  %v1188_v7 = vpack.c.bf16 %v595_v24, %v595_v24  ;;  %v600_v30 = vmax.f32 %v589_v25, 0.0  ;;  %v587_v31 = vadd.f32 %v1709_v55, %v548_v26  ;;  %v559_v32 = vadd.f32 %v1316_v28, %v1288_v6  ;;  %v408_v33 = vpop.f32.mrf.mxu0 }
  0xfb   : > { %v550_v8 = vpop.f32.mrf.mxu1 }
  0xfc   : > { %652 = vst.msk [vmem:[%s1717_s4 + $0x4] sm:$0xf] %vm650_vm1, %v1188_v7  ;;  %v1193_v9 = vpack.c.bf16 %v600_v30, %v600_v30  ;;  %v598_v34 = vmax.f32 %v587_v31, 0.0  ;;  %v590_v35 = vadd.f32 %v1709_v55, %v559_v32  ;;  %v551_v37 = vadd.f32 %v550_v8, %v408_v33  ;;  %v1291_v10 = vpop.f32.mrf.mxu0 }
  0xfd   : > { %v1319_v38 = vpop.f32.mrf.mxu1 }
  0xfe   : > { %657 = vst.msk [vmem:[%s1717_s4 + $0x18] sm:$0xf] %vm650_vm1, %v1193_v9  ;;  %v1191_v40 = vpack.c.bf16 %v598_v34, %v598_v34  ;;  %v601_v14 = vmax.f32 %v590_v35, 0.0  ;;  %v588_v41 = vadd.f32 %v1709_v55, %v551_v37  ;;  %v572_v42 = vadd.f32 %v1319_v38, %v1291_v10  ;;  %v421_v43 = vpop.f32.mrf.mxu0 }
  0xff   : > { %v563_v27 = vpop.f32.mrf.mxu1 }
 0x100   : > { %655 = vst.msk [vmem:[%s1717_s4 + $0x10] sm:$0xf] %vm650_vm1, %v1191_v40  ;;  %v1194_v29 = vpack.c.bf16 %v601_v14, %v601_v14  ;;  %v599_v44 = vmax.f32 %v588_v41, 0.0  ;;  %v593_v45 = vadd.f32 %v1709_v55, %v572_v42  ;;  %v564_v46 = vadd.f32 %v563_v27, %v421_v43  ;;  %v1292_v47 = vpop.f32.mrf.mxu0 }
 0x101   : > { %v1320_v36 = vpop.f32.mrf.mxu1 }
 0x102   : > { %658 = vst.msk [vmem:[%s1717_s4 + $0x1c] sm:$0xf] %vm650_vm1, %v1194_v29  ;;  %v1192_v48 = vpack.c.bf16 %v599_v44, %v599_v44  ;;  %v604_v49 = vmax.f32 %v593_v45, 0.0  ;;  %v591_v50 = vadd.f32 %v1709_v55, %v564_v46  ;;  %v424_v39 = vpop.f32.mrf.mxu0 }
 0x103   : > { %v566_v53 = vpop.f32.mrf.mxu1 }
 0x104   : > { %656 = vst.msk [vmem:[%s1717_s4 + $0x14] sm:$0xf] %vm650_vm1, %v1192_v48  ;;  %v1197_v54 = vpack.c.bf16 %v604_v49, %v604_v49  ;;  %v602_v56 = vmax.f32 %v591_v50, 0.0  ;;  %v567_v57 = vadd.f32 %v566_v53, %v424_v39 }
 0x106   : > { %v665_v58 = vsel %vm1742_vm4, %v1197_v54, %v664_v52  ;;  %v1195_v59 = vpack.c.bf16 %v602_v56, %v602_v56  ;;  %v592_v60 = vadd.f32 %v1709_v55, %v567_v57 }
 0x107   : > { %666 = vst [vmem:[%s1717_s4 + $0x28] sm:$0x1] %v665_v58 }
 0x108   : > { %659 = vst.msk [vmem:[%s1717_s4 + $0x20] sm:$0xf] %vm650_vm1, %v1195_v59  ;;  %v603_v61 = vmax.f32 %v592_v60, 0.0 }
 0x10a   : > { %v1196_v62 = vpack.c.bf16 %v603_v61, %v603_v61 }
 0x10c   : > { %660 = vst.msk [vmem:[%s1717_s4 + $0x24] sm:$0xf] %vm650_vm1, %v1196_v62  ;;  %v1339_v63 = vpop.f32.mrf.mxu0 }
 0x10d   : > { %v1367_v11 = vpop.f32.mrf.mxu1 }
 0x10e   : > { %v897_v12 = vadd.f32 %v1367_v11, %v1339_v63  ;;  %v794_v13 = vpop.f32.mrf.mxu0 }
 0x10f   : > { %v888_v0 = vpop.f32.mrf.mxu1 }
 0x110   : > { %v936_v15 = vadd.f32 %v1709_v55, %v897_v12  ;;  %v889_v16 = vadd.f32 %v888_v0, %v794_v13  ;;  %v1340_v1 = vpop.f32.mrf.mxu0  ;;  %v1183_v12 = vld [vmem:[%s1717_s4 + $0x54] sm:$0x1] }
 0x111   : > { %v1368_v17 = vpop.f32.mrf.mxu1 }
 0x112   : > { %v947_v18 = vmax.f32 %v936_v15, 0.0  ;;  %v934_v2 = vadd.f32 %v1709_v55, %v889_v16  ;;  %v900_v19 = vadd.f32 %v1368_v17, %v1340_v1  ;;  %v797_v3 = vpop.f32.mrf.mxu0 }
 0x113   : > { %v891_v20 = vpop.f32.mrf.mxu1 }
 0x114   : > { %v1200_v21 = vpack.c.bf16 %v947_v18, %v947_v18  ;;  %v945_v4 = vmax.f32 %v934_v2, 0.0  ;;  %v937_v22 = vadd.f32 %v1709_v55, %v900_v19  ;;  %v892_v23 = vadd.f32 %v891_v20, %v797_v3  ;;  %v1343_v5 = vpop.f32.mrf.mxu0 }
 0x115   : > { %v1371_v24 = vpop.f32.mrf.mxu1 }
 0x116   : > { %1175 = vst.msk [vmem:[%s1717_s4 + $0x34] sm:$0xf] %vm650_vm1, %v1200_v21  ;;  %v1198_v25 = vpack.c.bf16 %v945_v4, %v945_v4  ;;  %v948_v26 = vmax.f32 %v937_v22, 0.0  ;;  %v935_v6 = vadd.f32 %v1709_v55, %v892_v23  ;;  %v913_v28 = vadd.f32 %v1371_v24, %v1343_v5  ;;  %v810_v7 = vpop.f32.mrf.mxu0 }
 0x117   : > { %v904_v30 = vpop.f32.mrf.mxu1 }
 0x118   : > { %1173 = vst.msk [vmem:[%s1717_s4 + $0x2c] sm:$0xf] %vm650_vm1, %v1198_v25  ;;  %v1201_v31 = vpack.c.bf16 %v948_v26, %v948_v26  ;;  %v946_v32 = vmax.f32 %v935_v6, 0.0  ;;  %v940_v33 = vadd.f32 %v1709_v55, %v913_v28  ;;  %v905_v8 = vadd.f32 %v904_v30, %v810_v7  ;;  %v1344_v9 = vpop.f32.mrf.mxu0 }
 0x119   : > { %v1372_v34 = vpop.f32.mrf.mxu1 }
 0x11a   : > { %1176 = vst.msk [vmem:[%s1717_s4 + $0x38] sm:$0xf] %vm650_vm1, %v1201_v31  ;;  %v1199_v35 = vpack.c.bf16 %v946_v32, %v946_v32  ;;  %v951_v37 = vmax.f32 %v940_v33, 0.0  ;;  %v938_v10 = vadd.f32 %v1709_v55, %v905_v8  ;;  %v916_v38 = vadd.f32 %v1372_v34, %v1344_v9  ;;  %v813_v40 = vpop.f32.mrf.mxu0 }
 0x11b   : > { %v907_v14 = vpop.f32.mrf.mxu1 }
 0x11c   : > { %1174 = vst.msk [vmem:[%s1717_s4 + $0x30] sm:$0xf] %vm650_vm1, %v1199_v35  ;;  %v1204_v41 = vpack.c.bf16 %v951_v37, %v951_v37  ;;  %v949_v42 = vmax.f32 %v938_v10, 0.0  ;;  %v941_v43 = vadd.f32 %v1709_v55, %v916_v38  ;;  %v908_v27 = vadd.f32 %v907_v14, %v813_v40  ;;  %v1347_v29 = vpop.f32.mrf.mxu0 }
 0x11d   : > { %v1375_v44 = vpop.f32.mrf.mxu1 }
 0x11e   : > { %1179 = vst.msk [vmem:[%s1717_s4 + $0x44] sm:$0xf] %vm650_vm1, %v1204_v41  ;;  %v1202_v45 = vpack.c.bf16 %v949_v42, %v949_v42  ;;  %v952_v46 = vmax.f32 %v941_v43, 0.0  ;;  %v939_v47 = vadd.f32 %v1709_v55, %v908_v27  ;;  %v929_v36 = vadd.f32 %v1375_v44, %v1347_v29  ;;  %v826_v48 = vpop.f32.mrf.mxu0 }
 0x11f   : > { %v920_v49 = vpop.f32.mrf.mxu1 }
 0x120   : > { %1177 = vst.msk [vmem:[%s1717_s4 + $0x3c] sm:$0xf] %vm650_vm1, %v1202_v45  ;;  %v1205_v50 = vpack.c.bf16 %v952_v46, %v952_v46  ;;  %v950_v39 = vmax.f32 %v939_v47, 0.0  ;;  %v944_v52 = vadd.f32 %v1709_v55, %v929_v36  ;;  %v921_v53 = vadd.f32 %v920_v49, %v826_v48  ;;  %v1348_v54 = vpop.f32.mrf.mxu0 }
 0x121   : > { %v1376_v56 = vpop.f32.mrf.mxu1 }
 0x122   : > { %1180 = vst.msk [vmem:[%s1717_s4 + $0x48] sm:$0xf] %vm650_vm1, %v1205_v50  ;;  %v1203_v57 = vpack.c.bf16 %v950_v39, %v950_v39  ;;  %v955_v58 = vmax.f32 %v944_v52, 0.0  ;;  %v942_v59 = vadd.f32 %v1709_v55, %v921_v53  ;;  %v829_v60 = vpop.f32.mrf.mxu0 }
 0x123   : > { %v923_v61 = vpop.f32.mrf.mxu1 }
 0x124   : > { %1178 = vst.msk [vmem:[%s1717_s4 + $0x40] sm:$0xf] %vm650_vm1, %v1203_v57  ;;  %v1208_v62 = vpack.c.bf16 %v955_v58, %v955_v58  ;;  %v953_v63 = vmax.f32 %v942_v59, 0.0  ;;  %v924_v11 = vadd.f32 %v923_v61, %v829_v60 }
 0x126   : > { %v1013_v13 = vsel %vm1742_vm4, %v1208_v62, %v1183_v12  ;;  %v1206_v0 = vpack.c.bf16 %v953_v63, %v953_v63  ;;  %v943_v15 = vadd.f32 %v1709_v55, %v924_v11 }
 0x127   : > { %1184 = vst [vmem:[%s1717_s4 + $0x54] sm:$0x1] %v1013_v13 }
 0x128   : > { %1181 = vst.msk [vmem:[%s1717_s4 + $0x4c] sm:$0xf] %vm650_vm1, %v1206_v0  ;;  %v954_v16 = vmax.f32 %v943_v15, 0.0 }
 0x12a   : > { %v1207_v1 = vpack.c.bf16 %v954_v16, %v954_v16 }
 0x12c   : > { %1182 = vst.msk [vmem:[%s1717_s4 + $0x50] sm:$0xf] %vm650_vm1, %v1207_v1 }
 0x12d PF: > { %s13_s12 = sadd.s32 1, %s1433_s12  }
 0x12e   : > { %p10_p4 = scmp.ge.s32.totalorder %s13_s12, 5  }
 0x130   :  { %12 = sbr.rel (!%p10_p4) target bundleno = 1 (0x1), region = 65 }

// kernel: unreal_forward.8
= control target key start
LH: loop header
LB: loop body
LE: loop exit
PB: predicated region body
PF: predicated region fallthrough
CT: control target
= control target key end

     0   :  { %vm887_vm0 = vcmask 1042432   ;;  %vm888_vm1 = vcmask 1043456   ;;  %v1610_v3 = vmov 65535   ;;  %v1611_v5 = vmov 0   ;;  %s2176_s1 = inlined_call_operand.vmem [shape: bf16[263,1024], index: 1, kind: input, shape index: {}]   ;;  %s2177_s0 = inlined_call_operand.vmem [shape: bf16[24,263], index: 0, kind: input, shape index: {}]   ;;  %s2178_s2 = inlined_call_operand.vmem [shape: f32[1,1024], index: 2, kind: input, shape index: {}]   ;;  %s2179_s3 = inlined_call_operand.vmem [shape: bf16[24,1024], index: 3, kind: output, shape index: {}]  }
   0x1   :  { %v77_v0 = vld [vmem:[%s2176_s1 + $0x1c0] sm:$0xff]  ;;  %v889_v4 = vsel %vm887_vm0, 4294967295, %v1610_v3  ;;  %998 = vmatprep.mubr.bf16.mxu1 %v1611_v5  ;;  %v78_v12 = vld [vmem:[%s2176_s1 + $0x1c8] sm:$0xff]  ;;  %vm880_vm2 = vcmask 56320  }
   0x2   :  { %v81_v1 = vld [vmem:[%s2176_s1 + $0x1e0] sm:$0xff]  ;;  %v1642_v9 = vsel %vm888_vm1, %v889_v4, 0  ;;  %v82_v15 = vld [vmem:[%s2176_s1 + $0x1e8] sm:$0xff] }
   0x3   :  { %v149_v2 = vld [vmem:[%s2176_s1 + $0x400] sm:$0xff]  ;;  %v1482_v6 = vcombine.high %v77_v0, %v81_v1  ;;  %v1481_v7 = vcombine.low %v77_v0, %v81_v1  ;;  %v1484_v17 = vcombine.high %v78_v12, %v82_v15  ;;  %v70_v22 = vld [vmem:[%s2176_s1 + $0x188] sm:$0xff]  ;;  %v1483_v26 = vcombine.low %v78_v12, %v82_v15 }
   0x4   :  { %v1554_v8 = vcombine.high %v149_v2, %v149_v2  ;;  %v69_v10 = vld [vmem:[%s2176_s1 + $0x180] sm:$0xff]  ;;  %v1553_v13 = vcombine.low %v149_v2, %v149_v2  ;;  %v74_v23 = vld [vmem:[%s2176_s1 + $0x1a8] sm:$0xff] }
   0x5   :  { %v73_v11 = vld [vmem:[%s2176_s1 + $0x1a0] sm:$0xff]  ;;  %915 = vmatprep.subr.bf16.mxu0 %v1482_v6  ;;  %v1673_v24 = vld [vmem:[%s2177_s0 + $0x8] ss:$12 sps:$4 sm:$0xff]   ;;  %v1476_v29 = vcombine.high %v70_v22, %v74_v23  ;;  %v1475_v34 = vcombine.low %v70_v22, %v74_v23 }
   0x6   :  { %v1474_v14 = vcombine.high %v69_v10, %v73_v11  ;;  %v895_v16 = vand.u32 %v1554_v8, %v1642_v9  ;;  %v61_v18 = vld [vmem:[%s2176_s1 + $0x140] sm:$0xff]  ;;  %916 = vmatpush1.bf16.msra.mxu0 %v1481_v7  ;;  %v892_v20 = vand.u32 %v1553_v13, %v1642_v9  ;;  %v1473_v21 = vcombine.low %v69_v10, %v73_v11  ;;  %v62_v31 = vld [vmem:[%s2176_s1 + $0x148] sm:$0xff]  ;;  %v151_v10 = vld [vmem:[%s2176_s1 + $0x410] sm:$0xff] }
   0x7   :  { %v65_v19 = vld [vmem:[%s2176_s1 + $0x160] sm:$0xff]  ;;  %v66_v32 = vld [vmem:[%s2176_s1 + $0x168] sm:$0xff]  ;;  %v1557_v15 = vcombine.low %v151_v10, %v151_v10 }
   0x8   :  { %980 = vmatprep.subr.bf16.mxu1 %v895_v16  ;;  %917 = vmatprep.subr.bf16.mxu0 %v1474_v14  ;;  %v1466_v25 = vcombine.high %v61_v18, %v65_v19  ;;  %v53_v27 = vld [vmem:[%s2176_s1 + $0x100] sm:$0xff]  ;;  %v1465_v30 = vcombine.low %v61_v18, %v65_v19  ;;  %v1468_v37 = vcombine.high %v62_v31, %v66_v32  ;;  %v54_v39 = vld [vmem:[%s2176_s1 + $0x108] sm:$0xff] }
   0x9   :  { %981 = vmatpush1.bf16.msra.mxu1 %v892_v20  ;;  %v57_v28 = vld [vmem:[%s2176_s1 + $0x120] sm:$0xff]  ;;  %v58_v40 = vld [vmem:[%s2176_s1 + $0x128] sm:$0xff]  ;;  %v1467_v42 = vcombine.low %v62_v31, %v66_v32  ;;  %v1558_v16 = vcombine.high %v151_v10, %v151_v10  ;;  %v1777_v22 = vand.u32 %v1557_v15, %v1642_v9 }
   0xa   :  { %1017 = vmatprep.subr.bf16.mxu1 %v1484_v17  ;;  %918 = vmatpush1.bf16.msra.mxu0 %v1473_v21  ;;  %v1458_v33 = vcombine.high %v53_v27, %v57_v28  ;;  %v45_v35 = vld [vmem:[%s2176_s1 + $0xc0] sm:$0xff]  ;;  %v1457_v38 = vcombine.low %v53_v27, %v57_v28  ;;  %v1460_v45 = vcombine.high %v54_v39, %v58_v40  ;;  %v46_v47 = vld [vmem:[%s2176_s1 + $0xc8] sm:$0xff] }
   0xb   :  { %919 = vmatprep.subr.bf16.mxu0 %v1466_v25  ;;  %v49_v36 = vld [vmem:[%s2176_s1 + $0xe0] sm:$0xff]  ;;  %v50_v48 = vld [vmem:[%s2176_s1 + $0xe8] sm:$0xff]  ;;  %v1459_v50 = vcombine.low %v54_v39, %v58_v40  ;;  %v1774_v21 = vand.u32 %v1558_v16, %v1642_v9 }
   0xc   :  { %1561 = vmatmul.mubr.msk.bf16.vlgmr.msra.gmra.mxu1 %vm880_vm2, %v1673_v24  ;;  %v1450_v41 = vcombine.high %v45_v35, %v49_v36  ;;  %v37_v43 = vld [vmem:[%s2176_s1 + $0x80] sm:$0xff]  ;;  %v1449_v46 = vcombine.low %v45_v35, %v49_v36  ;;  %v1452_v53 = vcombine.high %v46_v47, %v50_v48  ;;  %v38_v55 = vld [vmem:[%s2176_s1 + $0x88] sm:$0xff]  ;;  %v1451_v60 = vcombine.low %v46_v47, %v50_v48 }
   0xd   :  { %1018 = vmatpush1.bf16.msra.mxu1 %v1483_v26  ;;  %1008 = vmatprep.mubr.bf16.mxu1 %v1611_v5  ;;  %v41_v44 = vld [vmem:[%s2176_s1 + $0xa0] sm:$0xff]  ;;  %v42_v56 = vld [vmem:[%s2176_s1 + $0xa8] sm:$0xff] }
   0xe   :  { %1019 = vmatprep.subr.bf16.mxu1 %v1476_v29  ;;  %920 = vmatpush1.bf16.msra.mxu0 %v1465_v30  ;;  %v1442_v49 = vcombine.high %v37_v43, %v41_v44  ;;  %v29_v51 = vld [vmem:[%s2176_s1 + $0x40] sm:$0xff]  ;;  %v1441_v54 = vcombine.low %v37_v43, %v41_v44  ;;  %v1444_v62 = vcombine.high %v38_v55, %v42_v56  ;;  %v30_v1 = vld [vmem:[%s2176_s1 + $0x48] sm:$0xff] }
   0xf   :  { %921 = vmatprep.subr.bf16.mxu0 %v1458_v33  ;;  %v33_v52 = vld [vmem:[%s2176_s1 + $0x60] sm:$0xff]  ;;  %v34_v2 = vld [vmem:[%s2176_s1 + $0x68] sm:$0xff]  ;;  %v1443_v4 = vcombine.low %v38_v55, %v42_v56 }
  0x10   :  { %v1434_v57 = vcombine.high %v29_v51, %v33_v52  ;;  %v21_v58 = vld [vmem:[%s2176_s1] sm:$0xff]  ;;  %v1433_v0 = vcombine.low %v29_v51, %v33_v52  ;;  %v1436_v8 = vcombine.high %v30_v1, %v34_v2  ;;  %v22_v12 = vld [vmem:[%s2176_s1 + $0x8] sm:$0xff]  ;;  %v1435_v17 = vcombine.low %v30_v1, %v34_v2  ;;  %v152_v52 = vld [vmem:[%s2176_s1 + $0x418] sm:$0xff] }
  0x11   :  { %1020 = vmatpush1.bf16.msra.mxu1 %v1475_v34  ;;  %v25_v59 = vld [vmem:[%s2176_s1 + $0x20] sm:$0xff]  ;;  %v26_v13 = vld [vmem:[%s2176_s1 + $0x28] sm:$0xff]  ;;  %v1559_v56 = vcombine.low %v152_v52, %v152_v52 }
  0x12   :  { %1021 = vmatprep.subr.bf16.mxu1 %v1468_v37  ;;  %922 = vmatpush1.bf16.msra.mxu0 %v1457_v38  ;;  %v1735_v61 = vld [vmem:[%s2177_s0 + $0x4] ss:$12 sps:$4 sm:$0xff]   ;;  %v1740_v63 = vld [vmem:[%s2177_s0 + $0x20] ss:$0 sps:$4 sm:$0xff]   ;;  %v1426_v3 = vcombine.high %v21_v58, %v25_v59  ;;  %v1425_v11 = vcombine.low %v21_v58, %v25_v59  ;;  %v1428_v20 = vcombine.high %v22_v12, %v26_v13  ;;  %v142_v25 = vld [vmem:[%s2176_s1 + $0x3c8] sm:$0xff] }
  0x13   :  { %923 = vmatprep.subr.bf16.mxu0 %v1450_v41  ;;  %947 = vmatprep.mubr.bf16.mxu0 %v1735_v61  ;;  %v141_v6 = vld [vmem:[%s2176_s1 + $0x3c0] sm:$0xff]  ;;  %v146_v26 = vld [vmem:[%s2176_s1 + $0x3e8] sm:$0xff]  ;;  %v1427_v28 = vcombine.low %v22_v12, %v26_v13  ;;  %v1840_v1 = vand.u32 %v1559_v56, %v1642_v9  ;;  %v47_v56 = vld [vmem:[%s2176_s1 + $0xd0] sm:$0xff] }
  0x14   :  { %1562 = vmatmul.mubr.msk.bf16.gmra.mxu1 %vm880_vm2, %v1740_v63  ;;  %v145_v7 = vld [vmem:[%s2176_s1 + $0x3e0] sm:$0xff]  ;;  %v1548_v31 = vcombine.high %v142_v25, %v146_v26  ;;  %v134_v33 = vld [vmem:[%s2176_s1 + $0x388] sm:$0xff]  ;;  %v1547_v36 = vcombine.low %v142_v25, %v146_v26 }
  0x15   :  { %1022 = vmatpush1.bf16.msra.mxu1 %v1467_v42  ;;  %1049 = vmatprep.mubr.bf16.mxu1 %v1735_v61  ;;  %v1546_v14 = vcombine.high %v141_v6, %v145_v7  ;;  %v133_v18 = vld [vmem:[%s2176_s1 + $0x380] sm:$0xff]  ;;  %v1545_v23 = vcombine.low %v141_v6, %v145_v7  ;;  %v138_v34 = vld [vmem:[%s2176_s1 + $0x3a8] sm:$0xff] }
  0x16   :  { %1023 = vmatprep.subr.bf16.mxu1 %v1460_v45  ;;  %924 = vmatpush1.bf16.msra.mxu0 %v1449_v46  ;;  %v137_v19 = vld [vmem:[%s2176_s1 + $0x3a0] sm:$0xff]  ;;  %v1540_v39 = vcombine.high %v134_v33, %v138_v34  ;;  %v126_v41 = vld [vmem:[%s2176_s1 + $0x348] sm:$0xff]  ;;  %v1539_v44 = vcombine.low %v134_v33, %v138_v34  ;;  %v19_v33 = vld [vmem:[%s2177_s0 + $0x18] sm:$0xff] }
  0x17   :  { %925 = vmatprep.subr.bf16.mxu0 %v1442_v49  ;;  %v1538_v27 = vcombine.high %v133_v18, %v137_v19  ;;  %v125_v29 = vld [vmem:[%s2176_s1 + $0x340] sm:$0xff]  ;;  %v1537_v32 = vcombine.low %v133_v18, %v137_v19  ;;  %v130_v42 = vld [vmem:[%s2176_s1 + $0x368] sm:$0xff] }
  0x18   :  { %v129_v30 = vld [vmem:[%s2176_s1 + $0x360] sm:$0xff]  ;;  %v1532_v47 = vcombine.high %v126_v41, %v130_v42  ;;  %v118_v49 = vld [vmem:[%s2176_s1 + $0x308] sm:$0xff] }
  0x19   :  { %1024 = vmatpush1.bf16.msra.mxu1 %v1459_v50  ;;  %v1530_v35 = vcombine.high %v125_v29, %v129_v30  ;;  %v117_v37 = vld [vmem:[%s2176_s1 + $0x300] sm:$0xff]  ;;  %v1529_v40 = vcombine.low %v125_v29, %v129_v30  ;;  %v122_v50 = vld [vmem:[%s2176_s1 + $0x328] sm:$0xff] }
  0x1a   :  { %1025 = vmatprep.subr.bf16.mxu1 %v1452_v53  ;;  %926 = vmatpush1.bf16.msra.mxu0 %v1441_v54  ;;  %v121_v38 = vld [vmem:[%s2176_s1 + $0x320] sm:$0xff]  ;;  %v1531_v53 = vcombine.low %v126_v41, %v130_v42  ;;  %v1524_v58 = vcombine.high %v118_v49, %v122_v50  ;;  %v102_v10 = vld [vmem:[%s2176_s1 + $0x288] sm:$0xff] }
  0x1b   :  { %927 = vmatprep.subr.bf16.mxu0 %v1434_v57  ;;  %v1522_v43 = vcombine.high %v117_v37, %v121_v38  ;;  %v109_v45 = vld [vmem:[%s2176_s1 + $0x2c0] sm:$0xff]  ;;  %v1521_v48 = vcombine.low %v117_v37, %v121_v38  ;;  %v1560_v57 = vcombine.high %v152_v52, %v152_v52  ;;  %v150_v16 = vld [vmem:[%s2176_s1 + $0x408] sm:$0xff]  ;;  %v79_v38 = vld [vmem:[%s2176_s1 + $0x1d0] sm:$0xff] }
  0x1c   :  { %v113_v46 = vld [vmem:[%s2176_s1 + $0x2e0] sm:$0xff]  ;;  %v94_v19 = vld [vmem:[%s2176_s1 + $0x248] sm:$0xff]  ;;  %v1556_v25 = vcombine.high %v150_v16, %v150_v16  ;;  %v1555_v29 = vcombine.low %v150_v16, %v150_v16 }
  0x1d   :  { %1026 = vmatpush1.bf16.msra.mxu1 %v1451_v60  ;;  %v1514_v51 = vcombine.high %v109_v45, %v113_v46  ;;  %v101_v54 = vld [vmem:[%s2176_s1 + $0x280] sm:$0xff]  ;;  %v1513_v59 = vcombine.low %v109_v45, %v113_v46  ;;  %v110_v60 = vld [vmem:[%s2176_s1 + $0x2c8] sm:$0xff]  ;;  %v1902_v45 = vcombine.low %v19_v33, %v19_v33 }
  0x1e   :  { %1027 = vmatprep.subr.bf16.mxu1 %v1444_v62  ;;  %928 = vmatpush1.bf16.msra.mxu0 %v1433_v0  ;;  %v105_v55 = vld [vmem:[%s2176_s1 + $0x2a0] sm:$0xff]  ;;  %v114_v62 = vld [vmem:[%s2176_s1 + $0x2e8] sm:$0xff]  ;;  %v1837_v0 = vand.u32 %v1560_v57, %v1642_v9  ;;  %v898_v37 = vand.u32 %v1555_v29, %v1642_v9  ;;  %v51_v57 = vld [vmem:[%s2176_s1 + $0xf0] sm:$0xff] }
  0x1f   :  { %929 = vmatprep.subr.bf16.mxu0 %v1426_v3  ;;  %v1506_v2 = vcombine.high %v101_v54, %v105_v55  ;;  %v1523_v3 = vcombine.low %v118_v49, %v122_v50  ;;  %v97_v6 = vld [vmem:[%s2176_s1 + $0x260] sm:$0xff]  ;;  %v1516_v7 = vcombine.high %v110_v60, %v114_v62  ;;  %v1515_v13 = vcombine.low %v110_v60, %v114_v62  ;;  %v86_v30 = vld [vmem:[%s2176_s1 + $0x208] sm:$0xff]  ;;  %v55_v50 = vld [vmem:[%s2176_s1 + $0x110] sm:$0xff] }
  0x20   :  { %v89_v15 = vld [vmem:[%s2176_s1 + $0x220] sm:$0xff]  ;;  %v1454_v60 = vcombine.high %v47_v56, %v51_v57  ;;  %v39_v62 = vld [vmem:[%s2176_s1 + $0x90] sm:$0xff] }
  0x21   :  { %1028 = vmatpush1.bf16.msra.mxu1 %v1443_v4  ;;  %v93_v4 = vld [vmem:[%s2176_s1 + $0x240] sm:$0xff]  ;;  %v139_v29 = vld [vmem:[%s2176_s1 + $0x3b0] sm:$0xff] }
  0x22   :  { %1029 = vmatprep.subr.bf16.mxu1 %v1436_v8  ;;  %930 = vmatpush1.bf16.msra.mxu0 %v1425_v11  ;;  %v1505_v8 = vcombine.low %v101_v54, %v105_v55  ;;  %v106_v11 = vld [vmem:[%s2176_s1 + $0x2a8] sm:$0xff]  ;;  %v1498_v12 = vcombine.high %v93_v4, %v97_v6  ;;  %v1497_v18 = vcombine.low %v93_v4, %v97_v6  ;;  %v84_v54 = vld [vmem:[%s2176_s1 + $0x1f8] sm:$0xff]  ;;  %v31_v6 = vld [vmem:[%s2176_s1 + $0x50] sm:$0xff] }
  0x23   :  { %931 = vmatprep.subr.bf16.mxu0 %v1546_v14  ;;  %v85_v14 = vld [vmem:[%s2176_s1 + $0x200] sm:$0xff]  ;;  %v1507_v26 = vcombine.low %v102_v10, %v106_v11 }
  0x25   :  { %1030 = vmatpush1.bf16.msra.mxu1 %v1435_v17  ;;  %v1508_v17 = vcombine.high %v102_v10, %v106_v11  ;;  %v23_v10 = vld [vmem:[%s2176_s1 + $0x10] sm:$0xff] }
  0x26   :  { %1031 = vmatprep.subr.bf16.mxu1 %v1428_v20  ;;  %932 = vmatpush2.bf16.msra.mxu0 %v1545_v23  ;;  %v98_v20 = vld [vmem:[%s2176_s1 + $0x268] sm:$0xff]  ;;  %v1490_v23 = vcombine.high %v85_v14, %v89_v15  ;;  %v27_v11 = vld [vmem:[%s2176_s1 + $0x30] sm:$0xff] }
  0x27   :  { %933 = vmatprep.subr.bf16.mxu0 %v1538_v27  ;;  %v1500_v27 = vcombine.high %v94_v19, %v98_v20  ;;  %v1499_v34 = vcombine.low %v94_v19, %v98_v20  ;;  %v1429_v20 = vcombine.low %v23_v10, %v27_v11 }
  0x29   :  { %1032 = vmatpush1.bf16.msra.mxu1 %v1427_v28  ;;  %v1489_v28 = vcombine.low %v85_v14, %v89_v15  ;;  %v76_v14 = vld [vmem:[%s2176_s1 + $0x1b8] sm:$0xff]  ;;  %v1430_v15 = vcombine.high %v23_v10, %v27_v11  ;;  %v99_v10 = vld [vmem:[%s2176_s1 + $0x270] sm:$0xff] }
  0x2a   :  { %1033 = vmatprep.subr.bf16.mxu1 %v1548_v31  ;;  %934 = vmatpush2.bf16.msra.mxu0 %v1537_v32  ;;  %v90_v31 = vld [vmem:[%s2176_s1 + $0x228] sm:$0xff]  ;;  %v901_v32 = vand.u32 %v1556_v25, %v1642_v9  ;;  %v71_v9 = vld [vmem:[%s2176_s1 + $0x190] sm:$0xff]  ;;  %v68_v25 = vld [vmem:[%s2176_s1 + $0x178] sm:$0xff] }
  0x2b   :  { %935 = vmatprep.subr.bf16.mxu0 %v1530_v35  ;;  %v1882_v35 = vld [vmem:[%s2177_s0] ss:$12 sps:$4 sm:$0xff]   ;;  %v1491_v41 = vcombine.low %v86_v30, %v90_v31 }
  0x2d   :  { %1034 = vmatpush2.bf16.msra.mxu1 %v1547_v36  ;;  %v1492_v36 = vcombine.high %v86_v30, %v90_v31 }
  0x2e   :  { %1035 = vmatprep.subr.bf16.mxu1 %v1540_v39  ;;  %936 = vmatpush2.bf16.msra.mxu0 %v1529_v40  ;;  %v83_v39 = vld [vmem:[%s2176_s1 + $0x1f0] sm:$0xff]  ;;  %v1891_v40 = vcombine.high %v19_v33, %v19_v33  ;;  %v60_v33 = vld [vmem:[%s2176_s1 + $0x138] sm:$0xff] }
  0x2f   :  { %937 = vmatprep.subr.bf16.mxu0 %v1522_v43  ;;  %v1486_v42 = vcombine.high %v79_v38, %v83_v39  ;;  %v75_v43 = vld [vmem:[%s2176_s1 + $0x1b0] sm:$0xff] }
  0x30   :  { %v1478_v46 = vcombine.high %v71_v9, %v75_v43  ;;  %v1477_v49 = vcombine.low %v71_v9, %v75_v43  ;;  %v52_v9 = vld [vmem:[%s2176_s1 + $0xf8] sm:$0xff] }
  0x31   :  { %1036 = vmatpush2.bf16.msra.mxu1 %v1539_v44  ;;  %v1485_v44 = vcombine.low %v79_v38, %v83_v39  ;;  %v131_v38 = vld [vmem:[%s2176_s1 + $0x370] sm:$0xff] }
  0x32   :  { %1037 = vmatprep.subr.bf16.mxu1 %v1532_v47  ;;  %938 = vmatpush2.bf16.msra.mxu0 %v1521_v48  ;;  %v63_v47 = vld [vmem:[%s2176_s1 + $0x150] sm:$0xff] }
  0x33   :  { %939 = vmatprep.subr.bf16.mxu0 %v1514_v51  ;;  %v67_v48 = vld [vmem:[%s2176_s1 + $0x170] sm:$0xff] }
  0x34   :  { %v59_v51 = vld [vmem:[%s2176_s1 + $0x130] sm:$0xff]  ;;  %v1469_v52 = vcombine.low %v63_v47, %v67_v48 }
  0x35   :  { %1038 = vmatpush2.bf16.msra.mxu1 %v1531_v53  ;;  %v80_v53 = vld [vmem:[%s2176_s1 + $0x1d8] sm:$0xff]  ;;  %v1462_v55 = vcombine.high %v55_v50, %v59_v51 }
  0x36   :  { %1039 = vmatprep.subr.bf16.mxu1 %v1524_v58  ;;  %940 = vmatpush2.bf16.msra.mxu0 %v1513_v59  ;;  %v1488_v58 = vcombine.high %v80_v53, %v84_v54  ;;  %v1461_v59 = vcombine.low %v55_v50, %v59_v51  ;;  %v1487_v16 = vcombine.low %v80_v53, %v84_v54  ;;  %v44_v50 = vld [vmem:[%s2176_s1 + $0xb8] sm:$0xff]  ;;  %v115_v53 = vld [vmem:[%s2176_s1 + $0x2f0] sm:$0xff] }
  0x37   :  { %941 = vmatprep.subr.bf16.mxu0 %v1506_v2  ;;  %v43_v2 = vld [vmem:[%s2176_s1 + $0xb0] sm:$0xff] }
  0x38   :  { %v1446_v4 = vcombine.high %v39_v62, %v43_v2 }
  0x39   :  { %1040 = vmatpush2.bf16.msra.mxu1 %v1523_v3  ;;  %v1453_v3 = vcombine.low %v47_v56, %v51_v57  ;;  %v32_v56 = vld [vmem:[%s2176_s1 + $0x58] sm:$0xff] }
  0x3a   :  { %1041 = vmatprep.subr.bf16.mxu1 %v1516_v7  ;;  %942 = vmatpush2.bf16.msra.mxu0 %v1505_v8  ;;  %v1445_v7 = vcombine.low %v39_v62, %v43_v2  ;;  %v36_v57 = vld [vmem:[%s2176_s1 + $0x78] sm:$0xff]  ;;  %v107_v62 = vld [vmem:[%s2176_s1 + $0x2b0] sm:$0xff] }
  0x3b   :  { %943 = vmatprep.subr.bf16.mxu0 %v1498_v12  ;;  %v1440_v2 = vcombine.high %v32_v56, %v36_v57 }
  0x3d   :  { %1042 = vmatpush2.bf16.msra.mxu1 %v1515_v13  ;;  %v72_v13 = vld [vmem:[%s2176_s1 + $0x198] sm:$0xff] }
  0x3e   :  { %1043 = vmatprep.subr.bf16.mxu1 %v1508_v17  ;;  %944 = vmatpush2.bf16.msra.mxu0 %v1497_v18  ;;  %v143_v17 = vld [vmem:[%s2176_s1 + $0x3d0] sm:$0xff]  ;;  %v1480_v19 = vcombine.high %v72_v13, %v76_v14 }
  0x3f   :  { %945 = vmatprep.subr.bf16.mxu0 %v1490_v23  ;;  %v147_v18 = vld [vmem:[%s2176_s1 + $0x3f0] sm:$0xff]  ;;  %v64_v23 = vld [vmem:[%s2176_s1 + $0x158] sm:$0xff] }
  0x40   :  { %v1472_v30 = vcombine.high %v64_v23, %v68_v25  ;;  %v1549_v31 = vcombine.low %v143_v17, %v147_v18 }
  0x41   :  { %1044 = vmatpush2.bf16.msra.mxu1 %v1507_v26  ;;  %v1550_v26 = vcombine.high %v143_v17, %v147_v18  ;;  %v87_v17 = vld [vmem:[%s2176_s1 + $0x210] sm:$0xff] }
  0x42   :  { %1045 = vmatprep.subr.bf16.mxu1 %v1500_v27  ;;  %946 = vmatpush2.bf16.msra.mxu0 %v1489_v28  ;;  %v1479_v27 = vcombine.low %v72_v13, %v76_v14  ;;  %v135_v28 = vld [vmem:[%s2176_s1 + $0x390] sm:$0xff]  ;;  %v144_v13 = vld [vmem:[%s2176_s1 + $0x3d8] sm:$0xff] }
  0x43   :  { %1082 = vmatprep.subr.bf16.mxu0 %v901_v32  ;;  %v56_v32 = vld [vmem:[%s2176_s1 + $0x118] sm:$0xff]  ;;  %v91_v18 = vld [vmem:[%s2176_s1 + $0x230] sm:$0xff] }
  0x44   :  { %v1464_v39 = vcombine.high %v56_v32, %v60_v33  ;;  %v148_v14 = vld [vmem:[%s2176_s1 + $0x3f8] sm:$0xff] }
  0x45   :  { %1046 = vmatpush2.bf16.msra.mxu1 %v1499_v34  ;;  %948 = vmatmul.mubr.bf16.vlgmr.msra.gmra.mxu0 %v1882_v35  ;;  %v1542_v34 = vcombine.high %v135_v28, %v139_v29 }
  0x46   :  { %1047 = vmatprep.subr.bf16.mxu1 %v1492_v36  ;;  %1083 = vmatpush1.bf16.msra.mxu0 %v898_v37  ;;  %v1471_v36 = vcombine.low %v64_v23, %v68_v25  ;;  %v127_v37 = vld [vmem:[%s2176_s1 + $0x350] sm:$0xff]  ;;  %v136_v23 = vld [vmem:[%s2176_s1 + $0x398] sm:$0xff] }
  0x47   :  { %957 = vmatprep.mubr.bf16.mxu0 %v1891_v40  ;;  %1184 = vmatprep.subr.bf16.mxu0 %v1774_v21  ;;  %v1470_v21 = vcombine.high %v63_v47, %v67_v48  ;;  %v1534_v43 = vcombine.high %v127_v37, %v131_v38  ;;  %v123_v47 = vld [vmem:[%s2176_s1 + $0x330] sm:$0xff]  ;;  %v140_v25 = vld [vmem:[%s2176_s1 + $0x3b8] sm:$0xff] }
  0x49   :  { %1048 = vmatpush2.bf16.msra.mxu1 %v1491_v41  ;;  %v1541_v41 = vcombine.low %v135_v28, %v139_v29  ;;  %v1544_v28 = vcombine.high %v136_v23, %v140_v25  ;;  %v1493_v29 = vcombine.low %v87_v17, %v91_v18 }
  0x4a   :  { %1119 = vmatprep.subr.bf16.mxu1 %v1486_v42  ;;  %v48_v42 = vld [vmem:[%s2176_s1 + $0xd8] sm:$0xff] }
  0x4b   :  { %v1456_v48 = vcombine.high %v48_v42, %v52_v9 }
  0x4c   :  { %1050 = vmatmul.mubr.bf16.vlgmr.msra.gmra.mxu1 %v1882_v35 }
  0x4d   :  { %1120 = vmatpush1.bf16.msra.mxu1 %v1485_v44  ;;  %1059 = vmatprep.mubr.bf16.mxu1 %v1891_v40  ;;  %v1463_v44 = vcombine.low %v56_v32, %v60_v33  ;;  %v1543_v32 = vcombine.low %v136_v23, %v140_v25 }
  0x4e   :  { %958 = vmatmul.mubr.bf16.gmra.mxu0 %v1902_v45  ;;  %1121 = vmatprep.subr.bf16.mxu1 %v1478_v46  ;;  %v119_v46 = vld [vmem:[%s2176_s1 + $0x310] sm:$0xff] }
  0x4f   :  { %1100 = vmatprep.mubr.bf16.mxu0 %v1611_v5  ;;  %v1526_v51 = vcombine.high %v119_v46, %v123_v47 }
  0x51   :  { %1122 = vmatpush1.bf16.msra.mxu1 %v1477_v49  ;;  %v1533_v49 = vcombine.low %v127_v37, %v131_v38 }
  0x52   :  { %1123 = vmatprep.subr.bf16.mxu1 %v1470_v21  ;;  %v40_v21 = vld [vmem:[%s2176_s1 + $0x98] sm:$0xff] }
  0x53   :  { %v1448_v54 = vcombine.high %v40_v21, %v44_v50 }
  0x54   :  { %1060 = vmatmul.mubr.bf16.gmra.mxu1 %v1902_v45 }
  0x55   :  { %1124 = vmatpush1.bf16.msra.mxu1 %v1469_v52  ;;  %1151 = vmatprep.mubr.bf16.mxu1 %v1735_v61  ;;  %v1455_v52 = vcombine.low %v48_v42, %v52_v9  ;;  %v104_v9 = vld [vmem:[%s2176_s1 + $0x298] sm:$0xff] }
  0x56   :  { %1563 = vmatmul.mubr.msk.bf16.vlgmr.msra.gmra.mxu0 %vm880_vm2, %v1673_v24  ;;  %1125 = vmatprep.subr.bf16.mxu1 %v1462_v55  ;;  %v1525_v55 = vcombine.low %v119_v46, %v123_v47  ;;  %v100_v47 = vld [vmem:[%s2176_s1 + $0x278] sm:$0xff] }
  0x57   :  { %1185 = vmatpush1.bf16.msra.mxu0 %v1777_v22  ;;  %1110 = vmatprep.mubr.bf16.mxu0 %v1611_v5  ;;  %v35_v22 = vld [vmem:[%s2176_s1 + $0x70] sm:$0xff] }
  0x58   :  { %1221 = vmatprep.subr.bf16.mxu0 %v1488_v58  ;;  %v1438_v8 = vcombine.high %v31_v6, %v35_v22  ;;  %v1437_v12 = vcombine.low %v31_v6, %v35_v22  ;;  %v28_v6 = vld [vmem:[%s2176_s1 + $0x38] sm:$0xff] }
  0x59   :  { %1126 = vmatpush1.bf16.msra.mxu1 %v1461_v59  ;;  %v1447_v59 = vcombine.low %v40_v21, %v44_v50  ;;  %v88_v21 = vld [vmem:[%s2176_s1 + $0x218] sm:$0xff] }
  0x5a   :  { %1127 = vmatprep.subr.bf16.mxu1 %v1454_v60  ;;  %v103_v60 = vld [vmem:[%s2176_s1 + $0x290] sm:$0xff]  ;;  %v92_v50 = vld [vmem:[%s2176_s1 + $0x238] sm:$0xff] }
  0x5b   :  { %v1510_v22 = vcombine.high %v103_v60, %v107_v62 }
  0x5d   :  { %1128 = vmatpush1.bf16.msra.mxu1 %v1453_v3 }
  0x5e   :  { %1564 = vmatmul.mubr.msk.bf16.gmra.mxu0 %vm880_vm2, %v1740_v63  ;;  %1129 = vmatprep.subr.bf16.mxu1 %v1446_v4  ;;  %v24_v4 = vld [vmem:[%s2176_s1 + $0x18] sm:$0xff] }
  0x5f   :  { %1202 = vmatprep.mubr.bf16.mxu0 %v1611_v5  ;;  %v1432_v11 = vcombine.high %v24_v4, %v28_v6 }
  0x61   :  { %1130 = vmatpush1.bf16.msra.mxu1 %v1445_v7  ;;  %v1439_v7 = vcombine.low %v32_v56, %v36_v57 }
  0x62   :  { %1131 = vmatprep.subr.bf16.mxu1 %v1438_v8  ;;  %v95_v8 = vld [vmem:[%s2176_s1 + $0x250] sm:$0xff] }
  0x65   :  { %1132 = vmatpush1.bf16.msra.mxu1 %v1437_v12  ;;  %v1509_v12 = vcombine.low %v103_v60, %v107_v62 }
  0x66   :  { %1565 = vmatmul.mubr.msk.bf16.vlgmr.msra.gmra.mxu0 %vm880_vm2, %v1673_v24  ;;  %1133 = vmatprep.subr.bf16.mxu1 %v1430_v15  ;;  %v1502_v15 = vcombine.high %v95_v8, %v99_v10 }
  0x67   :  { %1222 = vmatpush1.bf16.msra.mxu0 %v1487_v16  ;;  %1212 = vmatprep.mubr.bf16.mxu0 %v1611_v5  ;;  %v1431_v16 = vcombine.low %v24_v4, %v28_v6 }
  0x68   :  { %1223 = vmatprep.subr.bf16.mxu0 %v1480_v19  ;;  %v1552_v19 = vcombine.high %v144_v13, %v148_v14 }
  0x69   :  { %1134 = vmatpush1.bf16.msra.mxu1 %v1429_v20  ;;  %v1501_v20 = vcombine.low %v95_v8, %v99_v10 }
  0x6a   :  { %1135 = vmatprep.subr.bf16.mxu1 %v1550_v26  ;;  %v1494_v26 = vcombine.high %v87_v17, %v91_v18 }
  0x6b   :  { %1224 = vmatpush1.bf16.msra.mxu0 %v1479_v27  ;;  %v1551_v27 = vcombine.low %v144_v13, %v148_v14 }
  0x6c   :  { %1225 = vmatprep.subr.bf16.mxu0 %v1472_v30  ;;  %v128_v30 = vld [vmem:[%s2176_s1 + $0x358] sm:$0xff] }
  0x6d   :  { %1136 = vmatpush2.bf16.msra.mxu1 %v1549_v31  ;;  %v132_v31 = vld [vmem:[%s2176_s1 + $0x378] sm:$0xff] }
  0x6e   :  { %1137 = vmatprep.subr.bf16.mxu1 %v1542_v34  ;;  %1566 = vmatmul.mubr.msk.bf16.gmra.mxu0 %vm880_vm2, %v1740_v63  ;;  %v1536_v33 = vcombine.high %v128_v30, %v132_v31  ;;  %v120_v34 = vld [vmem:[%s2176_s1 + $0x318] sm:$0xff]  ;;  %v1535_v37 = vcombine.low %v128_v30, %v132_v31 }
  0x6f   :  { %1226 = vmatpush1.bf16.msra.mxu0 %v1471_v36  ;;  %1253 = vmatprep.mubr.bf16.mxu0 %v1735_v61  ;;  %v111_v61 = vld [vmem:[%s2176_s1 + $0x2d0] sm:$0xff]  ;;  %v124_v36 = vld [vmem:[%s2176_s1 + $0x338] sm:$0xff] }
  0x70   :  { %1227 = vmatprep.subr.bf16.mxu0 %v1464_v39  ;;  %v1518_v58 = vcombine.high %v111_v61, %v115_v53  ;;  %v1517_v3 = vcombine.low %v111_v61, %v115_v53  ;;  %v1528_v38 = vcombine.high %v120_v34, %v124_v36  ;;  %v112_v39 = vld [vmem:[%s2176_s1 + $0x2d8] sm:$0xff]  ;;  %v1495_v61 = vcombine.low %v88_v21, %v92_v50 }
  0x71   :  { %1138 = vmatpush2.bf16.msra.mxu1 %v1541_v41  ;;  %v116_v41 = vld [vmem:[%s2176_s1 + $0x2f8] sm:$0xff] }
  0x72   :  { %1139 = vmatprep.subr.bf16.mxu1 %v1534_v43  ;;  %v1520_v42 = vcombine.high %v112_v39, %v116_v41  ;;  %v108_v43 = vld [vmem:[%s2176_s1 + $0x2b8] sm:$0xff] }
  0x73   :  { %1228 = vmatpush1.bf16.msra.mxu0 %v1463_v44  ;;  %v1519_v44 = vcombine.low %v112_v39, %v116_v41  ;;  %v1512_v46 = vcombine.high %v104_v9, %v108_v43 }
  0x74   :  { %1229 = vmatprep.subr.bf16.mxu0 %v1456_v48  ;;  %v1511_v48 = vcombine.low %v104_v9, %v108_v43 }
  0x75   :  { %1140 = vmatpush2.bf16.msra.mxu1 %v1533_v49 }
  0x76   :  { %1141 = vmatprep.subr.bf16.mxu1 %v1526_v51 }
  0x77   :  { %1230 = vmatpush1.bf16.msra.mxu0 %v1455_v52  ;;  %v1496_v52 = vcombine.high %v88_v21, %v92_v50 }
  0x78   :  { %1231 = vmatprep.subr.bf16.mxu0 %v1448_v54 }
  0x79   :  { %1142 = vmatpush2.bf16.msra.mxu1 %v1525_v55 }
  0x7a   :  { %1143 = vmatprep.subr.bf16.mxu1 %v1518_v58 }
  0x7b   :  { %1232 = vmatpush1.bf16.msra.mxu0 %v1447_v59  ;;  %v155_v59 = vlaneseq }
  0x7c   :  { %1233 = vmatprep.subr.bf16.mxu0 %v1440_v2 }
  0x7d   :  { %1144 = vmatpush2.bf16.msra.mxu1 %v1517_v3  ;;  %v2117_v60 = vshrl.u32 %v155_v59, 7 }
  0x7e   :  { %1145 = vmatprep.subr.bf16.mxu1 %v1510_v22 }
  0x7f   :  { %1234 = vmatpush1.bf16.msra.mxu0 %v1439_v7  ;;  %v157_v62 = vsub.s32 0, %v2117_v60 }
  0x80   :  { %1235 = vmatprep.subr.bf16.mxu0 %v1432_v11 }
  0x81   :  { %1146 = vmatpush2.bf16.msra.mxu1 %v1509_v12 }
  0x82   :  { %1147 = vmatprep.subr.bf16.mxu1 %v1502_v15  ;;  %v165_v15 = vsub.s32 2, %v2117_v60 }
  0x83   :  { %1236 = vmatpush1.bf16.msra.mxu0 %v1431_v16  ;;  %v169_v16 = vsub.s32 3, %v2117_v60 }
  0x84   :  { %1237 = vmatprep.subr.bf16.mxu0 %v1552_v19 }
  0x85   :  { %1148 = vmatpush2.bf16.msra.mxu1 %v1501_v20 }
  0x86   :  { %1149 = vmatprep.subr.bf16.mxu1 %v1494_v26 }
  0x87   :  { %1238 = vmatpush2.bf16.msra.mxu0 %v1551_v27 }
  0x88   :  { %1239 = vmatprep.subr.bf16.mxu0 %v1544_v28 }
  0x89   :  { %1150 = vmatpush2.bf16.msra.mxu1 %v1493_v29 }
  0x8a   :  { %1286 = vmatprep.subr.bf16.mxu1 %v1837_v0  ;;  %v1527_v0 = vcombine.low %v120_v34, %v124_v36 }
  0x8b   :  { %1240 = vmatpush2.bf16.msra.mxu0 %v1543_v32 }
  0x8c   :  { %1152 = vmatmul.mubr.bf16.vlgmr.msra.gmra.mxu1 %v1882_v35  ;;  %1241 = vmatprep.subr.bf16.mxu0 %v1536_v33 }
  0x8d   :  { %1287 = vmatpush1.bf16.msra.mxu1 %v1840_v1  ;;  %1161 = vmatprep.mubr.bf16.mxu1 %v1891_v40  ;;  %v96_v1 = vld [vmem:[%s2176_s1 + $0x258] sm:$0xff] }
  0x8e   :  { %v1504_v49 = vcombine.high %v96_v1, %v100_v47  ;;  %v1503_v51 = vcombine.low %v96_v1, %v100_v47 }
  0x8f   :  { %1242 = vmatpush2.bf16.msra.mxu0 %v1535_v37 }
  0x90   :  { %1243 = vmatprep.subr.bf16.mxu0 %v1528_v38 }
  0x93   :  { %1244 = vmatpush2.bf16.msra.mxu0 %v1527_v0 }
  0x94   :  { %1245 = vmatprep.subr.bf16.mxu0 %v1520_v42  ;;  %1162 = vmatmul.mubr.bf16.gmra.mxu1 %v1902_v45 }
  0x95   :  { %1304 = vmatprep.mubr.bf16.mxu1 %v1611_v5 }
  0x97   :  { %1246 = vmatpush2.bf16.msra.mxu0 %v1519_v44 }
  0x98   :  { %1247 = vmatprep.subr.bf16.mxu0 %v1512_v46 }
  0x9b   :  { %1248 = vmatpush2.bf16.msra.mxu0 %v1511_v48 }
  0x9c   :  { %1249 = vmatprep.subr.bf16.mxu0 %v1504_v49  ;;  %1567 = vmatmul.mubr.msk.bf16.vlgmr.msra.gmra.mxu1 %vm880_vm2, %v1673_v24 }
  0x9d   :  { %1314 = vmatprep.mubr.bf16.mxu1 %v1611_v5 }
  0x9f   :  { %1250 = vmatpush2.bf16.msra.mxu0 %v1503_v51 }
  0xa0   :  { %1251 = vmatprep.subr.bf16.mxu0 %v1496_v52 }
  0xa3   :  { %1252 = vmatpush2.bf16.msra.mxu0 %v1495_v61 }
  0xa4   :  { %1568 = vmatmul.mubr.msk.bf16.gmra.mxu1 %vm880_vm2, %v1740_v63  ;;  %v2123_v63 = vld [vmem:[%s2178_s2] sm:$0xff] }
  0xa5   :  { %v166_v29 = vrot.slane %v2123_v63, %v165_v15  ;;  %v170_v30 = vrot.slane %v2123_v63, %v169_v16 }
  0xa6   :  { %1254 = vmatmul.mubr.bf16.vlgmr.msra.gmra.mxu0 %v1882_v35  ;;  %v161_v35 = vsub.s32 1, %v2117_v60 }
  0xa7   :  { %1263 = vmatprep.mubr.bf16.mxu0 %v1891_v40  ;;  %v158_v40 = vrot.slane %v2123_v63, %v157_v62 }
  0xae   :  { %1264 = vmatmul.mubr.bf16.gmra.mxu0 %v1902_v45  ;;  %v162_v45 = vrot.slane %v2123_v63, %v161_v35 }
  0xcc   :  { %v1000_v53 = vpop.f32.mrf.mxu1 }
  0xce   :  { %v1002_v54 = vpop.f32.mrf.mxu1 }
  0xd0   :  { %v1004_v55 = vpop.f32.mrf.mxu1 }
  0xd2   :  { %v1006_v56 = vpop.f32.mrf.mxu1 }
  0xd4   :  { %v1010_v24 = vpop.f32.mrf.mxu1 }
  0xd6   :  { %v1012_v57 = vpop.f32.mrf.mxu1 }
  0xd8   :  { %v1014_v5 = vpop.f32.mrf.mxu1 }
  0xda   :  { %v1015_v58 = vpop.f32.mrf.mxu1 }
 0x105   :  { %v949_v2 = vpop.f32.mrf.mxu0 }
 0x106   :  { %v950_v3 = vadd.f32 %v949_v2, %v158_v40 }
 0x107   :  { %v951_v4 = vpop.f32.mrf.mxu0 }
 0x108   :  { %v952_v6 = vadd.f32 %v951_v4, %v162_v45  ;;  %v1001_v7 = vadd.f32 %v1000_v53, %v950_v3 }
 0x109   :  { %v953_v22 = vpop.f32.mrf.mxu0 }
 0x10a   :  { %v1003_v8 = vadd.f32 %v1002_v54, %v952_v6  ;;  %v954_v10 = vadd.f32 %v953_v22, %v158_v40  ;;  %v173_v22 = vsub.s32 4, %v2117_v60 }
 0x10b   :  { %v955_v11 = vpop.f32.mrf.mxu0 }
 0x10c   :  { %v1051_v12 = vpop.f32.mrf.mxu1  ;;  %v1581_v13 = vpack.c.bf16 %v1003_v8, %v1001_v7  ;;  %v956_v14 = vadd.f32 %v955_v11, %v162_v45  ;;  %v1005_v19 = vadd.f32 %v1004_v55, %v954_v10  ;;  %v177_v7 = vsub.s32 5, %v2117_v60 }
 0x10d   :  { %v1052_v39 = vadd.f32 %v1051_v12, %v166_v29  ;;  %v174_v8 = vrot.slane %v2123_v63, %v173_v22 }
 0x10e   :  { %v959_v17 = vpop.f32.mrf.mxu0  ;;  %v1053_v18 = vpop.f32.mrf.mxu1  ;;  %1403 = vst [vmem:[%s2179_s3] sm:$0xff] %v1581_v13  ;;  %v1007_v20 = vadd.f32 %v1006_v56, %v956_v14  ;;  %v178_v10 = vrot.slane %v2123_v63, %v177_v7 }
 0x10f   :  { %v960_v23 = vadd.f32 %v959_v17, %v158_v40  ;;  %v1054_v41 = vadd.f32 %v1053_v18, %v170_v30 }
 0x110   :  { %v961_v25 = vpop.f32.mrf.mxu0  ;;  %v1055_v26 = vpop.f32.mrf.mxu1  ;;  %v1585_v27 = vpack.c.bf16 %v1007_v20, %v1005_v19 }
 0x111   :  { %v962_v28 = vadd.f32 %v961_v25, %v162_v45  ;;  %v1011_v33 = vadd.f32 %v1010_v24, %v960_v23  ;;  %v1056_v44 = vadd.f32 %v1055_v26, %v166_v29 }
 0x112   :  { %v963_v31 = vpop.f32.mrf.mxu0  ;;  %v1057_v32 = vpop.f32.mrf.mxu1  ;;  %1407 = vst [vmem:[%s2179_s3 + $0x20] sm:$0xff] %v1585_v27 }
 0x113   :  { %v1013_v34 = vadd.f32 %v1012_v57, %v962_v28  ;;  %v1058_v49 = vadd.f32 %v1057_v32, %v170_v30 }
 0x114   :  { %v964_v36 = vpop.f32.mrf.mxu0  ;;  %v1061_v37 = vpop.f32.mrf.mxu1 }
 0x115   :  { %v1589_v38 = vpack.c.bf16 %v1013_v34, %v1011_v33  ;;  %v1062_v52 = vadd.f32 %v1061_v37, %v166_v29 }
 0x116   :  { %v1102_v0 = vpop.f32.mrf.mxu0  ;;  %v1063_v42 = vpop.f32.mrf.mxu1 }
 0x117   :  { %1411 = vst [vmem:[%s2179_s3 + $0x40] sm:$0xff] %v1589_v38  ;;  %v1103_v46 = vadd.f32 %v1102_v0, %v1052_v39  ;;  %v1064_v53 = vadd.f32 %v1063_v42, %v170_v30  ;;  %v185_v42 = vsub.s32 7, %v2117_v60 }
 0x118   :  { %v1104_v9 = vpop.f32.mrf.mxu0  ;;  %v1065_v43 = vpop.f32.mrf.mxu1 }
 0x119   :  { %v1105_v1 = vadd.f32 %v1104_v9, %v1054_v41  ;;  %v181_v41 = vsub.s32 6, %v2117_v60 }
 0x11a   :  { %v1106_v47 = vpop.f32.mrf.mxu0  ;;  %v1066_v48 = vpop.f32.mrf.mxu1 }
 0x11b   :  { %v1582_v21 = vpack.c.bf16 %v1105_v1, %v1103_v46  ;;  %v1107_v51 = vadd.f32 %v1106_v47, %v1056_v44  ;;  %v182_v43 = vrot.slane %v2123_v63, %v181_v41  ;;  %v186_v46 = vrot.slane %v2123_v63, %v185_v42 }
 0x11c   :  { %v1108_v50 = vpop.f32.mrf.mxu0 }
 0x11d   :  { %1404 = vst [vmem:[%s2179_s3 + $0x8] sm:$0xff] %v1582_v21  ;;  %v1109_v61 = vadd.f32 %v1108_v50, %v1058_v49 }
 0x11e   :  { %v1112_v54 = vpop.f32.mrf.mxu0 }
 0x11f   :  { %v1586_v55 = vpack.c.bf16 %v1109_v61, %v1107_v51  ;;  %v1113_v24 = vadd.f32 %v1112_v54, %v1062_v52 }
 0x120   :  { %v1114_v56 = vpop.f32.mrf.mxu0 }
 0x121   :  { %1408 = vst [vmem:[%s2179_s3 + $0x28] sm:$0xff] %v1586_v55  ;;  %v1115_v57 = vadd.f32 %v1114_v56, %v1064_v53 }
 0x122   :  { %v1116_v5 = vpop.f32.mrf.mxu0 }
 0x123   :  { %v1590_v58 = vpack.c.bf16 %v1115_v57, %v1113_v24 }
 0x124   :  { %v1117_v59 = vpop.f32.mrf.mxu0 }
 0x125   :  { %1412 = vst [vmem:[%s2179_s3 + $0x48] sm:$0xff] %v1590_v58 }
 0x126   :  { %v1204_v62 = vpop.f32.mrf.mxu0 }
 0x128   :  { %v1206_v35 = vpop.f32.mrf.mxu0 }
 0x12a   :  { %v1208_v40 = vpop.f32.mrf.mxu0 }
 0x12c   :  { %v1210_v45 = vpop.f32.mrf.mxu0 }
 0x12e   :  { %v1214_v2 = vpop.f32.mrf.mxu0 }
 0x130   :  { %v1216_v3 = vpop.f32.mrf.mxu0 }
 0x132   :  { %v1218_v4 = vpop.f32.mrf.mxu0 }
 0x134   :  { %v1219_v6 = vpop.f32.mrf.mxu0 }
 0x14c   :  { %v1153_v11 = vpop.f32.mrf.mxu1 }
 0x14d   :  { %v1154_v12 = vadd.f32 %v1153_v11, %v174_v8 }
 0x14e   :  { %v1155_v13 = vpop.f32.mrf.mxu1 }
 0x14f   :  { %v1156_v14 = vadd.f32 %v1155_v13, %v178_v10  ;;  %v1205_v16 = vadd.f32 %v1204_v62, %v1154_v12 }
 0x150   :  { %v1157_v15 = vpop.f32.mrf.mxu1 }
 0x151   :  { %v1207_v17 = vadd.f32 %v1206_v35, %v1156_v14  ;;  %v1158_v18 = vadd.f32 %v1157_v15, %v174_v8 }
 0x152   :  { %v1159_v19 = vpop.f32.mrf.mxu1 }
 0x153   :  { %v1583_v20 = vpack.c.bf16 %v1207_v17, %v1205_v16  ;;  %v1160_v23 = vadd.f32 %v1159_v19, %v178_v10  ;;  %v1209_v26 = vadd.f32 %v1208_v40, %v1158_v18 }
 0x154   :  { %v1163_v25 = vpop.f32.mrf.mxu1 }
 0x155   :  { %1405 = vst [vmem:[%s2179_s3 + $0x10] sm:$0xff] %v1583_v20  ;;  %v1211_v27 = vadd.f32 %v1210_v45, %v1160_v23  ;;  %v1164_v28 = vadd.f32 %v1163_v25, %v174_v8 }
 0x156   :  { %v1165_v29 = vpop.f32.mrf.mxu1 }
 0x157   :  { %v1587_v30 = vpack.c.bf16 %v1211_v27, %v1209_v26  ;;  %v1215_v31 = vadd.f32 %v1214_v2, %v1164_v28  ;;  %v1166_v32 = vadd.f32 %v1165_v29, %v178_v10 }
 0x158   :  { %v1167_v33 = vpop.f32.mrf.mxu1 }
 0x159   :  { %1409 = vst [vmem:[%s2179_s3 + $0x30] sm:$0xff] %v1587_v30  ;;  %v1217_v34 = vadd.f32 %v1216_v3, %v1166_v32 }
 0x15a   :  { %v1168_v36 = vpop.f32.mrf.mxu1 }
 0x15b   :  { %v1591_v37 = vpack.c.bf16 %v1217_v34, %v1215_v31 }
 0x15c   :  { %v1306_v38 = vpop.f32.mrf.mxu1 }
 0x15d   :  { %1413 = vst [vmem:[%s2179_s3 + $0x50] sm:$0xff] %v1591_v37 }
 0x15e   :  { %v1308_v39 = vpop.f32.mrf.mxu1 }
 0x160   :  { %v1310_v0 = vpop.f32.mrf.mxu1 }
 0x162   :  { %v1312_v9 = vpop.f32.mrf.mxu1 }
 0x164   :  { %v1316_v44 = vpop.f32.mrf.mxu1 }
 0x166   :  { %v1255_v1 = vpop.f32.mrf.mxu0  ;;  %v1318_v47 = vpop.f32.mrf.mxu1 }
 0x167   :  { %v1256_v48 = vadd.f32 %v1255_v1, %v182_v43 }
 0x168   :  { %v1257_v49 = vpop.f32.mrf.mxu0  ;;  %v1320_v21 = vpop.f32.mrf.mxu1 }
 0x169   :  { %v1258_v50 = vadd.f32 %v1257_v49, %v186_v46  ;;  %v1307_v61 = vadd.f32 %v1306_v38, %v1256_v48 }
 0x16a   :  { %v1259_v51 = vpop.f32.mrf.mxu0  ;;  %v1321_v52 = vpop.f32.mrf.mxu1 }
 0x16b   :  { %v1309_v53 = vadd.f32 %v1308_v39, %v1258_v50  ;;  %v1260_v54 = vadd.f32 %v1259_v51, %v182_v43 }
 0x16c   :  { %v1261_v55 = vpop.f32.mrf.mxu0 }
 0x16d   :  { %v1584_v56 = vpack.c.bf16 %v1309_v53, %v1307_v61  ;;  %v1262_v60 = vadd.f32 %v1261_v55, %v186_v46  ;;  %v1311_v63 = vadd.f32 %v1310_v0, %v1260_v54 }
 0x16e   :  { %v1265_v24 = vpop.f32.mrf.mxu0 }
 0x16f   :  { %1406 = vst [vmem:[%s2179_s3 + $0x18] sm:$0xff] %v1584_v56  ;;  %v1313_v57 = vadd.f32 %v1312_v9, %v1262_v60  ;;  %v1266_v5 = vadd.f32 %v1265_v24, %v182_v43 }
 0x170   :  { %v1267_v58 = vpop.f32.mrf.mxu0 }
 0x171   :  { %v1588_v59 = vpack.c.bf16 %v1313_v57, %v1311_v63  ;;  %v1268_v62 = vadd.f32 %v1267_v58, %v186_v46  ;;  %v1317_v40 = vadd.f32 %v1316_v44, %v1266_v5 }
 0x172   :  { %v1269_v35 = vpop.f32.mrf.mxu0 }
 0x173   :  { %1410 = vst [vmem:[%s2179_s3 + $0x38] sm:$0xff] %v1588_v59  ;;  %v1319_v45 = vadd.f32 %v1318_v47, %v1268_v62 }
 0x174   :  { %v1270_v2 = vpop.f32.mrf.mxu0 }
 0x175   :  { %v1592_v3 = vpack.c.bf16 %v1319_v45, %v1317_v40 }
 0x177   :  { %1414 = vst [vmem:[%s2179_s3 + $0x58] sm:$0xff] %v1592_v3 }

// kernel: unreal_forward.7
= control target key start
LH: loop header
LB: loop body
LE: loop exit
PB: predicated region body
PF: predicated region fallthrough
CT: control target
= control target key end

     0   :  { %vm2055_vm0 = vcmask 261120   ;;  %s4467_s1 = inlined_call_operand.vmem [shape: bf16[2592,256], index: 1, kind: input, shape index: {}]   ;;  %s4468_s0 = inlined_call_operand.vmem [shape: bf16[8,2592], index: 0, kind: input, shape index: {}]   ;;  %s4469_s2 = inlined_call_operand.vmem [shape: f32[1,256], index: 2, kind: input, shape index: {}]   ;;  %s4470_s3 = inlined_call_operand.vmem [shape: bf16[8,256], index: 3, kind: output, shape index: {}]  }
   0x1   :  { %v2874_v0 = vld [vmem:[%s4467_s1 + $0x74] ss:$8 sps:$4 sm:$0xff]   ;;  %v2876_v1 = vld [vmem:[%s4467_s1 + $0x70] ss:$8 sps:$4 sm:$0xff]   ;;  %v2880_v4 = vld [vmem:[%s4467_s1 + $0x64] ss:$8 sps:$4 sm:$0xff]  }
   0x2   :  { %2059 = vmatprep.subr.bf16.mxu0 %v2874_v0  ;;  %v2877_v2 = vld [vmem:[%s4467_s1 + $0x174] ss:$8 sps:$4 sm:$0xff]   ;;  %v2879_v3 = vld [vmem:[%s4467_s1 + $0x170] ss:$8 sps:$4 sm:$0xff]   ;;  %v2882_v5 = vld [vmem:[%s4467_s1 + $0x60] ss:$8 sps:$4 sm:$0xff]  }
   0x3   :  { %2060 = vmatpush1.bf16.msra.mxu0 %v2876_v1  ;;  %2100 = vmatprep.subr.bf16.mxu1 %v2877_v2  ;;  %v2883_v6 = vld [vmem:[%s4467_s1 + $0x164] ss:$8 sps:$4 sm:$0xff]   ;;  %v2885_v7 = vld [vmem:[%s4467_s1 + $0x160] ss:$8 sps:$4 sm:$0xff]   ;;  %v2886_v8 = vld [vmem:[%s4467_s1 + $0x54] ss:$8 sps:$4 sm:$0xff]  }
   0x4   :  { %2101 = vmatpush1.bf16.msra.mxu1 %v2879_v3  ;;  %2061 = vmatprep.subr.bf16.mxu0 %v2880_v4  ;;  %v2888_v9 = vld [vmem:[%s4467_s1 + $0x50] ss:$8 sps:$4 sm:$0xff]   ;;  %v2889_v10 = vld [vmem:[%s4467_s1 + $0x154] ss:$8 sps:$4 sm:$0xff]   ;;  %v2892_v11 = vld [vmem:[%s4467_s1 + $0x44] ss:$8 sps:$4 sm:$0xff]  }
   0x5   :  { %2102 = vmatprep.subr.bf16.mxu1 %v2883_v6  ;;  %v2891_v12 = vld [vmem:[%s4467_s1 + $0x150] ss:$8 sps:$4 sm:$0xff]   ;;  %v2895_v13 = vld [vmem:[%s4467_s1 + $0x144] ss:$8 sps:$4 sm:$0xff]   ;;  %v2894_v14 = vld [vmem:[%s4467_s1 + $0x40] ss:$8 sps:$4 sm:$0xff]  }
   0x6   :  { %v2898_v15 = vld [vmem:[%s4467_s1 + $0x34] ss:$8 sps:$4 sm:$0xff]   ;;  %v2897_v16 = vld [vmem:[%s4467_s1 + $0x140] ss:$8 sps:$4 sm:$0xff]   ;;  %v2900_v18 = vld [vmem:[%s4467_s1 + $0x30] ss:$8 sps:$4 sm:$0xff]  }
   0x7   :  { %2062 = vmatpush1.bf16.msra.mxu0 %v2882_v5  ;;  %v2901_v17 = vld [vmem:[%s4467_s1 + $0x134] ss:$8 sps:$4 sm:$0xff]   ;;  %v2904_v19 = vld [vmem:[%s4467_s1 + $0x24] ss:$8 sps:$4 sm:$0xff]   ;;  %v2903_v20 = vld [vmem:[%s4467_s1 + $0x130] ss:$8 sps:$4 sm:$0xff]  }
   0x8   :  { %2063 = vmatprep.subr.bf16.mxu0 %v2886_v8  ;;  %2103 = vmatpush1.bf16.msra.mxu1 %v2885_v7  ;;  %v2907_v21 = vld [vmem:[%s4467_s1 + $0x124] ss:$8 sps:$4 sm:$0xff]   ;;  %v2906_v22 = vld [vmem:[%s4467_s1 + $0x20] ss:$8 sps:$4 sm:$0xff]   ;;  %v2910_v23 = vld [vmem:[%s4467_s1 + $0x14] ss:$8 sps:$4 sm:$0xff]  }
   0x9   :  { %2104 = vmatprep.subr.bf16.mxu1 %v2889_v10  ;;  %v2909_v24 = vld [vmem:[%s4467_s1 + $0x120] ss:$8 sps:$4 sm:$0xff]   ;;  %v2913_v25 = vld [vmem:[%s4467_s1 + $0x114] ss:$8 sps:$4 sm:$0xff]   ;;  %v2912_v26 = vld [vmem:[%s4467_s1 + $0x10] ss:$8 sps:$4 sm:$0xff]  }
   0xa   :  { %v2916_v27 = vld [vmem:[%s4467_s1 + $0x4] ss:$8 sps:$4 sm:$0xff]   ;;  %v2915_v28 = vld [vmem:[%s4467_s1 + $0x110] ss:$8 sps:$4 sm:$0xff]   ;;  %v2918_v30 = vld [vmem:[%s4467_s1] ss:$8 sps:$4 sm:$0xff]  }
   0xb   :  { %2064 = vmatpush1.bf16.msra.mxu0 %v2888_v9  ;;  %v2919_v29 = vld [vmem:[%s4467_s1 + $0x104] ss:$8 sps:$4 sm:$0xff]   ;;  %v2922_v31 = vld [vmem:[%s4467_s1 + $0xf4] ss:$8 sps:$4 sm:$0xff]   ;;  %v2921_v32 = vld [vmem:[%s4467_s1 + $0x100] ss:$8 sps:$4 sm:$0xff]  }
   0xc   :  { %2065 = vmatprep.subr.bf16.mxu0 %v2892_v11  ;;  %2105 = vmatpush1.bf16.msra.mxu1 %v2891_v12  ;;  %v2925_v33 = vld [vmem:[%s4467_s1 + $0x1f4] ss:$8 sps:$4 sm:$0xff]   ;;  %v2924_v34 = vld [vmem:[%s4467_s1 + $0xf0] ss:$8 sps:$4 sm:$0xff]   ;;  %v2928_v35 = vld [vmem:[%s4467_s1 + $0xe4] ss:$8 sps:$4 sm:$0xff]  }
   0xd   :  { %2106 = vmatprep.subr.bf16.mxu1 %v2895_v13  ;;  %v2927_v36 = vld [vmem:[%s4467_s1 + $0x1f0] ss:$8 sps:$4 sm:$0xff]   ;;  %v2931_v37 = vld [vmem:[%s4467_s1 + $0x1e4] ss:$8 sps:$4 sm:$0xff]   ;;  %v2930_v38 = vld [vmem:[%s4467_s1 + $0xe0] ss:$8 sps:$4 sm:$0xff]  }
   0xe   :  { %v2934_v39 = vld [vmem:[%s4467_s1 + $0xd4] ss:$8 sps:$4 sm:$0xff]   ;;  %v2933_v40 = vld [vmem:[%s4467_s1 + $0x1e0] ss:$8 sps:$4 sm:$0xff]   ;;  %v2936_v42 = vld [vmem:[%s4467_s1 + $0xd0] ss:$8 sps:$4 sm:$0xff]  }
   0xf   :  { %2066 = vmatpush1.bf16.msra.mxu0 %v2894_v14  ;;  %v2937_v41 = vld [vmem:[%s4467_s1 + $0x1d4] ss:$8 sps:$4 sm:$0xff]   ;;  %v2940_v43 = vld [vmem:[%s4467_s1 + $0xc4] ss:$8 sps:$4 sm:$0xff]   ;;  %v2939_v44 = vld [vmem:[%s4467_s1 + $0x1d0] ss:$8 sps:$4 sm:$0xff]  }
  0x10   :  { %2067 = vmatprep.subr.bf16.mxu0 %v2898_v15  ;;  %2107 = vmatpush1.bf16.msra.mxu1 %v2897_v16  ;;  %v2943_v45 = vld [vmem:[%s4467_s1 + $0x1c4] ss:$8 sps:$4 sm:$0xff]   ;;  %v2942_v47 = vld [vmem:[%s4467_s1 + $0xc0] ss:$8 sps:$4 sm:$0xff]   ;;  %v2946_v49 = vld [vmem:[%s4467_s1 + $0xb4] ss:$8 sps:$4 sm:$0xff]  }
  0x11   :  { %2108 = vmatprep.subr.bf16.mxu1 %v2901_v17  ;;  %v15_v46 = vld [vmem:[%s4468_s0] sm:$0xff]  ;;  %v16_v50 = vld [vmem:[%s4468_s0 + $0x8] sm:$0xff]  ;;  %v2949_v53 = vld [vmem:[%s4467_s1 + $0x1b4] ss:$8 sps:$4 sm:$0xff]  }
  0x12   :  { %v2526_v48 = vcombine.high %v15_v46, %v15_v46  ;;  %v2945_v51 = vld [vmem:[%s4467_s1 + $0x1c0] ss:$8 sps:$4 sm:$0xff]   ;;  %v2528_v52 = vcombine.high %v16_v50, %v16_v50  ;;  %v2948_v54 = vld [vmem:[%s4467_s1 + $0xb0] ss:$8 sps:$4 sm:$0xff]   ;;  %v2952_v55 = vld [vmem:[%s4467_s1 + $0xa4] ss:$8 sps:$4 sm:$0xff]   ;;  %v2525_v5 = vcombine.low %v15_v46, %v15_v46  ;;  %v2527_v8 = vcombine.low %v16_v50, %v16_v50 }
  0x13   :  { %2068 = vmatpush1.bf16.msra.mxu0 %v2900_v18  ;;  %v2951_v56 = vld [vmem:[%s4467_s1 + $0x1b0] ss:$8 sps:$4 sm:$0xff]   ;;  %v2955_v57 = vld [vmem:[%s4467_s1 + $0x1a4] ss:$8 sps:$4 sm:$0xff]   ;;  %v2954_v58 = vld [vmem:[%s4467_s1 + $0xa0] ss:$8 sps:$4 sm:$0xff]  }
  0x14   :  { %2069 = vmatprep.subr.bf16.mxu0 %v2904_v19  ;;  %2109 = vmatpush1.bf16.msra.mxu1 %v2903_v20  ;;  %v2958_v59 = vld [vmem:[%s4467_s1 + $0x94] ss:$8 sps:$4 sm:$0xff]   ;;  %v2957_v60 = vld [vmem:[%s4467_s1 + $0x1a0] ss:$8 sps:$4 sm:$0xff]   ;;  %v2960_v62 = vld [vmem:[%s4467_s1 + $0x90] ss:$8 sps:$4 sm:$0xff]  }
  0x15   :  { %2110 = vmatprep.subr.bf16.mxu1 %v2907_v21  ;;  %2091 = vmatprep.mubr.bf16.mxu0 %v2526_v48  ;;  %v2961_v61 = vld [vmem:[%s4467_s1 + $0x194] ss:$8 sps:$4 sm:$0xff]   ;;  %v2964_v63 = vld [vmem:[%s4467_s1 + $0x84] ss:$8 sps:$4 sm:$0xff]   ;;  %v2963_v0 = vld [vmem:[%s4467_s1 + $0x190] ss:$8 sps:$4 sm:$0xff]  }
  0x16   :  { %2132 = vmatprep.mubr.bf16.mxu1 %v2528_v52  ;;  %v2967_v1 = vld [vmem:[%s4467_s1 + $0x184] ss:$8 sps:$4 sm:$0xff]   ;;  %v2966_v2 = vld [vmem:[%s4467_s1 + $0x80] ss:$8 sps:$4 sm:$0xff]   ;;  %v2974_v3 = vld [vmem:[%s4467_s1 + $0x274] ss:$8 sps:$4 sm:$0xff]  }
  0x17   :  { %2070 = vmatpush1.bf16.msra.mxu0 %v2906_v22  ;;  %v2969_v4 = vld [vmem:[%s4467_s1 + $0x180] ss:$8 sps:$4 sm:$0xff]   ;;  %v2979_v6 = vld [vmem:[%s4467_s1 + $0x374] ss:$8 sps:$4 sm:$0xff]   ;;  %v2972_v7 = vld [vmem:[%s4467_s1 + $0x270] ss:$8 sps:$4 sm:$0xff]  }
  0x18   :  { %2071 = vmatprep.subr.bf16.mxu0 %v2910_v23  ;;  %2111 = vmatpush1.bf16.msra.mxu1 %v2909_v24  ;;  %v2982_v9 = vld [vmem:[%s4467_s1 + $0x264] ss:$8 sps:$4 sm:$0xff]   ;;  %v2977_v10 = vld [vmem:[%s4467_s1 + $0x370] ss:$8 sps:$4 sm:$0xff]   ;;  %v2980_v12 = vld [vmem:[%s4467_s1 + $0x260] ss:$8 sps:$4 sm:$0xff]  }
  0x19   :  { %2112 = vmatprep.subr.bf16.mxu1 %v2913_v25  ;;  %v2985_v11 = vld [vmem:[%s4467_s1 + $0x364] ss:$8 sps:$4 sm:$0xff]   ;;  %v2988_v13 = vld [vmem:[%s4467_s1 + $0x254] ss:$8 sps:$4 sm:$0xff]   ;;  %v2983_v14 = vld [vmem:[%s4467_s1 + $0x360] ss:$8 sps:$4 sm:$0xff]  }
  0x1a   :  { %v2991_v15 = vld [vmem:[%s4467_s1 + $0x354] ss:$8 sps:$4 sm:$0xff]   ;;  %v2986_v16 = vld [vmem:[%s4467_s1 + $0x250] ss:$8 sps:$4 sm:$0xff]   ;;  %v2994_v17 = vld [vmem:[%s4467_s1 + $0x244] ss:$8 sps:$4 sm:$0xff]  }
  0x1b   :  { %2072 = vmatpush1.bf16.msra.mxu0 %v2912_v26  ;;  %v2989_v18 = vld [vmem:[%s4467_s1 + $0x350] ss:$8 sps:$4 sm:$0xff]   ;;  %v2997_v19 = vld [vmem:[%s4467_s1 + $0x344] ss:$8 sps:$4 sm:$0xff]   ;;  %v2992_v20 = vld [vmem:[%s4467_s1 + $0x240] ss:$8 sps:$4 sm:$0xff]  }
  0x1c   :  { %2073 = vmatprep.subr.bf16.mxu0 %v2916_v27  ;;  %2113 = vmatpush1.bf16.msra.mxu1 %v2915_v28  ;;  %v3000_v21 = vld [vmem:[%s4467_s1 + $0x234] ss:$8 sps:$4 sm:$0xff]   ;;  %v2995_v22 = vld [vmem:[%s4467_s1 + $0x340] ss:$8 sps:$4 sm:$0xff]   ;;  %v2998_v24 = vld [vmem:[%s4467_s1 + $0x230] ss:$8 sps:$4 sm:$0xff]  }
  0x1d   :  { %2114 = vmatprep.subr.bf16.mxu1 %v2919_v29  ;;  %v3003_v23 = vld [vmem:[%s4467_s1 + $0x334] ss:$8 sps:$4 sm:$0xff]   ;;  %v3006_v25 = vld [vmem:[%s4467_s1 + $0x224] ss:$8 sps:$4 sm:$0xff]   ;;  %v3001_v26 = vld [vmem:[%s4467_s1 + $0x330] ss:$8 sps:$4 sm:$0xff]  }
  0x1e   :  { %v3009_v27 = vld [vmem:[%s4467_s1 + $0x324] ss:$8 sps:$4 sm:$0xff]   ;;  %v3004_v28 = vld [vmem:[%s4467_s1 + $0x220] ss:$8 sps:$4 sm:$0xff]   ;;  %v3012_v29 = vld [vmem:[%s4467_s1 + $0x214] ss:$8 sps:$4 sm:$0xff]  }
  0x1f   :  { %2074 = vmatpush1.bf16.msra.mxu0 %v2918_v30  ;;  %v3007_v30 = vld [vmem:[%s4467_s1 + $0x320] ss:$8 sps:$4 sm:$0xff]   ;;  %v3025_v46 = vld [vmem:[%s4467_s1 + $0x3f0] ss:$8 sps:$4 sm:$0xff]  }
  0x20   :  { %2075 = vmatprep.subr.bf16.mxu0 %v2922_v31  ;;  %2115 = vmatpush1.bf16.msra.mxu1 %v2921_v32  ;;  %v3015_v31 = vld [vmem:[%s4467_s1 + $0x314] ss:$8 sps:$4 sm:$0xff]   ;;  %v3028_v48 = vld [vmem:[%s4467_s1 + $0x2e0] ss:$8 sps:$4 sm:$0xff]   ;;  %v3034_v52 = vld [vmem:[%s4467_s1 + $0x2d0] ss:$8 sps:$4 sm:$0xff]  }
  0x21   :  { %2116 = vmatprep.subr.bf16.mxu1 %v2925_v33  ;;  %v3681_v32 = vld [vmem:[%s4468_s0 + $0x10] sm:$0xff]  ;;  %v3031_v50 = vld [vmem:[%s4467_s1 + $0x3e0] ss:$8 sps:$4 sm:$0xff]  }
  0x22   :  { %v3010_v33 = vld [vmem:[%s4467_s1 + $0x210] ss:$8 sps:$4 sm:$0xff]  }
  0x23   :  { %2076 = vmatpush2.bf16.msra.mxu0 %v2924_v34  ;;  %v2530_v34 = vcombine.high %v3681_v32, %v3681_v32 }
  0x24   :  { %2077 = vmatprep.subr.bf16.mxu0 %v2928_v35  ;;  %2117 = vmatpush2.bf16.msra.mxu1 %v2927_v36  ;;  %v3691_v35 = vld [vmem:[%s4468_s0 + $0x18] sm:$0xff]  ;;  %v3018_v36 = vld [vmem:[%s4467_s1 + $0x204] ss:$8 sps:$4 sm:$0xff]  }
  0x25   :  { %2118 = vmatprep.subr.bf16.mxu1 %v2931_v37  ;;  %v2532_v37 = vcombine.high %v3691_v35, %v3691_v35 }
  0x27   :  { %2078 = vmatpush2.bf16.msra.mxu0 %v2930_v38  ;;  %v3013_v38 = vld [vmem:[%s4467_s1 + $0x310] ss:$8 sps:$4 sm:$0xff]  }
  0x28   :  { %2079 = vmatprep.subr.bf16.mxu0 %v2934_v39  ;;  %2119 = vmatpush2.bf16.msra.mxu1 %v2933_v40  ;;  %v3021_v39 = vld [vmem:[%s4467_s1 + $0x304] ss:$8 sps:$4 sm:$0xff]   ;;  %v3016_v40 = vld [vmem:[%s4467_s1 + $0x200] ss:$8 sps:$4 sm:$0xff]  }
  0x29   :  { %2120 = vmatprep.subr.bf16.mxu1 %v2937_v41  ;;  %v3024_v41 = vld [vmem:[%s4467_s1 + $0x2f4] ss:$8 sps:$4 sm:$0xff]  }
  0x2b   :  { %2080 = vmatpush2.bf16.msra.mxu0 %v2936_v42  ;;  %v3019_v42 = vld [vmem:[%s4467_s1 + $0x300] ss:$8 sps:$4 sm:$0xff]  }
  0x2c   :  { %2081 = vmatprep.subr.bf16.mxu0 %v2940_v43  ;;  %2121 = vmatpush2.bf16.msra.mxu1 %v2939_v44  ;;  %v3027_v43 = vld [vmem:[%s4467_s1 + $0x3f4] ss:$8 sps:$4 sm:$0xff]   ;;  %v3022_v44 = vld [vmem:[%s4467_s1 + $0x2f0] ss:$8 sps:$4 sm:$0xff]  }
  0x2d   :  { %2122 = vmatprep.subr.bf16.mxu1 %v2943_v45  ;;  %v3030_v45 = vld [vmem:[%s4467_s1 + $0x2e4] ss:$8 sps:$4 sm:$0xff]  }
  0x2f   :  { %2082 = vmatpush2.bf16.msra.mxu0 %v2942_v47  ;;  %v3033_v47 = vld [vmem:[%s4467_s1 + $0x3e4] ss:$8 sps:$4 sm:$0xff]  }
  0x30   :  { %2083 = vmatprep.subr.bf16.mxu0 %v2946_v49  ;;  %2123 = vmatpush2.bf16.msra.mxu1 %v2945_v51  ;;  %v3036_v49 = vld [vmem:[%s4467_s1 + $0x2d4] ss:$8 sps:$4 sm:$0xff]  }
  0x31   :  { %2124 = vmatprep.subr.bf16.mxu1 %v2949_v53  ;;  %v3039_v51 = vld [vmem:[%s4467_s1 + $0x3d4] ss:$8 sps:$4 sm:$0xff]   ;;  %v3042_v53 = vld [vmem:[%s4467_s1 + $0x2c4] ss:$8 sps:$4 sm:$0xff]  }
  0x33   :  { %2084 = vmatpush2.bf16.msra.mxu0 %v2948_v54  ;;  %v3037_v54 = vld [vmem:[%s4467_s1 + $0x3d0] ss:$8 sps:$4 sm:$0xff]  }
  0x34   :  { %2085 = vmatprep.subr.bf16.mxu0 %v2952_v55  ;;  %2125 = vmatpush2.bf16.msra.mxu1 %v2951_v56  ;;  %v3045_v55 = vld [vmem:[%s4467_s1 + $0x3c4] ss:$8 sps:$4 sm:$0xff]   ;;  %v3040_v56 = vld [vmem:[%s4467_s1 + $0x2c0] ss:$8 sps:$4 sm:$0xff]  }
  0x35   :  { %2126 = vmatprep.subr.bf16.mxu1 %v2955_v57  ;;  %v3048_v57 = vld [vmem:[%s4467_s1 + $0x2b4] ss:$8 sps:$4 sm:$0xff]  }
  0x37   :  { %2086 = vmatpush2.bf16.msra.mxu0 %v2954_v58  ;;  %v3043_v58 = vld [vmem:[%s4467_s1 + $0x3c0] ss:$8 sps:$4 sm:$0xff]  }
  0x38   :  { %2087 = vmatprep.subr.bf16.mxu0 %v2958_v59  ;;  %2127 = vmatpush2.bf16.msra.mxu1 %v2957_v60  ;;  %v3051_v59 = vld [vmem:[%s4467_s1 + $0x3b4] ss:$8 sps:$4 sm:$0xff]   ;;  %v3046_v60 = vld [vmem:[%s4467_s1 + $0x2b0] ss:$8 sps:$4 sm:$0xff]  }
  0x39   :  { %2128 = vmatprep.subr.bf16.mxu1 %v2961_v61  ;;  %v3054_v61 = vld [vmem:[%s4467_s1 + $0x2a4] ss:$8 sps:$4 sm:$0xff]  }
  0x3b   :  { %2088 = vmatpush2.bf16.msra.mxu0 %v2960_v62  ;;  %v3049_v62 = vld [vmem:[%s4467_s1 + $0x3b0] ss:$8 sps:$4 sm:$0xff]  }
  0x3c   :  { %2089 = vmatprep.subr.bf16.mxu0 %v2964_v63  ;;  %2129 = vmatpush2.bf16.msra.mxu1 %v2963_v0  ;;  %v3057_v63 = vld [vmem:[%s4467_s1 + $0x3a4] ss:$8 sps:$4 sm:$0xff]   ;;  %v3052_v0 = vld [vmem:[%s4467_s1 + $0x2a0] ss:$8 sps:$4 sm:$0xff]  }
  0x3d   :  { %2130 = vmatprep.subr.bf16.mxu1 %v2967_v1  ;;  %v3060_v1 = vld [vmem:[%s4467_s1 + $0x294] ss:$8 sps:$4 sm:$0xff]  }
  0x3f   :  { %2090 = vmatpush2.bf16.msra.mxu0 %v2966_v2  ;;  %v3055_v2 = vld [vmem:[%s4467_s1 + $0x3a0] ss:$8 sps:$4 sm:$0xff]  }
  0x40   :  { %2141 = vmatprep.subr.bf16.mxu0 %v2974_v3  ;;  %2131 = vmatpush2.bf16.msra.mxu1 %v2969_v4  ;;  %v3063_v3 = vld [vmem:[%s4467_s1 + $0x394] ss:$8 sps:$4 sm:$0xff]   ;;  %v3058_v4 = vld [vmem:[%s4467_s1 + $0x290] ss:$8 sps:$4 sm:$0xff]  }
  0x41   :  { %2182 = vmatprep.subr.bf16.mxu1 %v2979_v6  ;;  %v3061_v6 = vld [vmem:[%s4467_s1 + $0x390] ss:$8 sps:$4 sm:$0xff]  }
  0x42   :  { %2092 = vmatmul.mubr.bf16.vlgmr.msra.gmra.mxu0 %v2525_v5  ;;  %v3066_v5 = vld [vmem:[%s4467_s1 + $0x284] ss:$8 sps:$4 sm:$0xff]  }
  0x43   :  { %2142 = vmatpush1.bf16.msra.mxu0 %v2972_v7  ;;  %2133 = vmatmul.mubr.bf16.vlgmr.msra.gmra.mxu1 %v2527_v8  ;;  %v3069_v7 = vld [vmem:[%s4467_s1 + $0x384] ss:$8 sps:$4 sm:$0xff]   ;;  %v3064_v8 = vld [vmem:[%s4467_s1 + $0x280] ss:$8 sps:$4 sm:$0xff]  }
  0x44   :  { %2143 = vmatprep.subr.bf16.mxu0 %v2982_v9  ;;  %2183 = vmatpush1.bf16.msra.mxu1 %v2977_v10  ;;  %v3074_v9 = vld [vmem:[%s4467_s1 + $0x474] ss:$8 sps:$4 sm:$0xff]   ;;  %v3067_v10 = vld [vmem:[%s4467_s1 + $0x380] ss:$8 sps:$4 sm:$0xff]  }
  0x45   :  { %2184 = vmatprep.subr.bf16.mxu1 %v2985_v11  ;;  %2173 = vmatprep.mubr.bf16.mxu0 %v2530_v34  ;;  %v2529_v11 = vcombine.low %v3681_v32, %v3681_v32  ;;  %v3095_v32 = vld [vmem:[%s4467_s1 + $0x540] ss:$8 sps:$4 sm:$0xff]   ;;  %v3098_v34 = vld [vmem:[%s4467_s1 + $0x430] ss:$8 sps:$4 sm:$0xff]  }
  0x46   :  { %2214 = vmatprep.mubr.bf16.mxu1 %v2532_v37  ;;  %v3109_v37 = vld [vmem:[%s4467_s1 + $0x524] ss:$8 sps:$4 sm:$0xff]  }
  0x47   :  { %2144 = vmatpush1.bf16.msra.mxu0 %v2980_v12  ;;  %v3079_v12 = vld [vmem:[%s4467_s1 + $0x574] ss:$8 sps:$4 sm:$0xff]  }
  0x48   :  { %2145 = vmatprep.subr.bf16.mxu0 %v2988_v13  ;;  %2185 = vmatpush1.bf16.msra.mxu1 %v2983_v14  ;;  %v3072_v13 = vld [vmem:[%s4467_s1 + $0x470] ss:$8 sps:$4 sm:$0xff]   ;;  %v2531_v14 = vcombine.low %v3691_v35, %v3691_v35  ;;  %v3106_v35 = vld [vmem:[%s4467_s1 + $0x424] ss:$8 sps:$4 sm:$0xff]  }
  0x49   :  { %2186 = vmatprep.subr.bf16.mxu1 %v2991_v15  ;;  %v3082_v15 = vld [vmem:[%s4467_s1 + $0x464] ss:$8 sps:$4 sm:$0xff]  }
  0x4b   :  { %2146 = vmatpush1.bf16.msra.mxu0 %v2986_v16  ;;  %v3077_v16 = vld [vmem:[%s4467_s1 + $0x570] ss:$8 sps:$4 sm:$0xff]  }
  0x4c   :  { %2147 = vmatprep.subr.bf16.mxu0 %v2994_v17  ;;  %2187 = vmatpush1.bf16.msra.mxu1 %v2989_v18  ;;  %v3828_v17 = vld [vmem:[%s4468_s0 + $0x20] sm:$0xff] }
  0x4d   :  { %2188 = vmatprep.subr.bf16.mxu1 %v2997_v19  ;;  %v3080_v18 = vld [vmem:[%s4467_s1 + $0x460] ss:$8 sps:$4 sm:$0xff]   ;;  %v3085_v19 = vld [vmem:[%s4467_s1 + $0x564] ss:$8 sps:$4 sm:$0xff]  }
  0x4f   :  { %2148 = vmatpush1.bf16.msra.mxu0 %v2992_v20  ;;  %v2534_v20 = vcombine.high %v3828_v17, %v3828_v17 }
  0x50   :  { %2149 = vmatprep.subr.bf16.mxu0 %v3000_v21  ;;  %2189 = vmatpush1.bf16.msra.mxu1 %v2995_v22  ;;  %v3841_v21 = vld [vmem:[%s4468_s0 + $0x28] sm:$0xff]  ;;  %v3088_v22 = vld [vmem:[%s4467_s1 + $0x454] ss:$8 sps:$4 sm:$0xff]  }
  0x51   :  { %2190 = vmatprep.subr.bf16.mxu1 %v3003_v23  ;;  %v2536_v23 = vcombine.high %v3841_v21, %v3841_v21 }
  0x53   :  { %2150 = vmatpush1.bf16.msra.mxu0 %v2998_v24  ;;  %v3083_v24 = vld [vmem:[%s4467_s1 + $0x560] ss:$8 sps:$4 sm:$0xff]  }
  0x54   :  { %2151 = vmatprep.subr.bf16.mxu0 %v3006_v25  ;;  %2191 = vmatpush1.bf16.msra.mxu1 %v3001_v26  ;;  %v3091_v25 = vld [vmem:[%s4467_s1 + $0x554] ss:$8 sps:$4 sm:$0xff]   ;;  %v3086_v26 = vld [vmem:[%s4467_s1 + $0x450] ss:$8 sps:$4 sm:$0xff]  }
  0x55   :  { %2192 = vmatprep.subr.bf16.mxu1 %v3009_v27  ;;  %v3094_v27 = vld [vmem:[%s4467_s1 + $0x444] ss:$8 sps:$4 sm:$0xff]  }
  0x57   :  { %2152 = vmatpush1.bf16.msra.mxu0 %v3004_v28  ;;  %v3089_v28 = vld [vmem:[%s4467_s1 + $0x550] ss:$8 sps:$4 sm:$0xff]  }
  0x58   :  { %2153 = vmatprep.subr.bf16.mxu0 %v3012_v29  ;;  %2193 = vmatpush1.bf16.msra.mxu1 %v3007_v30  ;;  %v3097_v29 = vld [vmem:[%s4467_s1 + $0x544] ss:$8 sps:$4 sm:$0xff]   ;;  %v3092_v30 = vld [vmem:[%s4467_s1 + $0x440] ss:$8 sps:$4 sm:$0xff]  }
  0x59   :  { %2194 = vmatprep.subr.bf16.mxu1 %v3015_v31  ;;  %v3100_v31 = vld [vmem:[%s4467_s1 + $0x434] ss:$8 sps:$4 sm:$0xff]  }
  0x5b   :  { %2154 = vmatpush1.bf16.msra.mxu0 %v3010_v33  ;;  %v3103_v33 = vld [vmem:[%s4467_s1 + $0x534] ss:$8 sps:$4 sm:$0xff]  }
  0x5c   :  { %2155 = vmatprep.subr.bf16.mxu0 %v3018_v36  ;;  %2195 = vmatpush1.bf16.msra.mxu1 %v3013_v38  ;;  %v3101_v36 = vld [vmem:[%s4467_s1 + $0x530] ss:$8 sps:$4 sm:$0xff]   ;;  %v3104_v38 = vld [vmem:[%s4467_s1 + $0x420] ss:$8 sps:$4 sm:$0xff]  }
  0x5d   :  { %2196 = vmatprep.subr.bf16.mxu1 %v3021_v39  ;;  %v3112_v39 = vld [vmem:[%s4467_s1 + $0x414] ss:$8 sps:$4 sm:$0xff]  }
  0x5f   :  { %2156 = vmatpush1.bf16.msra.mxu0 %v3016_v40  ;;  %v3107_v40 = vld [vmem:[%s4467_s1 + $0x520] ss:$8 sps:$4 sm:$0xff]  }
  0x60   :  { %2157 = vmatprep.subr.bf16.mxu0 %v3024_v41  ;;  %2197 = vmatpush1.bf16.msra.mxu1 %v3019_v42  ;;  %v3115_v41 = vld [vmem:[%s4467_s1 + $0x514] ss:$8 sps:$4 sm:$0xff]   ;;  %v3110_v42 = vld [vmem:[%s4467_s1 + $0x410] ss:$8 sps:$4 sm:$0xff]  }
  0x61   :  { %2198 = vmatprep.subr.bf16.mxu1 %v3027_v43  ;;  %v3118_v43 = vld [vmem:[%s4467_s1 + $0x404] ss:$8 sps:$4 sm:$0xff]  }
  0x63   :  { %2158 = vmatpush2.bf16.msra.mxu0 %v3022_v44  ;;  %v3113_v44 = vld [vmem:[%s4467_s1 + $0x510] ss:$8 sps:$4 sm:$0xff]  }
  0x64   :  { %2159 = vmatprep.subr.bf16.mxu0 %v3030_v45  ;;  %2199 = vmatpush2.bf16.msra.mxu1 %v3025_v46  ;;  %v3121_v45 = vld [vmem:[%s4467_s1 + $0x504] ss:$8 sps:$4 sm:$0xff]   ;;  %v3116_v46 = vld [vmem:[%s4467_s1 + $0x400] ss:$8 sps:$4 sm:$0xff]  }
  0x65   :  { %2200 = vmatprep.subr.bf16.mxu1 %v3033_v47  ;;  %v3124_v47 = vld [vmem:[%s4467_s1 + $0x4f4] ss:$8 sps:$4 sm:$0xff]  }
  0x67   :  { %2160 = vmatpush2.bf16.msra.mxu0 %v3028_v48  ;;  %v3119_v48 = vld [vmem:[%s4467_s1 + $0x500] ss:$8 sps:$4 sm:$0xff]  }
  0x68   :  { %2161 = vmatprep.subr.bf16.mxu0 %v3036_v49  ;;  %2201 = vmatpush2.bf16.msra.mxu1 %v3031_v50  ;;  %v3127_v49 = vld [vmem:[%s4467_s1 + $0x5f4] ss:$8 sps:$4 sm:$0xff]   ;;  %v3122_v50 = vld [vmem:[%s4467_s1 + $0x4f0] ss:$8 sps:$4 sm:$0xff]  }
  0x69   :  { %2202 = vmatprep.subr.bf16.mxu1 %v3039_v51  ;;  %v3130_v51 = vld [vmem:[%s4467_s1 + $0x4e4] ss:$8 sps:$4 sm:$0xff]  }
  0x6b   :  { %2162 = vmatpush2.bf16.msra.mxu0 %v3034_v52  ;;  %v3125_v52 = vld [vmem:[%s4467_s1 + $0x5f0] ss:$8 sps:$4 sm:$0xff]  }
  0x6c   :  { %2163 = vmatprep.subr.bf16.mxu0 %v3042_v53  ;;  %2203 = vmatpush2.bf16.msra.mxu1 %v3037_v54  ;;  %v3133_v53 = vld [vmem:[%s4467_s1 + $0x5e4] ss:$8 sps:$4 sm:$0xff]   ;;  %v3128_v54 = vld [vmem:[%s4467_s1 + $0x4e0] ss:$8 sps:$4 sm:$0xff]  }
  0x6d   :  { %2204 = vmatprep.subr.bf16.mxu1 %v3045_v55  ;;  %v3136_v55 = vld [vmem:[%s4467_s1 + $0x4d4] ss:$8 sps:$4 sm:$0xff]  }
  0x6f   :  { %2164 = vmatpush2.bf16.msra.mxu0 %v3040_v56  ;;  %v3131_v56 = vld [vmem:[%s4467_s1 + $0x5e0] ss:$8 sps:$4 sm:$0xff]  }
  0x70   :  { %2165 = vmatprep.subr.bf16.mxu0 %v3048_v57  ;;  %2205 = vmatpush2.bf16.msra.mxu1 %v3043_v58  ;;  %v3139_v57 = vld [vmem:[%s4467_s1 + $0x5d4] ss:$8 sps:$4 sm:$0xff]   ;;  %v3134_v58 = vld [vmem:[%s4467_s1 + $0x4d0] ss:$8 sps:$4 sm:$0xff]  }
  0x71   :  { %2206 = vmatprep.subr.bf16.mxu1 %v3051_v59  ;;  %v3142_v59 = vld [vmem:[%s4467_s1 + $0x4c4] ss:$8 sps:$4 sm:$0xff]  }
  0x73   :  { %2166 = vmatpush2.bf16.msra.mxu0 %v3046_v60  ;;  %v3137_v60 = vld [vmem:[%s4467_s1 + $0x5d0] ss:$8 sps:$4 sm:$0xff]  }
  0x74   :  { %2167 = vmatprep.subr.bf16.mxu0 %v3054_v61  ;;  %2207 = vmatpush2.bf16.msra.mxu1 %v3049_v62  ;;  %v3145_v61 = vld [vmem:[%s4467_s1 + $0x5c4] ss:$8 sps:$4 sm:$0xff]   ;;  %v3140_v62 = vld [vmem:[%s4467_s1 + $0x4c0] ss:$8 sps:$4 sm:$0xff]  }
  0x75   :  { %2208 = vmatprep.subr.bf16.mxu1 %v3057_v63  ;;  %v3148_v63 = vld [vmem:[%s4467_s1 + $0x4b4] ss:$8 sps:$4 sm:$0xff]  }
  0x77   :  { %2168 = vmatpush2.bf16.msra.mxu0 %v3052_v0  ;;  %v3143_v0 = vld [vmem:[%s4467_s1 + $0x5c0] ss:$8 sps:$4 sm:$0xff]  }
  0x78   :  { %2169 = vmatprep.subr.bf16.mxu0 %v3060_v1  ;;  %2209 = vmatpush2.bf16.msra.mxu1 %v3055_v2  ;;  %v3151_v1 = vld [vmem:[%s4467_s1 + $0x5b4] ss:$8 sps:$4 sm:$0xff]   ;;  %v3146_v2 = vld [vmem:[%s4467_s1 + $0x4b0] ss:$8 sps:$4 sm:$0xff]  }
  0x79   :  { %2210 = vmatprep.subr.bf16.mxu1 %v3063_v3  ;;  %v3154_v3 = vld [vmem:[%s4467_s1 + $0x4a4] ss:$8 sps:$4 sm:$0xff]  }
  0x7b   :  { %2170 = vmatpush2.bf16.msra.mxu0 %v3058_v4  ;;  %v3149_v4 = vld [vmem:[%s4467_s1 + $0x5b0] ss:$8 sps:$4 sm:$0xff]  }
  0x7c   :  { %2171 = vmatprep.subr.bf16.mxu0 %v3066_v5  ;;  %2211 = vmatpush2.bf16.msra.mxu1 %v3061_v6  ;;  %v3157_v5 = vld [vmem:[%s4467_s1 + $0x5a4] ss:$8 sps:$4 sm:$0xff]   ;;  %v3152_v6 = vld [vmem:[%s4467_s1 + $0x4a0] ss:$8 sps:$4 sm:$0xff]  }
  0x7d   :  { %2212 = vmatprep.subr.bf16.mxu1 %v3069_v7  ;;  %v3160_v7 = vld [vmem:[%s4467_s1 + $0x494] ss:$8 sps:$4 sm:$0xff]  }
  0x7f   :  { %2172 = vmatpush2.bf16.msra.mxu0 %v3064_v8  ;;  %v3155_v8 = vld [vmem:[%s4467_s1 + $0x5a0] ss:$8 sps:$4 sm:$0xff]  }
  0x80   :  { %2223 = vmatprep.subr.bf16.mxu0 %v3074_v9  ;;  %2213 = vmatpush2.bf16.msra.mxu1 %v3067_v10  ;;  %v3163_v9 = vld [vmem:[%s4467_s1 + $0x594] ss:$8 sps:$4 sm:$0xff]   ;;  %v3158_v10 = vld [vmem:[%s4467_s1 + $0x490] ss:$8 sps:$4 sm:$0xff]  }
  0x81   :  { %2264 = vmatprep.subr.bf16.mxu1 %v3079_v12  ;;  %v3161_v12 = vld [vmem:[%s4467_s1 + $0x590] ss:$8 sps:$4 sm:$0xff]  }
  0x82   :  { %2174 = vmatmul.mubr.bf16.vlgmr.msra.gmra.mxu0 %v2529_v11  ;;  %v3166_v11 = vld [vmem:[%s4467_s1 + $0x484] ss:$8 sps:$4 sm:$0xff]  }
  0x83   :  { %2224 = vmatpush1.bf16.msra.mxu0 %v3072_v13  ;;  %2215 = vmatmul.mubr.bf16.vlgmr.msra.gmra.mxu1 %v2531_v14  ;;  %v3164_v13 = vld [vmem:[%s4467_s1 + $0x480] ss:$8 sps:$4 sm:$0xff]   ;;  %v3169_v14 = vld [vmem:[%s4467_s1 + $0x584] ss:$8 sps:$4 sm:$0xff]  }
  0x84   :  { %2225 = vmatprep.subr.bf16.mxu0 %v3082_v15  ;;  %2265 = vmatpush1.bf16.msra.mxu1 %v3077_v16  ;;  %v3174_v15 = vld [vmem:[%s4467_s1 + $0x674] ss:$8 sps:$4 sm:$0xff]  }
  0x85   :  { %2255 = vmatprep.mubr.bf16.mxu0 %v2534_v20  ;;  %2266 = vmatprep.subr.bf16.mxu1 %v3085_v19  ;;  %v4019_v16 = vld [vmem:[%s4468_s0 + $0x30] sm:$0xff]  ;;  %v2533_v19 = vcombine.low %v3828_v17, %v3828_v17  ;;  %v2535_v17 = vcombine.low %v3841_v21, %v3841_v21  ;;  %v3180_v21 = vld [vmem:[%s4467_s1 + $0x660] ss:$8 sps:$4 sm:$0xff]  }
  0x86   :  { %2296 = vmatprep.mubr.bf16.mxu1 %v2536_v23  ;;  %v3179_v20 = vld [vmem:[%s4467_s1 + $0x774] ss:$8 sps:$4 sm:$0xff]   ;;  %v3172_v23 = vld [vmem:[%s4467_s1 + $0x670] ss:$8 sps:$4 sm:$0xff]  }
  0x87   :  { %2226 = vmatpush1.bf16.msra.mxu0 %v3080_v18  ;;  %v3167_v18 = vld [vmem:[%s4467_s1 + $0x580] ss:$8 sps:$4 sm:$0xff]  }
  0x88   :  { %2227 = vmatprep.subr.bf16.mxu0 %v3088_v22  ;;  %2267 = vmatpush1.bf16.msra.mxu1 %v3083_v24  ;;  %v4032_v22 = vld [vmem:[%s4468_s0 + $0x38] sm:$0xff]  ;;  %v2538_v24 = vcombine.high %v4019_v16, %v4019_v16 }
  0x89   :  { %2268 = vmatprep.subr.bf16.mxu1 %v3091_v25  ;;  %v3182_v25 = vld [vmem:[%s4467_s1 + $0x664] ss:$8 sps:$4 sm:$0xff]  }
  0x8b   :  { %2228 = vmatpush1.bf16.msra.mxu0 %v3086_v26  ;;  %v3177_v26 = vld [vmem:[%s4467_s1 + $0x770] ss:$8 sps:$4 sm:$0xff]  }
  0x8c   :  { %2229 = vmatprep.subr.bf16.mxu0 %v3094_v27  ;;  %2269 = vmatpush1.bf16.msra.mxu1 %v3089_v28  ;;  %v2540_v27 = vcombine.high %v4032_v22, %v4032_v22  ;;  %v3185_v28 = vld [vmem:[%s4467_s1 + $0x764] ss:$8 sps:$4 sm:$0xff]  }
  0x8d   :  { %2270 = vmatprep.subr.bf16.mxu1 %v3097_v29  ;;  %v3188_v29 = vld [vmem:[%s4467_s1 + $0x654] ss:$8 sps:$4 sm:$0xff]  }
  0x8f   :  { %2230 = vmatpush1.bf16.msra.mxu0 %v3092_v30  ;;  %v3183_v30 = vld [vmem:[%s4467_s1 + $0x760] ss:$8 sps:$4 sm:$0xff]  }
  0x90   :  { %2231 = vmatprep.subr.bf16.mxu0 %v3100_v31  ;;  %2271 = vmatpush1.bf16.msra.mxu1 %v3095_v32  ;;  %v3191_v31 = vld [vmem:[%s4467_s1 + $0x754] ss:$8 sps:$4 sm:$0xff]   ;;  %v3186_v32 = vld [vmem:[%s4467_s1 + $0x650] ss:$8 sps:$4 sm:$0xff]  }
  0x91   :  { %2272 = vmatprep.subr.bf16.mxu1 %v3103_v33  ;;  %v3194_v33 = vld [vmem:[%s4467_s1 + $0x644] ss:$8 sps:$4 sm:$0xff]  }
  0x93   :  { %2232 = vmatpush1.bf16.msra.mxu0 %v3098_v34  ;;  %v3189_v34 = vld [vmem:[%s4467_s1 + $0x750] ss:$8 sps:$4 sm:$0xff]  }
  0x94   :  { %2233 = vmatprep.subr.bf16.mxu0 %v3106_v35  ;;  %2273 = vmatpush1.bf16.msra.mxu1 %v3101_v36  ;;  %v3197_v35 = vld [vmem:[%s4467_s1 + $0x744] ss:$8 sps:$4 sm:$0xff]   ;;  %v3192_v36 = vld [vmem:[%s4467_s1 + $0x640] ss:$8 sps:$4 sm:$0xff]  }
  0x95   :  { %2274 = vmatprep.subr.bf16.mxu1 %v3109_v37  ;;  %v3200_v37 = vld [vmem:[%s4467_s1 + $0x634] ss:$8 sps:$4 sm:$0xff]  }
  0x97   :  { %2234 = vmatpush1.bf16.msra.mxu0 %v3104_v38  ;;  %v3195_v38 = vld [vmem:[%s4467_s1 + $0x740] ss:$8 sps:$4 sm:$0xff]  }
  0x98   :  { %2235 = vmatprep.subr.bf16.mxu0 %v3112_v39  ;;  %2275 = vmatpush1.bf16.msra.mxu1 %v3107_v40  ;;  %v3203_v39 = vld [vmem:[%s4467_s1 + $0x734] ss:$8 sps:$4 sm:$0xff]   ;;  %v3198_v40 = vld [vmem:[%s4467_s1 + $0x630] ss:$8 sps:$4 sm:$0xff]  }
  0x99   :  { %2276 = vmatprep.subr.bf16.mxu1 %v3115_v41  ;;  %v3206_v41 = vld [vmem:[%s4467_s1 + $0x624] ss:$8 sps:$4 sm:$0xff]  }
  0x9b   :  { %2236 = vmatpush1.bf16.msra.mxu0 %v3110_v42  ;;  %v3201_v42 = vld [vmem:[%s4467_s1 + $0x730] ss:$8 sps:$4 sm:$0xff]  }
  0x9c   :  { %2237 = vmatprep.subr.bf16.mxu0 %v3118_v43  ;;  %2277 = vmatpush1.bf16.msra.mxu1 %v3113_v44  ;;  %v3209_v43 = vld [vmem:[%s4467_s1 + $0x724] ss:$8 sps:$4 sm:$0xff]   ;;  %v3204_v44 = vld [vmem:[%s4467_s1 + $0x620] ss:$8 sps:$4 sm:$0xff]  }
  0x9d   :  { %2278 = vmatprep.subr.bf16.mxu1 %v3121_v45  ;;  %v3212_v45 = vld [vmem:[%s4467_s1 + $0x614] ss:$8 sps:$4 sm:$0xff]  }
  0x9f   :  { %2238 = vmatpush1.bf16.msra.mxu0 %v3116_v46  ;;  %v3207_v46 = vld [vmem:[%s4467_s1 + $0x720] ss:$8 sps:$4 sm:$0xff]  }
  0xa0   :  { %2239 = vmatprep.subr.bf16.mxu0 %v3124_v47  ;;  %2279 = vmatpush1.bf16.msra.mxu1 %v3119_v48  ;;  %v3215_v47 = vld [vmem:[%s4467_s1 + $0x714] ss:$8 sps:$4 sm:$0xff]   ;;  %v3210_v48 = vld [vmem:[%s4467_s1 + $0x610] ss:$8 sps:$4 sm:$0xff]  }
  0xa1   :  { %2280 = vmatprep.subr.bf16.mxu1 %v3127_v49  ;;  %v3218_v49 = vld [vmem:[%s4467_s1 + $0x604] ss:$8 sps:$4 sm:$0xff]  }
  0xa3   :  { %2240 = vmatpush2.bf16.msra.mxu0 %v3122_v50  ;;  %v3213_v50 = vld [vmem:[%s4467_s1 + $0x710] ss:$8 sps:$4 sm:$0xff]  }
  0xa4   :  { %2241 = vmatprep.subr.bf16.mxu0 %v3130_v51  ;;  %2281 = vmatpush2.bf16.msra.mxu1 %v3125_v52  ;;  %v3221_v51 = vld [vmem:[%s4467_s1 + $0x704] ss:$8 sps:$4 sm:$0xff]   ;;  %v3216_v52 = vld [vmem:[%s4467_s1 + $0x600] ss:$8 sps:$4 sm:$0xff]  }
  0xa5   :  { %2282 = vmatprep.subr.bf16.mxu1 %v3133_v53  ;;  %v3224_v53 = vld [vmem:[%s4467_s1 + $0x6f4] ss:$8 sps:$4 sm:$0xff]  }
  0xa7   :  { %2242 = vmatpush2.bf16.msra.mxu0 %v3128_v54  ;;  %v3219_v54 = vld [vmem:[%s4467_s1 + $0x700] ss:$8 sps:$4 sm:$0xff]  }
  0xa8   :  { %2243 = vmatprep.subr.bf16.mxu0 %v3136_v55  ;;  %2283 = vmatpush2.bf16.msra.mxu1 %v3131_v56  ;;  %v3227_v55 = vld [vmem:[%s4467_s1 + $0x7f4] ss:$8 sps:$4 sm:$0xff]   ;;  %v3222_v56 = vld [vmem:[%s4467_s1 + $0x6f0] ss:$8 sps:$4 sm:$0xff]  }
  0xa9   :  { %2284 = vmatprep.subr.bf16.mxu1 %v3139_v57  ;;  %v3230_v57 = vld [vmem:[%s4467_s1 + $0x6e4] ss:$8 sps:$4 sm:$0xff]  }
  0xab   :  { %2244 = vmatpush2.bf16.msra.mxu0 %v3134_v58  ;;  %v3225_v58 = vld [vmem:[%s4467_s1 + $0x7f0] ss:$8 sps:$4 sm:$0xff]  }
  0xac   :  { %2245 = vmatprep.subr.bf16.mxu0 %v3142_v59  ;;  %2285 = vmatpush2.bf16.msra.mxu1 %v3137_v60  ;;  %v3233_v59 = vld [vmem:[%s4467_s1 + $0x7e4] ss:$8 sps:$4 sm:$0xff]   ;;  %v3228_v60 = vld [vmem:[%s4467_s1 + $0x6e0] ss:$8 sps:$4 sm:$0xff]  }
  0xad   :  { %2286 = vmatprep.subr.bf16.mxu1 %v3145_v61  ;;  %v3236_v61 = vld [vmem:[%s4467_s1 + $0x6d4] ss:$8 sps:$4 sm:$0xff]  }
  0xaf   :  { %2246 = vmatpush2.bf16.msra.mxu0 %v3140_v62  ;;  %v3231_v62 = vld [vmem:[%s4467_s1 + $0x7e0] ss:$8 sps:$4 sm:$0xff]  }
  0xb0   :  { %2247 = vmatprep.subr.bf16.mxu0 %v3148_v63  ;;  %2287 = vmatpush2.bf16.msra.mxu1 %v3143_v0  ;;  %v3239_v63 = vld [vmem:[%s4467_s1 + $0x7d4] ss:$8 sps:$4 sm:$0xff]   ;;  %v3234_v0 = vld [vmem:[%s4467_s1 + $0x6d0] ss:$8 sps:$4 sm:$0xff]  }
  0xb1   :  { %2288 = vmatprep.subr.bf16.mxu1 %v3151_v1  ;;  %v3242_v1 = vld [vmem:[%s4467_s1 + $0x6c4] ss:$8 sps:$4 sm:$0xff]  }
  0xb3   :  { %2248 = vmatpush2.bf16.msra.mxu0 %v3146_v2  ;;  %v3237_v2 = vld [vmem:[%s4467_s1 + $0x7d0] ss:$8 sps:$4 sm:$0xff]  }
  0xb4   :  { %2249 = vmatprep.subr.bf16.mxu0 %v3154_v3  ;;  %2289 = vmatpush2.bf16.msra.mxu1 %v3149_v4  ;;  %v3245_v3 = vld [vmem:[%s4467_s1 + $0x7c4] ss:$8 sps:$4 sm:$0xff]   ;;  %v3240_v4 = vld [vmem:[%s4467_s1 + $0x6c0] ss:$8 sps:$4 sm:$0xff]  }
  0xb5   :  { %2290 = vmatprep.subr.bf16.mxu1 %v3157_v5  ;;  %v3248_v5 = vld [vmem:[%s4467_s1 + $0x6b4] ss:$8 sps:$4 sm:$0xff]  }
  0xb7   :  { %2250 = vmatpush2.bf16.msra.mxu0 %v3152_v6  ;;  %v3243_v6 = vld [vmem:[%s4467_s1 + $0x7c0] ss:$8 sps:$4 sm:$0xff]  }
  0xb8   :  { %2251 = vmatprep.subr.bf16.mxu0 %v3160_v7  ;;  %2291 = vmatpush2.bf16.msra.mxu1 %v3155_v8  ;;  %v3251_v7 = vld [vmem:[%s4467_s1 + $0x7b4] ss:$8 sps:$4 sm:$0xff]   ;;  %v3246_v8 = vld [vmem:[%s4467_s1 + $0x6b0] ss:$8 sps:$4 sm:$0xff]  }
  0xb9   :  { %2292 = vmatprep.subr.bf16.mxu1 %v3163_v9  ;;  %v3254_v9 = vld [vmem:[%s4467_s1 + $0x6a4] ss:$8 sps:$4 sm:$0xff]  }
  0xbb   :  { %2252 = vmatpush2.bf16.msra.mxu0 %v3158_v10  ;;  %v3249_v10 = vld [vmem:[%s4467_s1 + $0x7b0] ss:$8 sps:$4 sm:$0xff]  }
  0xbc   :  { %2253 = vmatprep.subr.bf16.mxu0 %v3166_v11  ;;  %2293 = vmatpush2.bf16.msra.mxu1 %v3161_v12  ;;  %v3257_v11 = vld [vmem:[%s4467_s1 + $0x7a4] ss:$8 sps:$4 sm:$0xff]   ;;  %v3252_v12 = vld [vmem:[%s4467_s1 + $0x6a0] ss:$8 sps:$4 sm:$0xff]  }
  0xbd   :  { %2294 = vmatprep.subr.bf16.mxu1 %v3169_v14  ;;  %v3260_v14 = vld [vmem:[%s4467_s1 + $0x694] ss:$8 sps:$4 sm:$0xff]  }
  0xbf   :  { %2254 = vmatpush2.bf16.msra.mxu0 %v3164_v13  ;;  %v352_v13 = vlaneseq }
  0xc0   :  { %2305 = vmatprep.subr.bf16.mxu0 %v3174_v15  ;;  %2295 = vmatpush2.bf16.msra.mxu1 %v3167_v18  ;;  %v3255_v15 = vld [vmem:[%s4467_s1 + $0x7a0] ss:$8 sps:$4 sm:$0xff]   ;;  %v3263_v18 = vld [vmem:[%s4467_s1 + $0x794] ss:$8 sps:$4 sm:$0xff]  }
  0xc1   :  { %2346 = vmatprep.subr.bf16.mxu1 %v3179_v20  ;;  %v353_v20 = vshrl.u32 %v352_v13, 7  ;;  %v3316_v13 = vld [vmem:[%s4467_s1 + $0x800] ss:$8 sps:$4 sm:$0xff]  }
  0xc2   :  { %2256 = vmatmul.mubr.bf16.vlgmr.msra.gmra.mxu0 %v2533_v19  ;;  %v3258_v19 = vld [vmem:[%s4467_s1 + $0x690] ss:$8 sps:$4 sm:$0xff]  }
  0xc3   :  { %2306 = vmatpush1.bf16.msra.mxu0 %v3172_v23  ;;  %2337 = vmatprep.mubr.bf16.mxu0 %v2538_v24  ;;  %v3266_v23 = vld [vmem:[%s4467_s1 + $0x684] ss:$8 sps:$4 sm:$0xff]   ;;  %v3261_v24 = vld [vmem:[%s4467_s1 + $0x790] ss:$8 sps:$4 sm:$0xff]  }
  0xc4   :  { %2297 = vmatmul.mubr.bf16.vlgmr.msra.gmra.mxu1 %v2535_v17  ;;  %2307 = vmatprep.subr.bf16.mxu0 %v3182_v25  ;;  %v3269_v17 = vld [vmem:[%s4467_s1 + $0x784] ss:$8 sps:$4 sm:$0xff]   ;;  %v3264_v25 = vld [vmem:[%s4467_s1 + $0x680] ss:$8 sps:$4 sm:$0xff]  }
  0xc5   :  { %2347 = vmatpush1.bf16.msra.mxu1 %v3177_v26  ;;  %2378 = vmatprep.mubr.bf16.mxu1 %v2540_v27  ;;  %v354_v26 = vsub.s32 0, %v353_v20  ;;  %v350_v27 = vld [vmem:[%s4469_s2] sm:$0x3] }
  0xc6   :  { %2348 = vmatprep.subr.bf16.mxu1 %v3185_v28  ;;  %v3274_v28 = vld [vmem:[%s4467_s1 + $0x874] ss:$8 sps:$4 sm:$0xff]  }
  0xc7   :  { %2308 = vmatpush1.bf16.msra.mxu0 %v3180_v21  ;;  %v4232_v21 = vld [vmem:[%s4468_s0 + $0x40] sm:$0xff] }
  0xc8   :  { %2309 = vmatprep.subr.bf16.mxu0 %v3188_v29  ;;  %v3267_v29 = vld [vmem:[%s4467_s1 + $0x780] ss:$8 sps:$4 sm:$0xff]  }
  0xc9   :  { %2349 = vmatpush1.bf16.msra.mxu1 %v3183_v30  ;;  %v358_v30 = vsub.s32 1, %v353_v20  ;;  %v3330_v20 = vld [vmem:[%s4467_s1 + $0x8e4] ss:$8 sps:$4 sm:$0xff]  }
  0xca   :  { %2350 = vmatprep.subr.bf16.mxu1 %v3191_v31  ;;  %v2537_v31 = vcombine.low %v4019_v16, %v4019_v16  ;;  %v2539_v16 = vcombine.low %v4032_v22, %v4032_v22  ;;  %v3285_v22 = vld [vmem:[%s4467_s1 + $0x964] ss:$8 sps:$4 sm:$0xff]  }
  0xcb   :  { %2310 = vmatpush1.bf16.msra.mxu0 %v3186_v32  ;;  %v3279_v32 = vld [vmem:[%s4467_s1 + $0x974] ss:$8 sps:$4 sm:$0xff]  }
  0xcc   :  { %2311 = vmatprep.subr.bf16.mxu0 %v3194_v33  ;;  %v4245_v33 = vld [vmem:[%s4468_s0 + $0x48] sm:$0xff] }
  0xcd   :  { %2351 = vmatpush1.bf16.msra.mxu1 %v3189_v34  ;;  %v355_v34 = vrot.slane %v350_v27, %v354_v26  ;;  %v3331_v26 = vld [vmem:[%s4467_s1 + $0x9e0] ss:$8 sps:$4 sm:$0xff]  }
  0xce   :  { %2352 = vmatprep.subr.bf16.mxu1 %v3197_v35  ;;  %v3272_v35 = vld [vmem:[%s4467_s1 + $0x870] ss:$8 sps:$4 sm:$0xff]  }
  0xcf   :  { %2312 = vmatpush1.bf16.msra.mxu0 %v3192_v36  ;;  %v2542_v36 = vcombine.high %v4232_v21, %v4232_v21 }
  0xd0   :  { %2313 = vmatprep.subr.bf16.mxu0 %v3200_v37  ;;  %v3282_v37 = vld [vmem:[%s4467_s1 + $0x864] ss:$8 sps:$4 sm:$0xff]  }
  0xd1   :  { %2353 = vmatpush1.bf16.msra.mxu1 %v3195_v38  ;;  %v3277_v38 = vld [vmem:[%s4467_s1 + $0x970] ss:$8 sps:$4 sm:$0xff]  }
  0xd2   :  { %2354 = vmatprep.subr.bf16.mxu1 %v3203_v39  ;;  %v359_v39 = vrot.slane %v350_v27, %v358_v30  ;;  %v3339_v27 = vld [vmem:[%s4467_s1 + $0x9d4] ss:$8 sps:$4 sm:$0xff]   ;;  %v3337_v30 = vld [vmem:[%s4467_s1 + $0x9d0] ss:$8 sps:$4 sm:$0xff]  }
  0xd3   :  { %2314 = vmatpush1.bf16.msra.mxu0 %v3198_v40  ;;  %v2544_v40 = vcombine.high %v4245_v33, %v4245_v33 }
  0xd4   :  { %2315 = vmatprep.subr.bf16.mxu0 %v3206_v41 }
  0xd5   :  { %2355 = vmatpush1.bf16.msra.mxu1 %v3201_v42 }
  0xd6   :  { %2356 = vmatprep.subr.bf16.mxu1 %v3209_v43  ;;  %v3280_v43 = vld [vmem:[%s4467_s1 + $0x860] ss:$8 sps:$4 sm:$0xff]  }
  0xd7   :  { %2316 = vmatpush1.bf16.msra.mxu0 %v3204_v44 }
  0xd8   :  { %2317 = vmatprep.subr.bf16.mxu0 %v3212_v45 }
  0xd9   :  { %2357 = vmatpush1.bf16.msra.mxu1 %v3207_v46  ;;  %v3288_v46 = vld [vmem:[%s4467_s1 + $0x854] ss:$8 sps:$4 sm:$0xff]  }
  0xda   :  { %2358 = vmatprep.subr.bf16.mxu1 %v3215_v47 }
  0xdb   :  { %2318 = vmatpush1.bf16.msra.mxu0 %v3210_v48 }
  0xdc   :  { %2319 = vmatprep.subr.bf16.mxu0 %v3218_v49  ;;  %v3283_v49 = vld [vmem:[%s4467_s1 + $0x960] ss:$8 sps:$4 sm:$0xff]  }
  0xdd   :  { %2359 = vmatpush1.bf16.msra.mxu1 %v3213_v50 }
  0xde   :  { %2360 = vmatprep.subr.bf16.mxu1 %v3221_v51 }
  0xdf   :  { %2320 = vmatpush1.bf16.msra.mxu0 %v3216_v52  ;;  %v3291_v52 = vld [vmem:[%s4467_s1 + $0x954] ss:$8 sps:$4 sm:$0xff]  }
  0xe0   :  { %2321 = vmatprep.subr.bf16.mxu0 %v3224_v53 }
  0xe1   :  { %2361 = vmatpush1.bf16.msra.mxu1 %v3219_v54  ;;  %v3286_v54 = vld [vmem:[%s4467_s1 + $0x850] ss:$8 sps:$4 sm:$0xff]  }
  0xe2   :  { %2362 = vmatprep.subr.bf16.mxu1 %v3227_v55 }
  0xe3   :  { %2322 = vmatpush2.bf16.msra.mxu0 %v3222_v56 }
  0xe4   :  { %2323 = vmatprep.subr.bf16.mxu0 %v3230_v57  ;;  %v3294_v57 = vld [vmem:[%s4467_s1 + $0x844] ss:$8 sps:$4 sm:$0xff]  }
  0xe5   :  { %2363 = vmatpush2.bf16.msra.mxu1 %v3225_v58  ;;  %v3289_v58 = vld [vmem:[%s4467_s1 + $0x950] ss:$8 sps:$4 sm:$0xff]  }
  0xe6   :  { %2364 = vmatprep.subr.bf16.mxu1 %v3233_v59 }
  0xe7   :  { %2324 = vmatpush2.bf16.msra.mxu0 %v3228_v60  ;;  %v3297_v60 = vld [vmem:[%s4467_s1 + $0x944] ss:$8 sps:$4 sm:$0xff]  }
  0xe8   :  { %2325 = vmatprep.subr.bf16.mxu0 %v3236_v61  ;;  %v3292_v61 = vld [vmem:[%s4467_s1 + $0x840] ss:$8 sps:$4 sm:$0xff]  }
  0xe9   :  { %2365 = vmatpush2.bf16.msra.mxu1 %v3231_v62  ;;  %v3300_v62 = vld [vmem:[%s4467_s1 + $0x834] ss:$8 sps:$4 sm:$0xff]  }
  0xea   :  { %2366 = vmatprep.subr.bf16.mxu1 %v3239_v63  ;;  %v3295_v63 = vld [vmem:[%s4467_s1 + $0x940] ss:$8 sps:$4 sm:$0xff]  }
  0xeb   :  { %2326 = vmatpush2.bf16.msra.mxu0 %v3234_v0  ;;  %v3303_v0 = vld [vmem:[%s4467_s1 + $0x934] ss:$8 sps:$4 sm:$0xff]  }
  0xec   :  { %2327 = vmatprep.subr.bf16.mxu0 %v3242_v1  ;;  %v3298_v1 = vld [vmem:[%s4467_s1 + $0x830] ss:$8 sps:$4 sm:$0xff]  }
  0xed   :  { %2367 = vmatpush2.bf16.msra.mxu1 %v3237_v2  ;;  %v3306_v2 = vld [vmem:[%s4467_s1 + $0x824] ss:$8 sps:$4 sm:$0xff]  }
  0xee   :  { %2368 = vmatprep.subr.bf16.mxu1 %v3245_v3  ;;  %v3301_v3 = vld [vmem:[%s4467_s1 + $0x930] ss:$8 sps:$4 sm:$0xff]  }
  0xef   :  { %2328 = vmatpush2.bf16.msra.mxu0 %v3240_v4  ;;  %v3309_v4 = vld [vmem:[%s4467_s1 + $0x924] ss:$8 sps:$4 sm:$0xff]  }
  0xf0   :  { %2329 = vmatprep.subr.bf16.mxu0 %v3248_v5  ;;  %v3304_v5 = vld [vmem:[%s4467_s1 + $0x820] ss:$8 sps:$4 sm:$0xff]  }
  0xf1   :  { %2369 = vmatpush2.bf16.msra.mxu1 %v3243_v6  ;;  %v3312_v6 = vld [vmem:[%s4467_s1 + $0x814] ss:$8 sps:$4 sm:$0xff]  }
  0xf2   :  { %2370 = vmatprep.subr.bf16.mxu1 %v3251_v7  ;;  %v3307_v7 = vld [vmem:[%s4467_s1 + $0x920] ss:$8 sps:$4 sm:$0xff]  }
  0xf3   :  { %2330 = vmatpush2.bf16.msra.mxu0 %v3246_v8  ;;  %v3315_v8 = vld [vmem:[%s4467_s1 + $0x914] ss:$8 sps:$4 sm:$0xff]  }
  0xf4   :  { %2331 = vmatprep.subr.bf16.mxu0 %v3254_v9  ;;  %v3310_v9 = vld [vmem:[%s4467_s1 + $0x810] ss:$8 sps:$4 sm:$0xff]  }
  0xf5   :  { %2371 = vmatpush2.bf16.msra.mxu1 %v3249_v10  ;;  %v3318_v10 = vld [vmem:[%s4467_s1 + $0x804] ss:$8 sps:$4 sm:$0xff]  }
  0xf6   :  { %2372 = vmatprep.subr.bf16.mxu1 %v3257_v11  ;;  %v3313_v11 = vld [vmem:[%s4467_s1 + $0x910] ss:$8 sps:$4 sm:$0xff]  }
  0xf7   :  { %2332 = vmatpush2.bf16.msra.mxu0 %v3252_v12  ;;  %v3321_v12 = vld [vmem:[%s4467_s1 + $0x904] ss:$8 sps:$4 sm:$0xff]  }
  0xf8   :  { %2333 = vmatprep.subr.bf16.mxu0 %v3260_v14  ;;  %v3324_v14 = vld [vmem:[%s4467_s1 + $0x8f4] ss:$8 sps:$4 sm:$0xff]  }
  0xf9   :  { %2373 = vmatpush2.bf16.msra.mxu1 %v3255_v15  ;;  %v3319_v15 = vld [vmem:[%s4467_s1 + $0x900] ss:$8 sps:$4 sm:$0xff]  }
  0xfa   :  { %2374 = vmatprep.subr.bf16.mxu1 %v3263_v18  ;;  %v3327_v18 = vld [vmem:[%s4467_s1 + $0x9f4] ss:$8 sps:$4 sm:$0xff]  }
  0xfb   :  { %2334 = vmatpush2.bf16.msra.mxu0 %v3258_v19  ;;  %v3322_v19 = vld [vmem:[%s4467_s1 + $0x8f0] ss:$8 sps:$4 sm:$0xff]  }
  0xfc   :  { %2335 = vmatprep.subr.bf16.mxu0 %v3266_v23  ;;  %v3325_v23 = vld [vmem:[%s4467_s1 + $0x9f0] ss:$8 sps:$4 sm:$0xff]  }
  0xfd   :  { %2375 = vmatpush2.bf16.msra.mxu1 %v3261_v24  ;;  %v3333_v24 = vld [vmem:[%s4467_s1 + $0x9e4] ss:$8 sps:$4 sm:$0xff]  }
  0xfe   :  { %2376 = vmatprep.subr.bf16.mxu1 %v3269_v17  ;;  %v3328_v17 = vld [vmem:[%s4467_s1 + $0x8e0] ss:$8 sps:$4 sm:$0xff]  }
  0xff   :  { %2336 = vmatpush2.bf16.msra.mxu0 %v3264_v25  ;;  %v3336_v25 = vld [vmem:[%s4467_s1 + $0x8d4] ss:$8 sps:$4 sm:$0xff]  }
 0x100   :  { %2387 = vmatprep.subr.bf16.mxu0 %v3274_v28  ;;  %v3334_v28 = vld [vmem:[%s4467_s1 + $0x8d0] ss:$8 sps:$4 sm:$0xff]  }
 0x101   :  { %2377 = vmatpush2.bf16.msra.mxu1 %v3267_v29  ;;  %v3342_v29 = vld [vmem:[%s4467_s1 + $0x8c4] ss:$8 sps:$4 sm:$0xff]  }
 0x102   :  { %v2093_v41 = vpop.f32.mrf.mxu0  ;;  %2338 = vmatmul.mubr.bf16.vlgmr.msra.gmra.mxu0 %v2537_v31  ;;  %2428 = vmatprep.subr.bf16.mxu1 %v3279_v32  ;;  %v3345_v31 = vld [vmem:[%s4467_s1 + $0x9c4] ss:$8 sps:$4 sm:$0xff]   ;;  %v3340_v32 = vld [vmem:[%s4467_s1 + $0x8c0] ss:$8 sps:$4 sm:$0xff]  }
 0x103   :  { %v2094_v42 = vadd.f32 %v2093_v41, %v355_v34  ;;  %2388 = vmatpush1.bf16.msra.mxu0 %v3272_v35  ;;  %2419 = vmatprep.mubr.bf16.mxu0 %v2542_v36  ;;  %v2134_v45 = vpop.f32.mrf.mxu1  ;;  %v3348_v34 = vld [vmem:[%s4467_s1 + $0x8b4] ss:$8 sps:$4 sm:$0xff]   ;;  %v3343_v35 = vld [vmem:[%s4467_s1 + $0x9c0] ss:$8 sps:$4 sm:$0xff]  }
 0x104   :  { %v2095_v44 = vpop.f32.mrf.mxu0  ;;  %2379 = vmatmul.mubr.bf16.vlgmr.msra.gmra.mxu1 %v2539_v16  ;;  %2389 = vmatprep.subr.bf16.mxu0 %v3282_v37  ;;  %v3351_v36 = vld [vmem:[%s4467_s1 + $0x9b4] ss:$8 sps:$4 sm:$0xff]   ;;  %v3346_v16 = vld [vmem:[%s4467_s1 + $0x8b0] ss:$8 sps:$4 sm:$0xff]   ;;  %v3354_v37 = vld [vmem:[%s4467_s1 + $0x8a4] ss:$8 sps:$4 sm:$0xff]  }
 0x105   :  { %v2096_v47 = vadd.f32 %v2095_v44, %v359_v39  ;;  %v4271_v48 = vadd.f32 %v2134_v45, %v2094_v42  ;;  %2429 = vmatpush1.bf16.msra.mxu1 %v3277_v38  ;;  %2460 = vmatprep.mubr.bf16.mxu1 %v2544_v40  ;;  %v2136_v51 = vpop.f32.mrf.mxu1  ;;  %v3349_v38 = vld [vmem:[%s4467_s1 + $0x9b0] ss:$8 sps:$4 sm:$0xff]   ;;  %v3357_v39 = vld [vmem:[%s4467_s1 + $0x9a4] ss:$8 sps:$4 sm:$0xff]   ;;  %v3352_v40 = vld [vmem:[%s4467_s1 + $0x8a0] ss:$8 sps:$4 sm:$0xff]  }
 0x106   :  { %v2097_v50 = vpop.f32.mrf.mxu0  ;;  %2430 = vmatprep.subr.bf16.mxu1 %v3285_v22  ;;  %v3360_v41 = vld [vmem:[%s4467_s1 + $0x894] ss:$8 sps:$4 sm:$0xff]   ;;  %v3355_v22 = vld [vmem:[%s4467_s1 + $0x9a0] ss:$8 sps:$4 sm:$0xff]   ;;  %v3366_v44 = vld [vmem:[%s4467_s1 + $0x884] ss:$8 sps:$4 sm:$0xff]  }
 0x107   :  { %v4279_v53 = vadd.f32 %v2136_v51, %v2096_v47  ;;  %2390 = vmatpush1.bf16.msra.mxu0 %v3280_v43  ;;  %v2138_v56 = vpop.f32.mrf.mxu1  ;;  %v3363_v42 = vld [vmem:[%s4467_s1 + $0x994] ss:$8 sps:$4 sm:$0xff]   ;;  %v3358_v43 = vld [vmem:[%s4467_s1 + $0x890] ss:$8 sps:$4 sm:$0xff]   ;;  %v3364_v47 = vld [vmem:[%s4467_s1 + $0x880] ss:$8 sps:$4 sm:$0xff]   ;;  %v2541_v51 = vcombine.low %v4232_v21, %v4232_v21 }
 0x108   :  { %v2098_v55 = vpop.f32.mrf.mxu0  ;;  %2391 = vmatprep.subr.bf16.mxu0 %v3288_v46  ;;  %v3361_v45 = vld [vmem:[%s4467_s1 + $0x990] ss:$8 sps:$4 sm:$0xff]   ;;  %v3369_v46 = vld [vmem:[%s4467_s1 + $0x984] ss:$8 sps:$4 sm:$0xff]   ;;  %v3367_v50 = vld [vmem:[%s4467_s1 + $0x980] ss:$8 sps:$4 sm:$0xff]  }
 0x109   :  { %2431 = vmatpush1.bf16.msra.mxu1 %v3283_v49  ;;  %v2139_v59 = vpop.f32.mrf.mxu1  ;;  %v3376_v49 = vld [vmem:[%s4467_s1 + $0xa14] ss:$8 sps:$4 sm:$0xff]   ;;  %v3379_v55 = vld [vmem:[%s4467_s1 + $0xa04] ss:$8 sps:$4 sm:$0xff]   ;;  %v3377_v21 = vld [vmem:[%s4467_s1 + $0xa00] ss:$8 sps:$4 sm:$0xff]  }
 0x10a   :  { %2432 = vmatprep.subr.bf16.mxu1 %v3291_v52  ;;  %v3374_v52 = vld [vmem:[%s4467_s1 + $0xa10] ss:$8 sps:$4 sm:$0xff]  }
 0x10b   :  { %2392 = vmatpush1.bf16.msra.mxu0 %v3286_v54  ;;  %v2543_v54 = vcombine.low %v4245_v33, %v4245_v33 }
 0x10c   :  { %2393 = vmatprep.subr.bf16.mxu0 %v3294_v57 }
 0x10d   :  { %2433 = vmatpush1.bf16.msra.mxu1 %v3289_v58  ;;  %v3381_v58 = vmov 0  }
 0x10e   :  { %2434 = vmatprep.subr.bf16.mxu1 %v3297_v60 }
 0x10f   :  { %2394 = vmatpush1.bf16.msra.mxu0 %v3292_v61 }
 0x110   :  { %2395 = vmatprep.subr.bf16.mxu0 %v3300_v62 }
 0x111   :  { %2435 = vmatpush1.bf16.msra.mxu1 %v3295_v63 }
 0x112   :  { %2436 = vmatprep.subr.bf16.mxu1 %v3303_v0 }
 0x113   :  { %2396 = vmatpush1.bf16.msra.mxu0 %v3298_v1 }
 0x114   :  { %2397 = vmatprep.subr.bf16.mxu0 %v3306_v2 }
 0x115   :  { %2437 = vmatpush1.bf16.msra.mxu1 %v3301_v3 }
 0x116   :  { %2438 = vmatprep.subr.bf16.mxu1 %v3309_v4 }
 0x117   :  { %2398 = vmatpush1.bf16.msra.mxu0 %v3304_v5 }
 0x118   :  { %2399 = vmatprep.subr.bf16.mxu0 %v3312_v6 }
 0x119   :  { %2439 = vmatpush1.bf16.msra.mxu1 %v3307_v7 }
 0x11a   :  { %2440 = vmatprep.subr.bf16.mxu1 %v3315_v8 }
 0x11b   :  { %2400 = vmatpush1.bf16.msra.mxu0 %v3310_v9 }
 0x11c   :  { %2401 = vmatprep.subr.bf16.mxu0 %v3318_v10 }
 0x11d   :  { %2441 = vmatpush1.bf16.msra.mxu1 %v3313_v11 }
 0x11e   :  { %2442 = vmatprep.subr.bf16.mxu1 %v3321_v12 }
 0x11f   :  { %2402 = vmatpush1.bf16.msra.mxu0 %v3316_v13 }
 0x120   :  { %2403 = vmatprep.subr.bf16.mxu0 %v3324_v14 }
 0x121   :  { %2443 = vmatpush1.bf16.msra.mxu1 %v3319_v15 }
 0x122   :  { %2444 = vmatprep.subr.bf16.mxu1 %v3327_v18 }
 0x123   :  { %2404 = vmatpush2.bf16.msra.mxu0 %v3322_v19 }
 0x124   :  { %2405 = vmatprep.subr.bf16.mxu0 %v3330_v20 }
 0x125   :  { %2445 = vmatpush2.bf16.msra.mxu1 %v3325_v23 }
 0x126   :  { %2446 = vmatprep.subr.bf16.mxu1 %v3333_v24 }
 0x127   :  { %2406 = vmatpush2.bf16.msra.mxu0 %v3328_v17 }
 0x128   :  { %2407 = vmatprep.subr.bf16.mxu0 %v3336_v25 }
 0x129   :  { %2447 = vmatpush2.bf16.msra.mxu1 %v3331_v26 }
 0x12a   :  { %2448 = vmatprep.subr.bf16.mxu1 %v3339_v27 }
 0x12b   :  { %2408 = vmatpush2.bf16.msra.mxu0 %v3334_v28 }
 0x12c   :  { %2409 = vmatprep.subr.bf16.mxu0 %v3342_v29 }
 0x12d   :  { %2449 = vmatpush2.bf16.msra.mxu1 %v3337_v30 }
 0x12e   :  { %2450 = vmatprep.subr.bf16.mxu1 %v3345_v31 }
 0x12f   :  { %2410 = vmatpush2.bf16.msra.mxu0 %v3340_v32 }
 0x130   :  { %2411 = vmatprep.subr.bf16.mxu0 %v3348_v34 }
 0x131   :  { %2451 = vmatpush2.bf16.msra.mxu1 %v3343_v35 }
 0x132   :  { %2452 = vmatprep.subr.bf16.mxu1 %v3351_v36 }
 0x133   :  { %2412 = vmatpush2.bf16.msra.mxu0 %v3346_v16 }
 0x134   :  { %2413 = vmatprep.subr.bf16.mxu0 %v3354_v37 }
 0x135   :  { %2453 = vmatpush2.bf16.msra.mxu1 %v3349_v38 }
 0x136   :  { %2454 = vmatprep.subr.bf16.mxu1 %v3357_v39 }
 0x137   :  { %2414 = vmatpush2.bf16.msra.mxu0 %v3352_v40 }
 0x138   :  { %2415 = vmatprep.subr.bf16.mxu0 %v3360_v41 }
 0x139   :  { %2455 = vmatpush2.bf16.msra.mxu1 %v3355_v22 }
 0x13a   :  { %2456 = vmatprep.subr.bf16.mxu1 %v3363_v42 }
 0x13b   :  { %2416 = vmatpush2.bf16.msra.mxu0 %v3358_v43 }
 0x13c   :  { %2417 = vmatprep.subr.bf16.mxu0 %v3366_v44 }
 0x13d   :  { %2457 = vmatpush2.bf16.msra.mxu1 %v3361_v45 }
 0x13e   :  { %2458 = vmatprep.subr.bf16.mxu1 %v3369_v46 }
 0x13f   :  { %2418 = vmatpush2.bf16.msra.mxu0 %v3364_v47 }
 0x140   :  { %2481 = vmatprep.subr.bf16.mxu0 %v3376_v49 }
 0x141   :  { %2459 = vmatpush2.bf16.msra.mxu1 %v3367_v50 }
 0x142   :  { %v2175_v56 = vpop.f32.mrf.mxu0  ;;  %2420 = vmatmul.mubr.bf16.vlgmr.msra.gmra.mxu0 %v2541_v51 }
 0x143   :  { %v2176_v57 = vadd.f32 %v2175_v56, %v4271_v48  ;;  %2482 = vmatpush1.bf16.msra.mxu0 %v3374_v52  ;;  %2501 = vmatprep.mubr.bf16.mxu0 %v3381_v58  ;;  %v2216_v33 = vpop.f32.mrf.mxu1  ;;  %v3380_v48 = vld [vmem:[%s4468_s0 + $0x50] ss:$0 sps:$4 sm:$0xff]  }
 0x144   :  { %2461 = vmatmul.mubr.bf16.vlgmr.msra.gmra.mxu1 %v2543_v54  ;;  %v2177_v59 = vpop.f32.mrf.mxu0  ;;  %2483 = vmatprep.subr.bf16.mxu0 %v3379_v55 }
 0x145   :  { %v2178_v60 = vadd.f32 %v2177_v59, %v4279_v53  ;;  %v2217_v61 = vadd.f32 %v2216_v33, %v2176_v57  ;;  %v2218_v63 = vpop.f32.mrf.mxu1 }
 0x146   :  { %v2179_v62 = vpop.f32.mrf.mxu0 }
 0x147   :  { %v2219_v0 = vadd.f32 %v2218_v63, %v2178_v60  ;;  %2484 = vmatpush1.bf16.msra.mxu0 %v3377_v21  ;;  %v2220_v2 = vpop.f32.mrf.mxu1 }
 0x148   :  { %v2180_v1 = vpop.f32.mrf.mxu0 }
 0x149   :  { %v2221_v3 = vpop.f32.mrf.mxu1 }
 0x14a   :  { %2870 = vmatmul.mubr.msk.bf16.vlgmr.msra.gmra.mxu0 %vm2055_vm0, %v3380_v48 }
 0x182   :  { %v2257_v4 = vpop.f32.mrf.mxu0 }
 0x183   :  { %v2258_v5 = vadd.f32 %v2257_v4, %v2217_v61 }
 0x184   :  { %v2259_v6 = vpop.f32.mrf.mxu0  ;;  %v2298_v7 = vpop.f32.mrf.mxu1 }
 0x185   :  { %v2260_v8 = vadd.f32 %v2259_v6, %v2219_v0  ;;  %v2299_v53 = vadd.f32 %v2298_v7, %v2258_v5 }
 0x186   :  { %v2261_v9 = vpop.f32.mrf.mxu0  ;;  %v2300_v10 = vpop.f32.mrf.mxu1 }
 0x187   :  { %v2301_v11 = vadd.f32 %v2300_v10, %v2260_v8 }
 0x188   :  { %v2262_v12 = vpop.f32.mrf.mxu0  ;;  %v2302_v13 = vpop.f32.mrf.mxu1 }
 0x18a   :  { %v2303_v14 = vpop.f32.mrf.mxu1 }
 0x1c2   :  { %v2339_v15 = vpop.f32.mrf.mxu0 }
 0x1c3   :  { %v2340_v18 = vadd.f32 %v2339_v15, %v2299_v53 }
 0x1c4   :  { %v2341_v19 = vpop.f32.mrf.mxu0  ;;  %v2380_v20 = vpop.f32.mrf.mxu1 }
 0x1c5   :  { %v2342_v23 = vadd.f32 %v2341_v19, %v2301_v11  ;;  %v2381_v24 = vadd.f32 %v2380_v20, %v2340_v18 }
 0x1c6   :  { %v2343_v17 = vpop.f32.mrf.mxu0  ;;  %v2382_v25 = vpop.f32.mrf.mxu1 }
 0x1c7   :  { %v2383_v26 = vadd.f32 %v2382_v25, %v2342_v23 }
 0x1c8   :  { %v2344_v27 = vpop.f32.mrf.mxu0  ;;  %v2384_v28 = vpop.f32.mrf.mxu1 }
 0x1ca   :  { %v2385_v29 = vpop.f32.mrf.mxu1 }
 0x202   :  { %v2421_v30 = vpop.f32.mrf.mxu0 }
 0x203   :  { %v2422_v34 = vadd.f32 %v2421_v30, %v2381_v24 }
 0x204   :  { %v2462_v31 = vpop.f32.mrf.mxu1  ;;  %v2423_v32 = vpop.f32.mrf.mxu0 }
 0x205   :  { %v2424_v16 = vadd.f32 %v2423_v32, %v2383_v26  ;;  %v2463_v39 = vadd.f32 %v2462_v31, %v2422_v34 }
 0x206   :  { %v2464_v35 = vpop.f32.mrf.mxu1  ;;  %v2425_v36 = vpop.f32.mrf.mxu0 }
 0x207   :  { %v2465_v22 = vadd.f32 %v2464_v35, %v2424_v16 }
 0x208   :  { %v2466_v37 = vpop.f32.mrf.mxu1  ;;  %v2426_v38 = vpop.f32.mrf.mxu0 }
 0x20a   :  { %v2467_v40 = vpop.f32.mrf.mxu1  ;;  %v2503_v41 = vpop.f32.mrf.mxu0 }
 0x20b   :  { %v2504_v42 = vadd.f32 %v2503_v41, %v2463_v39 }
 0x20c   :  { %v2505_v43 = vpop.f32.mrf.mxu0 }
 0x20d   :  { %v2506_v44 = vadd.f32 %v2505_v43, %v2465_v22  ;;  %v2510_v46 = vmax.f32 %v2504_v42, 0.0 }
 0x20e   :  { %v2507_v45 = vpop.f32.mrf.mxu0 }
 0x20f   :  { %v2511_v47 = vmax.f32 %v2506_v44, 0.0 }
 0x210   :  { %v2508_v49 = vpop.f32.mrf.mxu0 }
 0x211   :  { %v2872_v50 = vpack.c.bf16 %v2511_v47, %v2510_v46 }
 0x213   :  { %2520 = vst [vmem:[%s4470_s3] sm:$0xff] %v2872_v50 }

// kernel: unreal_forward.9
= control target key start
LH: loop header
LB: loop body
LE: loop exit
PB: predicated region body
PF: predicated region fallthrough
CT: control target
= control target key end

     0   :  { %s2199_s30 = smov 0   ;;  %s2201_s10 = smov 0   ;;  %s2737_s0 = inlined_call_operand.vmem [shape: bf16[3,8,1024], index: 0, kind: input, shape index: {}]   ;;  %s2738_s1 = inlined_call_operand.vmem [shape: f32[3,8,1], index: 1, kind: input, shape index: {}]   ;;  %s2739_s2 = inlined_call_operand.vmem [shape: f32[8,256], index: 2, kind: input, shape index: {}]   ;;  %s2740_s3 = inlined_call_operand.vmem [shape: f32[8,256], index: 3, kind: input, shape index: {}]   ;;  %s2741_s4 = inlined_call_operand.vmem [shape: bf16[256,1024], index: 4, kind: input, shape index: {}]   ;;  %s2742_s5 = inlined_call_operand.vmem [shape: bf16[256,7], index: 5, kind: input, shape index: {}]   ;;  %s2743_s6 = inlined_call_operand.vmem [shape: f32[1,7], index: 6, kind: input, shape index: {}]   ;;  %s2744_s7 = inlined_call_operand.vmem [shape: f32[3,8,7], index: 7, kind: output, shape index: {0}]   ;;  %s2745_s8 = inlined_call_operand.vmem [shape: f32[8,256], index: 8, kind: output, shape index: {1}]   ;;  %s2746_s9 = inlined_call_operand.vmem [shape: f32[8,256], index: 9, kind: output, shape index: {2}]  }
   0x1   :  { %s2203_s11 = smov 0  }
   0x2 LB: > { %s29_s12 = sadd.s32 1, %s2142_s10  ;;  %p1866_p0 = scmp.ge.s32.totalorder %s2146_s11, 1  ;;  %s2146_s11 = sphi %s2203_s11, %s20_s11   ;;  %s2142_s10 = sphi %s2201_s10, %s2748_s10   ;;  %s2138_s30 = sphi %s2199_s30, %s2747_s30  }
   0x3   : > { %p30_p1 = scmp.ge.s32.totalorder %s29_s12, 3  ;;  %p346_p2 = scmp.lt.s32.totalorder %s2146_s11, 4 }
   0x5   : > { %s2750_s12 = smov (%p30_p1, %s29_s12), 0  ;;  %p347_p3 = pnand %p1866_p0, %p346_p2 }
   0x6   : > { %p415_p4 = scmp.lt.s32.totalorder (!%p347_p3), %s2138_s30, 2  ;;  %p1871_p5 = scmp.ne.s32.totalorder (!%p347_p3), %s2138_s30, 0 }
   0x7   : > { %350 = sbr.rel (%p347_p3) target bundleno = 651 (0x28b), region = 48 }
   0xc   : > { %s416_s13 = scalar_select %p415_p4, %s2138_s30, 2 }
   0xd   : > { %462 = sbr.rel (%p1871_p5) target bundleno = 21 (0x15), region = 52 }
   0xe   : > { %s2027_s14 = sshll.u32 %s416_s13, 5  ;;  %s1869_s15 = sshll.u32 %s416_s13, 3 }
   0xf   : > { %s2220_s18 = scalar_lea.vmem %s2737_s0, %s2027_s14  ;;  %s430_s21 = scalar_lea.vmem %s2738_s1, %s1869_s15 }
  0x10   : > { %s2228_s24 = scalar_lea.vmem %s2744_s7, %s1869_s15 }
  0x12   : > { %v463_v0 = vld [vmem:[%s2739_s2] sm:$0xff]  ;;  %v464_v1 = vld [vmem:[%s2739_s2 + $0x8] sm:$0xff] }
  0x13   : > { %v467_v2 = vld [vmem:[%s2740_s3] sm:$0xff]  ;;  %465 = vst [vmem:[#allocation2] sm:$0xff] %v463_v0  ;;  %466 = vst [vmem:[#allocation2 + $0x8] sm:$0xff] %v464_v1  ;;  %v468_v3 = vld [vmem:[%s2740_s3 + $0x8] sm:$0xff] }
  0x14   : > { %469 = vst [vmem:[#allocation3 + $0x8] sm:$0xff] %v467_v2  ;;  %470 = vst [vmem:[#allocation3] sm:$0xff] %v468_v3 }
  0x15 PF: > { %v471_v4 = vld [vmem:[%s430_s21] sm:$0xff]  ;;  %v2148_v7 = vmov 0   ;;  %v556_v9 = vld [vmem:[%s2741_s4 + $0x1c8] sm:$0xff]  ;;  %v2341_v0 = vld [vmem:[%s2741_s4 + $0x1d0] sm:$0xff]  ;;  %vm1668_vm0 = vcmask 56320  }
  0x16   : > { %v555_v5 = vld [vmem:[%s2741_s4 + $0x1c0] sm:$0xff]  ;;  %2075 = vset.pattern.permute.xlu0 %v2148_v7  ;;  %v560_v10 = vld [vmem:[%s2741_s4 + $0x1e8] sm:$0xff]  ;;  %v2346_v1 = vld [vmem:[%s2741_s4 + $0x1f0] sm:$0xff] }
  0x17   : > { %v559_v6 = vld [vmem:[%s2741_s4 + $0x1e0] sm:$0xff]  ;;  %476 = vperm.xlu0 %2075, %v471_v4   ;;  %v1931_v13 = vcombine.high %v556_v9, %v560_v10  ;;  %v1930_v14 = vcombine.low %v556_v9, %v560_v10  ;;  %v548_v16 = vld [vmem:[%s2741_s4 + $0x188] sm:$0xff]  ;;  %v2351_v2 = vld [vmem:[%s2741_s4 + $0x1d8] sm:$0xff]  ;;  %v1932_v4 = vcombine.low %v2341_v0, %v2346_v1 }
  0x18   : > { %v1929_v8 = vcombine.high %v555_v5, %v559_v6  ;;  %v1928_v11 = vcombine.low %v555_v5, %v559_v6  ;;  %v547_v12 = vld [vmem:[%s2741_s4 + $0x180] sm:$0xff]  ;;  %v552_v17 = vld [vmem:[%s2741_s4 + $0x1a8] sm:$0xff]  ;;  %v2358_v5 = vld [vmem:[%s2741_s4 + $0x1f8] sm:$0xff] }
  0x19   : > { %v551_v15 = vld [vmem:[%s2741_s4 + $0x1a0] sm:$0xff]  ;;  %v1923_v19 = vcombine.high %v548_v16, %v552_v17  ;;  %v540_v22 = vld [vmem:[%s2741_s4 + $0x148] sm:$0xff]  ;;  %1308 = vmatprep.subr.bf16.mxu1 %v1931_v13  ;;  %v1922_v25 = vcombine.low %v548_v16, %v552_v17 }
  0x1a   : > { %1267 = vmatprep.subr.bf16.mxu0 %v1929_v8  ;;  %v1921_v18 = vcombine.high %v547_v12, %v551_v15  ;;  %v539_v20 = vld [vmem:[%s2741_s4 + $0x140] sm:$0xff]  ;;  %v1920_v23 = vcombine.low %v547_v12, %v551_v15  ;;  %v544_v24 = vld [vmem:[%s2741_s4 + $0x168] sm:$0xff]  ;;  %1309 = vmatpush1.bf16.msra.mxu1 %v1930_v14  ;;  %v1934_v8 = vcombine.low %v2351_v2, %v2358_v5 }
  0x1b   : > { %v543_v21 = vld [vmem:[%s2741_s4 + $0x160] sm:$0xff]  ;;  %1268 = vmatpush1.bf16.msra.mxu0 %v1928_v11  ;;  %1310 = vmatprep.subr.bf16.mxu1 %v1923_v19  ;;  %v1915_v27 = vcombine.high %v540_v22, %v544_v24  ;;  %v532_v30 = vld [vmem:[%s2741_s4 + $0x108] sm:$0xff]  ;;  %v1914_v33 = vcombine.low %v540_v22, %v544_v24 }
  0x1c   : > { %1269 = vmatprep.subr.bf16.mxu0 %v1921_v18  ;;  %v1913_v26 = vcombine.high %v539_v20, %v543_v21  ;;  %v531_v28 = vld [vmem:[%s2741_s4 + $0x100] sm:$0xff]  ;;  %v536_v31 = vld [vmem:[%s2741_s4 + $0x128] sm:$0xff]  ;;  %v1912_v32 = vcombine.low %v539_v20, %v543_v21 }
  0x1d   : > { %v535_v29 = vld [vmem:[%s2741_s4 + $0x120] sm:$0xff]  ;;  %v1907_v35 = vcombine.high %v532_v30, %v536_v31  ;;  %v524_v38 = vld [vmem:[%s2741_s4 + $0xc8] sm:$0xff]  ;;  %v1906_v41 = vcombine.low %v532_v30, %v536_v31 }
  0x1e   : > { %1311 = vmatpush1.bf16.msra.mxu1 %v1922_v25  ;;  %v1905_v34 = vcombine.high %v531_v28, %v535_v29  ;;  %v523_v36 = vld [vmem:[%s2741_s4 + $0xc0] sm:$0xff]  ;;  %v528_v39 = vld [vmem:[%s2741_s4 + $0xe8] sm:$0xff]  ;;  %v1904_v40 = vcombine.low %v531_v28, %v535_v29 }
  0x1f   : > { %1270 = vmatpush1.bf16.msra.mxu0 %v1920_v23  ;;  %1312 = vmatprep.subr.bf16.mxu1 %v1915_v27  ;;  %v527_v37 = vld [vmem:[%s2741_s4 + $0xe0] sm:$0xff]  ;;  %v1899_v43 = vcombine.high %v524_v38, %v528_v39  ;;  %v516_v46 = vld [vmem:[%s2741_s4 + $0x88] sm:$0xff]  ;;  %v1898_v49 = vcombine.low %v524_v38, %v528_v39 }
  0x20   : > { %1271 = vmatprep.subr.bf16.mxu0 %v1913_v26  ;;  %v1897_v42 = vcombine.high %v523_v36, %v527_v37  ;;  %v515_v44 = vld [vmem:[%s2741_s4 + $0x80] sm:$0xff]  ;;  %v520_v47 = vld [vmem:[%s2741_s4 + $0xa8] sm:$0xff]  ;;  %v1896_v48 = vcombine.low %v523_v36, %v527_v37 }
  0x21   : > { %v519_v45 = vld [vmem:[%s2741_s4 + $0xa0] sm:$0xff]  ;;  %v1891_v51 = vcombine.high %v516_v46, %v520_v47  ;;  %v508_v54 = vld [vmem:[%s2741_s4 + $0x48] sm:$0xff]  ;;  %v1890_v57 = vcombine.low %v516_v46, %v520_v47 }
  0x22   : > { %1313 = vmatpush1.bf16.msra.mxu1 %v1914_v33  ;;  %v1889_v50 = vcombine.high %v515_v44, %v519_v45  ;;  %v507_v52 = vld [vmem:[%s2741_s4 + $0x40] sm:$0xff]  ;;  %v512_v55 = vld [vmem:[%s2741_s4 + $0x68] sm:$0xff]  ;;  %v1888_v56 = vcombine.low %v515_v44, %v519_v45 }
  0x23   : > { %1272 = vmatpush1.bf16.msra.mxu0 %v1912_v32  ;;  %1314 = vmatprep.subr.bf16.mxu1 %v1907_v35  ;;  %v511_v53 = vld [vmem:[%s2741_s4 + $0x60] sm:$0xff]  ;;  %v1883_v60 = vcombine.high %v508_v54, %v512_v55  ;;  %v500_v62 = vld [vmem:[%s2741_s4 + $0x8] sm:$0xff]  ;;  %v1882_v6 = vcombine.low %v508_v54, %v512_v55 }
  0x24   : > { %1273 = vmatprep.subr.bf16.mxu0 %v1905_v34  ;;  %v1881_v58 = vcombine.high %v507_v52, %v511_v53  ;;  %v499_v59 = vld [vmem:[%s2741_s4] sm:$0xff]  ;;  %v504_v63 = vld [vmem:[%s2741_s4 + $0x28] sm:$0xff]  ;;  %v1880_v3 = vcombine.low %v507_v52, %v511_v53 }
  0x25   : > { %v503_v61 = vld [vmem:[%s2741_s4 + $0x20] sm:$0xff]  ;;  %v1875_v9 = vcombine.high %v500_v62, %v504_v63  ;;  %v620_v12 = vld [vmem:[%s2741_s4 + $0x3c8] sm:$0xff]  ;;  %v1874_v15 = vcombine.low %v500_v62, %v504_v63 }
  0x26   : > { %1315 = vmatpush1.bf16.msra.mxu1 %v1906_v41  ;;  %v1873_v7 = vcombine.high %v499_v59, %v503_v61  ;;  %v619_v10 = vld [vmem:[%s2741_s4 + $0x3c0] sm:$0xff]  ;;  %v624_v13 = vld [vmem:[%s2741_s4 + $0x3e8] sm:$0xff]  ;;  %v1872_v14 = vcombine.low %v499_v59, %v503_v61 }
  0x27   : > { %1274 = vmatpush1.bf16.msra.mxu0 %v1904_v40  ;;  %1316 = vmatprep.subr.bf16.mxu1 %v1899_v43  ;;  %v623_v11 = vld [vmem:[%s2741_s4 + $0x3e0] sm:$0xff]  ;;  %v1995_v17 = vcombine.high %v620_v12, %v624_v13  ;;  %v612_v20 = vld [vmem:[%s2741_s4 + $0x388] sm:$0xff]  ;;  %v1994_v23 = vcombine.low %v620_v12, %v624_v13 }
  0x28   : > { %1275 = vmatprep.subr.bf16.mxu0 %v1897_v42  ;;  %v1993_v16 = vcombine.high %v619_v10, %v623_v11  ;;  %v611_v18 = vld [vmem:[%s2741_s4 + $0x380] sm:$0xff]  ;;  %v616_v21 = vld [vmem:[%s2741_s4 + $0x3a8] sm:$0xff]  ;;  %v1992_v22 = vcombine.low %v619_v10, %v623_v11 }
  0x29   : > { %v615_v19 = vld [vmem:[%s2741_s4 + $0x3a0] sm:$0xff]  ;;  %v1987_v26 = vcombine.high %v612_v20, %v616_v21  ;;  %v604_v28 = vld [vmem:[%s2741_s4 + $0x348] sm:$0xff]  ;;  %v1986_v33 = vcombine.low %v612_v20, %v616_v21 }
  0x2a   : > { %1317 = vmatpush1.bf16.msra.mxu1 %v1898_v49  ;;  %v1985_v24 = vcombine.high %v611_v18, %v615_v19  ;;  %v603_v25 = vld [vmem:[%s2741_s4 + $0x340] sm:$0xff]  ;;  %v608_v29 = vld [vmem:[%s2741_s4 + $0x368] sm:$0xff]  ;;  %v1984_v30 = vcombine.low %v611_v18, %v615_v19  ;;  %v1933_v18 = vcombine.high %v2341_v0, %v2346_v1  ;;  %v1935_v19 = vcombine.high %v2351_v2, %v2358_v5  ;;  %v537_v0 = vld [vmem:[%s2741_s4 + $0x130] sm:$0xff] }
  0x2b   : > { %1276 = vmatpush1.bf16.msra.mxu0 %v1896_v48  ;;  %1318 = vmatprep.subr.bf16.mxu1 %v1891_v51  ;;  %v607_v27 = vld [vmem:[%s2741_s4 + $0x360] sm:$0xff]  ;;  %v596_v35 = vld [vmem:[%s2741_s4 + $0x308] sm:$0xff]  ;;  %v1979_v37 = vcombine.high %v604_v28, %v608_v29  ;;  %v1978_v41 = vcombine.low %v604_v28, %v608_v29  ;;  %v554_v28 = vld [vmem:[%s2741_s4 + $0x1b8] sm:$0xff] }
  0x2c   : > { %1277 = vmatprep.subr.bf16.mxu0 %v1889_v50  ;;  %v595_v31 = vld [vmem:[%s2741_s4 + $0x300] sm:$0xff]  ;;  %v1977_v34 = vcombine.high %v603_v25, %v607_v27  ;;  %v600_v36 = vld [vmem:[%s2741_s4 + $0x328] sm:$0xff]  ;;  %v1976_v38 = vcombine.low %v603_v25, %v607_v27  ;;  %v549_v25 = vld [vmem:[%s2741_s4 + $0x190] sm:$0xff] }
  0x2d   : > { %v599_v32 = vld [vmem:[%s2741_s4 + $0x320] sm:$0xff]  ;;  %v588_v43 = vld [vmem:[%s2741_s4 + $0x2c8] sm:$0xff]  ;;  %v1971_v45 = vcombine.high %v596_v35, %v600_v36  ;;  %v1970_v49 = vcombine.low %v596_v35, %v600_v36  ;;  %v550_v27 = vld [vmem:[%s2741_s4 + $0x198] sm:$0xff] }
  0x2e   : > { %1319 = vmatpush1.bf16.msra.mxu1 %v1890_v57  ;;  %v587_v39 = vld [vmem:[%s2741_s4 + $0x2c0] sm:$0xff]  ;;  %v1969_v42 = vcombine.high %v595_v31, %v599_v32  ;;  %v592_v44 = vld [vmem:[%s2741_s4 + $0x2e8] sm:$0xff]  ;;  %v1968_v46 = vcombine.low %v595_v31, %v599_v32  ;;  %v541_v31 = vld [vmem:[%s2741_s4 + $0x150] sm:$0xff] }
  0x2f   : > { %1278 = vmatpush1.bf16.msra.mxu0 %v1888_v56  ;;  %1320 = vmatprep.subr.bf16.mxu1 %v1883_v60  ;;  %v591_v40 = vld [vmem:[%s2741_s4 + $0x2e0] sm:$0xff]  ;;  %v580_v51 = vld [vmem:[%s2741_s4 + $0x288] sm:$0xff]  ;;  %v1963_v53 = vcombine.high %v588_v43, %v592_v44  ;;  %v1962_v56 = vcombine.low %v588_v43, %v592_v44  ;;  %v542_v35 = vld [vmem:[%s2741_s4 + $0x158] sm:$0xff] }
  0x30   : > { %1279 = vmatprep.subr.bf16.mxu0 %v1881_v58  ;;  %v579_v47 = vld [vmem:[%s2741_s4 + $0x280] sm:$0xff]  ;;  %v1961_v50 = vcombine.high %v587_v39, %v591_v40  ;;  %v584_v52 = vld [vmem:[%s2741_s4 + $0x2a8] sm:$0xff]  ;;  %v1960_v54 = vcombine.low %v587_v39, %v591_v40  ;;  %v546_v36 = vld [vmem:[%s2741_s4 + $0x178] sm:$0xff] }
  0x31   : > { %v583_v48 = vld [vmem:[%s2741_s4 + $0x2a0] sm:$0xff]  ;;  %v1955_v59 = vcombine.high %v580_v51, %v584_v52  ;;  %v572_v60 = vld [vmem:[%s2741_s4 + $0x248] sm:$0xff]  ;;  %v1954_v63 = vcombine.low %v580_v51, %v584_v52  ;;  %v1919_v40 = vcombine.high %v542_v35, %v546_v36  ;;  %v534_v1 = vld [vmem:[%s2741_s4 + $0x118] sm:$0xff]  ;;  %v1918_v5 = vcombine.low %v542_v35, %v546_v36 }
  0x32   : > { %1321 = vmatpush1.bf16.msra.mxu1 %v1882_v6  ;;  %v571_v55 = vld [vmem:[%s2741_s4 + $0x240] sm:$0xff]  ;;  %v1953_v57 = vcombine.high %v579_v47, %v583_v48  ;;  %v576_v61 = vld [vmem:[%s2741_s4 + $0x268] sm:$0xff]  ;;  %v1952_v62 = vcombine.low %v579_v47, %v583_v48  ;;  %v538_v2 = vld [vmem:[%s2741_s4 + $0x138] sm:$0xff] }
  0x33   : > { %1280 = vmatpush1.bf16.msra.mxu0 %v1880_v3  ;;  %1322 = vmatprep.subr.bf16.mxu1 %v1875_v9  ;;  %v575_v58 = vld [vmem:[%s2741_s4 + $0x260] sm:$0xff]  ;;  %v1947_v6 = vcombine.high %v572_v60, %v576_v61  ;;  %v564_v10 = vld [vmem:[%s2741_s4 + $0x208] sm:$0xff]  ;;  %v1946_v13 = vcombine.low %v572_v60, %v576_v61  ;;  %v525_v43 = vld [vmem:[%s2741_s4 + $0xd0] sm:$0xff]  ;;  %v1910_v48 = vcombine.low %v534_v1, %v538_v2 }
  0x34   : > { %1281 = vmatprep.subr.bf16.mxu0 %v1873_v7  ;;  %v1945_v3 = vcombine.high %v571_v55, %v575_v58  ;;  %v563_v7 = vld [vmem:[%s2741_s4 + $0x200] sm:$0xff]  ;;  %v568_v11 = vld [vmem:[%s2741_s4 + $0x228] sm:$0xff]  ;;  %v1944_v12 = vcombine.low %v571_v55, %v575_v58  ;;  %v529_v44 = vld [vmem:[%s2741_s4 + $0xf0] sm:$0xff] }
  0x35   : > { %v567_v9 = vld [vmem:[%s2741_s4 + $0x220] sm:$0xff]  ;;  %v473_v21 = vld [vmem:[#allocation2 + $0x8] sm:$0xff]  ;;  %v517_v51 = vld [vmem:[%s2741_s4 + $0x90] sm:$0xff]  ;;  %v1900_v55 = vcombine.low %v525_v43, %v529_v44 }
  0x36   : > { %1323 = vmatpush1.bf16.msra.mxu1 %v1874_v15  ;;  %v1939_v15 = vcombine.high %v564_v10, %v568_v11  ;;  %v472_v20 = vld [vmem:[#allocation2] sm:$0xff]  ;;  %v521_v52 = vld [vmem:[%s2741_s4 + $0xb0] sm:$0xff]  ;;  %v510_v61 = vld [vmem:[%s2741_s4 + $0x58] sm:$0xff] }
  0x37   : > { %1282 = vmatpush1.bf16.msra.mxu0 %v1872_v14  ;;  %1324 = vmatprep.subr.bf16.mxu1 %v1995_v17  ;;  %v1937_v14 = vcombine.high %v563_v7, %v567_v9  ;;  %v1938_v17 = vcombine.low %v564_v10, %v568_v11  ;;  %v513_v60 = vld [vmem:[%s2741_s4 + $0x70] sm:$0xff]  ;;  %v502_v11 = vld [vmem:[%s2741_s4 + $0x18] sm:$0xff] }
  0x38   : > { %1283 = vmatprep.subr.bf16.mxu0 %v1993_v16  ;;  %v1936_v16 = vcombine.low %v563_v7, %v567_v9  ;;  %v501_v9 = vld [vmem:[%s2741_s4 + $0x10] sm:$0xff] }
  0x39   : > { %v505_v10 = vld [vmem:[%s2741_s4 + $0x30] sm:$0xff] }
  0x3a   : > { %1325 = vmatpush2.bf16.msra.mxu1 %v1994_v23  ;;  %v605_v35 = vld [vmem:[%s2741_s4 + $0x350] sm:$0xff] }
  0x3b   : > { %1284 = vmatpush2.bf16.msra.mxu0 %v1992_v22  ;;  %1326 = vmatprep.subr.bf16.mxu1 %v1987_v26  ;;  %v553_v26 = vld [vmem:[%s2741_s4 + $0x1b0] sm:$0xff] }
  0x3c   : > { %1285 = vmatprep.subr.bf16.mxu0 %v1985_v24  ;;  %v1925_v32 = vcombine.high %v549_v25, %v553_v26  ;;  %v609_v36 = vld [vmem:[%s2741_s4 + $0x370] sm:$0xff] }
  0x3e   : > { %1327 = vmatpush2.bf16.msra.mxu1 %v1986_v33  ;;  %v1927_v33 = vcombine.high %v550_v27, %v554_v28 }
  0x3f   : > { %1286 = vmatpush2.bf16.msra.mxu0 %v1984_v30  ;;  %1328 = vmatprep.subr.bf16.mxu1 %v1979_v37  ;;  %v1924_v37 = vcombine.low %v549_v25, %v553_v26  ;;  %v613_v26 = vld [vmem:[%s2741_s4 + $0x390] sm:$0xff] }
  0x40   : > { %1287 = vmatprep.subr.bf16.mxu0 %v1977_v34  ;;  %v545_v34 = vld [vmem:[%s2741_s4 + $0x170] sm:$0xff] }
  0x41   : > { %v1917_v39 = vcombine.high %v541_v31, %v545_v34 }
  0x42   : > { %1329 = vmatpush2.bf16.msra.mxu1 %v1978_v41  ;;  %v533_v41 = vld [vmem:[%s2741_s4 + $0x110] sm:$0xff] }
  0x43   : > { %1288 = vmatpush2.bf16.msra.mxu0 %v1976_v38  ;;  %1330 = vmatprep.subr.bf16.mxu1 %v1971_v45  ;;  %v1926_v38 = vcombine.low %v550_v27, %v554_v28  ;;  %v526_v45 = vld [vmem:[%s2741_s4 + $0xd8] sm:$0xff]  ;;  %v1908_v47 = vcombine.low %v533_v41, %v537_v0  ;;  %v617_v27 = vld [vmem:[%s2741_s4 + $0x3b0] sm:$0xff] }
  0x44   : > { %1289 = vmatprep.subr.bf16.mxu0 %v1969_v42  ;;  %v1911_v42 = vcombine.high %v534_v1, %v538_v2  ;;  %v614_v28 = vld [vmem:[%s2741_s4 + $0x398] sm:$0xff]  ;;  %v597_v1 = vld [vmem:[%s2741_s4 + $0x310] sm:$0xff] }
  0x45   : > { %v601_v2 = vld [vmem:[%s2741_s4 + $0x330] sm:$0xff] }
  0x46   : > { %1331 = vmatpush2.bf16.msra.mxu1 %v1970_v49  ;;  %v1901_v49 = vcombine.high %v525_v43, %v529_v44  ;;  %v1973_v43 = vcombine.high %v597_v1, %v601_v2 }
  0x47   : > { %1290 = vmatpush2.bf16.msra.mxu0 %v1968_v46  ;;  %1332 = vmatprep.subr.bf16.mxu1 %v1963_v53  ;;  %v530_v46 = vld [vmem:[%s2741_s4 + $0xf8] sm:$0xff] }
  0x48   : > { %1291 = vmatprep.subr.bf16.mxu0 %v1961_v50  ;;  %v1903_v50 = vcombine.high %v526_v45, %v530_v46  ;;  %v518_v53 = vld [vmem:[%s2741_s4 + $0x98] sm:$0xff] }
  0x4a   : > { %1333 = vmatpush2.bf16.msra.mxu1 %v1962_v56  ;;  %v1902_v56 = vcombine.low %v526_v45, %v530_v46  ;;  %v589_v45 = vld [vmem:[%s2741_s4 + $0x2d0] sm:$0xff] }
  0x4b   : > { %1292 = vmatpush2.bf16.msra.mxu0 %v1960_v54  ;;  %1334 = vmatprep.subr.bf16.mxu1 %v1955_v59  ;;  %v522_v54 = vld [vmem:[%s2741_s4 + $0xb8] sm:$0xff]  ;;  %v509_v59 = vld [vmem:[%s2741_s4 + $0x50] sm:$0xff] }
  0x4c   : > { %1293 = vmatprep.subr.bf16.mxu0 %v1953_v57  ;;  %v1893_v57 = vcombine.high %v517_v51, %v521_v52  ;;  %v1895_v58 = vcombine.high %v518_v53, %v522_v54  ;;  %v593_v46 = vld [vmem:[%s2741_s4 + $0x2f0] sm:$0xff] }
  0x4e   : > { %1335 = vmatpush2.bf16.msra.mxu1 %v1954_v63  ;;  %v1892_v63 = vcombine.low %v517_v51, %v521_v52  ;;  %v1965_v51 = vcombine.high %v589_v45, %v593_v46 }
  0x4f   : > { %1294 = vmatpush2.bf16.msra.mxu0 %v1952_v62  ;;  %1336 = vmatprep.subr.bf16.mxu1 %v1947_v6  ;;  %v514_v62 = vld [vmem:[%s2741_s4 + $0x78] sm:$0xff]  ;;  %v1885_v6 = vcombine.high %v509_v59, %v513_v60 }
  0x50   : > { %1295 = vmatprep.subr.bf16.mxu0 %v1945_v3  ;;  %v1894_v3 = vcombine.low %v518_v53, %v522_v54  ;;  %v1887_v7 = vcombine.high %v510_v61, %v514_v62  ;;  %v581_v53 = vld [vmem:[%s2741_s4 + $0x290] sm:$0xff] }
  0x51   : > { %v585_v54 = vld [vmem:[%s2741_s4 + $0x2b0] sm:$0xff] }
  0x52   : > { %1337 = vmatpush2.bf16.msra.mxu1 %v1946_v13  ;;  %v1884_v13 = vcombine.low %v509_v59, %v513_v60  ;;  %v1957_v59 = vcombine.high %v581_v53, %v585_v54 }
  0x53   : > { %1296 = vmatpush2.bf16.msra.mxu0 %v1944_v12  ;;  %1338 = vmatprep.subr.bf16.mxu1 %v1939_v15  ;;  %v506_v12 = vld [vmem:[%s2741_s4 + $0x38] sm:$0xff]  ;;  %v1877_v15 = vcombine.high %v501_v9, %v505_v10 }
  0x54   : > { %1297 = vmatprep.subr.bf16.mxu0 %v1937_v14  ;;  %v1886_v14 = vcombine.low %v510_v61, %v514_v62  ;;  %v573_v61 = vld [vmem:[%s2741_s4 + $0x250] sm:$0xff] }
  0x55   : > { %v577_v62 = vld [vmem:[%s2741_s4 + $0x270] sm:$0xff] }
  0x56   : > { %1339 = vmatpush2.bf16.msra.mxu1 %v1938_v17  ;;  %v621_v17 = vld [vmem:[%s2741_s4 + $0x3d0] sm:$0xff] }
  0x57   : > { %1298 = vmatpush2.bf16.msra.mxu0 %v1936_v16  ;;  %1390 = vmatprep.subr.bf16.mxu1 %v1935_v19  ;;  %v1879_v16 = vcombine.high %v502_v11, %v506_v12  ;;  %v622_v19 = vld [vmem:[%s2741_s4 + $0x3d8] sm:$0xff] }
  0x58   : > { %1349 = vmatprep.subr.bf16.mxu0 %v1933_v18  ;;  %v625_v18 = vld [vmem:[%s2741_s4 + $0x3f0] sm:$0xff] }
  0x92   : > { %v2462_v22 = vpop.permute.xlu0 %476 }
  0x93   : > { %v479_v23 = vmul.f32 %v2462_v22, %v472_v20  ;;  %v480_v24 = vmul.f32 %v2462_v22, %v473_v21  ;;  %v626_v20 = vld [vmem:[%s2741_s4 + $0x3f8] sm:$0xff]  ;;  %v1876_v21 = vcombine.low %v501_v9, %v505_v10  ;;  %v1949_v9 = vcombine.high %v573_v61, %v577_v62 }
  0x94   : > { %v1999_v25 = vcombine.high %v622_v19, %v626_v20 }
  0x95   : > { %v2478_v29 = vpack.c.bf16 %v479_v23, %v479_v23  ;;  %v498_v30 = vpack.c.bf16 %v480_v24, %v480_v24  ;;  %v1878_v23 = vcombine.low %v502_v11, %v506_v12  ;;  %v1997_v24 = vcombine.high %v621_v17, %v625_v18  ;;  %v565_v11 = vld [vmem:[%s2741_s4 + $0x210] sm:$0xff] }
  0x96   : > { %v569_v12 = vld [vmem:[%s2741_s4 + $0x230] sm:$0xff] }
  0x97   : > { %1299 = vmatprep.mubr.bf16.mxu0 %v498_v30  ;;  %1340 = vmatprep.mubr.bf16.mxu1 %v498_v30 }
  0x98   : > { %1300 = vmatmul.mubr.bf16.vlgmr.msra.gmra.mxu0 %v2478_v29  ;;  %1341 = vmatmul.mubr.bf16.vlgmr.msra.gmra.mxu1 %v2478_v29 }
  0x99   : > { %1350 = vmatpush1.bf16.msra.mxu0 %v1932_v4  ;;  %1391 = vmatpush1.bf16.msra.mxu1 %v1934_v8  ;;  %v1916_v4 = vcombine.low %v541_v31, %v545_v34  ;;  %v1909_v8 = vcombine.high %v533_v41, %v537_v0  ;;  %v1996_v31 = vcombine.low %v621_v17, %v625_v18 }
  0x9a   : > { %1381 = vmatprep.mubr.bf16.mxu0 %v498_v30  ;;  %1422 = vmatprep.mubr.bf16.mxu1 %v498_v30  ;;  %v618_v30 = vld [vmem:[%s2741_s4 + $0x3b8] sm:$0xff]  ;;  %v1981_v41 = vcombine.high %v605_v35, %v609_v36  ;;  %v1941_v17 = vcombine.high %v565_v11, %v569_v12 }
  0x9b   : > { %1351 = vmatprep.subr.bf16.mxu0 %v1925_v32  ;;  %1392 = vmatprep.subr.bf16.mxu1 %v1927_v33  ;;  %v1998_v32 = vcombine.low %v622_v19, %v626_v20  ;;  %v1989_v33 = vcombine.high %v613_v26, %v617_v27  ;;  %v1991_v34 = vcombine.high %v614_v28, %v618_v30 }
  0x9c   : > { %v1940_v19 = vcombine.low %v565_v11, %v569_v12 }
  0x9d   : > { %1352 = vmatpush1.bf16.msra.mxu0 %v1924_v37  ;;  %1393 = vmatpush1.bf16.msra.mxu1 %v1926_v38  ;;  %v606_v37 = vld [vmem:[%s2741_s4 + $0x358] sm:$0xff] }
  0x9e   : > { %1353 = vmatprep.subr.bf16.mxu0 %v1917_v39  ;;  %1394 = vmatprep.subr.bf16.mxu1 %v1919_v40  ;;  %v610_v38 = vld [vmem:[%s2741_s4 + $0x378] sm:$0xff]  ;;  %v1988_v39 = vcombine.low %v613_v26, %v617_v27  ;;  %v1990_v40 = vcombine.low %v614_v28, %v618_v30  ;;  %v2081_v26 = vld [vmem:[%s2742_s5 + $0x28] sm:$0xff]   ;;  %v2082_v27 = vld [vmem:[%s2742_s5 + $0x60] sm:$0xff]  }
  0x9f   : > { %v1983_v0 = vcombine.high %v606_v37, %v610_v38  ;;  %v2083_v28 = vld [vmem:[%s2742_s5 + $0x20] sm:$0xff]   ;;  %v2084_v30 = vld [vmem:[%s2742_s5 + $0x58] sm:$0xff]  }
  0xa1   : > { %1354 = vmatpush1.bf16.msra.mxu0 %v1916_v4  ;;  %1395 = vmatpush1.bf16.msra.mxu1 %v1918_v5  ;;  %v598_v4 = vld [vmem:[%s2741_s4 + $0x318] sm:$0xff] }
  0xa2   : > { %1355 = vmatprep.subr.bf16.mxu0 %v1909_v8  ;;  %1396 = vmatprep.subr.bf16.mxu1 %v1911_v42  ;;  %v602_v5 = vld [vmem:[%s2741_s4 + $0x338] sm:$0xff]  ;;  %v1980_v8 = vcombine.low %v605_v35, %v609_v36  ;;  %v1982_v42 = vcombine.low %v606_v37, %v610_v38  ;;  %v2089_v35 = vld [vmem:[%s2742_s5 + $0x8] sm:$0xff]   ;;  %v2090_v36 = vld [vmem:[%s2742_s5 + $0x40] sm:$0xff]  }
  0xa3   : > { %v1975_v44 = vcombine.high %v598_v4, %v602_v5  ;;  %v2091_v37 = vld [vmem:[%s2742_s5] sm:$0xff]  }
  0xa5   : > { %1356 = vmatpush1.bf16.msra.mxu0 %v1908_v47  ;;  %1397 = vmatpush1.bf16.msra.mxu1 %v1910_v48  ;;  %v590_v47 = vld [vmem:[%s2741_s4 + $0x2d8] sm:$0xff] }
  0xa6   : > { %1357 = vmatprep.subr.bf16.mxu0 %v1901_v49  ;;  %1398 = vmatprep.subr.bf16.mxu1 %v1903_v50  ;;  %v594_v48 = vld [vmem:[%s2741_s4 + $0x2f8] sm:$0xff]  ;;  %v1972_v49 = vcombine.low %v597_v1, %v601_v2  ;;  %v1974_v50 = vcombine.low %v598_v4, %v602_v5  ;;  %v485_v5 = vld [vmem:[%s2220_s18] sm:$0xff] }
  0xa7   : > { %v1967_v52 = vcombine.high %v590_v47, %v594_v48 }
  0xa9   : > { %1358 = vmatpush1.bf16.msra.mxu0 %v1900_v55  ;;  %1399 = vmatpush1.bf16.msra.mxu1 %v1902_v56  ;;  %v582_v55 = vld [vmem:[%s2741_s4 + $0x298] sm:$0xff] }
  0xaa   : > { %1359 = vmatprep.subr.bf16.mxu0 %v1893_v57  ;;  %1400 = vmatprep.subr.bf16.mxu1 %v1895_v58  ;;  %v586_v56 = vld [vmem:[%s2741_s4 + $0x2b8] sm:$0xff]  ;;  %v1964_v57 = vcombine.low %v589_v45, %v593_v46  ;;  %v1966_v58 = vcombine.low %v590_v47, %v594_v48 }
  0xab   : > { %v1959_v60 = vcombine.high %v582_v55, %v586_v56 }
  0xad   : > { %1360 = vmatpush1.bf16.msra.mxu0 %v1892_v63  ;;  %1401 = vmatpush1.bf16.msra.mxu1 %v1894_v3  ;;  %v574_v63 = vld [vmem:[%s2741_s4 + $0x258] sm:$0xff] }
  0xae   : > { %1361 = vmatprep.subr.bf16.mxu0 %v1885_v6  ;;  %1402 = vmatprep.subr.bf16.mxu1 %v1887_v7  ;;  %v578_v3 = vld [vmem:[%s2741_s4 + $0x278] sm:$0xff]  ;;  %v1956_v6 = vcombine.low %v581_v53, %v585_v54  ;;  %v1958_v7 = vcombine.low %v582_v55, %v586_v56  ;;  %v487_v56 = vld [vmem:[%s2220_s18 + $0x10] sm:$0xff] }
  0xaf   : > { %v1951_v10 = vcombine.high %v574_v63, %v578_v3 }
  0xb1   : > { %1362 = vmatpush1.bf16.msra.mxu0 %v1884_v13  ;;  %1403 = vmatpush1.bf16.msra.mxu1 %v1886_v14  ;;  %v566_v13 = vld [vmem:[%s2741_s4 + $0x218] sm:$0xff] }
  0xb2   : > { %1363 = vmatprep.subr.bf16.mxu0 %v1877_v15  ;;  %1404 = vmatprep.subr.bf16.mxu1 %v1879_v16  ;;  %v570_v14 = vld [vmem:[%s2741_s4 + $0x238] sm:$0xff]  ;;  %v1948_v15 = vcombine.low %v573_v61, %v577_v62  ;;  %v1950_v16 = vcombine.low %v574_v63, %v578_v3  ;;  %v493_v62 = vunpack.c.l.bf16 %v487_v56 }
  0xb3   : > { %v1943_v18 = vcombine.high %v566_v13, %v570_v14  ;;  %v1942_v20 = vcombine.low %v566_v13, %v570_v14 }
  0xb5   : > { %1364 = vmatpush1.bf16.msra.mxu0 %v1876_v21  ;;  %1405 = vmatpush1.bf16.msra.mxu1 %v1878_v23  ;;  %v2076_v21 = vld [vmem:[%s2742_s5 + $0x78] sm:$0xff]  }
  0xb6   : > { %1365 = vmatprep.subr.bf16.mxu0 %v1997_v24  ;;  %1406 = vmatprep.subr.bf16.mxu1 %v1999_v25  ;;  %v2077_v23 = vld [vmem:[%s2742_s5 + $0x38] sm:$0xff]   ;;  %v2078_v24 = vld [vmem:[%s2742_s5 + $0x70] sm:$0xff]  }
  0xb7   : > { %v2079_v25 = vld [vmem:[%s2742_s5 + $0x30] sm:$0xff]  }
  0xb9   : > { %1366 = vmatpush2.bf16.msra.mxu0 %v1996_v31  ;;  %1407 = vmatpush2.bf16.msra.mxu1 %v1998_v32  ;;  %v2085_v31 = vld [vmem:[%s2742_s5 + $0x18] sm:$0xff]   ;;  %v2086_v32 = vld [vmem:[%s2742_s5 + $0x50] sm:$0xff]  }
  0xba   : > { %1367 = vmatprep.subr.bf16.mxu0 %v1989_v33  ;;  %1408 = vmatprep.subr.bf16.mxu1 %v1991_v34  ;;  %v2087_v33 = vld [vmem:[%s2742_s5 + $0x10] sm:$0xff]   ;;  %v2088_v34 = vld [vmem:[%s2742_s5 + $0x48] sm:$0xff]  }
  0xbd   : > { %1368 = vmatpush2.bf16.msra.mxu0 %v1988_v39  ;;  %1409 = vmatpush2.bf16.msra.mxu1 %v1990_v40 }
  0xbe   : > { %1369 = vmatprep.subr.bf16.mxu0 %v1981_v41  ;;  %1410 = vmatprep.subr.bf16.mxu1 %v1983_v0 }
  0xc1   : > { %1370 = vmatpush2.bf16.msra.mxu0 %v1980_v8  ;;  %1411 = vmatpush2.bf16.msra.mxu1 %v1982_v42  ;;  %v486_v8 = vld [vmem:[%s2220_s18 + $0x8] sm:$0xff]  ;;  %v489_v42 = vunpack.c.l.bf16 %v485_v5 }
  0xc2   : > { %1371 = vmatprep.subr.bf16.mxu0 %v1973_v43  ;;  %1412 = vmatprep.subr.bf16.mxu1 %v1975_v44  ;;  %v491_v43 = vunpack.c.l.bf16 %v486_v8  ;;  %v490_v44 = vunpack.c.h.bf16 %v485_v5  ;;  %v492_v46 = vunpack.c.h.bf16 %v486_v8 }
  0xc5   : > { %1372 = vmatpush2.bf16.msra.mxu0 %v1972_v49  ;;  %1413 = vmatpush2.bf16.msra.mxu1 %v1974_v50 }
  0xc6   : > { %1373 = vmatprep.subr.bf16.mxu0 %v1965_v51  ;;  %1414 = vmatprep.subr.bf16.mxu1 %v1967_v52 }
  0xc9   : > { %1374 = vmatpush2.bf16.msra.mxu0 %v1964_v57  ;;  %1415 = vmatpush2.bf16.msra.mxu1 %v1966_v58  ;;  %v488_v57 = vld [vmem:[%s2220_s18 + $0x18] sm:$0xff] }
  0xca   : > { %1375 = vmatprep.subr.bf16.mxu0 %v1957_v59  ;;  %1416 = vmatprep.subr.bf16.mxu1 %v1959_v60  ;;  %v495_v63 = vunpack.c.l.bf16 %v488_v57 }
  0xcd   : > { %1376 = vmatpush2.bf16.msra.mxu0 %v1956_v6  ;;  %1417 = vmatpush2.bf16.msra.mxu1 %v1958_v7  ;;  %v494_v6 = vunpack.c.h.bf16 %v487_v56  ;;  %v496_v7 = vunpack.c.h.bf16 %v488_v57 }
  0xce   : > { %1377 = vmatprep.subr.bf16.mxu0 %v1949_v9  ;;  %1418 = vmatprep.subr.bf16.mxu1 %v1951_v10 }
  0xd1   : > { %1378 = vmatpush2.bf16.msra.mxu0 %v1948_v15  ;;  %1419 = vmatpush2.bf16.msra.mxu1 %v1950_v16 }
  0xd2   : > { %1379 = vmatprep.subr.bf16.mxu0 %v1941_v17  ;;  %1420 = vmatprep.subr.bf16.mxu1 %v1943_v18 }
  0xd5   : > { %1380 = vmatpush2.bf16.msra.mxu0 %v1940_v19  ;;  %1421 = vmatpush2.bf16.msra.mxu1 %v1942_v20 }
  0xd6   : > { %2028 = vmatprep.subr.bf16.mxu0 %v2076_v21 }
  0xd8   : > { %1382 = vmatmul.mubr.bf16.vlgmr.msra.gmra.mxu0 %v2478_v29  ;;  %1423 = vmatmul.mubr.bf16.vlgmr.msra.gmra.mxu1 %v2478_v29  ;;  %v2080_v29 = vld [vmem:[%s2742_s5 + $0x68] sm:$0xff]  }
  0xd9   : > { %2029 = vmatpush3.bf16.msra.mxu0 %v2077_v23 }
  0xda   : > { %2030 = vmatprep.subr.bf16.mxu0 %v2078_v24 }
  0xdd   : > { %2031 = vmatpush3.bf16.msra.mxu0 %v2079_v25  ;;  %v481_v25 = vld [vmem:[#allocation3 + $0x8] sm:$0xff] }
  0xde   : > { %2032 = vmatprep.subr.bf16.mxu0 %v2080_v29 }
  0xe1   : > { %2033 = vmatpush3.bf16.msra.mxu0 %v2081_v26 }
  0xe2   : > { %2034 = vmatprep.subr.bf16.mxu0 %v2082_v27 }
  0xe5   : > { %2035 = vmatpush3.bf16.msra.mxu0 %v2083_v28  ;;  %v482_v28 = vld [vmem:[#allocation3] sm:$0xff] }
  0xe6   : > { %2036 = vmatprep.subr.bf16.mxu0 %v2084_v30  ;;  %v483_v30 = vmul.f32 %v481_v25, %v2462_v22 }
  0xe9   : > { %2037 = vmatpush3.bf16.msra.mxu0 %v2085_v31 }
  0xea   : > { %2038 = vmatprep.subr.bf16.mxu0 %v2086_v32 }
  0xed   : > { %2039 = vmatpush3.bf16.msra.mxu0 %v2087_v33 }
  0xee   : > { %2040 = vmatprep.subr.bf16.mxu0 %v2088_v34 }
  0xf1   : > { %2041 = vmatpush3.bf16.msra.mxu0 %v2089_v35 }
  0xf2   : > { %2042 = vmatprep.subr.bf16.mxu0 %v2090_v36  ;;  %v484_v36 = vmul.f32 %v482_v28, %v2462_v22 }
  0xf5   : > { %2043 = vmatpush3.bf16.msra.mxu0 %v2091_v37 }
 0x158   : > { %v1301_v38 = vpop.f32.mrf.mxu0  ;;  %v1342_v39 = vpop.f32.mrf.mxu1 }
 0x159   : > { %v1431_v45 = vadd.f32 %v1301_v38, %v489_v42  ;;  %v1433_v47 = vadd.f32 %v1342_v39, %v491_v43 }
 0x15a   : > { %v1303_v40 = vpop.f32.mrf.mxu0  ;;  %v1344_v41 = vpop.f32.mrf.mxu1 }
 0x15b   : > { %v1432_v48 = vadd.f32 %v1303_v40, %v490_v44  ;;  %v2000_v49 = vmul.f32 -1.442695, %v1431_v45  ;;  %v1434_v50 = vadd.f32 %v1344_v41, %v492_v46  ;;  %v2002_v51 = vmul.f32 -1.442695, %v1433_v47  ;;  %v2006_v47 = vld [vmem:[%s2743_s6] ss:$0 sm:$0xff] }
 0x15c   : > { %v1305_v0 = vpop.f32.mrf.mxu0  ;;  %v1346_v1 = vpop.f32.mrf.mxu1 }
 0x15d   : > { %v2001_v52 = vmul.f32 -1.442695, %v1432_v48  ;;  %2092 = vpow2.f32 %v2000_v49  ;;  %v2003_v53 = vmul.f32 -1.442695, %v1434_v50 }
 0x15e   : > { %v1306_v2 = vpop.f32.mrf.mxu0  ;;  %v1347_v4 = vpop.f32.mrf.mxu1  ;;  %2094 = vpow2.f32 %v2002_v51 }
 0x15f   : > { %2096 = vpow2.f32 %v2001_v52 }
 0x160   : > { %2098 = vpow2.f32 %v2003_v53 }
 0x16a   : > { %v2093_v54 = vpop.eup %2092 }
 0x16b   : > { %v2095_v55 = vpop.eup %2094  ;;  %v1445_v59 = vadd.f32 1.0, %v2093_v54 }
 0x16c   : > { %v2097_v58 = vpop.eup %2096  ;;  %v1457_v61 = vadd.f32 1.0, %v2095_v55 }
 0x16d   : > { %v2099_v60 = vpop.eup %2098  ;;  %v1446_v3 = vadd.f32 1.0, %v2097_v58  ;;  %2100 = vrcp.f32 %v1445_v59 }
 0x16e   : > { %v1458_v9 = vadd.f32 1.0, %v2099_v60  ;;  %2102 = vrcp.f32 %v1457_v61 }
 0x16f   : > { %2104 = vrcp.f32 %v1446_v3 }
 0x17a   : > { %v2101_v29 = vpop.eup %2100 }
 0x17b   : > { %v2103_v26 = vpop.eup %2102 }
 0x17c   : > { %v2105_v27 = vpop.eup %2104  ;;  %v1477_v33 = vmul.f32 %v2103_v26, %v483_v30 }
 0x198   : > { %v1383_v10 = vpop.f32.mrf.mxu0  ;;  %v1424_v11 = vpop.f32.mrf.mxu1 }
 0x199   : > { %v1435_v12 = vadd.f32 %v1383_v10, %v493_v62  ;;  %v1437_v13 = vadd.f32 %v1424_v11, %v495_v63 }
 0x19a   : > { %v1385_v14 = vpop.f32.mrf.mxu0  ;;  %v1426_v15 = vpop.f32.mrf.mxu1 }
 0x19b   : > { %2106 = vtanh.f32 %v1435_v12  ;;  %v2004_v16 = vmul.f32 -1.442695, %v1437_v13  ;;  %v1436_v17 = vadd.f32 %v1385_v14, %v494_v6  ;;  %v1438_v18 = vadd.f32 %v1426_v15, %v496_v7 }
 0x19c   : > { %2108 = vrcp.f32 %v1458_v9  ;;  %v1387_v19 = vpop.f32.mrf.mxu0  ;;  %v1428_v20 = vpop.f32.mrf.mxu1 }
 0x19d   : > { %2110 = vpow2.f32 %v2004_v16  ;;  %v2005_v21 = vmul.f32 -1.442695, %v1438_v18 }
 0x19e   : > { %2112 = vtanh.f32 %v1436_v17  ;;  %v1388_v23 = vpop.f32.mrf.mxu0  ;;  %v1429_v24 = vpop.f32.mrf.mxu1 }
 0x19f   : > { %2114 = vpow2.f32 %v2005_v21 }
 0x1a8   : > { %v2107_v31 = vpop.eup %2106 }
 0x1a9   : > { %v2109_v32 = vpop.eup %2108  ;;  %v1479_v34 = vmul.f32 %v2107_v31, %v2101_v29 }
 0x1aa   : > { %v2111_v35 = vpop.eup %2110  ;;  %v1478_v41 = vmul.f32 %v2109_v32, %v484_v36 }
 0x1ab   : > { %v2113_v37 = vpop.eup %2112  ;;  %v1481_v38 = vadd.f32 %v1479_v34, %v1477_v33  ;;  %v1471_v39 = vadd.f32 1.0, %v2111_v35 }
 0x1ac   : > { %v2115_v40 = vpop.eup %2114  ;;  %v1480_v0 = vmul.f32 %v2113_v37, %v2105_v27 }
 0x1ad   : > { %2116 = vtanh.f32 %v1481_v38  ;;  %1489 = vst [vmem:[#allocation3 + $0x8] sm:$0xff] %v1481_v38  ;;  %1672 = vst [vmem:[%s2746_s9] sm:$0xff] %v1481_v38  ;;  %v1472_v1 = vadd.f32 1.0, %v2115_v40 }
 0x1ae   : > { %2118 = vrcp.f32 %v1471_v39  ;;  %v1482_v2 = vadd.f32 %v1480_v0, %v1478_v41 }
 0x1af   : > { %2120 = vrcp.f32 %v1472_v1 }
 0x1b0   : > { %2122 = vtanh.f32 %v1482_v2  ;;  %1490 = vst [vmem:[#allocation3] sm:$0xff] %v1482_v2  ;;  %1673 = vst [vmem:[%s2746_s9 + $0x8] sm:$0xff] %v1482_v2 }
 0x1ba   : > { %v2117_v22 = vpop.eup %2116 }
 0x1bb   : > { %v2119_v4 = vpop.eup %2118 }
 0x1bc   : > { %v2121_v5 = vpop.eup %2120  ;;  %v1485_v8 = vmul.f32 %v2119_v4, %v2117_v22 }
 0x1bd   : > { %v2123_v42 = vpop.eup %2122 }
 0x1be   : > { %v1486_v43 = vmul.f32 %v2123_v42, %v2121_v5  ;;  %1487 = vst [vmem:[#allocation2] sm:$0xff] %v1485_v8  ;;  %1670 = vst [vmem:[%s2745_s8] sm:$0xff] %v1485_v8  ;;  %v1491_v45 = vpack.c.bf16 %v1485_v8, %v1485_v8 }
 0x1c0   : > { %1488 = vst [vmem:[#allocation2 + $0x8] sm:$0xff] %v1486_v43  ;;  %v1492_v44 = vpack.c.bf16 %v1486_v43, %v1486_v43  ;;  %1671 = vst [vmem:[%s2745_s8 + $0x8] sm:$0xff] %v1486_v43 }
 0x1c2   : > { %1660 = vmatprep.mubr.bf16.mxu0 %v1492_v44 }
 0x1c3   : > { %1661 = vmatmul.mubr.bf16.vlgmr.msra.gmra.mxu0 %v1491_v45 }
 0x283   : > { %v2044_v46 = vpop.f32.mrf.mxu0 }
 0x285   : > { %v2045_v48 = vpop.f32.mrf.mxu0 }
 0x286   : > { %v2046_v49 = vadd.f32 %v2045_v48, %v2044_v46 }
 0x287   : > { %v2047_v50 = vpop.f32.mrf.mxu0 }
 0x288   : > { %v1663_v51 = vadd.f32 %v2046_v49, %v2006_v47 }
 0x289   : > { %v2048_v52 = vpop.f32.mrf.mxu0 }
 0x28a   : > { %1669 = vst.msk [vmem:[%s2228_s24] sm:$0xff] %vm1668_vm0, %v1663_v51 }
 0x28b PF: > { %s20_s11 = sadd.s32 1, %s2146_s11   ;;  %s2747_s30 = smov %s2142_s10 }
 0x28c   : > { %p17_p6 = scmp.ge.s32.totalorder %s20_s11, 5   ;;  %s2748_s10 = smov %s2750_s12 }
 0x28e   :  { %19 = sbr.rel (!%p17_p6) target bundleno = 2 (0x2), region = 115 }

</bundles_post_ra>
